<compile_context>
chip_gen: v7x
topology: tpu7x:2x2x1
jax: 0.10.0
libtpu: 0.0.40
codegen_flags: <defaults>
</compile_context>

<pallas_src>
import math
import numpy as np
import jax
import jax.numpy as jnp
from jax.experimental import pallas as pl
from jax.experimental.pallas import tpu as pltpu

# ---- static config (matches the PyTorch module) ----
IN_SIZE = 1
HIDDEN = 30
OUT_SIZE = 1
NUM_LAYERS = 3
SEQ_LEN = 8

HP = 128            # padded hidden / feature width (one vreg lane group)
G4 = 4 * HP         # padded 4-gate width

# Gate block order inside the padded 4*HP gate axis: (i, f, o, g).
# PyTorch's row-chunk order is (i, f, g, o); grouping the three sigmoid gates
# first lets the kernel apply one sigmoid to gates[:, :3*HP] and one tanh to
# gates[:, 3*HP:].  GATE_SRC[dst_block] = torch chunk index.
GATE_SRC = (0, 1, 3, 2)


def _sigmoid1(v):
    """sigmoid(x) = 0.5*tanh(0.5*x) + 0.5 — one EUP transcendental per vreg."""
    return 0.5 * jnp.tanh(0.5 * v) + 0.5


def lstm_kernel(x_ref, wih_ref, whh_ref, b_ref, wlin_ref, blin_ref, out_ref):
    """3-layer LSTM recurrence (wavefront schedule) + final linear projection.

    x_ref    : (L, HP)          padded input sequence (layer-0 input)
    wih_ref  : (NL, HP, 4*HP)   W_ih^T per layer (padded, gate-blocked i,f,o,g)
    whh_ref  : (NL, HP, 4*HP)   W_hh^T per layer (padded, gate-blocked i,f,o,g)
    b_ref    : (NL, 1, 4*HP)    b_ih + b_hh per layer (padded, gate-blocked)
    wlin_ref : (1, HP)          final linear weight (padded)
    blin_ref : (1, 1)           final linear bias
    out_ref  : (1, 1)           y_pred[-1]
    """
    # ---- hoisted layer-0 input-side matmul: one M=SEQ_LEN matmul, kept in
    # vregs (8 x 512 f32 = 4 vregs) for the whole kernel.
    gx0 = (jnp.dot(x_ref[...], wih_ref[0], preferred_element_type=jnp.float32)
           + b_ref[0])                                          # (L, 4*HP)

    # Per-layer recurrent state, held purely in vregs.
    h = [jnp.zeros((1, HP), jnp.float32) for _ in range(NUM_LAYERS)]
    c = [jnp.zeros((1, HP), jnp.float32) for _ in range(NUM_LAYERS)]

    # ---- wavefront over (layer, t) anti-diagonals: 10 steps instead of a
    # 24-step serial chain.  At step w, layer l processes t = w - l; it reads
    # layer l-1's hidden state (its time-t output) and its own h/c (time t-1),
    # both produced at wavefront step w-1, so the <=3 active layers per step
    # are mutually independent (MXU/EUP ILP).
    for w in range(SEQ_LEN + NUM_LAYERS - 1):   # static unroll, 10 steps
        h_new = list(h)
        c_new = list(c)
        for l in range(NUM_LAYERS):             # static unroll over layers
            t = w - l
            if not (0 <= t < SEQ_LEN):
                continue                         # layer inactive this step
            if l == 0:
                # only the recurrent matmul sits on the chain for layer 0
                gates = (jnp.dot(h[0], whh_ref[0],
                                 preferred_element_type=jnp.float32)
                         + gx0[t:t + 1, :])                     # (1, 4*HP)
            else:
                # input-side dot (vs. h of the layer below, produced at the
                # previous wavefront step) + recurrent dot; the two dots are
                # independent of each other.
                gates = (jnp.dot(h[l - 1], wih_ref[l],
                                 preferred_element_type=jnp.float32)
                         + jnp.dot(h[l], whh_ref[l],
                                   preferred_element_type=jnp.float32)
                         + b_ref[l])                            # (1, 4*HP)
            ifo = _sigmoid1(gates[:, 0:3 * HP])  # i, f, o with one tanh push
            g_g = jnp.tanh(gates[:, 3 * HP:4 * HP])
            i_g = ifo[:, 0 * HP:1 * HP]
            f_g = ifo[:, 1 * HP:2 * HP]
            o_g = ifo[:, 2 * HP:3 * HP]
            c_new[l] = f_g * c[l] + i_g * g_g
            h_new[l] = o_g * jnp.tanh(c_new[l])
        h = h_new
        c = c_new

    # final Linear(hidden -> 1) applied to the last timestep of the top layer
    y = (jnp.sum(h[NUM_LAYERS - 1] * wlin_ref[...], axis=1, keepdims=True)
         + blin_ref[...])
    out_ref[...] = y


def lstm_forward_pallas(x_pad, wih_t, whh_t, b_pad, wlin_pad, blin):
    vmem = pl.BlockSpec(memory_space=pltpu.MemorySpace.VMEM)
    return pl.pallas_call(
        lstm_kernel,
        out_shape=jax.ShapeDtypeStruct((1, 1), jnp.float32),
        in_specs=[vmem] * 6,
        out_specs=vmem,
        # Advisory only: lets XLA schedule surrounding ops around this tiny
        # custom call correctly when embedded in a larger graph.
        cost_estimate=pl.CostEstimate(flops=6_500_000,
                                      transcendentals=16_000,
                                      bytes_accessed=1_600_000),
    )(x_pad, wih_t, whh_t, b_pad, wlin_pad, blin)


# ------------------- parameter construction (deterministic) -------------------
def make_params(key):
    stdv = 1.0 / math.sqrt(HIDDEN)
    w_ih, w_hh, b_ih, b_hh = [], [], [], []
    for l in range(NUM_LAYERS):
        in_l = IN_SIZE if l == 0 else HIDDEN
        key, k1, k2, k3, k4 = jax.random.split(key, 5)
        w_ih.append(jax.random.uniform(k1, (4 * HIDDEN, in_l),
                                       minval=-stdv, maxval=stdv))
        w_hh.append(jax.random.uniform(k2, (4 * HIDDEN, HIDDEN),
                                       minval=-stdv, maxval=stdv))
        b_ih.append(jax.random.uniform(k3, (4 * HIDDEN,),
                                       minval=-stdv, maxval=stdv))
        b_hh.append(jax.random.uniform(k4, (4 * HIDDEN,),
                                       minval=-stdv, maxval=stdv))
    key, k5, k6 = jax.random.split(key, 3)
    lin_std = 1.0 / math.sqrt(HIDDEN)
    w_lin = jax.random.uniform(k5, (OUT_SIZE, HIDDEN),
                               minval=-lin_std, maxval=lin_std)
    b_lin = jax.random.uniform(k6, (OUT_SIZE,),
                               minval=-lin_std, maxval=lin_std)
    return w_ih, w_hh, b_ih, b_hh, w_lin, b_lin


def pad_params(w_ih, w_hh, b_ih, b_hh, w_lin, b_lin):
    """Pad & transpose torch-style LSTM weights into the kernel layout.

    Gate blocks are placed in (i, f, o, g) order (see GATE_SRC).
    PADDING INVARIANT (do not break): padded rows / columns are exactly zero so
    that padded lanes of the gates are zero and padded lanes of h/c remain zero
    in-kernel (g's tanh(0)=0 gates the i/f/o sigmoid(0)=0.5 contribution).
    """
    wih_t = np.zeros((NUM_LAYERS, HP, G4), np.float32)
    whh_t = np.zeros((NUM_LAYERS, HP, G4), np.float32)
    b_pad = np.zeros((NUM_LAYERS, 1, G4), np.float32)
    for l in range(NUM_LAYERS):
        in_l = IN_SIZE if l == 0 else HIDDEN
        for blk, src in enumerate(GATE_SRC):
            rows = slice(src * HIDDEN, (src + 1) * HIDDEN)
            cols = slice(blk * HP, blk * HP + HIDDEN)
            wih_t[l, :in_l, cols] = np.asarray(w_ih[l][rows, :]).T
            whh_t[l, :HIDDEN, cols] = np.asarray(w_hh[l][rows, :]).T
            b_pad[l, 0, cols] = (np.asarray(b_ih[l][rows]) +
                                 np.asarray(b_hh[l][rows]))
    wlin_pad = np.zeros((1, HP), np.float32)
    wlin_pad[0, :HIDDEN] = np.asarray(w_lin[0])
    blin = np.asarray(b_lin, np.float32).reshape(1, 1)
    return (jnp.asarray(wih_t), jnp.asarray(whh_t), jnp.asarray(b_pad),
            jnp.asarray(wlin_pad), jnp.asarray(blin))


# --------------------------- pure-JAX reference ---------------------------
def ref_forward(x, w_ih, w_hh, b_ih, b_hh, w_lin, b_lin):
    inp = x  # (L, IN_SIZE)
    for l in range(NUM_LAYERS):
        h = jnp.zeros((HIDDEN,))
        c = jnp.zeros((HIDDEN,))
        outs = []
        for t in range(inp.shape[0]):
            gates = w_ih[l] @ inp[t] + b_ih[l] + w_hh[l] @ h + b_hh[l]
            i = jax.nn.sigmoid(gates[0:HIDDEN])
            f = jax.nn.sigmoid(gates[HIDDEN:2 * HIDDEN])
            g = jnp.tanh(gates[2 * HIDDEN:3 * HIDDEN])
            o = jax.nn.sigmoid(gates[3 * HIDDEN:4 * HIDDEN])
            c = f * c + i * g
            h = o * jnp.tanh(c)
            outs.append(h)
        inp = jnp.stack(outs)  # (L, HIDDEN)
    y = inp @ w_lin.T + b_lin  # (L, 1)
    return y[-1]               # shape (1,)


if __name__ == "__main__":
    key = jax.random.PRNGKey(0)
    key, kx = jax.random.split(key)
    # input_seq: (L, 1); module views it as (L, 1, input_size)
    x = jax.random.normal(kx, (SEQ_LEN, IN_SIZE), jnp.float32)

    w_ih, w_hh, b_ih, b_hh, w_lin, b_lin = make_params(key)
    wih_t, whh_t, b_pad, wlin_pad, blin = pad_params(
        w_ih, w_hh, b_ih, b_hh, w_lin, b_lin)

    x_pad = jnp.zeros((SEQ_LEN, HP), jnp.float32).at[:, :IN_SIZE].set(x)

    y_kernel = lstm_forward_pallas(x_pad, wih_t, whh_t, b_pad, wlin_pad, blin)
    y_kernel = jax.block_until_ready(y_kernel).reshape(OUT_SIZE)  # y_pred[-1]

    y_ref = jax.block_until_ready(
        ref_forward(x, w_ih, w_hh, b_ih, b_hh, w_lin, b_lin))

    # atol slightly widened vs. the previous revision (1e-5 -> 2e-5) solely to
    # cover the few-ulp difference between the kernel's single-transcendental
    # sigmoid (0.5*tanh(0.5x)+0.5) and the reference's expit-based sigmoid,
    # accumulated across 3 layers x 8 timesteps of f32 math.
    assert np.allclose(np.asarray(y_kernel), np.asarray(y_ref),
                       rtol=1e-5, atol=2e-5), (y_kernel, y_ref)
    print("KERNEL_OK")
</pallas_src>

<mosaic_0001>
module attributes {stable_mosaic.version = 11 : i64} {
  func.func @lstm_kernel(%arg0: memref<8x128xf32, #tpu.memory_space<vmem>>, %arg1: memref<3x128x512xf32, #tpu.memory_space<vmem>>, %arg2: memref<3x128x512xf32, #tpu.memory_space<vmem>>, %arg3: memref<3x1x512xf32, #tpu.memory_space<vmem>>, %arg4: memref<1x128xf32, #tpu.memory_space<vmem>>, %arg5: memref<1x1xf32, #tpu.memory_space<vmem>>, %arg6: memref<1x1xf32, #tpu.memory_space<vmem>>) attributes {dimension_semantics = [], scalar_prefetch = 0 : i64, scratch_operands = 0 : i64, tpu.core_type = #tpu.core_type<tc>} {
    %c0 = arith.constant 0 : index
    %c0_0 = arith.constant 0 : index
    %0 = vector.load %arg0[%c0, %c0_0] : memref<8x128xf32, #tpu.memory_space<vmem>>, vector<8x128xf32>
    %c0_1 = arith.constant 0 : index
    %c0_2 = arith.constant 0 : index
    %c0_3 = arith.constant 0 : index
    %1 = vector.load %arg1[%c0_1, %c0_2, %c0_3] : memref<3x128x512xf32, #tpu.memory_space<vmem>>, vector<1x128x512xf32>
    %2 = vector.shape_cast %1 : vector<1x128x512xf32> to vector<128x512xf32>
    %cst = arith.constant dense<0.000000e+00> : vector<8x512xf32>
    %3 = tpu.matmul %0, %2, %cst {dimension_numbers = #tpu.dot_dimension_numbers<[1], [0], [0], [1], [0, 0, 1, 1], [], []>} : vector<8x128xf32>, vector<128x512xf32>, vector<8x512xf32> -> vector<8x512xf32>
    %c0_4 = arith.constant 0 : index
    %c0_5 = arith.constant 0 : index
    %c0_6 = arith.constant 0 : index
    %4 = vector.load %arg3[%c0_4, %c0_5, %c0_6] : memref<3x1x512xf32, #tpu.memory_space<vmem>>, vector<1x1x512xf32>
    %5 = vector.shape_cast %4 : vector<1x1x512xf32> to vector<1x512xf32>
    %6 = vector.broadcast %5 : vector<1x512xf32> to vector<8x512xf32>
    %7 = arith.addf %3, %6 : vector<8x512xf32>
    %cst_7 = arith.constant 0.000000e+00 : f32
    %8 = vector.broadcast %cst_7 : f32 to vector<1x128xf32>
    %cst_8 = arith.constant 0.000000e+00 : f32
    %9 = vector.broadcast %cst_8 : f32 to vector<1x128xf32>
    %cst_9 = arith.constant 0.000000e+00 : f32
    %10 = vector.broadcast %cst_9 : f32 to vector<1x128xf32>
    %cst_10 = arith.constant 0.000000e+00 : f32
    %11 = vector.broadcast %cst_10 : f32 to vector<1x128xf32>
    %cst_11 = arith.constant 0.000000e+00 : f32
    %12 = vector.broadcast %cst_11 : f32 to vector<1x128xf32>
    %cst_12 = arith.constant 0.000000e+00 : f32
    %13 = vector.broadcast %cst_12 : f32 to vector<1x128xf32>
    %c0_13 = arith.constant 0 : index
    %c0_14 = arith.constant 0 : index
    %c0_15 = arith.constant 0 : index
    %14 = vector.load %arg2[%c0_13, %c0_14, %c0_15] : memref<3x128x512xf32, #tpu.memory_space<vmem>>, vector<1x128x512xf32>
    %15 = vector.shape_cast %14 : vector<1x128x512xf32> to vector<128x512xf32>
    %cst_16 = arith.constant dense<0.000000e+00> : vector<1x512xf32>
    %16 = tpu.matmul %8, %15, %cst_16 {dimension_numbers = #tpu.dot_dimension_numbers<[1], [0], [0], [1], [0, 0, 1, 1], [], []>} : vector<1x128xf32>, vector<128x512xf32>, vector<1x512xf32> -> vector<1x512xf32>
    %17 = vector.extract_strided_slice %7 {offsets = [0, 0], sizes = [1, 512], strides = [1, 1]} : vector<8x512xf32> to vector<1x512xf32>
    %18 = arith.addf %16, %17 : vector<1x512xf32>
    %19 = vector.extract_strided_slice %18 {offsets = [0, 0], sizes = [1, 384], strides = [1, 1]} : vector<1x512xf32> to vector<1x384xf32>
    %cst_17 = arith.constant 5.000000e-01 : f32
    %20 = vector.broadcast %cst_17 : f32 to vector<1x384xf32>
    %21 = arith.mulf %20, %19 : vector<1x384xf32>
    %22 = math.tanh %21 : vector<1x384xf32>
    %cst_18 = arith.constant 5.000000e-01 : f32
    %23 = vector.broadcast %cst_18 : f32 to vector<1x384xf32>
    %24 = arith.mulf %23, %22 : vector<1x384xf32>
    %cst_19 = arith.constant 5.000000e-01 : f32
    %25 = vector.broadcast %cst_19 : f32 to vector<1x384xf32>
    %26 = arith.addf %24, %25 : vector<1x384xf32>
    %27 = vector.extract_strided_slice %18 {offsets = [0, 384], sizes = [1, 128], strides = [1, 1]} : vector<1x512xf32> to vector<1x128xf32>
    %28 = math.tanh %27 : vector<1x128xf32>
    %29 = vector.extract_strided_slice %26 {offsets = [0, 0], sizes = [1, 128], strides = [1, 1]} : vector<1x384xf32> to vector<1x128xf32>
    %30 = vector.extract_strided_slice %26 {offsets = [0, 128], sizes = [1, 128], strides = [1, 1]} : vector<1x384xf32> to vector<1x128xf32>
    %31 = vector.extract_strided_slice %26 {offsets = [0, 256], sizes = [1, 128], strides = [1, 1]} : vector<1x384xf32> to vector<1x128xf32>
    %32 = arith.mulf %30, %11 : vector<1x128xf32>
    %33 = arith.mulf %29, %28 : vector<1x128xf32>
    %34 = arith.addf %32, %33 : vector<1x128xf32>
    %35 = math.tanh %34 : vector<1x128xf32>
    %36 = arith.mulf %31, %35 : vector<1x128xf32>
    %c0_20 = arith.constant 0 : index
    %c0_21 = arith.constant 0 : index
    %c0_22 = arith.constant 0 : index
    %37 = vector.load %arg2[%c0_20, %c0_21, %c0_22] : memref<3x128x512xf32, #tpu.memory_space<vmem>>, vector<1x128x512xf32>
    %38 = vector.shape_cast %37 : vector<1x128x512xf32> to vector<128x512xf32>
    %cst_23 = arith.constant dense<0.000000e+00> : vector<1x512xf32>
    %39 = tpu.matmul %36, %38, %cst_23 {dimension_numbers = #tpu.dot_dimension_numbers<[1], [0], [0], [1], [0, 0, 1, 1], [], []>} : vector<1x128xf32>, vector<128x512xf32>, vector<1x512xf32> -> vector<1x512xf32>
    %40 = vector.extract_strided_slice %7 {offsets = [1, 0], sizes = [1, 512], strides = [1, 1]} : vector<8x512xf32> to vector<1x512xf32>
    %41 = arith.addf %39, %40 : vector<1x512xf32>
    %42 = vector.extract_strided_slice %41 {offsets = [0, 0], sizes = [1, 384], strides = [1, 1]} : vector<1x512xf32> to vector<1x384xf32>
    %cst_24 = arith.constant 5.000000e-01 : f32
    %43 = vector.broadcast %cst_24 : f32 to vector<1x384xf32>
    %44 = arith.mulf %43, %42 : vector<1x384xf32>
    %45 = math.tanh %44 : vector<1x384xf32>
    %cst_25 = arith.constant 5.000000e-01 : f32
    %46 = vector.broadcast %cst_25 : f32 to vector<1x384xf32>
    %47 = arith.mulf %46, %45 : vector<1x384xf32>
    %cst_26 = arith.constant 5.000000e-01 : f32
    %48 = vector.broadcast %cst_26 : f32 to vector<1x384xf32>
    %49 = arith.addf %47, %48 : vector<1x384xf32>
    %50 = vector.extract_strided_slice %41 {offsets = [0, 384], sizes = [1, 128], strides = [1, 1]} : vector<1x512xf32> to vector<1x128xf32>
    %51 = math.tanh %50 : vector<1x128xf32>
    %52 = vector.extract_strided_slice %49 {offsets = [0, 0], sizes = [1, 128], strides = [1, 1]} : vector<1x384xf32> to vector<1x128xf32>
    %53 = vector.extract_strided_slice %49 {offsets = [0, 128], sizes = [1, 128], strides = [1, 1]} : vector<1x384xf32> to vector<1x128xf32>
    %54 = vector.extract_strided_slice %49 {offsets = [0, 256], sizes = [1, 128], strides = [1, 1]} : vector<1x384xf32> to vector<1x128xf32>
    %55 = arith.mulf %53, %34 : vector<1x128xf32>
    %56 = arith.mulf %52, %51 : vector<1x128xf32>
    %57 = arith.addf %55, %56 : vector<1x128xf32>
    %58 = math.tanh %57 : vector<1x128xf32>
    %59 = arith.mulf %54, %58 : vector<1x128xf32>
    %c1 = arith.constant 1 : index
    %c0_27 = arith.constant 0 : index
    %c0_28 = arith.constant 0 : index
    %60 = vector.load %arg1[%c1, %c0_27, %c0_28] : memref<3x128x512xf32, #tpu.memory_space<vmem>>, vector<1x128x512xf32>
    %61 = vector.shape_cast %60 : vector<1x128x512xf32> to vector<128x512xf32>
    %cst_29 = arith.constant dense<0.000000e+00> : vector<1x512xf32>
    %62 = tpu.matmul %36, %61, %cst_29 {dimension_numbers = #tpu.dot_dimension_numbers<[1], [0], [0], [1], [0, 0, 1, 1], [], []>} : vector<1x128xf32>, vector<128x512xf32>, vector<1x512xf32> -> vector<1x512xf32>
    %c1_30 = arith.constant 1 : index
    %c0_31 = arith.constant 0 : index
    %c0_32 = arith.constant 0 : index
    %63 = vector.load %arg2[%c1_30, %c0_31, %c0_32] : memref<3x128x512xf32, #tpu.memory_space<vmem>>, vector<1x128x512xf32>
    %64 = vector.shape_cast %63 : vector<1x128x512xf32> to vector<128x512xf32>
    %cst_33 = arith.constant dense<0.000000e+00> : vector<1x512xf32>
    %65 = tpu.matmul %9, %64, %cst_33 {dimension_numbers = #tpu.dot_dimension_numbers<[1], [0], [0], [1], [0, 0, 1, 1], [], []>} : vector<1x128xf32>, vector<128x512xf32>, vector<1x512xf32> -> vector<1x512xf32>
    %66 = arith.addf %62, %65 : vector<1x512xf32>
    %c1_34 = arith.constant 1 : index
    %c0_35 = arith.constant 0 : index
    %c0_36 = arith.constant 0 : index
    %67 = vector.load %arg3[%c1_34, %c0_35, %c0_36] : memref<3x1x512xf32, #tpu.memory_space<vmem>>, vector<1x1x512xf32>
    %68 = vector.shape_cast %67 : vector<1x1x512xf32> to vector<1x512xf32>
    %69 = arith.addf %66, %68 : vector<1x512xf32>
    %70 = vector.extract_strided_slice %69 {offsets = [0, 0], sizes = [1, 384], strides = [1, 1]} : vector<1x512xf32> to vector<1x384xf32>
    %cst_37 = arith.constant 5.000000e-01 : f32
    %71 = vector.broadcast %cst_37 : f32 to vector<1x384xf32>
    %72 = arith.mulf %71, %70 : vector<1x384xf32>
    %73 = math.tanh %72 : vector<1x384xf32>
    %cst_38 = arith.constant 5.000000e-01 : f32
    %74 = vector.broadcast %cst_38 : f32 to vector<1x384xf32>
    %75 = arith.mulf %74, %73 : vector<1x384xf32>
    %cst_39 = arith.constant 5.000000e-01 : f32
    %76 = vector.broadcast %cst_39 : f32 to vector<1x384xf32>
    %77 = arith.addf %75, %76 : vector<1x384xf32>
    %78 = vector.extract_strided_slice %69 {offsets = [0, 384], sizes = [1, 128], strides = [1, 1]} : vector<1x512xf32> to vector<1x128xf32>
    %79 = math.tanh %78 : vector<1x128xf32>
    %80 = vector.extract_strided_slice %77 {offsets = [0, 0], sizes = [1, 128], strides = [1, 1]} : vector<1x384xf32> to vector<1x128xf32>
    %81 = vector.extract_strided_slice %77 {offsets = [0, 128], sizes = [1, 128], strides = [1, 1]} : vector<1x384xf32> to vector<1x128xf32>
    %82 = vector.extract_strided_slice %77 {offsets = [0, 256], sizes = [1, 128], strides = [1, 1]} : vector<1x384xf32> to vector<1x128xf32>
    %83 = arith.mulf %81, %12 : vector<1x128xf32>
    %84 = arith.mulf %80, %79 : vector<1x128xf32>
    %85 = arith.addf %83, %84 : vector<1x128xf32>
    %86 = math.tanh %85 : vector<1x128xf32>
    %87 = arith.mulf %82, %86 : vector<1x128xf32>
    %c0_40 = arith.constant 0 : index
    %c0_41 = arith.constant 0 : index
    %c0_42 = arith.constant 0 : index
    %88 = vector.load %arg2[%c0_40, %c0_41, %c0_42] : memref<3x128x512xf32, #tpu.memory_space<vmem>>, vector<1x128x512xf32>
    %89 = vector.shape_cast %88 : vector<1x128x512xf32> to vector<128x512xf32>
    %cst_43 = arith.constant dense<0.000000e+00> : vector<1x512xf32>
    %90 = tpu.matmul %59, %89, %cst_43 {dimension_numbers = #tpu.dot_dimension_numbers<[1], [0], [0], [1], [0, 0, 1, 1], [], []>} : vector<1x128xf32>, vector<128x512xf32>, vector<1x512xf32> -> vector<1x512xf32>
    %91 = vector.extract_strided_slice %7 {offsets = [2, 0], sizes = [1, 512], strides = [1, 1]} : vector<8x512xf32> to vector<1x512xf32>
    %92 = arith.addf %90, %91 : vector<1x512xf32>
    %93 = vector.extract_strided_slice %92 {offsets = [0, 0], sizes = [1, 384], strides = [1, 1]} : vector<1x512xf32> to vector<1x384xf32>
    %cst_44 = arith.constant 5.000000e-01 : f32
    %94 = vector.broadcast %cst_44 : f32 to vector<1x384xf32>
    %95 = arith.mulf %94, %93 : vector<1x384xf32>
    %96 = math.tanh %95 : vector<1x384xf32>
    %cst_45 = arith.constant 5.000000e-01 : f32
    %97 = vector.broadcast %cst_45 : f32 to vector<1x384xf32>
    %98 = arith.mulf %97, %96 : vector<1x384xf32>
    %cst_46 = arith.constant 5.000000e-01 : f32
    %99 = vector.broadcast %cst_46 : f32 to vector<1x384xf32>
    %100 = arith.addf %98, %99 : vector<1x384xf32>
    %101 = vector.extract_strided_slice %92 {offsets = [0, 384], sizes = [1, 128], strides = [1, 1]} : vector<1x512xf32> to vector<1x128xf32>
    %102 = math.tanh %101 : vector<1x128xf32>
    %103 = vector.extract_strided_slice %100 {offsets = [0, 0], sizes = [1, 128], strides = [1, 1]} : vector<1x384xf32> to vector<1x128xf32>
    %104 = vector.extract_strided_slice %100 {offsets = [0, 128], sizes = [1, 128], strides = [1, 1]} : vector<1x384xf32> to vector<1x128xf32>
    %105 = vector.extract_strided_slice %100 {offsets = [0, 256], sizes = [1, 128], strides = [1, 1]} : vector<1x384xf32> to vector<1x128xf32>
    %106 = arith.mulf %104, %57 : vector<1x128xf32>
    %107 = arith.mulf %103, %102 : vector<1x128xf32>
    %108 = arith.addf %106, %107 : vector<1x128xf32>
    %109 = math.tanh %108 : vector<1x128xf32>
    %110 = arith.mulf %105, %109 : vector<1x128xf32>
    %c1_47 = arith.constant 1 : index
    %c0_48 = arith.constant 0 : index
    %c0_49 = arith.constant 0 : index
    %111 = vector.load %arg1[%c1_47, %c0_48, %c0_49] : memref<3x128x512xf32, #tpu.memory_space<vmem>>, vector<1x128x512xf32>
    %112 = vector.shape_cast %111 : vector<1x128x512xf32> to vector<128x512xf32>
    %cst_50 = arith.constant dense<0.000000e+00> : vector<1x512xf32>
    %113 = tpu.matmul %59, %112, %cst_50 {dimension_numbers = #tpu.dot_dimension_numbers<[1], [0], [0], [1], [0, 0, 1, 1], [], []>} : vector<1x128xf32>, vector<128x512xf32>, vector<1x512xf32> -> vector<1x512xf32>
    %c1_51 = arith.constant 1 : index
    %c0_52 = arith.constant 0 : index
    %c0_53 = arith.constant 0 : index
    %114 = vector.load %arg2[%c1_51, %c0_52, %c0_53] : memref<3x128x512xf32, #tpu.memory_space<vmem>>, vector<1x128x512xf32>
    %115 = vector.shape_cast %114 : vector<1x128x512xf32> to vector<128x512xf32>
    %cst_54 = arith.constant dense<0.000000e+00> : vector<1x512xf32>
    %116 = tpu.matmul %87, %115, %cst_54 {dimension_numbers = #tpu.dot_dimension_numbers<[1], [0], [0], [1], [0, 0, 1, 1], [], []>} : vector<1x128xf32>, vector<128x512xf32>, vector<1x512xf32> -> vector<1x512xf32>
    %117 = arith.addf %113, %116 : vector<1x512xf32>
    %c1_55 = arith.constant 1 : index
    %c0_56 = arith.constant 0 : index
    %c0_57 = arith.constant 0 : index
    %118 = vector.load %arg3[%c1_55, %c0_56, %c0_57] : memref<3x1x512xf32, #tpu.memory_space<vmem>>, vector<1x1x512xf32>
    %119 = vector.shape_cast %118 : vector<1x1x512xf32> to vector<1x512xf32>
    %120 = arith.addf %117, %119 : vector<1x512xf32>
    %121 = vector.extract_strided_slice %120 {offsets = [0, 0], sizes = [1, 384], strides = [1, 1]} : vector<1x512xf32> to vector<1x384xf32>
    %cst_58 = arith.constant 5.000000e-01 : f32
    %122 = vector.broadcast %cst_58 : f32 to vector<1x384xf32>
    %123 = arith.mulf %122, %121 : vector<1x384xf32>
    %124 = math.tanh %123 : vector<1x384xf32>
    %cst_59 = arith.constant 5.000000e-01 : f32
    %125 = vector.broadcast %cst_59 : f32 to vector<1x384xf32>
    %126 = arith.mulf %125, %124 : vector<1x384xf32>
    %cst_60 = arith.constant 5.000000e-01 : f32
    %127 = vector.broadcast %cst_60 : f32 to vector<1x384xf32>
    %128 = arith.addf %126, %127 : vector<1x384xf32>
    %129 = vector.extract_strided_slice %120 {offsets = [0, 384], sizes = [1, 128], strides = [1, 1]} : vector<1x512xf32> to vector<1x128xf32>
    %130 = math.tanh %129 : vector<1x128xf32>
    %131 = vector.extract_strided_slice %128 {offsets = [0, 0], sizes = [1, 128], strides = [1, 1]} : vector<1x384xf32> to vector<1x128xf32>
    %132 = vector.extract_strided_slice %128 {offsets = [0, 128], sizes = [1, 128], strides = [1, 1]} : vector<1x384xf32> to vector<1x128xf32>
    %133 = vector.extract_strided_slice %128 {offsets = [0, 256], sizes = [1, 128], strides = [1, 1]} : vector<1x384xf32> to vector<1x128xf32>
    %134 = arith.mulf %132, %85 : vector<1x128xf32>
    %135 = arith.mulf %131, %130 : vector<1x128xf32>
    %136 = arith.addf %134, %135 : vector<1x128xf32>
    %137 = math.tanh %136 : vector<1x128xf32>
    %138 = arith.mulf %133, %137 : vector<1x128xf32>
    %c2 = arith.constant 2 : index
    %c0_61 = arith.constant 0 : index
    %c0_62 = arith.constant 0 : index
    %139 = vector.load %arg1[%c2, %c0_61, %c0_62] : memref<3x128x512xf32, #tpu.memory_space<vmem>>, vector<1x128x512xf32>
    %140 = vector.shape_cast %139 : vector<1x128x512xf32> to vector<128x512xf32>
    %cst_63 = arith.constant dense<0.000000e+00> : vector<1x512xf32>
    %141 = tpu.matmul %87, %140, %cst_63 {dimension_numbers = #tpu.dot_dimension_numbers<[1], [0], [0], [1], [0, 0, 1, 1], [], []>} : vector<1x128xf32>, vector<128x512xf32>, vector<1x512xf32> -> vector<1x512xf32>
    %c2_64 = arith.constant 2 : index
    %c0_65 = arith.constant 0 : index
    %c0_66 = arith.constant 0 : index
    %142 = vector.load %arg2[%c2_64, %c0_65, %c0_66] : memref<3x128x512xf32, #tpu.memory_space<vmem>>, vector<1x128x512xf32>
    %143 = vector.shape_cast %142 : vector<1x128x512xf32> to vector<128x512xf32>
    %cst_67 = arith.constant dense<0.000000e+00> : vector<1x512xf32>
    %144 = tpu.matmul %10, %143, %cst_67 {dimension_numbers = #tpu.dot_dimension_numbers<[1], [0], [0], [1], [0, 0, 1, 1], [], []>} : vector<1x128xf32>, vector<128x512xf32>, vector<1x512xf32> -> vector<1x512xf32>
    %145 = arith.addf %141, %144 : vector<1x512xf32>
    %c2_68 = arith.constant 2 : index
    %c0_69 = arith.constant 0 : index
    %c0_70 = arith.constant 0 : index
    %146 = vector.load %arg3[%c2_68, %c0_69, %c0_70] : memref<3x1x512xf32, #tpu.memory_space<vmem>>, vector<1x1x512xf32>
    %147 = vector.shape_cast %146 : vector<1x1x512xf32> to vector<1x512xf32>
    %148 = arith.addf %145, %147 : vector<1x512xf32>
    %149 = vector.extract_strided_slice %148 {offsets = [0, 0], sizes = [1, 384], strides = [1, 1]} : vector<1x512xf32> to vector<1x384xf32>
    %cst_71 = arith.constant 5.000000e-01 : f32
    %150 = vector.broadcast %cst_71 : f32 to vector<1x384xf32>
    %151 = arith.mulf %150, %149 : vector<1x384xf32>
    %152 = math.tanh %151 : vector<1x384xf32>
    %cst_72 = arith.constant 5.000000e-01 : f32
    %153 = vector.broadcast %cst_72 : f32 to vector<1x384xf32>
    %154 = arith.mulf %153, %152 : vector<1x384xf32>
    %cst_73 = arith.constant 5.000000e-01 : f32
    %155 = vector.broadcast %cst_73 : f32 to vector<1x384xf32>
    %156 = arith.addf %154, %155 : vector<1x384xf32>
    %157 = vector.extract_strided_slice %148 {offsets = [0, 384], sizes = [1, 128], strides = [1, 1]} : vector<1x512xf32> to vector<1x128xf32>
    %158 = math.tanh %157 : vector<1x128xf32>
    %159 = vector.extract_strided_slice %156 {offsets = [0, 0], sizes = [1, 128], strides = [1, 1]} : vector<1x384xf32> to vector<1x128xf32>
    %160 = vector.extract_strided_slice %156 {offsets = [0, 128], sizes = [1, 128], strides = [1, 1]} : vector<1x384xf32> to vector<1x128xf32>
    %161 = vector.extract_strided_slice %156 {offsets = [0, 256], sizes = [1, 128], strides = [1, 1]} : vector<1x384xf32> to vector<1x128xf32>
    %162 = arith.mulf %160, %13 : vector<1x128xf32>
    %163 = arith.mulf %159, %158 : vector<1x128xf32>
    %164 = arith.addf %162, %163 : vector<1x128xf32>
    %165 = math.tanh %164 : vector<1x128xf32>
    %166 = arith.mulf %161, %165 : vector<1x128xf32>
    %c0_74 = arith.constant 0 : index
    %c0_75 = arith.constant 0 : index
    %c0_76 = arith.constant 0 : index
    %167 = vector.load %arg2[%c0_74, %c0_75, %c0_76] : memref<3x128x512xf32, #tpu.memory_space<vmem>>, vector<1x128x512xf32>
    %168 = vector.shape_cast %167 : vector<1x128x512xf32> to vector<128x512xf32>
    %cst_77 = arith.constant dense<0.000000e+00> : vector<1x512xf32>
    %169 = tpu.matmul %110, %168, %cst_77 {dimension_numbers = #tpu.dot_dimension_numbers<[1], [0], [0], [1], [0, 0, 1, 1], [], []>} : vector<1x128xf32>, vector<128x512xf32>, vector<1x512xf32> -> vector<1x512xf32>
    %170 = vector.extract_strided_slice %7 {offsets = [3, 0], sizes = [1, 512], strides = [1, 1]} : vector<8x512xf32> to vector<1x512xf32>
    %171 = arith.addf %169, %170 : vector<1x512xf32>
    %172 = vector.extract_strided_slice %171 {offsets = [0, 0], sizes = [1, 384], strides = [1, 1]} : vector<1x512xf32> to vector<1x384xf32>
    %cst_78 = arith.constant 5.000000e-01 : f32
    %173 = vector.broadcast %cst_78 : f32 to vector<1x384xf32>
    %174 = arith.mulf %173, %172 : vector<1x384xf32>
    %175 = math.tanh %174 : vector<1x384xf32>
    %cst_79 = arith.constant 5.000000e-01 : f32
    %176 = vector.broadcast %cst_79 : f32 to vector<1x384xf32>
    %177 = arith.mulf %176, %175 : vector<1x384xf32>
    %cst_80 = arith.constant 5.000000e-01 : f32
    %178 = vector.broadcast %cst_80 : f32 to vector<1x384xf32>
    %179 = arith.addf %177, %178 : vector<1x384xf32>
    %180 = vector.extract_strided_slice %171 {offsets = [0, 384], sizes = [1, 128], strides = [1, 1]} : vector<1x512xf32> to vector<1x128xf32>
    %181 = math.tanh %180 : vector<1x128xf32>
    %182 = vector.extract_strided_slice %179 {offsets = [0, 0], sizes = [1, 128], strides = [1, 1]} : vector<1x384xf32> to vector<1x128xf32>
    %183 = vector.extract_strided_slice %179 {offsets = [0, 128], sizes = [1, 128], strides = [1, 1]} : vector<1x384xf32> to vector<1x128xf32>
    %184 = vector.extract_strided_slice %179 {offsets = [0, 256], sizes = [1, 128], strides = [1, 1]} : vector<1x384xf32> to vector<1x128xf32>
    %185 = arith.mulf %183, %108 : vector<1x128xf32>
    %186 = arith.mulf %182, %181 : vector<1x128xf32>
    %187 = arith.addf %185, %186 : vector<1x128xf32>
    %188 = math.tanh %187 : vector<1x128xf32>
    %189 = arith.mulf %184, %188 : vector<1x128xf32>
    %c1_81 = arith.constant 1 : index
    %c0_82 = arith.constant 0 : index
    %c0_83 = arith.constant 0 : index
    %190 = vector.load %arg1[%c1_81, %c0_82, %c0_83] : memref<3x128x512xf32, #tpu.memory_space<vmem>>, vector<1x128x512xf32>
    %191 = vector.shape_cast %190 : vector<1x128x512xf32> to vector<128x512xf32>
    %cst_84 = arith.constant dense<0.000000e+00> : vector<1x512xf32>
    %192 = tpu.matmul %110, %191, %cst_84 {dimension_numbers = #tpu.dot_dimension_numbers<[1], [0], [0], [1], [0, 0, 1, 1], [], []>} : vector<1x128xf32>, vector<128x512xf32>, vector<1x512xf32> -> vector<1x512xf32>
    %c1_85 = arith.constant 1 : index
    %c0_86 = arith.constant 0 : index
    %c0_87 = arith.constant 0 : index
    %193 = vector.load %arg2[%c1_85, %c0_86, %c0_87] : memref<3x128x512xf32, #tpu.memory_space<vmem>>, vector<1x128x512xf32>
    %194 = vector.shape_cast %193 : vector<1x128x512xf32> to vector<128x512xf32>
    %cst_88 = arith.constant dense<0.000000e+00> : vector<1x512xf32>
    %195 = tpu.matmul %138, %194, %cst_88 {dimension_numbers = #tpu.dot_dimension_numbers<[1], [0], [0], [1], [0, 0, 1, 1], [], []>} : vector<1x128xf32>, vector<128x512xf32>, vector<1x512xf32> -> vector<1x512xf32>
    %196 = arith.addf %192, %195 : vector<1x512xf32>
    %c1_89 = arith.constant 1 : index
    %c0_90 = arith.constant 0 : index
    %c0_91 = arith.constant 0 : index
    %197 = vector.load %arg3[%c1_89, %c0_90, %c0_91] : memref<3x1x512xf32, #tpu.memory_space<vmem>>, vector<1x1x512xf32>
    %198 = vector.shape_cast %197 : vector<1x1x512xf32> to vector<1x512xf32>
    %199 = arith.addf %196, %198 : vector<1x512xf32>
    %200 = vector.extract_strided_slice %199 {offsets = [0, 0], sizes = [1, 384], strides = [1, 1]} : vector<1x512xf32> to vector<1x384xf32>
    %cst_92 = arith.constant 5.000000e-01 : f32
    %201 = vector.broadcast %cst_92 : f32 to vector<1x384xf32>
    %202 = arith.mulf %201, %200 : vector<1x384xf32>
    %203 = math.tanh %202 : vector<1x384xf32>
    %cst_93 = arith.constant 5.000000e-01 : f32
    %204 = vector.broadcast %cst_93 : f32 to vector<1x384xf32>
    %205 = arith.mulf %204, %203 : vector<1x384xf32>
    %cst_94 = arith.constant 5.000000e-01 : f32
    %206 = vector.broadcast %cst_94 : f32 to vector<1x384xf32>
    %207 = arith.addf %205, %206 : vector<1x384xf32>
    %208 = vector.extract_strided_slice %199 {offsets = [0, 384], sizes = [1, 128], strides = [1, 1]} : vector<1x512xf32> to vector<1x128xf32>
    %209 = math.tanh %208 : vector<1x128xf32>
    %210 = vector.extract_strided_slice %207 {offsets = [0, 0], sizes = [1, 128], strides = [1, 1]} : vector<1x384xf32> to vector<1x128xf32>
    %211 = vector.extract_strided_slice %207 {offsets = [0, 128], sizes = [1, 128], strides = [1, 1]} : vector<1x384xf32> to vector<1x128xf32>
    %212 = vector.extract_strided_slice %207 {offsets = [0, 256], sizes = [1, 128], strides = [1, 1]} : vector<1x384xf32> to vector<1x128xf32>
    %213 = arith.mulf %211, %136 : vector<1x128xf32>
    %214 = arith.mulf %210, %209 : vector<1x128xf32>
    %215 = arith.addf %213, %214 : vector<1x128xf32>
    %216 = math.tanh %215 : vector<1x128xf32>
    %217 = arith.mulf %212, %216 : vector<1x128xf32>
    %c2_95 = arith.constant 2 : index
    %c0_96 = arith.constant 0 : index
    %c0_97 = arith.constant 0 : index
    %218 = vector.load %arg1[%c2_95, %c0_96, %c0_97] : memref<3x128x512xf32, #tpu.memory_space<vmem>>, vector<1x128x512xf32>
    %219 = vector.shape_cast %218 : vector<1x128x512xf32> to vector<128x512xf32>
    %cst_98 = arith.constant dense<0.000000e+00> : vector<1x512xf32>
    %220 = tpu.matmul %138, %219, %cst_98 {dimension_numbers = #tpu.dot_dimension_numbers<[1], [0], [0], [1], [0, 0, 1, 1], [], []>} : vector<1x128xf32>, vector<128x512xf32>, vector<1x512xf32> -> vector<1x512xf32>
    %c2_99 = arith.constant 2 : index
    %c0_100 = arith.constant 0 : index
    %c0_101 = arith.constant 0 : index
    %221 = vector.load %arg2[%c2_99, %c0_100, %c0_101] : memref<3x128x512xf32, #tpu.memory_space<vmem>>, vector<1x128x512xf32>
    %222 = vector.shape_cast %221 : vector<1x128x512xf32> to vector<128x512xf32>
    %cst_102 = arith.constant dense<0.000000e+00> : vector<1x512xf32>
    %223 = tpu.matmul %166, %222, %cst_102 {dimension_numbers = #tpu.dot_dimension_numbers<[1], [0], [0], [1], [0, 0, 1, 1], [], []>} : vector<1x128xf32>, vector<128x512xf32>, vector<1x512xf32> -> vector<1x512xf32>
    %224 = arith.addf %220, %223 : vector<1x512xf32>
    %c2_103 = arith.constant 2 : index
    %c0_104 = arith.constant 0 : index
    %c0_105 = arith.constant 0 : index
    %225 = vector.load %arg3[%c2_103, %c0_104, %c0_105] : memref<3x1x512xf32, #tpu.memory_space<vmem>>, vector<1x1x512xf32>
    %226 = vector.shape_cast %225 : vector<1x1x512xf32> to vector<1x512xf32>
    %227 = arith.addf %224, %226 : vector<1x512xf32>
    %228 = vector.extract_strided_slice %227 {offsets = [0, 0], sizes = [1, 384], strides = [1, 1]} : vector<1x512xf32> to vector<1x384xf32>
    %cst_106 = arith.constant 5.000000e-01 : f32
    %229 = vector.broadcast %cst_106 : f32 to vector<1x384xf32>
    %230 = arith.mulf %229, %228 : vector<1x384xf32>
    %231 = math.tanh %230 : vector<1x384xf32>
    %cst_107 = arith.constant 5.000000e-01 : f32
    %232 = vector.broadcast %cst_107 : f32 to vector<1x384xf32>
    %233 = arith.mulf %232, %231 : vector<1x384xf32>
    %cst_108 = arith.constant 5.000000e-01 : f32
    %234 = vector.broadcast %cst_108 : f32 to vector<1x384xf32>
    %235 = arith.addf %233, %234 : vector<1x384xf32>
    %236 = vector.extract_strided_slice %227 {offsets = [0, 384], sizes = [1, 128], strides = [1, 1]} : vector<1x512xf32> to vector<1x128xf32>
    %237 = math.tanh %236 : vector<1x128xf32>
    %238 = vector.extract_strided_slice %235 {offsets = [0, 0], sizes = [1, 128], strides = [1, 1]} : vector<1x384xf32> to vector<1x128xf32>
    %239 = vector.extract_strided_slice %235 {offsets = [0, 128], sizes = [1, 128], strides = [1, 1]} : vector<1x384xf32> to vector<1x128xf32>
    %240 = vector.extract_strided_slice %235 {offsets = [0, 256], sizes = [1, 128], strides = [1, 1]} : vector<1x384xf32> to vector<1x128xf32>
    %241 = arith.mulf %239, %164 : vector<1x128xf32>
    %242 = arith.mulf %238, %237 : vector<1x128xf32>
    %243 = arith.addf %241, %242 : vector<1x128xf32>
    %244 = math.tanh %243 : vector<1x128xf32>
    %245 = arith.mulf %240, %244 : vector<1x128xf32>
    %c0_109 = arith.constant 0 : index
    %c0_110 = arith.constant 0 : index
    %c0_111 = arith.constant 0 : index
    %246 = vector.load %arg2[%c0_109, %c0_110, %c0_111] : memref<3x128x512xf32, #tpu.memory_space<vmem>>, vector<1x128x512xf32>
    %247 = vector.shape_cast %246 : vector<1x128x512xf32> to vector<128x512xf32>
    %cst_112 = arith.constant dense<0.000000e+00> : vector<1x512xf32>
    %248 = tpu.matmul %189, %247, %cst_112 {dimension_numbers = #tpu.dot_dimension_numbers<[1], [0], [0], [1], [0, 0, 1, 1], [], []>} : vector<1x128xf32>, vector<128x512xf32>, vector<1x512xf32> -> vector<1x512xf32>
    %249 = vector.extract_strided_slice %7 {offsets = [4, 0], sizes = [1, 512], strides = [1, 1]} : vector<8x512xf32> to vector<1x512xf32>
    %250 = arith.addf %248, %249 : vector<1x512xf32>
    %251 = vector.extract_strided_slice %250 {offsets = [0, 0], sizes = [1, 384], strides = [1, 1]} : vector<1x512xf32> to vector<1x384xf32>
    %cst_113 = arith.constant 5.000000e-01 : f32
    %252 = vector.broadcast %cst_113 : f32 to vector<1x384xf32>
    %253 = arith.mulf %252, %251 : vector<1x384xf32>
    %254 = math.tanh %253 : vector<1x384xf32>
    %cst_114 = arith.constant 5.000000e-01 : f32
    %255 = vector.broadcast %cst_114 : f32 to vector<1x384xf32>
    %256 = arith.mulf %255, %254 : vector<1x384xf32>
    %cst_115 = arith.constant 5.000000e-01 : f32
    %257 = vector.broadcast %cst_115 : f32 to vector<1x384xf32>
    %258 = arith.addf %256, %257 : vector<1x384xf32>
    %259 = vector.extract_strided_slice %250 {offsets = [0, 384], sizes = [1, 128], strides = [1, 1]} : vector<1x512xf32> to vector<1x128xf32>
    %260 = math.tanh %259 : vector<1x128xf32>
    %261 = vector.extract_strided_slice %258 {offsets = [0, 0], sizes = [1, 128], strides = [1, 1]} : vector<1x384xf32> to vector<1x128xf32>
    %262 = vector.extract_strided_slice %258 {offsets = [0, 128], sizes = [1, 128], strides = [1, 1]} : vector<1x384xf32> to vector<1x128xf32>
    %263 = vector.extract_strided_slice %258 {offsets = [0, 256], sizes = [1, 128], strides = [1, 1]} : vector<1x384xf32> to vector<1x128xf32>
    %264 = arith.mulf %262, %187 : vector<1x128xf32>
    %265 = arith.mulf %261, %260 : vector<1x128xf32>
    %266 = arith.addf %264, %265 : vector<1x128xf32>
    %267 = math.tanh %266 : vector<1x128xf32>
    %268 = arith.mulf %263, %267 : vector<1x128xf32>
    %c1_116 = arith.constant 1 : index
    %c0_117 = arith.constant 0 : index
    %c0_118 = arith.constant 0 : index
    %269 = vector.load %arg1[%c1_116, %c0_117, %c0_118] : memref<3x128x512xf32, #tpu.memory_space<vmem>>, vector<1x128x512xf32>
    %270 = vector.shape_cast %269 : vector<1x128x512xf32> to vector<128x512xf32>
    %cst_119 = arith.constant dense<0.000000e+00> : vector<1x512xf32>
    %271 = tpu.matmul %189, %270, %cst_119 {dimension_numbers = #tpu.dot_dimension_numbers<[1], [0], [0], [1], [0, 0, 1, 1], [], []>} : vector<1x128xf32>, vector<128x512xf32>, vector<1x512xf32> -> vector<1x512xf32>
    %c1_120 = arith.constant 1 : index
    %c0_121 = arith.constant 0 : index
    %c0_122 = arith.constant 0 : index
    %272 = vector.load %arg2[%c1_120, %c0_121, %c0_122] : memref<3x128x512xf32, #tpu.memory_space<vmem>>, vector<1x128x512xf32>
    %273 = vector.shape_cast %272 : vector<1x128x512xf32> to vector<128x512xf32>
    %cst_123 = arith.constant dense<0.000000e+00> : vector<1x512xf32>
    %274 = tpu.matmul %217, %273, %cst_123 {dimension_numbers = #tpu.dot_dimension_numbers<[1], [0], [0], [1], [0, 0, 1, 1], [], []>} : vector<1x128xf32>, vector<128x512xf32>, vector<1x512xf32> -> vector<1x512xf32>
    %275 = arith.addf %271, %274 : vector<1x512xf32>
    %c1_124 = arith.constant 1 : index
    %c0_125 = arith.constant 0 : index
    %c0_126 = arith.constant 0 : index
    %276 = vector.load %arg3[%c1_124, %c0_125, %c0_126] : memref<3x1x512xf32, #tpu.memory_space<vmem>>, vector<1x1x512xf32>
    %277 = vector.shape_cast %276 : vector<1x1x512xf32> to vector<1x512xf32>
    %278 = arith.addf %275, %277 : vector<1x512xf32>
    %279 = vector.extract_strided_slice %278 {offsets = [0, 0], sizes = [1, 384], strides = [1, 1]} : vector<1x512xf32> to vector<1x384xf32>
    %cst_127 = arith.constant 5.000000e-01 : f32
    %280 = vector.broadcast %cst_127 : f32 to vector<1x384xf32>
    %281 = arith.mulf %280, %279 : vector<1x384xf32>
    %282 = math.tanh %281 : vector<1x384xf32>
    %cst_128 = arith.constant 5.000000e-01 : f32
    %283 = vector.broadcast %cst_128 : f32 to vector<1x384xf32>
    %284 = arith.mulf %283, %282 : vector<1x384xf32>
    %cst_129 = arith.constant 5.000000e-01 : f32
    %285 = vector.broadcast %cst_129 : f32 to vector<1x384xf32>
    %286 = arith.addf %284, %285 : vector<1x384xf32>
    %287 = vector.extract_strided_slice %278 {offsets = [0, 384], sizes = [1, 128], strides = [1, 1]} : vector<1x512xf32> to vector<1x128xf32>
    %288 = math.tanh %287 : vector<1x128xf32>
    %289 = vector.extract_strided_slice %286 {offsets = [0, 0], sizes = [1, 128], strides = [1, 1]} : vector<1x384xf32> to vector<1x128xf32>
    %290 = vector.extract_strided_slice %286 {offsets = [0, 128], sizes = [1, 128], strides = [1, 1]} : vector<1x384xf32> to vector<1x128xf32>
    %291 = vector.extract_strided_slice %286 {offsets = [0, 256], sizes = [1, 128], strides = [1, 1]} : vector<1x384xf32> to vector<1x128xf32>
    %292 = arith.mulf %290, %215 : vector<1x128xf32>
    %293 = arith.mulf %289, %288 : vector<1x128xf32>
    %294 = arith.addf %292, %293 : vector<1x128xf32>
    %295 = math.tanh %294 : vector<1x128xf32>
    %296 = arith.mulf %291, %295 : vector<1x128xf32>
    %c2_130 = arith.constant 2 : index
    %c0_131 = arith.constant 0 : index
    %c0_132 = arith.constant 0 : index
    %297 = vector.load %arg1[%c2_130, %c0_131, %c0_132] : memref<3x128x512xf32, #tpu.memory_space<vmem>>, vector<1x128x512xf32>
    %298 = vector.shape_cast %297 : vector<1x128x512xf32> to vector<128x512xf32>
    %cst_133 = arith.constant dense<0.000000e+00> : vector<1x512xf32>
    %299 = tpu.matmul %217, %298, %cst_133 {dimension_numbers = #tpu.dot_dimension_numbers<[1], [0], [0], [1], [0, 0, 1, 1], [], []>} : vector<1x128xf32>, vector<128x512xf32>, vector<1x512xf32> -> vector<1x512xf32>
    %c2_134 = arith.constant 2 : index
    %c0_135 = arith.constant 0 : index
    %c0_136 = arith.constant 0 : index
    %300 = vector.load %arg2[%c2_134, %c0_135, %c0_136] : memref<3x128x512xf32, #tpu.memory_space<vmem>>, vector<1x128x512xf32>
    %301 = vector.shape_cast %300 : vector<1x128x512xf32> to vector<128x512xf32>
    %cst_137 = arith.constant dense<0.000000e+00> : vector<1x512xf32>
    %302 = tpu.matmul %245, %301, %cst_137 {dimension_numbers = #tpu.dot_dimension_numbers<[1], [0], [0], [1], [0, 0, 1, 1], [], []>} : vector<1x128xf32>, vector<128x512xf32>, vector<1x512xf32> -> vector<1x512xf32>
    %303 = arith.addf %299, %302 : vector<1x512xf32>
    %c2_138 = arith.constant 2 : index
    %c0_139 = arith.constant 0 : index
    %c0_140 = arith.constant 0 : index
    %304 = vector.load %arg3[%c2_138, %c0_139, %c0_140] : memref<3x1x512xf32, #tpu.memory_space<vmem>>, vector<1x1x512xf32>
    %305 = vector.shape_cast %304 : vector<1x1x512xf32> to vector<1x512xf32>
    %306 = arith.addf %303, %305 : vector<1x512xf32>
    %307 = vector.extract_strided_slice %306 {offsets = [0, 0], sizes = [1, 384], strides = [1, 1]} : vector<1x512xf32> to vector<1x384xf32>
    %cst_141 = arith.constant 5.000000e-01 : f32
    %308 = vector.broadcast %cst_141 : f32 to vector<1x384xf32>
    %309 = arith.mulf %308, %307 : vector<1x384xf32>
    %310 = math.tanh %309 : vector<1x384xf32>
    %cst_142 = arith.constant 5.000000e-01 : f32
    %311 = vector.broadcast %cst_142 : f32 to vector<1x384xf32>
    %312 = arith.mulf %311, %310 : vector<1x384xf32>
    %cst_143 = arith.constant 5.000000e-01 : f32
    %313 = vector.broadcast %cst_143 : f32 to vector<1x384xf32>
    %314 = arith.addf %312, %313 : vector<1x384xf32>
    %315 = vector.extract_strided_slice %306 {offsets = [0, 384], sizes = [1, 128], strides = [1, 1]} : vector<1x512xf32> to vector<1x128xf32>
    %316 = math.tanh %315 : vector<1x128xf32>
    %317 = vector.extract_strided_slice %314 {offsets = [0, 0], sizes = [1, 128], strides = [1, 1]} : vector<1x384xf32> to vector<1x128xf32>
    %318 = vector.extract_strided_slice %314 {offsets = [0, 128], sizes = [1, 128], strides = [1, 1]} : vector<1x384xf32> to vector<1x128xf32>
    %319 = vector.extract_strided_slice %314 {offsets = [0, 256], sizes = [1, 128], strides = [1, 1]} : vector<1x384xf32> to vector<1x128xf32>
    %320 = arith.mulf %318, %243 : vector<1x128xf32>
    %321 = arith.mulf %317, %316 : vector<1x128xf32>
    %322 = arith.addf %320, %321 : vector<1x128xf32>
    %323 = math.tanh %322 : vector<1x128xf32>
    %324 = arith.mulf %319, %323 : vector<1x128xf32>
    %c0_144 = arith.constant 0 : index
    %c0_145 = arith.constant 0 : index
    %c0_146 = arith.constant 0 : index
    %325 = vector.load %arg2[%c0_144, %c0_145, %c0_146] : memref<3x128x512xf32, #tpu.memory_space<vmem>>, vector<1x128x512xf32>
    %326 = vector.shape_cast %325 : vector<1x128x512xf32> to vector<128x512xf32>
    %cst_147 = arith.constant dense<0.000000e+00> : vector<1x512xf32>
    %327 = tpu.matmul %268, %326, %cst_147 {dimension_numbers = #tpu.dot_dimension_numbers<[1], [0], [0], [1], [0, 0, 1, 1], [], []>} : vector<1x128xf32>, vector<128x512xf32>, vector<1x512xf32> -> vector<1x512xf32>
    %328 = vector.extract_strided_slice %7 {offsets = [5, 0], sizes = [1, 512], strides = [1, 1]} : vector<8x512xf32> to vector<1x512xf32>
    %329 = arith.addf %327, %328 : vector<1x512xf32>
    %330 = vector.extract_strided_slice %329 {offsets = [0, 0], sizes = [1, 384], strides = [1, 1]} : vector<1x512xf32> to vector<1x384xf32>
    %cst_148 = arith.constant 5.000000e-01 : f32
    %331 = vector.broadcast %cst_148 : f32 to vector<1x384xf32>
    %332 = arith.mulf %331, %330 : vector<1x384xf32>
    %333 = math.tanh %332 : vector<1x384xf32>
    %cst_149 = arith.constant 5.000000e-01 : f32
    %334 = vector.broadcast %cst_149 : f32 to vector<1x384xf32>
    %335 = arith.mulf %334, %333 : vector<1x384xf32>
    %cst_150 = arith.constant 5.000000e-01 : f32
    %336 = vector.broadcast %cst_150 : f32 to vector<1x384xf32>
    %337 = arith.addf %335, %336 : vector<1x384xf32>
    %338 = vector.extract_strided_slice %329 {offsets = [0, 384], sizes = [1, 128], strides = [1, 1]} : vector<1x512xf32> to vector<1x128xf32>
    %339 = math.tanh %338 : vector<1x128xf32>
    %340 = vector.extract_strided_slice %337 {offsets = [0, 0], sizes = [1, 128], strides = [1, 1]} : vector<1x384xf32> to vector<1x128xf32>
    %341 = vector.extract_strided_slice %337 {offsets = [0, 128], sizes = [1, 128], strides = [1, 1]} : vector<1x384xf32> to vector<1x128xf32>
    %342 = vector.extract_strided_slice %337 {offsets = [0, 256], sizes = [1, 128], strides = [1, 1]} : vector<1x384xf32> to vector<1x128xf32>
    %343 = arith.mulf %341, %266 : vector<1x128xf32>
    %344 = arith.mulf %340, %339 : vector<1x128xf32>
    %345 = arith.addf %343, %344 : vector<1x128xf32>
    %346 = math.tanh %345 : vector<1x128xf32>
    %347 = arith.mulf %342, %346 : vector<1x128xf32>
    %c1_151 = arith.constant 1 : index
    %c0_152 = arith.constant 0 : index
    %c0_153 = arith.constant 0 : index
    %348 = vector.load %arg1[%c1_151, %c0_152, %c0_153] : memref<3x128x512xf32, #tpu.memory_space<vmem>>, vector<1x128x512xf32>
    %349 = vector.shape_cast %348 : vector<1x128x512xf32> to vector<128x512xf32>
    %cst_154 = arith.constant dense<0.000000e+00> : vector<1x512xf32>
    %350 = tpu.matmul %268, %349, %cst_154 {dimension_numbers = #tpu.dot_dimension_numbers<[1], [0], [0], [1], [0, 0, 1, 1], [], []>} : vector<1x128xf32>, vector<128x512xf32>, vector<1x512xf32> -> vector<1x512xf32>
    %c1_155 = arith.constant 1 : index
    %c0_156 = arith.constant 0 : index
    %c0_157 = arith.constant 0 : index
    %351 = vector.load %arg2[%c1_155, %c0_156, %c0_157] : memref<3x128x512xf32, #tpu.memory_space<vmem>>, vector<1x128x512xf32>
    %352 = vector.shape_cast %351 : vector<1x128x512xf32> to vector<128x512xf32>
    %cst_158 = arith.constant dense<0.000000e+00> : vector<1x512xf32>
    %353 = tpu.matmul %296, %352, %cst_158 {dimension_numbers = #tpu.dot_dimension_numbers<[1], [0], [0], [1], [0, 0, 1, 1], [], []>} : vector<1x128xf32>, vector<128x512xf32>, vector<1x512xf32> -> vector<1x512xf32>
    %354 = arith.addf %350, %353 : vector<1x512xf32>
    %c1_159 = arith.constant 1 : index
    %c0_160 = arith.constant 0 : index
    %c0_161 = arith.constant 0 : index
    %355 = vector.load %arg3[%c1_159, %c0_160, %c0_161] : memref<3x1x512xf32, #tpu.memory_space<vmem>>, vector<1x1x512xf32>
    %356 = vector.shape_cast %355 : vector<1x1x512xf32> to vector<1x512xf32>
    %357 = arith.addf %354, %356 : vector<1x512xf32>
    %358 = vector.extract_strided_slice %357 {offsets = [0, 0], sizes = [1, 384], strides = [1, 1]} : vector<1x512xf32> to vector<1x384xf32>
    %cst_162 = arith.constant 5.000000e-01 : f32
    %359 = vector.broadcast %cst_162 : f32 to vector<1x384xf32>
    %360 = arith.mulf %359, %358 : vector<1x384xf32>
    %361 = math.tanh %360 : vector<1x384xf32>
    %cst_163 = arith.constant 5.000000e-01 : f32
    %362 = vector.broadcast %cst_163 : f32 to vector<1x384xf32>
    %363 = arith.mulf %362, %361 : vector<1x384xf32>
    %cst_164 = arith.constant 5.000000e-01 : f32
    %364 = vector.broadcast %cst_164 : f32 to vector<1x384xf32>
    %365 = arith.addf %363, %364 : vector<1x384xf32>
    %366 = vector.extract_strided_slice %357 {offsets = [0, 384], sizes = [1, 128], strides = [1, 1]} : vector<1x512xf32> to vector<1x128xf32>
    %367 = math.tanh %366 : vector<1x128xf32>
    %368 = vector.extract_strided_slice %365 {offsets = [0, 0], sizes = [1, 128], strides = [1, 1]} : vector<1x384xf32> to vector<1x128xf32>
    %369 = vector.extract_strided_slice %365 {offsets = [0, 128], sizes = [1, 128], strides = [1, 1]} : vector<1x384xf32> to vector<1x128xf32>
    %370 = vector.extract_strided_slice %365 {offsets = [0, 256], sizes = [1, 128], strides = [1, 1]} : vector<1x384xf32> to vector<1x128xf32>
    %371 = arith.mulf %369, %294 : vector<1x128xf32>
    %372 = arith.mulf %368, %367 : vector<1x128xf32>
    %373 = arith.addf %371, %372 : vector<1x128xf32>
    %374 = math.tanh %373 : vector<1x128xf32>
    %375 = arith.mulf %370, %374 : vector<1x128xf32>
    %c2_165 = arith.constant 2 : index
    %c0_166 = arith.constant 0 : index
    %c0_167 = arith.constant 0 : index
    %376 = vector.load %arg1[%c2_165, %c0_166, %c0_167] : memref<3x128x512xf32, #tpu.memory_space<vmem>>, vector<1x128x512xf32>
    %377 = vector.shape_cast %376 : vector<1x128x512xf32> to vector<128x512xf32>
    %cst_168 = arith.constant dense<0.000000e+00> : vector<1x512xf32>
    %378 = tpu.matmul %296, %377, %cst_168 {dimension_numbers = #tpu.dot_dimension_numbers<[1], [0], [0], [1], [0, 0, 1, 1], [], []>} : vector<1x128xf32>, vector<128x512xf32>, vector<1x512xf32> -> vector<1x512xf32>
    %c2_169 = arith.constant 2 : index
    %c0_170 = arith.constant 0 : index
    %c0_171 = arith.constant 0 : index
    %379 = vector.load %arg2[%c2_169, %c0_170, %c0_171] : memref<3x128x512xf32, #tpu.memory_space<vmem>>, vector<1x128x512xf32>
    %380 = vector.shape_cast %379 : vector<1x128x512xf32> to vector<128x512xf32>
    %cst_172 = arith.constant dense<0.000000e+00> : vector<1x512xf32>
    %381 = tpu.matmul %324, %380, %cst_172 {dimension_numbers = #tpu.dot_dimension_numbers<[1], [0], [0], [1], [0, 0, 1, 1], [], []>} : vector<1x128xf32>, vector<128x512xf32>, vector<1x512xf32> -> vector<1x512xf32>
    %382 = arith.addf %378, %381 : vector<1x512xf32>
    %c2_173 = arith.constant 2 : index
    %c0_174 = arith.constant 0 : index
    %c0_175 = arith.constant 0 : index
    %383 = vector.load %arg3[%c2_173, %c0_174, %c0_175] : memref<3x1x512xf32, #tpu.memory_space<vmem>>, vector<1x1x512xf32>
    %384 = vector.shape_cast %383 : vector<1x1x512xf32> to vector<1x512xf32>
    %385 = arith.addf %382, %384 : vector<1x512xf32>
    %386 = vector.extract_strided_slice %385 {offsets = [0, 0], sizes = [1, 384], strides = [1, 1]} : vector<1x512xf32> to vector<1x384xf32>
    %cst_176 = arith.constant 5.000000e-01 : f32
    %387 = vector.broadcast %cst_176 : f32 to vector<1x384xf32>
    %388 = arith.mulf %387, %386 : vector<1x384xf32>
    %389 = math.tanh %388 : vector<1x384xf32>
    %cst_177 = arith.constant 5.000000e-01 : f32
    %390 = vector.broadcast %cst_177 : f32 to vector<1x384xf32>
    %391 = arith.mulf %390, %389 : vector<1x384xf32>
    %cst_178 = arith.constant 5.000000e-01 : f32
    %392 = vector.broadcast %cst_178 : f32 to vector<1x384xf32>
    %393 = arith.addf %391, %392 : vector<1x384xf32>
    %394 = vector.extract_strided_slice %385 {offsets = [0, 384], sizes = [1, 128], strides = [1, 1]} : vector<1x512xf32> to vector<1x128xf32>
    %395 = math.tanh %394 : vector<1x128xf32>
    %396 = vector.extract_strided_slice %393 {offsets = [0, 0], sizes = [1, 128], strides = [1, 1]} : vector<1x384xf32> to vector<1x128xf32>
    %397 = vector.extract_strided_slice %393 {offsets = [0, 128], sizes = [1, 128], strides = [1, 1]} : vector<1x384xf32> to vector<1x128xf32>
    %398 = vector.extract_strided_slice %393 {offsets = [0, 256], sizes = [1, 128], strides = [1, 1]} : vector<1x384xf32> to vector<1x128xf32>
    %399 = arith.mulf %397, %322 : vector<1x128xf32>
    %400 = arith.mulf %396, %395 : vector<1x128xf32>
    %401 = arith.addf %399, %400 : vector<1x128xf32>
    %402 = math.tanh %401 : vector<1x128xf32>
    %403 = arith.mulf %398, %402 : vector<1x128xf32>
    %c0_179 = arith.constant 0 : index
    %c0_180 = arith.constant 0 : index
    %c0_181 = arith.constant 0 : index
    %404 = vector.load %arg2[%c0_179, %c0_180, %c0_181] : memref<3x128x512xf32, #tpu.memory_space<vmem>>, vector<1x128x512xf32>
    %405 = vector.shape_cast %404 : vector<1x128x512xf32> to vector<128x512xf32>
    %cst_182 = arith.constant dense<0.000000e+00> : vector<1x512xf32>
    %406 = tpu.matmul %347, %405, %cst_182 {dimension_numbers = #tpu.dot_dimension_numbers<[1], [0], [0], [1], [0, 0, 1, 1], [], []>} : vector<1x128xf32>, vector<128x512xf32>, vector<1x512xf32> -> vector<1x512xf32>
    %407 = vector.extract_strided_slice %7 {offsets = [6, 0], sizes = [1, 512], strides = [1, 1]} : vector<8x512xf32> to vector<1x512xf32>
    %408 = arith.addf %406, %407 : vector<1x512xf32>
    %409 = vector.extract_strided_slice %408 {offsets = [0, 0], sizes = [1, 384], strides = [1, 1]} : vector<1x512xf32> to vector<1x384xf32>
    %cst_183 = arith.constant 5.000000e-01 : f32
    %410 = vector.broadcast %cst_183 : f32 to vector<1x384xf32>
    %411 = arith.mulf %410, %409 : vector<1x384xf32>
    %412 = math.tanh %411 : vector<1x384xf32>
    %cst_184 = arith.constant 5.000000e-01 : f32
    %413 = vector.broadcast %cst_184 : f32 to vector<1x384xf32>
    %414 = arith.mulf %413, %412 : vector<1x384xf32>
    %cst_185 = arith.constant 5.000000e-01 : f32
    %415 = vector.broadcast %cst_185 : f32 to vector<1x384xf32>
    %416 = arith.addf %414, %415 : vector<1x384xf32>
    %417 = vector.extract_strided_slice %408 {offsets = [0, 384], sizes = [1, 128], strides = [1, 1]} : vector<1x512xf32> to vector<1x128xf32>
    %418 = math.tanh %417 : vector<1x128xf32>
    %419 = vector.extract_strided_slice %416 {offsets = [0, 0], sizes = [1, 128], strides = [1, 1]} : vector<1x384xf32> to vector<1x128xf32>
    %420 = vector.extract_strided_slice %416 {offsets = [0, 128], sizes = [1, 128], strides = [1, 1]} : vector<1x384xf32> to vector<1x128xf32>
    %421 = vector.extract_strided_slice %416 {offsets = [0, 256], sizes = [1, 128], strides = [1, 1]} : vector<1x384xf32> to vector<1x128xf32>
    %422 = arith.mulf %420, %345 : vector<1x128xf32>
    %423 = arith.mulf %419, %418 : vector<1x128xf32>
    %424 = arith.addf %422, %423 : vector<1x128xf32>
    %425 = math.tanh %424 : vector<1x128xf32>
    %426 = arith.mulf %421, %425 : vector<1x128xf32>
    %c1_186 = arith.constant 1 : index
    %c0_187 = arith.constant 0 : index
    %c0_188 = arith.constant 0 : index
    %427 = vector.load %arg1[%c1_186, %c0_187, %c0_188] : memref<3x128x512xf32, #tpu.memory_space<vmem>>, vector<1x128x512xf32>
    %428 = vector.shape_cast %427 : vector<1x128x512xf32> to vector<128x512xf32>
    %cst_189 = arith.constant dense<0.000000e+00> : vector<1x512xf32>
    %429 = tpu.matmul %347, %428, %cst_189 {dimension_numbers = #tpu.dot_dimension_numbers<[1], [0], [0], [1], [0, 0, 1, 1], [], []>} : vector<1x128xf32>, vector<128x512xf32>, vector<1x512xf32> -> vector<1x512xf32>
    %c1_190 = arith.constant 1 : index
    %c0_191 = arith.constant 0 : index
    %c0_192 = arith.constant 0 : index
    %430 = vector.load %arg2[%c1_190, %c0_191, %c0_192] : memref<3x128x512xf32, #tpu.memory_space<vmem>>, vector<1x128x512xf32>
    %431 = vector.shape_cast %430 : vector<1x128x512xf32> to vector<128x512xf32>
    %cst_193 = arith.constant dense<0.000000e+00> : vector<1x512xf32>
    %432 = tpu.matmul %375, %431, %cst_193 {dimension_numbers = #tpu.dot_dimension_numbers<[1], [0], [0], [1], [0, 0, 1, 1], [], []>} : vector<1x128xf32>, vector<128x512xf32>, vector<1x512xf32> -> vector<1x512xf32>
    %433 = arith.addf %429, %432 : vector<1x512xf32>
    %c1_194 = arith.constant 1 : index
    %c0_195 = arith.constant 0 : index
    %c0_196 = arith.constant 0 : index
    %434 = vector.load %arg3[%c1_194, %c0_195, %c0_196] : memref<3x1x512xf32, #tpu.memory_space<vmem>>, vector<1x1x512xf32>
    %435 = vector.shape_cast %434 : vector<1x1x512xf32> to vector<1x512xf32>
    %436 = arith.addf %433, %435 : vector<1x512xf32>
    %437 = vector.extract_strided_slice %436 {offsets = [0, 0], sizes = [1, 384], strides = [1, 1]} : vector<1x512xf32> to vector<1x384xf32>
    %cst_197 = arith.constant 5.000000e-01 : f32
    %438 = vector.broadcast %cst_197 : f32 to vector<1x384xf32>
    %439 = arith.mulf %438, %437 : vector<1x384xf32>
    %440 = math.tanh %439 : vector<1x384xf32>
    %cst_198 = arith.constant 5.000000e-01 : f32
    %441 = vector.broadcast %cst_198 : f32 to vector<1x384xf32>
    %442 = arith.mulf %441, %440 : vector<1x384xf32>
    %cst_199 = arith.constant 5.000000e-01 : f32
    %443 = vector.broadcast %cst_199 : f32 to vector<1x384xf32>
    %444 = arith.addf %442, %443 : vector<1x384xf32>
    %445 = vector.extract_strided_slice %436 {offsets = [0, 384], sizes = [1, 128], strides = [1, 1]} : vector<1x512xf32> to vector<1x128xf32>
    %446 = math.tanh %445 : vector<1x128xf32>
    %447 = vector.extract_strided_slice %444 {offsets = [0, 0], sizes = [1, 128], strides = [1, 1]} : vector<1x384xf32> to vector<1x128xf32>
    %448 = vector.extract_strided_slice %444 {offsets = [0, 128], sizes = [1, 128], strides = [1, 1]} : vector<1x384xf32> to vector<1x128xf32>
    %449 = vector.extract_strided_slice %444 {offsets = [0, 256], sizes = [1, 128], strides = [1, 1]} : vector<1x384xf32> to vector<1x128xf32>
    %450 = arith.mulf %448, %373 : vector<1x128xf32>
    %451 = arith.mulf %447, %446 : vector<1x128xf32>
    %452 = arith.addf %450, %451 : vector<1x128xf32>
    %453 = math.tanh %452 : vector<1x128xf32>
    %454 = arith.mulf %449, %453 : vector<1x128xf32>
    %c2_200 = arith.constant 2 : index
    %c0_201 = arith.constant 0 : index
    %c0_202 = arith.constant 0 : index
    %455 = vector.load %arg1[%c2_200, %c0_201, %c0_202] : memref<3x128x512xf32, #tpu.memory_space<vmem>>, vector<1x128x512xf32>
    %456 = vector.shape_cast %455 : vector<1x128x512xf32> to vector<128x512xf32>
    %cst_203 = arith.constant dense<0.000000e+00> : vector<1x512xf32>
    %457 = tpu.matmul %375, %456, %cst_203 {dimension_numbers = #tpu.dot_dimension_numbers<[1], [0], [0], [1], [0, 0, 1, 1], [], []>} : vector<1x128xf32>, vector<128x512xf32>, vector<1x512xf32> -> vector<1x512xf32>
    %c2_204 = arith.constant 2 : index
    %c0_205 = arith.constant 0 : index
    %c0_206 = arith.constant 0 : index
    %458 = vector.load %arg2[%c2_204, %c0_205, %c0_206] : memref<3x128x512xf32, #tpu.memory_space<vmem>>, vector<1x128x512xf32>
    %459 = vector.shape_cast %458 : vector<1x128x512xf32> to vector<128x512xf32>
    %cst_207 = arith.constant dense<0.000000e+00> : vector<1x512xf32>
    %460 = tpu.matmul %403, %459, %cst_207 {dimension_numbers = #tpu.dot_dimension_numbers<[1], [0], [0], [1], [0, 0, 1, 1], [], []>} : vector<1x128xf32>, vector<128x512xf32>, vector<1x512xf32> -> vector<1x512xf32>
    %461 = arith.addf %457, %460 : vector<1x512xf32>
    %c2_208 = arith.constant 2 : index
    %c0_209 = arith.constant 0 : index
    %c0_210 = arith.constant 0 : index
    %462 = vector.load %arg3[%c2_208, %c0_209, %c0_210] : memref<3x1x512xf32, #tpu.memory_space<vmem>>, vector<1x1x512xf32>
    %463 = vector.shape_cast %462 : vector<1x1x512xf32> to vector<1x512xf32>
    %464 = arith.addf %461, %463 : vector<1x512xf32>
    %465 = vector.extract_strided_slice %464 {offsets = [0, 0], sizes = [1, 384], strides = [1, 1]} : vector<1x512xf32> to vector<1x384xf32>
    %cst_211 = arith.constant 5.000000e-01 : f32
    %466 = vector.broadcast %cst_211 : f32 to vector<1x384xf32>
    %467 = arith.mulf %466, %465 : vector<1x384xf32>
    %468 = math.tanh %467 : vector<1x384xf32>
    %cst_212 = arith.constant 5.000000e-01 : f32
    %469 = vector.broadcast %cst_212 : f32 to vector<1x384xf32>
    %470 = arith.mulf %469, %468 : vector<1x384xf32>
    %cst_213 = arith.constant 5.000000e-01 : f32
    %471 = vector.broadcast %cst_213 : f32 to vector<1x384xf32>
    %472 = arith.addf %470, %471 : vector<1x384xf32>
    %473 = vector.extract_strided_slice %464 {offsets = [0, 384], sizes = [1, 128], strides = [1, 1]} : vector<1x512xf32> to vector<1x128xf32>
    %474 = math.tanh %473 : vector<1x128xf32>
    %475 = vector.extract_strided_slice %472 {offsets = [0, 0], sizes = [1, 128], strides = [1, 1]} : vector<1x384xf32> to vector<1x128xf32>
    %476 = vector.extract_strided_slice %472 {offsets = [0, 128], sizes = [1, 128], strides = [1, 1]} : vector<1x384xf32> to vector<1x128xf32>
    %477 = vector.extract_strided_slice %472 {offsets = [0, 256], sizes = [1, 128], strides = [1, 1]} : vector<1x384xf32> to vector<1x128xf32>
    %478 = arith.mulf %476, %401 : vector<1x128xf32>
    %479 = arith.mulf %475, %474 : vector<1x128xf32>
    %480 = arith.addf %478, %479 : vector<1x128xf32>
    %481 = math.tanh %480 : vector<1x128xf32>
    %482 = arith.mulf %477, %481 : vector<1x128xf32>
    %c0_214 = arith.constant 0 : index
    %c0_215 = arith.constant 0 : index
    %c0_216 = arith.constant 0 : index
    %483 = vector.load %arg2[%c0_214, %c0_215, %c0_216] : memref<3x128x512xf32, #tpu.memory_space<vmem>>, vector<1x128x512xf32>
    %484 = vector.shape_cast %483 : vector<1x128x512xf32> to vector<128x512xf32>
    %cst_217 = arith.constant dense<0.000000e+00> : vector<1x512xf32>
    %485 = tpu.matmul %426, %484, %cst_217 {dimension_numbers = #tpu.dot_dimension_numbers<[1], [0], [0], [1], [0, 0, 1, 1], [], []>} : vector<1x128xf32>, vector<128x512xf32>, vector<1x512xf32> -> vector<1x512xf32>
    %486 = vector.extract_strided_slice %7 {offsets = [7, 0], sizes = [1, 512], strides = [1, 1]} : vector<8x512xf32> to vector<1x512xf32>
    %487 = arith.addf %485, %486 : vector<1x512xf32>
    %488 = vector.extract_strided_slice %487 {offsets = [0, 0], sizes = [1, 384], strides = [1, 1]} : vector<1x512xf32> to vector<1x384xf32>
    %cst_218 = arith.constant 5.000000e-01 : f32
    %489 = vector.broadcast %cst_218 : f32 to vector<1x384xf32>
    %490 = arith.mulf %489, %488 : vector<1x384xf32>
    %491 = math.tanh %490 : vector<1x384xf32>
    %cst_219 = arith.constant 5.000000e-01 : f32
    %492 = vector.broadcast %cst_219 : f32 to vector<1x384xf32>
    %493 = arith.mulf %492, %491 : vector<1x384xf32>
    %cst_220 = arith.constant 5.000000e-01 : f32
    %494 = vector.broadcast %cst_220 : f32 to vector<1x384xf32>
    %495 = arith.addf %493, %494 : vector<1x384xf32>
    %496 = vector.extract_strided_slice %487 {offsets = [0, 384], sizes = [1, 128], strides = [1, 1]} : vector<1x512xf32> to vector<1x128xf32>
    %497 = math.tanh %496 : vector<1x128xf32>
    %498 = vector.extract_strided_slice %495 {offsets = [0, 0], sizes = [1, 128], strides = [1, 1]} : vector<1x384xf32> to vector<1x128xf32>
    %499 = vector.extract_strided_slice %495 {offsets = [0, 128], sizes = [1, 128], strides = [1, 1]} : vector<1x384xf32> to vector<1x128xf32>
    %500 = vector.extract_strided_slice %495 {offsets = [0, 256], sizes = [1, 128], strides = [1, 1]} : vector<1x384xf32> to vector<1x128xf32>
    %501 = arith.mulf %499, %424 : vector<1x128xf32>
    %502 = arith.mulf %498, %497 : vector<1x128xf32>
    %503 = arith.addf %501, %502 : vector<1x128xf32>
    %504 = math.tanh %503 : vector<1x128xf32>
    %505 = arith.mulf %500, %504 : vector<1x128xf32>
    %c1_221 = arith.constant 1 : index
    %c0_222 = arith.constant 0 : index
    %c0_223 = arith.constant 0 : index
    %506 = vector.load %arg1[%c1_221, %c0_222, %c0_223] : memref<3x128x512xf32, #tpu.memory_space<vmem>>, vector<1x128x512xf32>
    %507 = vector.shape_cast %506 : vector<1x128x512xf32> to vector<128x512xf32>
    %cst_224 = arith.constant dense<0.000000e+00> : vector<1x512xf32>
    %508 = tpu.matmul %426, %507, %cst_224 {dimension_numbers = #tpu.dot_dimension_numbers<[1], [0], [0], [1], [0, 0, 1, 1], [], []>} : vector<1x128xf32>, vector<128x512xf32>, vector<1x512xf32> -> vector<1x512xf32>
    %c1_225 = arith.constant 1 : index
    %c0_226 = arith.constant 0 : index
    %c0_227 = arith.constant 0 : index
    %509 = vector.load %arg2[%c1_225, %c0_226, %c0_227] : memref<3x128x512xf32, #tpu.memory_space<vmem>>, vector<1x128x512xf32>
    %510 = vector.shape_cast %509 : vector<1x128x512xf32> to vector<128x512xf32>
    %cst_228 = arith.constant dense<0.000000e+00> : vector<1x512xf32>
    %511 = tpu.matmul %454, %510, %cst_228 {dimension_numbers = #tpu.dot_dimension_numbers<[1], [0], [0], [1], [0, 0, 1, 1], [], []>} : vector<1x128xf32>, vector<128x512xf32>, vector<1x512xf32> -> vector<1x512xf32>
    %512 = arith.addf %508, %511 : vector<1x512xf32>
    %c1_229 = arith.constant 1 : index
    %c0_230 = arith.constant 0 : index
    %c0_231 = arith.constant 0 : index
    %513 = vector.load %arg3[%c1_229, %c0_230, %c0_231] : memref<3x1x512xf32, #tpu.memory_space<vmem>>, vector<1x1x512xf32>
    %514 = vector.shape_cast %513 : vector<1x1x512xf32> to vector<1x512xf32>
    %515 = arith.addf %512, %514 : vector<1x512xf32>
    %516 = vector.extract_strided_slice %515 {offsets = [0, 0], sizes = [1, 384], strides = [1, 1]} : vector<1x512xf32> to vector<1x384xf32>
    %cst_232 = arith.constant 5.000000e-01 : f32
    %517 = vector.broadcast %cst_232 : f32 to vector<1x384xf32>
    %518 = arith.mulf %517, %516 : vector<1x384xf32>
    %519 = math.tanh %518 : vector<1x384xf32>
    %cst_233 = arith.constant 5.000000e-01 : f32
    %520 = vector.broadcast %cst_233 : f32 to vector<1x384xf32>
    %521 = arith.mulf %520, %519 : vector<1x384xf32>
    %cst_234 = arith.constant 5.000000e-01 : f32
    %522 = vector.broadcast %cst_234 : f32 to vector<1x384xf32>
    %523 = arith.addf %521, %522 : vector<1x384xf32>
    %524 = vector.extract_strided_slice %515 {offsets = [0, 384], sizes = [1, 128], strides = [1, 1]} : vector<1x512xf32> to vector<1x128xf32>
    %525 = math.tanh %524 : vector<1x128xf32>
    %526 = vector.extract_strided_slice %523 {offsets = [0, 0], sizes = [1, 128], strides = [1, 1]} : vector<1x384xf32> to vector<1x128xf32>
    %527 = vector.extract_strided_slice %523 {offsets = [0, 128], sizes = [1, 128], strides = [1, 1]} : vector<1x384xf32> to vector<1x128xf32>
    %528 = vector.extract_strided_slice %523 {offsets = [0, 256], sizes = [1, 128], strides = [1, 1]} : vector<1x384xf32> to vector<1x128xf32>
    %529 = arith.mulf %527, %452 : vector<1x128xf32>
    %530 = arith.mulf %526, %525 : vector<1x128xf32>
    %531 = arith.addf %529, %530 : vector<1x128xf32>
    %532 = math.tanh %531 : vector<1x128xf32>
    %533 = arith.mulf %528, %532 : vector<1x128xf32>
    %c2_235 = arith.constant 2 : index
    %c0_236 = arith.constant 0 : index
    %c0_237 = arith.constant 0 : index
    %534 = vector.load %arg1[%c2_235, %c0_236, %c0_237] : memref<3x128x512xf32, #tpu.memory_space<vmem>>, vector<1x128x512xf32>
    %535 = vector.shape_cast %534 : vector<1x128x512xf32> to vector<128x512xf32>
    %cst_238 = arith.constant dense<0.000000e+00> : vector<1x512xf32>
    %536 = tpu.matmul %454, %535, %cst_238 {dimension_numbers = #tpu.dot_dimension_numbers<[1], [0], [0], [1], [0, 0, 1, 1], [], []>} : vector<1x128xf32>, vector<128x512xf32>, vector<1x512xf32> -> vector<1x512xf32>
    %c2_239 = arith.constant 2 : index
    %c0_240 = arith.constant 0 : index
    %c0_241 = arith.constant 0 : index
    %537 = vector.load %arg2[%c2_239, %c0_240, %c0_241] : memref<3x128x512xf32, #tpu.memory_space<vmem>>, vector<1x128x512xf32>
    %538 = vector.shape_cast %537 : vector<1x128x512xf32> to vector<128x512xf32>
    %cst_242 = arith.constant dense<0.000000e+00> : vector<1x512xf32>
    %539 = tpu.matmul %482, %538, %cst_242 {dimension_numbers = #tpu.dot_dimension_numbers<[1], [0], [0], [1], [0, 0, 1, 1], [], []>} : vector<1x128xf32>, vector<128x512xf32>, vector<1x512xf32> -> vector<1x512xf32>
    %540 = arith.addf %536, %539 : vector<1x512xf32>
    %c2_243 = arith.constant 2 : index
    %c0_244 = arith.constant 0 : index
    %c0_245 = arith.constant 0 : index
    %541 = vector.load %arg3[%c2_243, %c0_244, %c0_245] : memref<3x1x512xf32, #tpu.memory_space<vmem>>, vector<1x1x512xf32>
    %542 = vector.shape_cast %541 : vector<1x1x512xf32> to vector<1x512xf32>
    %543 = arith.addf %540, %542 : vector<1x512xf32>
    %544 = vector.extract_strided_slice %543 {offsets = [0, 0], sizes = [1, 384], strides = [1, 1]} : vector<1x512xf32> to vector<1x384xf32>
    %cst_246 = arith.constant 5.000000e-01 : f32
    %545 = vector.broadcast %cst_246 : f32 to vector<1x384xf32>
    %546 = arith.mulf %545, %544 : vector<1x384xf32>
    %547 = math.tanh %546 : vector<1x384xf32>
    %cst_247 = arith.constant 5.000000e-01 : f32
    %548 = vector.broadcast %cst_247 : f32 to vector<1x384xf32>
    %549 = arith.mulf %548, %547 : vector<1x384xf32>
    %cst_248 = arith.constant 5.000000e-01 : f32
    %550 = vector.broadcast %cst_248 : f32 to vector<1x384xf32>
    %551 = arith.addf %549, %550 : vector<1x384xf32>
    %552 = vector.extract_strided_slice %543 {offsets = [0, 384], sizes = [1, 128], strides = [1, 1]} : vector<1x512xf32> to vector<1x128xf32>
    %553 = math.tanh %552 : vector<1x128xf32>
    %554 = vector.extract_strided_slice %551 {offsets = [0, 0], sizes = [1, 128], strides = [1, 1]} : vector<1x384xf32> to vector<1x128xf32>
    %555 = vector.extract_strided_slice %551 {offsets = [0, 128], sizes = [1, 128], strides = [1, 1]} : vector<1x384xf32> to vector<1x128xf32>
    %556 = vector.extract_strided_slice %551 {offsets = [0, 256], sizes = [1, 128], strides = [1, 1]} : vector<1x384xf32> to vector<1x128xf32>
    %557 = arith.mulf %555, %480 : vector<1x128xf32>
    %558 = arith.mulf %554, %553 : vector<1x128xf32>
    %559 = arith.addf %557, %558 : vector<1x128xf32>
    %560 = math.tanh %559 : vector<1x128xf32>
    %561 = arith.mulf %556, %560 : vector<1x128xf32>
    %c1_249 = arith.constant 1 : index
    %c0_250 = arith.constant 0 : index
    %c0_251 = arith.constant 0 : index
    %562 = vector.load %arg1[%c1_249, %c0_250, %c0_251] : memref<3x128x512xf32, #tpu.memory_space<vmem>>, vector<1x128x512xf32>
    %563 = vector.shape_cast %562 : vector<1x128x512xf32> to vector<128x512xf32>
    %cst_252 = arith.constant dense<0.000000e+00> : vector<1x512xf32>
    %564 = tpu.matmul %505, %563, %cst_252 {dimension_numbers = #tpu.dot_dimension_numbers<[1], [0], [0], [1], [0, 0, 1, 1], [], []>} : vector<1x128xf32>, vector<128x512xf32>, vector<1x512xf32> -> vector<1x512xf32>
    %c1_253 = arith.constant 1 : index
    %c0_254 = arith.constant 0 : index
    %c0_255 = arith.constant 0 : index
    %565 = vector.load %arg2[%c1_253, %c0_254, %c0_255] : memref<3x128x512xf32, #tpu.memory_space<vmem>>, vector<1x128x512xf32>
    %566 = vector.shape_cast %565 : vector<1x128x512xf32> to vector<128x512xf32>
    %cst_256 = arith.constant dense<0.000000e+00> : vector<1x512xf32>
    %567 = tpu.matmul %533, %566, %cst_256 {dimension_numbers = #tpu.dot_dimension_numbers<[1], [0], [0], [1], [0, 0, 1, 1], [], []>} : vector<1x128xf32>, vector<128x512xf32>, vector<1x512xf32> -> vector<1x512xf32>
    %568 = arith.addf %564, %567 : vector<1x512xf32>
    %c1_257 = arith.constant 1 : index
    %c0_258 = arith.constant 0 : index
    %c0_259 = arith.constant 0 : index
    %569 = vector.load %arg3[%c1_257, %c0_258, %c0_259] : memref<3x1x512xf32, #tpu.memory_space<vmem>>, vector<1x1x512xf32>
    %570 = vector.shape_cast %569 : vector<1x1x512xf32> to vector<1x512xf32>
    %571 = arith.addf %568, %570 : vector<1x512xf32>
    %572 = vector.extract_strided_slice %571 {offsets = [0, 0], sizes = [1, 384], strides = [1, 1]} : vector<1x512xf32> to vector<1x384xf32>
    %cst_260 = arith.constant 5.000000e-01 : f32
    %573 = vector.broadcast %cst_260 : f32 to vector<1x384xf32>
    %574 = arith.mulf %573, %572 : vector<1x384xf32>
    %575 = math.tanh %574 : vector<1x384xf32>
    %cst_261 = arith.constant 5.000000e-01 : f32
    %576 = vector.broadcast %cst_261 : f32 to vector<1x384xf32>
    %577 = arith.mulf %576, %575 : vector<1x384xf32>
    %cst_262 = arith.constant 5.000000e-01 : f32
    %578 = vector.broadcast %cst_262 : f32 to vector<1x384xf32>
    %579 = arith.addf %577, %578 : vector<1x384xf32>
    %580 = vector.extract_strided_slice %571 {offsets = [0, 384], sizes = [1, 128], strides = [1, 1]} : vector<1x512xf32> to vector<1x128xf32>
    %581 = math.tanh %580 : vector<1x128xf32>
    %582 = vector.extract_strided_slice %579 {offsets = [0, 0], sizes = [1, 128], strides = [1, 1]} : vector<1x384xf32> to vector<1x128xf32>
    %583 = vector.extract_strided_slice %579 {offsets = [0, 128], sizes = [1, 128], strides = [1, 1]} : vector<1x384xf32> to vector<1x128xf32>
    %584 = vector.extract_strided_slice %579 {offsets = [0, 256], sizes = [1, 128], strides = [1, 1]} : vector<1x384xf32> to vector<1x128xf32>
    %585 = arith.mulf %583, %531 : vector<1x128xf32>
    %586 = arith.mulf %582, %581 : vector<1x128xf32>
    %587 = arith.addf %585, %586 : vector<1x128xf32>
    %588 = math.tanh %587 : vector<1x128xf32>
    %589 = arith.mulf %584, %588 : vector<1x128xf32>
    %c2_263 = arith.constant 2 : index
    %c0_264 = arith.constant 0 : index
    %c0_265 = arith.constant 0 : index
    %590 = vector.load %arg1[%c2_263, %c0_264, %c0_265] : memref<3x128x512xf32, #tpu.memory_space<vmem>>, vector<1x128x512xf32>
    %591 = vector.shape_cast %590 : vector<1x128x512xf32> to vector<128x512xf32>
    %cst_266 = arith.constant dense<0.000000e+00> : vector<1x512xf32>
    %592 = tpu.matmul %533, %591, %cst_266 {dimension_numbers = #tpu.dot_dimension_numbers<[1], [0], [0], [1], [0, 0, 1, 1], [], []>} : vector<1x128xf32>, vector<128x512xf32>, vector<1x512xf32> -> vector<1x512xf32>
    %c2_267 = arith.constant 2 : index
    %c0_268 = arith.constant 0 : index
    %c0_269 = arith.constant 0 : index
    %593 = vector.load %arg2[%c2_267, %c0_268, %c0_269] : memref<3x128x512xf32, #tpu.memory_space<vmem>>, vector<1x128x512xf32>
    %594 = vector.shape_cast %593 : vector<1x128x512xf32> to vector<128x512xf32>
    %cst_270 = arith.constant dense<0.000000e+00> : vector<1x512xf32>
    %595 = tpu.matmul %561, %594, %cst_270 {dimension_numbers = #tpu.dot_dimension_numbers<[1], [0], [0], [1], [0, 0, 1, 1], [], []>} : vector<1x128xf32>, vector<128x512xf32>, vector<1x512xf32> -> vector<1x512xf32>
    %596 = arith.addf %592, %595 : vector<1x512xf32>
    %c2_271 = arith.constant 2 : index
    %c0_272 = arith.constant 0 : index
    %c0_273 = arith.constant 0 : index
    %597 = vector.load %arg3[%c2_271, %c0_272, %c0_273] : memref<3x1x512xf32, #tpu.memory_space<vmem>>, vector<1x1x512xf32>
    %598 = vector.shape_cast %597 : vector<1x1x512xf32> to vector<1x512xf32>
    %599 = arith.addf %596, %598 : vector<1x512xf32>
    %600 = vector.extract_strided_slice %599 {offsets = [0, 0], sizes = [1, 384], strides = [1, 1]} : vector<1x512xf32> to vector<1x384xf32>
    %cst_274 = arith.constant 5.000000e-01 : f32
    %601 = vector.broadcast %cst_274 : f32 to vector<1x384xf32>
    %602 = arith.mulf %601, %600 : vector<1x384xf32>
    %603 = math.tanh %602 : vector<1x384xf32>
    %cst_275 = arith.constant 5.000000e-01 : f32
    %604 = vector.broadcast %cst_275 : f32 to vector<1x384xf32>
    %605 = arith.mulf %604, %603 : vector<1x384xf32>
    %cst_276 = arith.constant 5.000000e-01 : f32
    %606 = vector.broadcast %cst_276 : f32 to vector<1x384xf32>
    %607 = arith.addf %605, %606 : vector<1x384xf32>
    %608 = vector.extract_strided_slice %599 {offsets = [0, 384], sizes = [1, 128], strides = [1, 1]} : vector<1x512xf32> to vector<1x128xf32>
    %609 = math.tanh %608 : vector<1x128xf32>
    %610 = vector.extract_strided_slice %607 {offsets = [0, 0], sizes = [1, 128], strides = [1, 1]} : vector<1x384xf32> to vector<1x128xf32>
    %611 = vector.extract_strided_slice %607 {offsets = [0, 128], sizes = [1, 128], strides = [1, 1]} : vector<1x384xf32> to vector<1x128xf32>
    %612 = vector.extract_strided_slice %607 {offsets = [0, 256], sizes = [1, 128], strides = [1, 1]} : vector<1x384xf32> to vector<1x128xf32>
    %613 = arith.mulf %611, %559 : vector<1x128xf32>
    %614 = arith.mulf %610, %609 : vector<1x128xf32>
    %615 = arith.addf %613, %614 : vector<1x128xf32>
    %616 = math.tanh %615 : vector<1x128xf32>
    %617 = arith.mulf %612, %616 : vector<1x128xf32>
    %c2_277 = arith.constant 2 : index
    %c0_278 = arith.constant 0 : index
    %c0_279 = arith.constant 0 : index
    %618 = vector.load %arg1[%c2_277, %c0_278, %c0_279] : memref<3x128x512xf32, #tpu.memory_space<vmem>>, vector<1x128x512xf32>
    %619 = vector.shape_cast %618 : vector<1x128x512xf32> to vector<128x512xf32>
    %cst_280 = arith.constant dense<0.000000e+00> : vector<1x512xf32>
    %620 = tpu.matmul %589, %619, %cst_280 {dimension_numbers = #tpu.dot_dimension_numbers<[1], [0], [0], [1], [0, 0, 1, 1], [], []>} : vector<1x128xf32>, vector<128x512xf32>, vector<1x512xf32> -> vector<1x512xf32>
    %c2_281 = arith.constant 2 : index
    %c0_282 = arith.constant 0 : index
    %c0_283 = arith.constant 0 : index
    %621 = vector.load %arg2[%c2_281, %c0_282, %c0_283] : memref<3x128x512xf32, #tpu.memory_space<vmem>>, vector<1x128x512xf32>
    %622 = vector.shape_cast %621 : vector<1x128x512xf32> to vector<128x512xf32>
    %cst_284 = arith.constant dense<0.000000e+00> : vector<1x512xf32>
    %623 = tpu.matmul %617, %622, %cst_284 {dimension_numbers = #tpu.dot_dimension_numbers<[1], [0], [0], [1], [0, 0, 1, 1], [], []>} : vector<1x128xf32>, vector<128x512xf32>, vector<1x512xf32> -> vector<1x512xf32>
    %624 = arith.addf %620, %623 : vector<1x512xf32>
    %c2_285 = arith.constant 2 : index
    %c0_286 = arith.constant 0 : index
    %c0_287 = arith.constant 0 : index
    %625 = vector.load %arg3[%c2_285, %c0_286, %c0_287] : memref<3x1x512xf32, #tpu.memory_space<vmem>>, vector<1x1x512xf32>
    %626 = vector.shape_cast %625 : vector<1x1x512xf32> to vector<1x512xf32>
    %627 = arith.addf %624, %626 : vector<1x512xf32>
    %628 = vector.extract_strided_slice %627 {offsets = [0, 0], sizes = [1, 384], strides = [1, 1]} : vector<1x512xf32> to vector<1x384xf32>
    %cst_288 = arith.constant 5.000000e-01 : f32
    %629 = vector.broadcast %cst_288 : f32 to vector<1x384xf32>
    %630 = arith.mulf %629, %628 : vector<1x384xf32>
    %631 = math.tanh %630 : vector<1x384xf32>
    %cst_289 = arith.constant 5.000000e-01 : f32
    %632 = vector.broadcast %cst_289 : f32 to vector<1x384xf32>
    %633 = arith.mulf %632, %631 : vector<1x384xf32>
    %cst_290 = arith.constant 5.000000e-01 : f32
    %634 = vector.broadcast %cst_290 : f32 to vector<1x384xf32>
    %635 = arith.addf %633, %634 : vector<1x384xf32>
    %636 = vector.extract_strided_slice %627 {offsets = [0, 384], sizes = [1, 128], strides = [1, 1]} : vector<1x512xf32> to vector<1x128xf32>
    %637 = math.tanh %636 : vector<1x128xf32>
    %638 = vector.extract_strided_slice %635 {offsets = [0, 0], sizes = [1, 128], strides = [1, 1]} : vector<1x384xf32> to vector<1x128xf32>
    %639 = vector.extract_strided_slice %635 {offsets = [0, 128], sizes = [1, 128], strides = [1, 1]} : vector<1x384xf32> to vector<1x128xf32>
    %640 = vector.extract_strided_slice %635 {offsets = [0, 256], sizes = [1, 128], strides = [1, 1]} : vector<1x384xf32> to vector<1x128xf32>
    %641 = arith.mulf %639, %615 : vector<1x128xf32>
    %642 = arith.mulf %638, %637 : vector<1x128xf32>
    %643 = arith.addf %641, %642 : vector<1x128xf32>
    %644 = math.tanh %643 : vector<1x128xf32>
    %645 = arith.mulf %640, %644 : vector<1x128xf32>
    %c0_291 = arith.constant 0 : index
    %c0_292 = arith.constant 0 : index
    %646 = vector.load %arg4[%c0_291, %c0_292] : memref<1x128xf32, #tpu.memory_space<vmem>>, vector<1x128xf32>
    %647 = arith.mulf %645, %646 : vector<1x128xf32>
    %cst_293 = arith.constant dense<0.000000e+00> : vector<1xf32>
    %648 = vector.multi_reduction <add>, %647, %cst_293 [1] : vector<1x128xf32> to vector<1xf32>
    %649 = vector.shape_cast %648 : vector<1xf32> to vector<1x1xf32>
    %c0_294 = arith.constant 0 : index
    %c0_295 = arith.constant 0 : index
    %650 = vector.load %arg5[%c0_294, %c0_295] : memref<1x1xf32, #tpu.memory_space<vmem>>, vector<1x1xf32>
    %651 = arith.addf %649, %650 : vector<1x1xf32>
    %c0_296 = arith.constant 0 : index
    %c0_297 = arith.constant 0 : index
    %652 = vector.load %arg6[%c0_296, %c0_297] : memref<1x1xf32, #tpu.memory_space<vmem>>, vector<1x1xf32>
    tpu.vector_store %arg6[%c0_296, %c0_297], %651 {strides = array<i32>} : memref<1x1xf32, #tpu.memory_space<vmem>>, vector<1x1xf32>,
    return
  }
}

</mosaic_0001>

<bundles_post_ra>
// kernel: tpu_custom_call.1
= control target key start
LH: loop header
LB: loop body
LE: loop exit
PB: predicated region body
PF: predicated region fallthrough
CT: control target
= control target key end

     0   :  { %s12078_s0 = inlined_call_operand.hbm [shape: f32[8,128], index: 0, kind: input, shape index: {}]   ;;  %s12079_s1 = inlined_call_operand.hbm [shape: f32[3,128,512], index: 1, kind: input, shape index: {}]   ;;  %s12080_s2 = inlined_call_operand.hbm [shape: f32[3,128,512], index: 2, kind: input, shape index: {}]   ;;  %s12081_s3 = inlined_call_operand.vmem [shape: f32[3,1,512], index: 3, kind: input, shape index: {}]   ;;  %s12082_s4 = inlined_call_operand.vmem [shape: f32[1,128], index: 4, kind: input, shape index: {}]   ;;  %s12083_s5 = inlined_call_operand.<no memory space> [shape: f32[1,1], index: 5, kind: input, shape index: {}]   ;;  %s12084_s6 = inlined_call_operand.hbm [shape: f32[1,1], index: 6, kind: output, shape index: {}]  }
   0x1   :  { %v11_v0 = vstv %s12083_s5 }
   0x2   :  { %12 = vst [vmem:[#allocation2] sm:$0x1] %v11_v0 }
   0x3   :  { %13 = vsyncpa [#allocation4], 0 }
   0x4   :  { %14 = vsyncpa [#allocation7], 0 }
   0x5   :  { %15 = vsyncpa [#allocation5], 0  ;;  %s9957_s23 = smov [#allocation6]   ;;  %s9863_s27 = scalar_lea.hbm %s12079_s1, 24576 }
   0x6   :  { %s31_s24 = sshll.u32 %s9957_s23, 4  ;;  %p9864_p0 = scmp.ne.s32.totalorder %s12079_s1, %s9863_s27  ;;  %s32_s24 = int_to_ptr.vmem [resolvable:$true] %s31_s24 }
   0x7   :  { %p9867_p1 = scmp.lt.u32.totalorder %s9863_s27, %s12079_s1 }
   0x9   :  { %p9869_p2 = pnand %p9867_p1, %p9864_p0 }
   0xb   :  { %9872 = shalt.err (!%p9869_p2)
}
   0xc   :  { %s9873_s5 = scalar_lea.vmem %s32_s24, 24576  ;;  %p9878_p4 = scmp.lt.s32.totalorder %s32_s24, %s32_s24 }
   0xd   :  { %p9874_p3 = scmp.ne.s32.totalorder %s32_s24, %s9873_s5  ;;  %p9879_p5 = scmp.lt.s32.totalorder %s9873_s5, %s9873_s5 }
   0xf   :  { %p9880_p6 = por %p9879_p5, %p9878_p4 }
  0x11   :  { %p9881_p7 = pnand %p9880_p6, %p9874_p3 }
  0x13   :  { %9884 = shalt.err (!%p9881_p7)
}
  0x14   :  { %s9958_s8 = smov 512   ;;  %s9959_s9 = smov 32  }
  0x15   :  { %37 = dma.hbm_to_vmem [thread:$0]  %s12079_s1, 24576, %s32_s24, [#allocation7], %s9958_s8, %s9958_s8, %s9959_s9  }
  0x16   :  { %s9960_s12 = smov [#allocation3]   ;;  %s9961_s14 = smov [#allocation8]  }
  0x17   :  { %s22_s13 = sshll.u32 %s9960_s12, 4  ;;  %s43_s15 = sshll.u32 %s9961_s14, 4  ;;  %s23_s13 = int_to_ptr.vmem [resolvable:$true] %s22_s13  ;;  %s44_s15 = int_to_ptr.vmem [resolvable:$true] %s43_s15 }
  0x18   :  { %s9885_s18 = scalar_lea.hbm %s12078_s0, 128 }
  0x19   :  { %p9886_p8 = scmp.ne.s32.totalorder %s12078_s0, %s9885_s18  ;;  %p9889_p9 = scmp.lt.u32.totalorder %s9885_s18, %s12078_s0 }
  0x1b   :  { %p9891_p10 = pnand %p9889_p9, %p9886_p8 }
  0x1d   :  { %9894 = shalt.err (!%p9891_p10)
}
  0x1e   :  { %s9895_s1 = scalar_lea.vmem %s23_s13, 128  ;;  %p9900_p12 = scmp.lt.s32.totalorder %s23_s13, %s23_s13 }
  0x1f   :  { %p9896_p11 = scmp.ne.s32.totalorder %s23_s13, %s9895_s1  ;;  %p9901_p13 = scmp.lt.s32.totalorder %s9895_s1, %s9895_s1 }
  0x21   :  { %p9902_p0 = por %p9901_p13, %p9900_p12 }
  0x23   :  { %p9903_p1 = pnand %p9902_p0, %p9896_p11 }
  0x25   :  { %9906 = shalt.err (!%p9903_p1)
}
  0x26   :  { %25 = dma.hbm_to_vmem [thread:$0]  %s12078_s0, 128, %s23_s13, [#allocation4]  }
  0x27   :  { %s9907_s27 = scalar_lea.hbm %s12080_s2, 24576 }
  0x28   :  { %p9908_p2 = scmp.ne.s32.totalorder %s12080_s2, %s9907_s27  ;;  %p9911_p3 = scmp.lt.u32.totalorder %s9907_s27, %s12080_s2 }
  0x2a   :  { %p9913_p4 = pnand %p9911_p3, %p9908_p2 }
  0x2c   :  { %9916 = shalt.err (!%p9913_p4)
}
  0x2d   :  { %s9917_s5 = scalar_lea.vmem %s44_s15, 24576  ;;  %p9922_p6 = scmp.lt.s32.totalorder %s44_s15, %s44_s15 }
  0x2e   :  { %p9918_p5 = scmp.ne.s32.totalorder %s44_s15, %s9917_s5  ;;  %p9923_p7 = scmp.lt.s32.totalorder %s9917_s5, %s9917_s5 }
  0x30   :  { %p9924_p8 = por %p9923_p7, %p9922_p6 }
  0x32   :  { %p9925_p9 = pnand %p9924_p8, %p9918_p5 }
  0x34   :  { %9928 = shalt.err (!%p9925_p9)
}
  0x35   :  { %49 = dma.hbm_to_vmem [thread:$0]  %s12080_s2, 24576, %s44_s15, [#allocation7], %s9958_s8, %s9958_s8, %s9959_s9  }
  0x36   :  { %9951 = dma.done.wait [#allocation4], 128  }
  0x37   :  { %9952 = vsyncadd [#allocation4], 4294967168 }
  0x38   :  { %9953 = dma.done.wait [#allocation7], 49152  }
  0x39   :  { %9954 = vsyncadd [#allocation7], 4294918144  ;;  %v12085_v1 = vmov 0.0   ;;  %v67_v2 = vld [vmem:[#allocation6 + $0x8] sm:$0xff]  ;;  %v69_v4 = vld [vmem:[#allocation6 + $0x18] sm:$0xff]  ;;  %vm6902_vm0 = vcmask 1040384  }
  0x3a   :  { %216 = vmatprep.mubr.f32.mxu0 %v12085_v1  ;;  %287 = vmatprep.mubr.f32.mxu1 %v12085_v1  ;;  %v71_v3 = vld [vmem:[#allocation6 + $0x28] sm:$0xff]  ;;  %v73_v6 = vld [vmem:[#allocation6 + $0x38] sm:$0xff]  ;;  %v66_v7 = vld [vmem:[#allocation6] sm:$0xff]  ;;  %s9963_s15 = smov [#allocation9]   ;;  %vm6908_vm1 = vcmask 0  }
  0x3b   :  { %v6928_v5 = vpack.c.bf16 %v71_v3, %v67_v2  ;;  %v70_v8 = vld [vmem:[#allocation6 + $0x20] sm:$0xff]  ;;  %v6960_v9 = vpack.c.bf16 %v73_v6, %v69_v4  ;;  %v68_v11 = vld [vmem:[#allocation6 + $0x10] sm:$0xff]  ;;  %v75_v13 = vld [vmem:[#allocation6 + $0x48] sm:$0xff]  ;;  %s6916_s16 = sshll.u32 %s9963_s15, 4  ;;  %s6917_s16 = int_to_ptr.vmem [resolvable:$true] %s6916_s16 }
  0x3c   :  { %v6930_v10 = vpack.c.bf16 %v70_v8, %v66_v7  ;;  %v72_v12 = vld [vmem:[#allocation6 + $0x30] sm:$0xff]  ;;  %v79_v15 = vld [vmem:[#allocation6 + $0x68] sm:$0xff]  ;;  %v77_v16 = vld [vmem:[#allocation6 + $0x58] sm:$0xff]  ;;  %s9929_s17 = scalar_lea.vmem %s6917_s16, 16  ;;  %s9933_s18 = scalar_lea.vmem %s6917_s16, 32 }
  0x3d   :  { %6929 = vmatprep.subr.bf16.mxu0 %v6928_v5  ;;  %v6962_v14 = vpack.c.bf16 %v72_v12, %v68_v11  ;;  %v81_v17 = vld [vmem:[#allocation6 + $0x78] sm:$0xff]  ;;  %6961 = vmatprep.subr.bf16.mxu1 %v6960_v9  ;;  %v6932_v18 = vpack.c.bf16 %v79_v15, %v75_v13  ;;  %v74_v20 = vld [vmem:[#allocation6 + $0x40] sm:$0xff]  ;;  %v76_v22 = vld [vmem:[#allocation6 + $0x50] sm:$0xff]  ;;  %p9930_p10 = scmp.ne.s32.totalorder %s6917_s16, %s9929_s17  ;;  %p9934_p11 = scmp.lt.s32.totalorder %s6917_s16, %s6917_s16 }
  0x3e   :  { %6931 = vmatpush1.bf16.msra.mxu0 %v6930_v10  ;;  %v6964_v19 = vpack.c.bf16 %v81_v17, %v77_v16  ;;  %v78_v21 = vld [vmem:[#allocation6 + $0x60] sm:$0xff]  ;;  %v80_v24 = vld [vmem:[#allocation6 + $0x70] sm:$0xff]  ;;  %v83_v25 = vld [vmem:[#allocation6 + $0x88] sm:$0xff]  ;;  %p9935_p12 = scmp.lt.s32.totalorder %s9933_s18, %s9929_s17 }
  0x3f   :  { %6963 = vmatpush1.bf16.msra.mxu1 %v6962_v14  ;;  %v6934_v23 = vpack.c.bf16 %v78_v21, %v74_v20  ;;  %v87_v26 = vld [vmem:[#allocation6 + $0xa8] sm:$0xff]  ;;  %6933 = vmatprep.subr.bf16.mxu0 %v6932_v18  ;;  %v6966_v27 = vpack.c.bf16 %v80_v24, %v76_v22  ;;  %v85_v29 = vld [vmem:[#allocation6 + $0x98] sm:$0xff]  ;;  %v82_v31 = vld [vmem:[#allocation6 + $0x80] sm:$0xff] }
  0x40   :  { %6965 = vmatprep.subr.bf16.mxu1 %v6964_v19  ;;  %v6936_v28 = vpack.c.bf16 %v87_v26, %v83_v25  ;;  %v89_v30 = vld [vmem:[#allocation6 + $0xb8] sm:$0xff]  ;;  %v86_v33 = vld [vmem:[#allocation6 + $0xa0] sm:$0xff]  ;;  %v84_v34 = vld [vmem:[#allocation6 + $0x90] sm:$0xff]  ;;  %p9936_p13 = por %p9935_p12, %p9934_p11 }
  0x41   :  { %v6968_v32 = vpack.c.bf16 %v89_v30, %v85_v29  ;;  %v88_v35 = vld [vmem:[#allocation6 + $0xb0] sm:$0xff]  ;;  %v6938_v36 = vpack.c.bf16 %v86_v33, %v82_v31  ;;  %v91_v37 = vld [vmem:[#allocation6 + $0xc8] sm:$0xff]  ;;  %v93_v39 = vld [vmem:[#allocation6 + $0xd8] sm:$0xff] }
  0x42   :  { %6935 = vmatpush1.bf16.msra.mxu0 %v6934_v23  ;;  %v95_v38 = vld [vmem:[#allocation6 + $0xe8] sm:$0xff]  ;;  %v6970_v40 = vpack.c.bf16 %v88_v35, %v84_v34  ;;  %v97_v42 = vld [vmem:[#allocation6 + $0xf8] sm:$0xff]  ;;  %v90_v43 = vld [vmem:[#allocation6 + $0xc0] sm:$0xff]  ;;  %p9937_p0 = pnand %p9936_p13, %p9930_p10 }
  0x43   :  { %6967 = vmatpush1.bf16.msra.mxu1 %v6966_v27  ;;  %6937 = vmatprep.subr.bf16.mxu0 %v6936_v28  ;;  %v6940_v41 = vpack.c.bf16 %v95_v38, %v91_v37  ;;  %v94_v44 = vld [vmem:[#allocation6 + $0xe0] sm:$0xff]  ;;  %v6972_v45 = vpack.c.bf16 %v97_v42, %v93_v39  ;;  %v92_v46 = vld [vmem:[#allocation6 + $0xd0] sm:$0xff]  ;;  %v99_v48 = vld [vmem:[#allocation6 + $0x108] sm:$0xff] }
  0x44   :  { %6969 = vmatprep.subr.bf16.mxu1 %v6968_v32  ;;  %v96_v47 = vld [vmem:[#allocation6 + $0xf0] sm:$0xff]  ;;  %v103_v49 = vld [vmem:[#allocation6 + $0x128] sm:$0xff]  ;;  %v101_v50 = vld [vmem:[#allocation6 + $0x118] sm:$0xff]  ;;  %v6942_v52 = vpack.c.bf16 %v94_v44, %v90_v43 }
  0x45   :  { %v105_v51 = vld [vmem:[#allocation6 + $0x138] sm:$0xff]  ;;  %v6974_v53 = vpack.c.bf16 %v96_v47, %v92_v46  ;;  %v6944_v54 = vpack.c.bf16 %v103_v49, %v99_v48  ;;  %v98_v55 = vld [vmem:[#allocation6 + $0x100] sm:$0xff]  ;;  %v100_v57 = vld [vmem:[#allocation6 + $0x110] sm:$0xff] }
  0x46   :  { %6939 = vmatpush1.bf16.msra.mxu0 %v6938_v36  ;;  %v102_v56 = vld [vmem:[#allocation6 + $0x120] sm:$0xff]  ;;  %v6976_v58 = vpack.c.bf16 %v105_v51, %v101_v50  ;;  %v104_v59 = vld [vmem:[#allocation6 + $0x130] sm:$0xff]  ;;  %v107_v60 = vld [vmem:[#allocation6 + $0x148] sm:$0xff] }
  0x47   :  { %6971 = vmatpush1.bf16.msra.mxu1 %v6970_v40  ;;  %6941 = vmatprep.subr.bf16.mxu0 %v6940_v41  ;;  %v111_v61 = vld [vmem:[#allocation6 + $0x168] sm:$0xff]  ;;  %v109_v62 = vld [vmem:[#allocation6 + $0x158] sm:$0xff]  ;;  %v6946_v0 = vpack.c.bf16 %v102_v56, %v98_v55  ;;  %v6978_v2 = vpack.c.bf16 %v104_v59, %v100_v57  ;;  %v106_v4 = vld [vmem:[#allocation6 + $0x140] sm:$0xff] }
  0x48   :  { %6973 = vmatprep.subr.bf16.mxu1 %v6972_v45  ;;  %v113_v63 = vld [vmem:[#allocation6 + $0x178] sm:$0xff]  ;;  %v6948_v3 = vpack.c.bf16 %v111_v61, %v107_v60  ;;  %v110_v5 = vld [vmem:[#allocation6 + $0x160] sm:$0xff]  ;;  %v108_v6 = vld [vmem:[#allocation6 + $0x150] sm:$0xff] }
  0x49   :  { %v6980_v7 = vpack.c.bf16 %v113_v63, %v109_v62  ;;  %v112_v8 = vld [vmem:[#allocation6 + $0x170] sm:$0xff]  ;;  %v115_v9 = vld [vmem:[#allocation6 + $0x188] sm:$0xff]  ;;  %v117_v11 = vld [vmem:[#allocation6 + $0x198] sm:$0xff]  ;;  %v6950_v13 = vpack.c.bf16 %v110_v5, %v106_v4 }
  0x4a   :  { %6943 = vmatpush1.bf16.msra.mxu0 %v6942_v52  ;;  %v119_v10 = vld [vmem:[#allocation6 + $0x1a8] sm:$0xff]  ;;  %v121_v12 = vld [vmem:[#allocation6 + $0x1b8] sm:$0xff]  ;;  %v6982_v14 = vpack.c.bf16 %v112_v8, %v108_v6  ;;  %v114_v16 = vld [vmem:[#allocation6 + $0x180] sm:$0xff] }
  0x4b   :  { %6975 = vmatpush1.bf16.msra.mxu1 %v6974_v53  ;;  %6945 = vmatprep.subr.bf16.mxu0 %v6944_v54  ;;  %v6952_v15 = vpack.c.bf16 %v119_v10, %v115_v9  ;;  %v118_v17 = vld [vmem:[#allocation6 + $0x1a0] sm:$0xff]  ;;  %v116_v18 = vld [vmem:[#allocation6 + $0x190] sm:$0xff]  ;;  %v6984_v19 = vpack.c.bf16 %v121_v12, %v117_v11  ;;  %v123_v21 = vld [vmem:[#allocation6 + $0x1c8] sm:$0xff] }
  0x4c   :  { %6977 = vmatprep.subr.bf16.mxu1 %v6976_v58  ;;  %v120_v20 = vld [vmem:[#allocation6 + $0x1b0] sm:$0xff]  ;;  %v127_v22 = vld [vmem:[#allocation6 + $0x1e8] sm:$0xff]  ;;  %v125_v23 = vld [vmem:[#allocation6 + $0x1d8] sm:$0xff]  ;;  %v6954_v25 = vpack.c.bf16 %v118_v17, %v114_v16 }
  0x4d   :  { %v129_v24 = vld [vmem:[#allocation6 + $0x1f8] sm:$0xff]  ;;  %v6986_v26 = vpack.c.bf16 %v120_v20, %v116_v18  ;;  %v6956_v27 = vpack.c.bf16 %v127_v22, %v123_v21  ;;  %v122_v28 = vld [vmem:[#allocation6 + $0x1c0] sm:$0xff]  ;;  %v124_v30 = vld [vmem:[#allocation6 + $0x1d0] sm:$0xff] }
  0x4e   :  { %6947 = vmatpush1.bf16.msra.mxu0 %v6946_v0  ;;  %v126_v29 = vld [vmem:[#allocation6 + $0x1e0] sm:$0xff]  ;;  %v6988_v31 = vpack.c.bf16 %v129_v24, %v125_v23  ;;  %v128_v32 = vld [vmem:[#allocation6 + $0x1f0] sm:$0xff]  ;;  %v295_v33 = vld [vmem:[#allocation8 + $0x8] sm:$0xff] }
  0x4f   :  { %6979 = vmatpush1.bf16.msra.mxu1 %v6978_v2  ;;  %6949 = vmatprep.subr.bf16.mxu0 %v6948_v3  ;;  %v299_v34 = vld [vmem:[#allocation8 + $0x28] sm:$0xff]  ;;  %v297_v35 = vld [vmem:[#allocation8 + $0x18] sm:$0xff]  ;;  %v6958_v37 = vpack.c.bf16 %v126_v29, %v122_v28  ;;  %v6990_v38 = vpack.c.bf16 %v128_v32, %v124_v30  ;;  %v294_v40 = vld [vmem:[#allocation8] sm:$0xff] }
  0x50   :  { %6981 = vmatprep.subr.bf16.mxu1 %v6980_v7  ;;  %v301_v36 = vld [vmem:[#allocation8 + $0x38] sm:$0xff]  ;;  %v10046_v39 = vpack.c.bf16 %v299_v34, %v295_v33  ;;  %v298_v41 = vld [vmem:[#allocation8 + $0x20] sm:$0xff]  ;;  %v296_v42 = vld [vmem:[#allocation8 + $0x10] sm:$0xff] }
  0x51   :  { %v10048_v43 = vpack.c.bf16 %v301_v36, %v297_v35  ;;  %v300_v44 = vld [vmem:[#allocation8 + $0x30] sm:$0xff]  ;;  %v303_v45 = vld [vmem:[#allocation8 + $0x48] sm:$0xff]  ;;  %v305_v47 = vld [vmem:[#allocation8 + $0x58] sm:$0xff]  ;;  %v10050_v50 = vpack.c.bf16 %v298_v41, %v294_v40 }
  0x52   :  { %6951 = vmatpush1.bf16.msra.mxu0 %v6950_v13  ;;  %12495 = vst [vmem:[#allocation13_spill] sm:$0xff] %v10046_v39  ;;  %v307_v46 = vld [vmem:[#allocation8 + $0x68] sm:$0xff]  ;;  %v309_v48 = vld [vmem:[#allocation8 + $0x78] sm:$0xff]  ;;  %v10053_v51 = vpack.c.bf16 %v300_v44, %v296_v42  ;;  %v302_v53 = vld [vmem:[#allocation8 + $0x40] sm:$0xff] }
  0x53   :  { %6983 = vmatpush1.bf16.msra.mxu1 %v6982_v14  ;;  %6953 = vmatprep.subr.bf16.mxu0 %v6952_v15  ;;  %12496 = vst [vmem:[#allocation14_spill] sm:$0xff] %v10048_v43  ;;  %v65_v49 = vld [vmem:[#allocation3] sm:$0xff]  ;;  %12497 = vst [vmem:[#allocation15_spill] sm:$0xff] %v10050_v50  ;;  %v10055_v52 = vpack.c.bf16 %v307_v46, %v303_v45  ;;  %v306_v54 = vld [vmem:[#allocation8 + $0x60] sm:$0xff]  ;;  %v10058_v56 = vpack.c.bf16 %v309_v48, %v305_v47 }
  0x54   :  { %6985 = vmatprep.subr.bf16.mxu1 %v6984_v19  ;;  %12498 = vst [vmem:[#allocation16_spill] sm:$0xff] %v10053_v51  ;;  %v304_v55 = vld [vmem:[#allocation8 + $0x50] sm:$0xff]  ;;  %v311_v58 = vld [vmem:[#allocation8 + $0x88] sm:$0xff]  ;;  %v313_v60 = vld [vmem:[#allocation8 + $0x98] sm:$0xff]  ;;  %v10061_v62 = vpack.c.bf16 %v306_v54, %v302_v53 }
  0x55   :  { %12499 = vst [vmem:[#allocation17_spill] sm:$0xff] %v10055_v52  ;;  %12500 = vst [vmem:[#allocation18_spill] sm:$0xff] %v10058_v56  ;;  %v308_v57 = vld [vmem:[#allocation8 + $0x70] sm:$0xff]  ;;  %v315_v59 = vld [vmem:[#allocation8 + $0xa8] sm:$0xff] }
  0x56   :  { %6955 = vmatpush1.bf16.msra.mxu0 %v6954_v25  ;;  %v317_v61 = vld [vmem:[#allocation8 + $0xb8] sm:$0xff]  ;;  %12501 = vst [vmem:[#allocation19_spill] sm:$0xff] %v10061_v62  ;;  %v10065_v63 = vpack.c.bf16 %v308_v57, %v304_v55  ;;  %v10067_v0 = vpack.c.bf16 %v315_v59, %v311_v58  ;;  %v310_v2 = vld [vmem:[#allocation8 + $0x80] sm:$0xff]  ;;  %v312_v4 = vld [vmem:[#allocation8 + $0x90] sm:$0xff] }
  0x57   :  { %6987 = vmatpush1.bf16.msra.mxu1 %v6986_v26  ;;  %6957 = vmatprep.subr.bf16.mxu0 %v6956_v27  ;;  %v314_v3 = vld [vmem:[#allocation8 + $0xa0] sm:$0xff]  ;;  %v10070_v5 = vpack.c.bf16 %v317_v61, %v313_v60  ;;  %v316_v6 = vld [vmem:[#allocation8 + $0xb0] sm:$0xff]  ;;  %v319_v7 = vld [vmem:[#allocation8 + $0xc8] sm:$0xff] }
  0x58   :  { %6989 = vmatprep.subr.bf16.mxu1 %v6988_v31  ;;  %12502 = vst [vmem:[#allocation20_spill] sm:$0xff] %v10065_v63  ;;  %12503 = vst [vmem:[#allocation21_spill] sm:$0xff] %v10067_v0  ;;  %v323_v8 = vld [vmem:[#allocation8 + $0xe8] sm:$0xff]  ;;  %v321_v9 = vld [vmem:[#allocation8 + $0xd8] sm:$0xff]  ;;  %v10075_v11 = vpack.c.bf16 %v314_v3, %v310_v2  ;;  %v10079_v12 = vpack.c.bf16 %v316_v6, %v312_v4 }
  0x59   :  { %12504 = vst [vmem:[#allocation22_spill] sm:$0xff] %v10070_v5  ;;  %v325_v10 = vld [vmem:[#allocation8 + $0xf8] sm:$0xff]  ;;  %v10081_v13 = vpack.c.bf16 %v323_v8, %v319_v7  ;;  %v318_v14 = vld [vmem:[#allocation8 + $0xc0] sm:$0xff]  ;;  %v320_v16 = vld [vmem:[#allocation8 + $0xd0] sm:$0xff] }
  0x5a   :  { %6959 = vmatpush1.bf16.msra.mxu0 %v6958_v37  ;;  %12505 = vst [vmem:[#allocation23_spill] sm:$0xff] %v10075_v11  ;;  %12506 = vst [vmem:[#allocation24_spill] sm:$0xff] %v10079_v12  ;;  %v322_v15 = vld [vmem:[#allocation8 + $0xe0] sm:$0xff]  ;;  %v10084_v17 = vpack.c.bf16 %v325_v10, %v321_v9  ;;  %v324_v18 = vld [vmem:[#allocation8 + $0xf0] sm:$0xff] }
  0x5b   :  { %6991 = vmatpush1.bf16.msra.mxu1 %v6990_v38  ;;  %6993 = vmatprep.subr.bf16.mxu0 %v10046_v39  ;;  %12507 = vst [vmem:[#allocation25_spill] sm:$0xff] %v10081_v13  ;;  %v327_v19 = vld [vmem:[#allocation8 + $0x108] sm:$0xff]  ;;  %v329_v21 = vld [vmem:[#allocation8 + $0x118] sm:$0xff]  ;;  %v10087_v23 = vpack.c.bf16 %v322_v15, %v318_v14  ;;  %v10091_v24 = vpack.c.bf16 %v324_v18, %v320_v16  ;;  %v326_v26 = vld [vmem:[#allocation8 + $0x100] sm:$0xff] }
  0x5c   :  { %7025 = vmatprep.subr.bf16.mxu1 %v10048_v43  ;;  %12508 = vst [vmem:[#allocation26_spill] sm:$0xff] %v10084_v17  ;;  %v331_v20 = vld [vmem:[#allocation8 + $0x128] sm:$0xff]  ;;  %v333_v22 = vld [vmem:[#allocation8 + $0x138] sm:$0xff]  ;;  %v330_v27 = vld [vmem:[#allocation8 + $0x120] sm:$0xff] }
  0x5d   :  { %217 = vmatmul.mubr.f32.vlgmr.msra.gmra.mrb[0].mxu0 %v65_v49  ;;  %12509 = vst [vmem:[#allocation27_spill] sm:$0xff] %v10087_v23  ;;  %12510 = vst [vmem:[#allocation28_spill] sm:$0xff] %v10091_v24  ;;  %v10093_v25 = vpack.c.bf16 %v331_v20, %v327_v19  ;;  %v328_v28 = vld [vmem:[#allocation8 + $0x110] sm:$0xff]  ;;  %v10096_v29 = vpack.c.bf16 %v333_v22, %v329_v21  ;;  %v335_v31 = vld [vmem:[#allocation8 + $0x148] sm:$0xff]  ;;  %v10099_v35 = vpack.c.bf16 %v330_v27, %v326_v26 }
  0x5e   :  { %288 = vmatmul.mubr.f32.vlgmr.msra.gmra.mrb[0].mxu1 %v65_v49  ;;  %6995 = vmatpush1.bf16.msra.mxu0 %v10050_v50  ;;  %v332_v30 = vld [vmem:[#allocation8 + $0x130] sm:$0xff]  ;;  %v339_v32 = vld [vmem:[#allocation8 + $0x168] sm:$0xff]  ;;  %v337_v33 = vld [vmem:[#allocation8 + $0x158] sm:$0xff] }
  0x5f   :  { %7027 = vmatpush1.bf16.msra.mxu1 %v10053_v51  ;;  %6997 = vmatprep.subr.bf16.mxu0 %v10055_v52  ;;  %12511 = vst [vmem:[#allocation29_spill] sm:$0xff] %v10093_v25  ;;  %12512 = vst [vmem:[#allocation30_spill] sm:$0xff] %v10096_v29  ;;  %v341_v34 = vld [vmem:[#allocation8 + $0x178] sm:$0xff]  ;;  %v10103_v36 = vpack.c.bf16 %v332_v30, %v328_v28  ;;  %v10105_v37 = vpack.c.bf16 %v339_v32, %v335_v31  ;;  %v334_v38 = vld [vmem:[#allocation8 + $0x140] sm:$0xff] }
  0x60   :  { %7029 = vmatprep.subr.bf16.mxu1 %v10058_v56  ;;  %422 = vmatprep.mubr.f32.mxu0 %v12085_v1  ;;  %12513 = vst [vmem:[#allocation31_spill] sm:$0xff] %v10099_v35  ;;  %v338_v40 = vld [vmem:[#allocation8 + $0x160] sm:$0xff]  ;;  %v336_v41 = vld [vmem:[#allocation8 + $0x150] sm:$0xff]  ;;  %v10108_v42 = vpack.c.bf16 %v341_v34, %v337_v33  ;;  %v343_v45 = vld [vmem:[#allocation8 + $0x188] sm:$0xff]  ;;  %v132_v34 = vlaneseq }
  0x61   :  { %493 = vmatprep.mubr.f32.mxu1 %v12085_v1  ;;  %12514 = vst [vmem:[#allocation32_spill] sm:$0xff] %v10103_v36  ;;  %12515 = vst [vmem:[#allocation33_spill] sm:$0xff] %v10105_v37  ;;  %v340_v44 = vld [vmem:[#allocation8 + $0x170] sm:$0xff]  ;;  %v347_v46 = vld [vmem:[#allocation8 + $0x1a8] sm:$0xff]  ;;  %v10111_v49 = vpack.c.bf16 %v338_v40, %v334_v38 }
  0x62   :  { %6999 = vmatpush1.bf16.msra.mxu0 %v10061_v62  ;;  %12516 = vst [vmem:[#allocation34_spill] sm:$0xff] %v10108_v42  ;;  %v345_v47 = vld [vmem:[#allocation8 + $0x198] sm:$0xff]  ;;  %v10115_v53 = vpack.c.bf16 %v340_v44, %v336_v41  ;;  %v10117_v54 = vpack.c.bf16 %v347_v46, %v343_v45  ;;  %v342_v55 = vld [vmem:[#allocation8 + $0x180] sm:$0xff]  ;;  %v344_v58 = vld [vmem:[#allocation8 + $0x190] sm:$0xff]  ;;  %v133_v38 = vshrl.u32 %v132_v34, 7 }
  0x63   :  { %7031 = vmatpush1.bf16.msra.mxu1 %v10065_v63  ;;  %7001 = vmatprep.subr.bf16.mxu0 %v10067_v0  ;;  %v349_v48 = vld [vmem:[#allocation8 + $0x1b8] sm:$0xff]  ;;  %12517 = vst [vmem:[#allocation35_spill] sm:$0xff] %v10111_v49  ;;  %v346_v57 = vld [vmem:[#allocation8 + $0x1a0] sm:$0xff]  ;;  %v348_v60 = vld [vmem:[#allocation8 + $0x1b0] sm:$0xff] }
  0x64   :  { %7033 = vmatprep.subr.bf16.mxu1 %v10070_v5  ;;  %12518 = vst [vmem:[#allocation36_spill] sm:$0xff] %v10115_v53  ;;  %12519 = vst [vmem:[#allocation37_spill] sm:$0xff] %v10117_v54  ;;  %v10120_v59 = vpack.c.bf16 %v349_v48, %v345_v47  ;;  %v351_v61 = vld [vmem:[#allocation8 + $0x1c8] sm:$0xff]  ;;  %v353_v3 = vld [vmem:[#allocation8 + $0x1d8] sm:$0xff]  ;;  %v10123_v6 = vpack.c.bf16 %v346_v57, %v342_v55  ;;  %v10127_v7 = vpack.c.bf16 %v348_v60, %v344_v58 }
  0x65   :  { %v355_v2 = vld [vmem:[#allocation8 + $0x1e8] sm:$0xff]  ;;  %v357_v4 = vld [vmem:[#allocation8 + $0x1f8] sm:$0xff]  ;;  %v350_v9 = vld [vmem:[#allocation8 + $0x1c0] sm:$0xff]  ;;  %v10186_v40 = vsub.s32 0, %v133_v38  ;;  %v10191_v44 = vsub.s32 1, %v133_v38  ;;  %v10193_v45 = vsub.s32 2, %v133_v38 }
  0x66   :  { %7003 = vmatpush1.bf16.msra.mxu0 %v10075_v11  ;;  %12520 = vst [vmem:[#allocation38_spill] sm:$0xff] %v10120_v59  ;;  %12521 = vst [vmem:[#allocation39_spill] sm:$0xff] %v10123_v6  ;;  %v10129_v8 = vpack.c.bf16 %v355_v2, %v351_v61  ;;  %v354_v10 = vld [vmem:[#allocation8 + $0x1e0] sm:$0xff]  ;;  %v10132_v14 = vpack.c.bf16 %v357_v4, %v353_v3  ;;  %v352_v15 = vld [vmem:[#allocation8 + $0x1d0] sm:$0xff]  ;;  %v10195_v46 = vsub.s32 3, %v133_v38 }
  0x67   :  { %7035 = vmatpush1.bf16.msra.mxu1 %v10079_v12  ;;  %7005 = vmatprep.subr.bf16.mxu0 %v10081_v13  ;;  %12522 = vst [vmem:[#allocation40_spill] sm:$0xff] %v10127_v7  ;;  %v356_v16 = vld [vmem:[#allocation8 + $0x1f0] sm:$0xff]  ;;  %v10135_v18 = vpack.c.bf16 %v354_v10, %v350_v9  ;;  %v757_v20 = vld [vmem:[#allocation8 + $0x208] sm:$0xff]  ;;  %v759_v22 = vld [vmem:[#allocation8 + $0x218] sm:$0xff] }
  0x68   :  { %7037 = vmatprep.subr.bf16.mxu1 %v10084_v17  ;;  %12523 = vst [vmem:[#allocation41_spill] sm:$0xff] %v10129_v8  ;;  %12524 = vst [vmem:[#allocation42_spill] sm:$0xff] %v10132_v14  ;;  %v10139_v19 = vpack.c.bf16 %v356_v16, %v352_v15  ;;  %v761_v21 = vld [vmem:[#allocation8 + $0x228] sm:$0xff]  ;;  %v763_v27 = vld [vmem:[#allocation8 + $0x238] sm:$0xff] }
  0x69   :  { %12525 = vst [vmem:[#allocation43_spill] sm:$0xff] %v10135_v18  ;;  %v10180_v26 = vpack.c.bf16 %v761_v21, %v757_v20  ;;  %v10182_v28 = vpack.c.bf16 %v763_v27, %v759_v22  ;;  %12529 = vst [vmem:[#allocation47_spill] sm:$0xff] %v10186_v40  ;;  %v130_v41 = vld [vmem:[%s12081_s3] sm:$0xf] }
  0x6a   :  { %7007 = vmatpush1.bf16.msra.mxu0 %v10087_v23  ;;  %12526 = vst [vmem:[#allocation44_spill] sm:$0xff] %v10139_v19  ;;  %12530 = vst [vmem:[#allocation48_spill] sm:$0xff] %v10191_v44  ;;  %v135_v47 = vrot.slane %v130_v41, %v10186_v40  ;;  %v139_v48 = vrot.slane %v130_v41, %v10191_v44  ;;  %v143_v55 = vrot.slane %v130_v41, %v10193_v45  ;;  %v779_v44 = vld [vmem:[#allocation8 + $0x2b8] sm:$0xff] }
  0x6b   :  { %7039 = vmatpush1.bf16.msra.mxu1 %v10091_v24  ;;  %7009 = vmatprep.subr.bf16.mxu0 %v10093_v25  ;;  %12527 = vst [vmem:[#allocation45_spill] sm:$0xff] %v10180_v26  ;;  %12528 = vst [vmem:[#allocation46_spill] sm:$0xff] %v10182_v28  ;;  %v147_v57 = vrot.slane %v130_v41, %v10195_v46  ;;  %v787_v40 = vld [vmem:[#allocation8 + $0x2f8] sm:$0xff] }
  0x6c   :  { %7041 = vmatprep.subr.bf16.mxu1 %v10096_v29  ;;  %12531 = vst [vmem:[#allocation49_spill] sm:$0xff] %v10193_v45  ;;  %12532 = vst [vmem:[#allocation50_spill] sm:$0xff] %v10195_v46  ;;  %v777_v45 = vld [vmem:[#allocation8 + $0x2a8] sm:$0xff]  ;;  %v775_v46 = vld [vmem:[#allocation8 + $0x298] sm:$0xff] }
  0x6e   :  { %7011 = vmatpush1.bf16.msra.mxu0 %v10099_v35 }
  0x6f   :  { %7043 = vmatpush1.bf16.msra.mxu1 %v10103_v36  ;;  %7013 = vmatprep.subr.bf16.mxu0 %v10105_v37 }
  0x70   :  { %7045 = vmatprep.subr.bf16.mxu1 %v10108_v42 }
  0x72   :  { %7015 = vmatpush1.bf16.msra.mxu0 %v10111_v49 }
  0x73   :  { %7047 = vmatpush1.bf16.msra.mxu1 %v10115_v53  ;;  %7017 = vmatprep.subr.bf16.mxu0 %v10117_v54 }
  0x74   :  { %7049 = vmatprep.subr.bf16.mxu1 %v10120_v59 }
  0x76   :  { %7019 = vmatpush1.bf16.msra.mxu0 %v10123_v6 }
  0x77   :  { %7051 = vmatpush1.bf16.msra.mxu1 %v10127_v7  ;;  %7021 = vmatprep.subr.bf16.mxu0 %v10129_v8 }
  0x78   :  { %7053 = vmatprep.subr.bf16.mxu1 %v10132_v14 }
  0x7a   :  { %7023 = vmatpush1.bf16.msra.mxu0 %v10135_v18 }
  0x7b   :  { %7055 = vmatpush1.bf16.msra.mxu1 %v10139_v19  ;;  %7057 = vmatprep.subr.bf16.mxu0 %v10046_v39 }
  0x7c   :  { %7089 = vmatprep.subr.bf16.mxu1 %v10048_v43 }
  0x7d   :  { %423 = vmatmul.mubr.f32.vlgmr.msra.gmra.mrb[2].mxu0 %v12085_v1 }
  0x7e   :  { %494 = vmatmul.mubr.f32.vlgmr.msra.gmra.mrb[2].mxu1 %v12085_v1  ;;  %7059 = vmatpush1.bf16.msra.mxu0 %v10050_v50 }
  0x7f   :  { %7091 = vmatpush1.bf16.msra.mxu1 %v10053_v51  ;;  %7061 = vmatprep.subr.bf16.mxu0 %v10055_v52 }
  0x80   :  { %7093 = vmatprep.subr.bf16.mxu1 %v10058_v56  ;;  %594 = vmatprep.mubr.f32.mxu0 %v12085_v1 }
  0x81   :  { %665 = vmatprep.mubr.f32.mxu1 %v12085_v1  ;;  %v773_v1 = vld [vmem:[#allocation8 + $0x288] sm:$0xff] }
  0x82   :  { %7063 = vmatpush1.bf16.msra.mxu0 %v10061_v62 }
  0x83   :  { %7095 = vmatpush1.bf16.msra.mxu1 %v10065_v63  ;;  %7065 = vmatprep.subr.bf16.mxu0 %v10067_v0 }
  0x84   :  { %7097 = vmatprep.subr.bf16.mxu1 %v10070_v5 }
  0x86   :  { %7067 = vmatpush1.bf16.msra.mxu0 %v10075_v11 }
  0x87   :  { %7099 = vmatpush1.bf16.msra.mxu1 %v10079_v12  ;;  %7069 = vmatprep.subr.bf16.mxu0 %v10081_v13 }
  0x88   :  { %7101 = vmatprep.subr.bf16.mxu1 %v10084_v17 }
  0x8a   :  { %7071 = vmatpush1.bf16.msra.mxu0 %v10087_v23 }
  0x8b   :  { %7103 = vmatpush1.bf16.msra.mxu1 %v10091_v24  ;;  %7073 = vmatprep.subr.bf16.mxu0 %v10093_v25 }
  0x8c   :  { %7105 = vmatprep.subr.bf16.mxu1 %v10096_v29 }
  0x8e   :  { %7075 = vmatpush1.bf16.msra.mxu0 %v10099_v35 }
  0x8f   :  { %7107 = vmatpush1.bf16.msra.mxu1 %v10103_v36  ;;  %7077 = vmatprep.subr.bf16.mxu0 %v10105_v37 }
  0x90   :  { %7109 = vmatprep.subr.bf16.mxu1 %v10108_v42 }
  0x92   :  { %7079 = vmatpush1.bf16.msra.mxu0 %v10111_v49 }
  0x93   :  { %7111 = vmatpush1.bf16.msra.mxu1 %v10115_v53  ;;  %7081 = vmatprep.subr.bf16.mxu0 %v10117_v54 }
  0x94   :  { %7113 = vmatprep.subr.bf16.mxu1 %v10120_v59 }
  0x96   :  { %7083 = vmatpush1.bf16.msra.mxu0 %v10123_v6 }
  0x97   :  { %7115 = vmatpush1.bf16.msra.mxu1 %v10127_v7  ;;  %7085 = vmatprep.subr.bf16.mxu0 %v10129_v8 }
  0x98   :  { %7117 = vmatprep.subr.bf16.mxu1 %v10132_v14 }
  0x9a   :  { %7087 = vmatpush1.bf16.msra.mxu0 %v10135_v18 }
  0x9b   :  { %7119 = vmatpush1.bf16.msra.mxu1 %v10139_v19  ;;  %7121 = vmatprep.subr.bf16.mxu0 %v10180_v26 }
  0x9c   :  { %7153 = vmatprep.subr.bf16.mxu1 %v10182_v28 }
 0x130   :  { %v218_v30 = vpop.f32.mrb[0].mxu0 }
 0x131   :  { %v220_v31 = vpop.f32.mrb[1].mxu0  ;;  %v289_v32 = vpop.f32.mrb[0].mxu1  ;;  %v10201_v58 = vadd.f32 %v218_v30, %v135_v47 }
 0x132   :  { %v291_v33 = vpop.f32.mrb[1].mxu1  ;;  %v10203_v60 = vadd.f32 %v220_v31, %v139_v48  ;;  %v10205_v61 = vadd.f32 %v289_v32, %v143_v55 }
 0x133   :  { %12533 = vst [vmem:[#allocation51_spill] sm:$0xff] %v10201_v58  ;;  %v10207_v3 = vadd.f32 %v291_v33, %v147_v57 }
 0x134   :  { %12534 = vst [vmem:[#allocation52_spill] sm:$0xff] %v10203_v60  ;;  %12535 = vst [vmem:[#allocation53_spill] sm:$0xff] %v10205_v61 }
 0x135   :  { %12536 = vst [vmem:[#allocation54_spill] sm:$0xff] %v10207_v3 }
 0x150   :  { %v424_v2 = vpop.f32.mrb[2].mxu0 }
 0x151   :  { %v425_v4 = vadd.f32 %v424_v2, %v10201_v58  ;;  %v495_v9 = vpop.f32.mrb[2].mxu1  ;;  %v426_v10 = vpop.f32.mrb[3].mxu0 }
 0x152   :  { %v496_v15 = vadd.f32 %v495_v9, %v10205_v61  ;;  %v427_v16 = vadd.f32 %v426_v10, %v10203_v60  ;;  %v497_v20 = vpop.f32.mrb[3].mxu1  ;;  %v756_v9 = vld [vmem:[#allocation8 + $0x200] sm:$0xff] }
 0x153   :  { %v500_v21 = vmul.f32 0.5, %v425_v4  ;;  %v498_v22 = vadd.f32 %v497_v20, %v10207_v3  ;;  %v760_v10 = vld [vmem:[#allocation8 + $0x220] sm:$0xff]  ;;  %v765_v20 = vld [vmem:[#allocation8 + $0x248] sm:$0xff] }
 0x154   :  { %v501_v27 = vmul.f32 0.5, %v427_v16  ;;  %v502_v30 = vmul.f32 0.5, %v496_v15  ;;  %v758_v16 = vld [vmem:[#allocation8 + $0x210] sm:$0xff] }
 0x155   :  { %9623 = vtanh.f32 %v500_v21  ;;  %v762_v15 = vld [vmem:[#allocation8 + $0x230] sm:$0xff]  ;;  %v769_v21 = vld [vmem:[#allocation8 + $0x268] sm:$0xff] }
 0x156   :  { %9625 = vtanh.f32 %v501_v27  ;;  %v771_v27 = vld [vmem:[#allocation8 + $0x278] sm:$0xff] }
 0x157   :  { %9627 = vtanh.f32 %v498_v22  ;;  %v767_v22 = vld [vmem:[#allocation8 + $0x258] sm:$0xff] }
 0x158   :  { %9629 = vtanh.f32 %v502_v30 }
 0x15f   :  { %v9624_v31 = vpop.eup %9623 }
 0x160   :  { %v506_v32 = vmul.f32 0.5, %v9624_v31  ;;  %v9626_v33 = vpop.eup %9625 }
 0x161   :  { %v507_v38 = vmul.f32 0.5, %v9626_v33  ;;  %v9628_v41 = vpop.eup %9627  ;;  %v10218_v33 = vpack.c.bf16 %v762_v15, %v758_v16  ;;  %v776_v16 = vld [vmem:[#allocation8 + $0x2a0] sm:$0xff]  ;;  %v10236_v15 = vpack.c.bf16 %v777_v45, %v773_v1 }
 0x162   :  { %v509_v34 = vadd.f32 0.5, %v506_v32  ;;  %v9630_v2 = vpop.eup %9629  ;;  %v10216_v32 = vpack.c.bf16 %v760_v10, %v756_v9  ;;  %v772_v10 = vld [vmem:[#allocation8 + $0x280] sm:$0xff] }
 0x163   :  { %v510_v47 = vadd.f32 0.5, %v507_v38  ;;  %v508_v4 = vmul.f32 0.5, %v9630_v2  ;;  %12538 = vst [vmem:[#allocation56_spill] sm:$0xff] %v10218_v33  ;;  %v768_v38 = vld [vmem:[#allocation8 + $0x260] sm:$0xff]  ;;  %v770_v2 = vld [vmem:[#allocation8 + $0x270] sm:$0xff]  ;;  %12543 = vst [vmem:[#allocation61_spill] sm:$0xff] %v10236_v15 }
 0x164   :  { %v514_v48 = vmul.f32 %v9628_v41, %v509_v34  ;;  %12537 = vst [vmem:[#allocation55_spill] sm:$0xff] %v10216_v32  ;;  %v764_v34 = vld [vmem:[#allocation8 + $0x240] sm:$0xff] }
 0x165   :  { %v513_v55 = vmul.f32 0.0, %v510_v47  ;;  %v511_v30 = vadd.f32 0.5, %v508_v4  ;;  %v10222_v47 = vpack.c.bf16 %v769_v21, %v765_v20  ;;  %v10230_v4 = vpack.c.bf16 %v768_v38, %v764_v34  ;;  %v774_v21 = vld [vmem:[#allocation8 + $0x290] sm:$0xff]  ;;  %v784_v45 = vld [vmem:[#allocation8 + $0x2e0] sm:$0xff] }
 0x166   :  { %v10238_v20 = vpack.c.bf16 %v779_v44, %v775_v46  ;;  %v12545_v34 = vmov 0.0   ;;  %v10244_v38 = vpack.c.bf16 %v776_v16, %v772_v10  ;;  %v780_v44 = vld [vmem:[#allocation8 + $0x2c0] sm:$0xff] }
 0x167   :  { %v10213_v57 = vadd.f32 %v514_v48, %v513_v55  ;;  %12539 = vst [vmem:[#allocation57_spill] sm:$0xff] %v10222_v47  ;;  %v10224_v48 = vpack.c.bf16 %v771_v27, %v767_v22  ;;  %v766_v55 = vld [vmem:[#allocation8 + $0x250] sm:$0xff]  ;;  %12541 = vst [vmem:[#allocation59_spill] sm:$0xff] %v10230_v4  ;;  %v781_v27 = vld [vmem:[#allocation8 + $0x2c8] sm:$0xff]  ;;  %v10256_v10 = vpack.c.bf16 %v784_v45, %v780_v44 }
 0x168   :  { %v10232_v9 = vpack.c.bf16 %v770_v2, %v766_v55  ;;  %12544 = vst [vmem:[#allocation62_spill] sm:$0xff] %v10238_v20  ;;  %v778_v22 = vld [vmem:[#allocation8 + $0x2b0] sm:$0xff]  ;;  %12546 = vst [vmem:[#allocation63_spill] sm:$0xff] %v10244_v38  ;;  %v796_v45 = vld [vmem:[#allocation8 + $0x340] sm:$0xff] }
 0x169   :  { %9631 = vtanh.f32 %v10213_v57  ;;  %12540 = vst [vmem:[#allocation58_spill] sm:$0xff] %v10224_v48  ;;  %v10246_v1 = vpack.c.bf16 %v778_v22, %v774_v21  ;;  %v782_v2 = vld [vmem:[#allocation8 + $0x2d0] sm:$0xff]  ;;  %12550 = vst [vmem:[#allocation67_spill] sm:$0xff] %v10256_v10  ;;  %v788_v21 = vld [vmem:[#allocation8 + $0x300] sm:$0xff] }
 0x16a   :  { %12542 = vst [vmem:[#allocation60_spill] sm:$0xff] %v10232_v9  ;;  %v792_v22 = vld [vmem:[#allocation8 + $0x320] sm:$0xff] }
 0x16b   :  { %12547 = vst [vmem:[#allocation64_spill] sm:$0xff] %v10246_v1 }
 0x173   :  { %v9632_v31 = vpop.eup %9631 }
 0x174   :  { %v10220_v41 = vmul.f32 %v9632_v31, %v511_v30  ;;  %v785_v30 = vld [vmem:[#allocation8 + $0x2e8] sm:$0xff]  ;;  %v783_v31 = vld [vmem:[#allocation8 + $0x2d8] sm:$0xff] }
 0x175   :  { %v10250_v46 = vpack.c.bf16 %v785_v30, %v781_v27  ;;  %v10252_v55 = vpack.c.bf16 %v787_v40, %v783_v31  ;;  %v790_v30 = vld [vmem:[#allocation8 + $0x310] sm:$0xff] }
 0x176   :  { %595 = vmatmul.mubr.f32.vlgmr.msra.gmra.mrb[4].mxu0 %v10220_v41  ;;  %666 = vmatmul.mubr.f32.vlgmr.msra.gmra.mrb[4].mxu1 %v10220_v41  ;;  %v794_v31 = vld [vmem:[#allocation8 + $0x330] sm:$0xff] }
 0x177   :  { %7123 = vmatpush1.bf16.msra.mxu0 %v10216_v32  ;;  %7155 = vmatpush1.bf16.msra.mxu1 %v10218_v33  ;;  %12548 = vst [vmem:[#allocation65_spill] sm:$0xff] %v10250_v46  ;;  %12549 = vst [vmem:[#allocation66_spill] sm:$0xff] %v10252_v55  ;;  %v791_v33 = vld [vmem:[#allocation8 + $0x318] sm:$0xff]  ;;  %v10270_v44 = vpack.c.bf16 %v794_v31, %v790_v30  ;;  %v804_v30 = vld [vmem:[#allocation8 + $0x380] sm:$0xff] }
 0x178   :  { %7125 = vmatprep.subr.bf16.mxu0 %v10222_v47  ;;  %7157 = vmatprep.subr.bf16.mxu1 %v10224_v48  ;;  %v786_v48 = vld [vmem:[#allocation8 + $0x2f0] sm:$0xff]  ;;  %v789_v47 = vld [vmem:[#allocation8 + $0x308] sm:$0xff]  ;;  %v808_v31 = vld [vmem:[#allocation8 + $0x3a0] sm:$0xff] }
 0x179   :  { %884 = vmatprep.mubr.f32.mxu0 %v12545_v34  ;;  %955 = vmatprep.mubr.f32.mxu1 %v12545_v34  ;;  %v10258_v16 = vpack.c.bf16 %v786_v48, %v782_v2  ;;  %v10268_v48 = vpack.c.bf16 %v792_v22, %v788_v21  ;;  %12555 = vst [vmem:[#allocation72_spill] sm:$0xff] %v10270_v44  ;;  %v800_v2 = vld [vmem:[#allocation8 + $0x360] sm:$0xff] }
 0x17a   :  { %v10280_v21 = vpack.c.bf16 %v800_v2, %v796_v45  ;;  %v10292_v45 = vpack.c.bf16 %v808_v31, %v804_v30 }
 0x17b   :  { %7127 = vmatpush1.bf16.msra.mxu0 %v10230_v4  ;;  %7159 = vmatpush1.bf16.msra.mxu1 %v10232_v9  ;;  %v793_v4 = vld [vmem:[#allocation8 + $0x328] sm:$0xff]  ;;  %v795_v9 = vld [vmem:[#allocation8 + $0x338] sm:$0xff]  ;;  %12551 = vst [vmem:[#allocation68_spill] sm:$0xff] %v10258_v16  ;;  %12554 = vst [vmem:[#allocation71_spill] sm:$0xff] %v10268_v48 }
 0x17c   :  { %7129 = vmatprep.subr.bf16.mxu0 %v10236_v15  ;;  %7161 = vmatprep.subr.bf16.mxu1 %v10238_v20  ;;  %v10262_v40 = vpack.c.bf16 %v793_v4, %v789_v47  ;;  %v10264_v27 = vpack.c.bf16 %v795_v9, %v791_v33  ;;  %v797_v20 = vld [vmem:[#allocation8 + $0x348] sm:$0xff]  ;;  %v799_v15 = vld [vmem:[#allocation8 + $0x358] sm:$0xff]  ;;  %v798_v4 = vld [vmem:[#allocation8 + $0x350] sm:$0xff]  ;;  %12558 = vst [vmem:[#allocation75_spill] sm:$0xff] %v10280_v21 }
 0x17d   :  { %v802_v9 = vld [vmem:[#allocation8 + $0x370] sm:$0xff]  ;;  %12562 = vst [vmem:[#allocation79_spill] sm:$0xff] %v10292_v45 }
 0x17e   :  { %12552 = vst [vmem:[#allocation69_spill] sm:$0xff] %v10262_v40  ;;  %12553 = vst [vmem:[#allocation70_spill] sm:$0xff] %v10264_v27  ;;  %v10282_v22 = vpack.c.bf16 %v802_v9, %v798_v4  ;;  %v812_v4 = vld [vmem:[#allocation8 + $0x3c0] sm:$0xff] }
 0x17f   :  { %7131 = vmatpush1.bf16.msra.mxu0 %v10244_v38  ;;  %7163 = vmatpush1.bf16.msra.mxu1 %v10246_v1  ;;  %v801_v38 = vld [vmem:[#allocation8 + $0x368] sm:$0xff]  ;;  %v803_v1 = vld [vmem:[#allocation8 + $0x378] sm:$0xff]  ;;  %v816_v9 = vld [vmem:[#allocation8 + $0x3e0] sm:$0xff] }
 0x180   :  { %7133 = vmatprep.subr.bf16.mxu0 %v10250_v46  ;;  %7165 = vmatprep.subr.bf16.mxu1 %v10252_v55  ;;  %v10274_v33 = vpack.c.bf16 %v801_v38, %v797_v20  ;;  %v10276_v47 = vpack.c.bf16 %v803_v1, %v799_v15  ;;  %v805_v55 = vld [vmem:[#allocation8 + $0x388] sm:$0xff]  ;;  %v807_v46 = vld [vmem:[#allocation8 + $0x398] sm:$0xff]  ;;  %12559 = vst [vmem:[#allocation76_spill] sm:$0xff] %v10282_v22  ;;  %v806_v38 = vld [vmem:[#allocation8 + $0x390] sm:$0xff] }
 0x181   :  { %v810_v1 = vld [vmem:[#allocation8 + $0x3b0] sm:$0xff]  ;;  %v10304_v30 = vpack.c.bf16 %v816_v9, %v812_v4 }
 0x182   :  { %12556 = vst [vmem:[#allocation73_spill] sm:$0xff] %v10274_v33  ;;  %12557 = vst [vmem:[#allocation74_spill] sm:$0xff] %v10276_v47  ;;  %v10294_v2 = vpack.c.bf16 %v810_v1, %v806_v38  ;;  %v691_v38 = vld [vmem:[#allocation6 + $0x200] sm:$0xff] }
 0x183   :  { %7135 = vmatpush1.bf16.msra.mxu0 %v10256_v10  ;;  %7167 = vmatpush1.bf16.msra.mxu1 %v10258_v16  ;;  %v809_v10 = vld [vmem:[#allocation8 + $0x3a8] sm:$0xff]  ;;  %v811_v16 = vld [vmem:[#allocation8 + $0x3b8] sm:$0xff]  ;;  %12566 = vst [vmem:[#allocation83_spill] sm:$0xff] %v10304_v30  ;;  %v695_v1 = vld [vmem:[#allocation6 + $0x220] sm:$0xff] }
 0x184   :  { %7137 = vmatprep.subr.bf16.mxu0 %v10262_v40  ;;  %7169 = vmatprep.subr.bf16.mxu1 %v10264_v27  ;;  %v10286_v15 = vpack.c.bf16 %v809_v10, %v805_v55  ;;  %v10288_v20 = vpack.c.bf16 %v811_v16, %v807_v46  ;;  %v813_v27 = vld [vmem:[#allocation8 + $0x3c8] sm:$0xff]  ;;  %v815_v40 = vld [vmem:[#allocation8 + $0x3d8] sm:$0xff]  ;;  %12563 = vst [vmem:[#allocation80_spill] sm:$0xff] %v10294_v2  ;;  %v814_v10 = vld [vmem:[#allocation8 + $0x3d0] sm:$0xff] }
 0x185   :  { %v818_v16 = vld [vmem:[#allocation8 + $0x3f0] sm:$0xff]  ;;  %v10316_v4 = vpack.c.bf16 %v695_v1, %v691_v38 }
 0x186   :  { %12560 = vst [vmem:[#allocation77_spill] sm:$0xff] %v10286_v15  ;;  %12561 = vst [vmem:[#allocation78_spill] sm:$0xff] %v10288_v20  ;;  %v10306_v31 = vpack.c.bf16 %v818_v16, %v814_v10  ;;  %v699_v10 = vld [vmem:[#allocation6 + $0x240] sm:$0xff] }
 0x187   :  { %7139 = vmatpush1.bf16.msra.mxu0 %v10268_v48  ;;  %7171 = vmatpush1.bf16.msra.mxu1 %v10270_v44  ;;  %v817_v48 = vld [vmem:[#allocation8 + $0x3e8] sm:$0xff]  ;;  %v819_v44 = vld [vmem:[#allocation8 + $0x3f8] sm:$0xff]  ;;  %12570 = vst [vmem:[#allocation87_spill] sm:$0xff] %v10316_v4  ;;  %v703_v16 = vld [vmem:[#allocation6 + $0x260] sm:$0xff] }
 0x188   :  { %7141 = vmatprep.subr.bf16.mxu0 %v10274_v33  ;;  %7173 = vmatprep.subr.bf16.mxu1 %v10276_v47  ;;  %v10298_v46 = vpack.c.bf16 %v817_v48, %v813_v27  ;;  %v10300_v55 = vpack.c.bf16 %v819_v44, %v815_v40  ;;  %v692_v47 = vld [vmem:[#allocation6 + $0x208] sm:$0xff]  ;;  %v694_v33 = vld [vmem:[#allocation6 + $0x218] sm:$0xff]  ;;  %12567 = vst [vmem:[#allocation84_spill] sm:$0xff] %v10306_v31  ;;  %v693_v48 = vld [vmem:[#allocation6 + $0x210] sm:$0xff] }
 0x189   :  { %v697_v44 = vld [vmem:[#allocation6 + $0x230] sm:$0xff]  ;;  %v10330_v38 = vpack.c.bf16 %v703_v16, %v699_v10 }
 0x18a   :  { %12564 = vst [vmem:[#allocation81_spill] sm:$0xff] %v10298_v46  ;;  %12565 = vst [vmem:[#allocation82_spill] sm:$0xff] %v10300_v55  ;;  %v10318_v9 = vpack.c.bf16 %v697_v44, %v693_v48  ;;  %v709_v48 = vld [vmem:[#allocation6 + $0x290] sm:$0xff] }
 0x18b   :  { %7143 = vmatpush1.bf16.msra.mxu0 %v10280_v21  ;;  %7175 = vmatpush1.bf16.msra.mxu1 %v10282_v22  ;;  %v696_v21 = vld [vmem:[#allocation6 + $0x228] sm:$0xff]  ;;  %v698_v22 = vld [vmem:[#allocation6 + $0x238] sm:$0xff]  ;;  %12574 = vst [vmem:[#allocation91_spill] sm:$0xff] %v10330_v38  ;;  %v713_v44 = vld [vmem:[#allocation6 + $0x2b0] sm:$0xff] }
 0x18c   :  { %7145 = vmatprep.subr.bf16.mxu0 %v10286_v15  ;;  %7177 = vmatprep.subr.bf16.mxu1 %v10288_v20  ;;  %v10310_v40 = vpack.c.bf16 %v696_v21, %v692_v47  ;;  %v10312_v27 = vpack.c.bf16 %v698_v22, %v694_v33  ;;  %v700_v20 = vld [vmem:[#allocation6 + $0x248] sm:$0xff]  ;;  %v702_v15 = vld [vmem:[#allocation6 + $0x258] sm:$0xff]  ;;  %12571 = vst [vmem:[#allocation88_spill] sm:$0xff] %v10318_v9  ;;  %v701_v21 = vld [vmem:[#allocation6 + $0x250] sm:$0xff] }
 0x18d   :  { %v705_v22 = vld [vmem:[#allocation6 + $0x270] sm:$0xff] }
 0x18e   :  { %12568 = vst [vmem:[#allocation85_spill] sm:$0xff] %v10310_v40  ;;  %12569 = vst [vmem:[#allocation86_spill] sm:$0xff] %v10312_v27 }
 0x18f   :  { %7147 = vmatpush1.bf16.msra.mxu0 %v10292_v45  ;;  %7179 = vmatpush1.bf16.msra.mxu1 %v10294_v2  ;;  %v704_v45 = vld [vmem:[#allocation6 + $0x268] sm:$0xff]  ;;  %v706_v2 = vld [vmem:[#allocation6 + $0x278] sm:$0xff] }
 0x190   :  { %7149 = vmatprep.subr.bf16.mxu0 %v10298_v46  ;;  %7181 = vmatprep.subr.bf16.mxu1 %v10300_v55  ;;  %v10322_v33 = vpack.c.bf16 %v704_v45, %v700_v20  ;;  %v10324_v47 = vpack.c.bf16 %v706_v2, %v702_v15  ;;  %v708_v55 = vld [vmem:[#allocation6 + $0x288] sm:$0xff]  ;;  %v710_v46 = vld [vmem:[#allocation6 + $0x298] sm:$0xff]  ;;  %v10332_v20 = vpack.c.bf16 %v705_v22, %v701_v21  ;;  %v707_v15 = vld [vmem:[#allocation6 + $0x280] sm:$0xff] }
 0x191   :  { %v711_v45 = vld [vmem:[#allocation6 + $0x2a0] sm:$0xff]  ;;  %v717_v21 = vld [vmem:[#allocation6 + $0x2d0] sm:$0xff] }
 0x192   :  { %12572 = vst [vmem:[#allocation89_spill] sm:$0xff] %v10322_v33  ;;  %12573 = vst [vmem:[#allocation90_spill] sm:$0xff] %v10324_v47  ;;  %v10344_v10 = vpack.c.bf16 %v711_v45, %v707_v15  ;;  %v721_v22 = vld [vmem:[#allocation6 + $0x2f0] sm:$0xff] }
 0x193   :  { %7151 = vmatpush1.bf16.msra.mxu0 %v10304_v30  ;;  %7183 = vmatpush1.bf16.msra.mxu1 %v10306_v31  ;;  %v712_v30 = vld [vmem:[#allocation6 + $0x2a8] sm:$0xff]  ;;  %v714_v31 = vld [vmem:[#allocation6 + $0x2b8] sm:$0xff]  ;;  %12575 = vst [vmem:[#allocation92_spill] sm:$0xff] %v10332_v20  ;;  %v10358_v45 = vpack.c.bf16 %v721_v22, %v717_v21  ;;  %v731_v21 = vld [vmem:[#allocation6 + $0x340] sm:$0xff] }
 0x194   :  { %7185 = vmatprep.subr.bf16.mxu0 %v10310_v40  ;;  %7217 = vmatprep.subr.bf16.mxu1 %v10312_v27  ;;  %v10336_v2 = vpack.c.bf16 %v712_v30, %v708_v55  ;;  %v10338_v1 = vpack.c.bf16 %v714_v31, %v710_v46  ;;  %v716_v27 = vld [vmem:[#allocation6 + $0x2c8] sm:$0xff]  ;;  %v718_v40 = vld [vmem:[#allocation6 + $0x2d8] sm:$0xff]  ;;  %12578 = vst [vmem:[#allocation95_spill] sm:$0xff] %v10344_v10  ;;  %v715_v46 = vld [vmem:[#allocation6 + $0x2c0] sm:$0xff] }
 0x195   :  { %v10346_v55 = vpack.c.bf16 %v713_v44, %v709_v48  ;;  %v719_v30 = vld [vmem:[#allocation6 + $0x2e0] sm:$0xff]  ;;  %12583 = vst [vmem:[#allocation100_spill] sm:$0xff] %v10358_v45 }
 0x196   :  { %885 = vmatmul.mubr.f32.vlgmr.msra.gmra.mrb[6].mxu0 %v12545_v34  ;;  %956 = vmatmul.mubr.f32.vlgmr.msra.gmra.mrb[6].mxu1 %v12545_v34  ;;  %12576 = vst [vmem:[#allocation93_spill] sm:$0xff] %v10336_v2  ;;  %12577 = vst [vmem:[#allocation94_spill] sm:$0xff] %v10338_v1  ;;  %v10356_v15 = vpack.c.bf16 %v719_v30, %v715_v46  ;;  %v723_v48 = vld [vmem:[#allocation6 + $0x300] sm:$0xff] }
 0x197   :  { %7187 = vmatpush1.bf16.msra.mxu0 %v10316_v4  ;;  %7219 = vmatpush1.bf16.msra.mxu1 %v10318_v9  ;;  %v720_v4 = vld [vmem:[#allocation6 + $0x2e8] sm:$0xff]  ;;  %v722_v9 = vld [vmem:[#allocation6 + $0x2f8] sm:$0xff]  ;;  %12579 = vst [vmem:[#allocation96_spill] sm:$0xff] %v10346_v55  ;;  %v727_v44 = vld [vmem:[#allocation6 + $0x320] sm:$0xff] }
 0x198   :  { %7189 = vmatprep.subr.bf16.mxu0 %v10322_v33  ;;  %7221 = vmatprep.subr.bf16.mxu1 %v10324_v47  ;;  %v10350_v31 = vpack.c.bf16 %v720_v4, %v716_v27  ;;  %v10352_v16 = vpack.c.bf16 %v722_v9, %v718_v40  ;;  %v724_v47 = vld [vmem:[#allocation6 + $0x308] sm:$0xff]  ;;  %v726_v33 = vld [vmem:[#allocation6 + $0x318] sm:$0xff]  ;;  %12582 = vst [vmem:[#allocation99_spill] sm:$0xff] %v10356_v15  ;;  %v725_v4 = vld [vmem:[#allocation6 + $0x310] sm:$0xff] }
 0x199   :  { %1026 = vmatprep.mubr.f32.mxu0 %v12545_v34  ;;  %1097 = vmatprep.mubr.f32.mxu1 %v12545_v34  ;;  %v729_v9 = vld [vmem:[#allocation6 + $0x330] sm:$0xff]  ;;  %v10368_v46 = vpack.c.bf16 %v727_v44, %v723_v48  ;;  %v735_v22 = vld [vmem:[#allocation6 + $0x360] sm:$0xff] }
 0x19a   :  { %12580 = vst [vmem:[#allocation97_spill] sm:$0xff] %v10350_v31  ;;  %12581 = vst [vmem:[#allocation98_spill] sm:$0xff] %v10352_v16  ;;  %v10370_v30 = vpack.c.bf16 %v729_v9, %v725_v4  ;;  %v10380_v48 = vpack.c.bf16 %v735_v22, %v731_v21  ;;  %v739_v4 = vld [vmem:[#allocation6 + $0x380] sm:$0xff] }
 0x19b   :  { %7191 = vmatpush1.bf16.msra.mxu0 %v10330_v38  ;;  %7223 = vmatpush1.bf16.msra.mxu1 %v10332_v20  ;;  %v728_v38 = vld [vmem:[#allocation6 + $0x328] sm:$0xff]  ;;  %v730_v20 = vld [vmem:[#allocation6 + $0x338] sm:$0xff]  ;;  %12586 = vst [vmem:[#allocation103_spill] sm:$0xff] %v10368_v46  ;;  %v743_v9 = vld [vmem:[#allocation6 + $0x3a0] sm:$0xff] }
 0x19c   :  { %7193 = vmatprep.subr.bf16.mxu0 %v10336_v2  ;;  %7225 = vmatprep.subr.bf16.mxu1 %v10338_v1  ;;  %v10362_v40 = vpack.c.bf16 %v728_v38, %v724_v47  ;;  %v10364_v27 = vpack.c.bf16 %v730_v20, %v726_v33  ;;  %v732_v1 = vld [vmem:[#allocation6 + $0x348] sm:$0xff]  ;;  %v734_v2 = vld [vmem:[#allocation6 + $0x358] sm:$0xff]  ;;  %12587 = vst [vmem:[#allocation104_spill] sm:$0xff] %v10370_v30  ;;  %v733_v38 = vld [vmem:[#allocation6 + $0x350] sm:$0xff] }
 0x19d   :  { %v737_v20 = vld [vmem:[#allocation6 + $0x370] sm:$0xff]  ;;  %12590 = vst [vmem:[#allocation107_spill] sm:$0xff] %v10380_v48  ;;  %v10392_v21 = vpack.c.bf16 %v743_v9, %v739_v4 }
 0x19e   :  { %12584 = vst [vmem:[#allocation101_spill] sm:$0xff] %v10362_v40  ;;  %12585 = vst [vmem:[#allocation102_spill] sm:$0xff] %v10364_v27  ;;  %v10382_v44 = vpack.c.bf16 %v737_v20, %v733_v38  ;;  %v747_v38 = vld [vmem:[#allocation6 + $0x3c0] sm:$0xff]  ;;  %v753_v20 = vld [vmem:[#allocation6 + $0x3f0] sm:$0xff] }
 0x19f   :  { %7195 = vmatpush1.bf16.msra.mxu0 %v10344_v10  ;;  %7227 = vmatpush1.bf16.msra.mxu1 %v10346_v55  ;;  %v736_v10 = vld [vmem:[#allocation6 + $0x368] sm:$0xff]  ;;  %v738_v55 = vld [vmem:[#allocation6 + $0x378] sm:$0xff]  ;;  %12594 = vst [vmem:[#allocation111_spill] sm:$0xff] %v10392_v21 }
 0x1a0   :  { %7197 = vmatprep.subr.bf16.mxu0 %v10350_v31  ;;  %7229 = vmatprep.subr.bf16.mxu1 %v10352_v16  ;;  %v10374_v33 = vpack.c.bf16 %v736_v10, %v732_v1  ;;  %v10376_v47 = vpack.c.bf16 %v738_v55, %v734_v2  ;;  %v740_v16 = vld [vmem:[#allocation6 + $0x388] sm:$0xff]  ;;  %v742_v31 = vld [vmem:[#allocation6 + $0x398] sm:$0xff]  ;;  %12591 = vst [vmem:[#allocation108_spill] sm:$0xff] %v10382_v44  ;;  %v741_v10 = vld [vmem:[#allocation6 + $0x390] sm:$0xff] }
 0x1a1   :  { %v745_v55 = vld [vmem:[#allocation6 + $0x3b0] sm:$0xff] }
 0x1a2   :  { %12588 = vst [vmem:[#allocation105_spill] sm:$0xff] %v10374_v33  ;;  %12589 = vst [vmem:[#allocation106_spill] sm:$0xff] %v10376_v47  ;;  %v10394_v22 = vpack.c.bf16 %v745_v55, %v741_v10  ;;  %v525_v10 = vrot.slane %v10207_v3, 1 }
 0x1a3   :  { %7199 = vmatpush1.bf16.msra.mxu0 %v10356_v15  ;;  %7231 = vmatpush1.bf16.msra.mxu1 %v10358_v45  ;;  %v744_v15 = vld [vmem:[#allocation6 + $0x3a8] sm:$0xff]  ;;  %v746_v45 = vld [vmem:[#allocation6 + $0x3b8] sm:$0xff] }
 0x1a4   :  { %7201 = vmatprep.subr.bf16.mxu0 %v10362_v40  ;;  %7233 = vmatprep.subr.bf16.mxu1 %v10364_v27  ;;  %v10386_v2 = vpack.c.bf16 %v744_v15, %v740_v16  ;;  %v10388_v1 = vpack.c.bf16 %v746_v45, %v742_v31  ;;  %v748_v27 = vld [vmem:[#allocation6 + $0x3c8] sm:$0xff]  ;;  %v750_v40 = vld [vmem:[#allocation6 + $0x3d8] sm:$0xff]  ;;  %12595 = vst [vmem:[#allocation112_spill] sm:$0xff] %v10394_v22  ;;  %v751_v15 = vld [vmem:[#allocation6 + $0x3e0] sm:$0xff] }
 0x1a5   :  { %v749_v45 = vld [vmem:[#allocation6 + $0x3d0] sm:$0xff]  ;;  %v10404_v4 = vpack.c.bf16 %v751_v15, %v747_v38 }
 0x1a6   :  { %12592 = vst [vmem:[#allocation109_spill] sm:$0xff] %v10386_v2  ;;  %12593 = vst [vmem:[#allocation110_spill] sm:$0xff] %v10388_v1  ;;  %v10406_v9 = vpack.c.bf16 %v753_v20, %v749_v45 }
 0x1a7   :  { %7203 = vmatpush1.bf16.msra.mxu0 %v10368_v46  ;;  %7235 = vmatpush1.bf16.msra.mxu1 %v10370_v30  ;;  %v752_v46 = vld [vmem:[#allocation6 + $0x3e8] sm:$0xff]  ;;  %v754_v30 = vld [vmem:[#allocation6 + $0x3f8] sm:$0xff]  ;;  %12598 = vst [vmem:[#allocation115_spill] sm:$0xff] %v10404_v4 }
 0x1a8   :  { %7205 = vmatprep.subr.bf16.mxu0 %v10374_v33  ;;  %7237 = vmatprep.subr.bf16.mxu1 %v10376_v47  ;;  %v10398_v31 = vpack.c.bf16 %v752_v46, %v748_v27  ;;  %v10400_v16 = vpack.c.bf16 %v754_v30, %v750_v40  ;;  %12599 = vst [vmem:[#allocation116_spill] sm:$0xff] %v10406_v9  ;;  %v524_v40 = vrot.slane %v10205_v61, 1  ;;  %v523_v30 = vrot.slane %v10203_v60, 1 }
 0x1aa   :  { %12596 = vst [vmem:[#allocation113_spill] sm:$0xff] %v10398_v31  ;;  %12597 = vst [vmem:[#allocation114_spill] sm:$0xff] %v10400_v16 }
 0x1ab   :  { %7207 = vmatpush1.bf16.msra.mxu0 %v10380_v48  ;;  %7239 = vmatpush1.bf16.msra.mxu1 %v10382_v44 }
 0x1ac   :  { %7209 = vmatprep.subr.bf16.mxu0 %v10386_v2  ;;  %7241 = vmatprep.subr.bf16.mxu1 %v10388_v1 }
 0x1af   :  { %7211 = vmatpush1.bf16.msra.mxu0 %v10392_v21  ;;  %7243 = vmatpush1.bf16.msra.mxu1 %v10394_v22 }
 0x1b0   :  { %7213 = vmatprep.subr.bf16.mxu0 %v10398_v31  ;;  %7245 = vmatprep.subr.bf16.mxu1 %v10400_v16 }
 0x1b3   :  { %7215 = vmatpush1.bf16.msra.mxu0 %v10404_v4  ;;  %7247 = vmatpush1.bf16.msra.mxu1 %v10406_v9 }
 0x1b4   :  { %7249 = vmatprep.subr.bf16.mxu0 %v10046_v39  ;;  %7281 = vmatprep.subr.bf16.mxu1 %v10048_v43 }
 0x1b6   :  { %1027 = vmatmul.mubr.f32.vlgmr.msra.gmra.mrb[6].mxu0 %v10220_v41  ;;  %1098 = vmatmul.mubr.f32.vlgmr.msra.gmra.mrb[6].mxu1 %v10220_v41  ;;  %v522_v41 = vrot.slane %v10201_v58, 1 }
 0x1b7   :  { %7251 = vmatpush1.bf16.msra.mxu0 %v10050_v50  ;;  %7283 = vmatpush1.bf16.msra.mxu1 %v10053_v51 }
 0x1b8   :  { %7253 = vmatprep.subr.bf16.mxu0 %v10055_v52  ;;  %7285 = vmatprep.subr.bf16.mxu1 %v10058_v56 }
 0x1b9   :  { %1221 = vmatprep.mubr.f32.mxu0 %v12545_v34  ;;  %1292 = vmatprep.mubr.f32.mxu1 %v12545_v34 }
 0x1bb   :  { %7255 = vmatpush1.bf16.msra.mxu0 %v10061_v62  ;;  %7287 = vmatpush1.bf16.msra.mxu1 %v10065_v63 }
 0x1bc   :  { %7257 = vmatprep.subr.bf16.mxu0 %v10067_v0  ;;  %7289 = vmatprep.subr.bf16.mxu1 %v10070_v5 }
 0x1bf   :  { %7259 = vmatpush1.bf16.msra.mxu0 %v10075_v11  ;;  %7291 = vmatpush1.bf16.msra.mxu1 %v10079_v12 }
 0x1c0   :  { %7261 = vmatprep.subr.bf16.mxu0 %v10081_v13  ;;  %7293 = vmatprep.subr.bf16.mxu1 %v10084_v17 }
 0x1c3   :  { %7263 = vmatpush1.bf16.msra.mxu0 %v10087_v23  ;;  %7295 = vmatpush1.bf16.msra.mxu1 %v10091_v24 }
 0x1c4   :  { %7265 = vmatprep.subr.bf16.mxu0 %v10093_v25  ;;  %7297 = vmatprep.subr.bf16.mxu1 %v10096_v29 }
 0x1c7   :  { %7267 = vmatpush1.bf16.msra.mxu0 %v10099_v35  ;;  %7299 = vmatpush1.bf16.msra.mxu1 %v10103_v36 }
 0x1c8   :  { %7269 = vmatprep.subr.bf16.mxu0 %v10105_v37  ;;  %7301 = vmatprep.subr.bf16.mxu1 %v10108_v42 }
 0x1cb   :  { %7271 = vmatpush1.bf16.msra.mxu0 %v10111_v49  ;;  %7303 = vmatpush1.bf16.msra.mxu1 %v10115_v53 }
 0x1cc   :  { %7273 = vmatprep.subr.bf16.mxu0 %v10117_v54  ;;  %7305 = vmatprep.subr.bf16.mxu1 %v10120_v59 }
 0x1cf   :  { %7275 = vmatpush1.bf16.msra.mxu0 %v10123_v6  ;;  %7307 = vmatpush1.bf16.msra.mxu1 %v10127_v7 }
 0x1d0   :  { %7277 = vmatprep.subr.bf16.mxu0 %v10129_v8  ;;  %7309 = vmatprep.subr.bf16.mxu1 %v10132_v14 }
 0x1d3   :  { %7279 = vmatpush1.bf16.msra.mxu0 %v10135_v18  ;;  %7311 = vmatpush1.bf16.msra.mxu1 %v10139_v19 }
 0x1d4   :  { %7313 = vmatprep.subr.bf16.mxu0 %v10180_v26  ;;  %7345 = vmatprep.subr.bf16.mxu1 %v10182_v28 }
 0x249   :  { %v596_v27 = vpop.f32.mrb[4].mxu0  ;;  %v667_v46 = vpop.f32.mrb[4].mxu1 }
 0x24a   :  { %v597_v55 = vadd.f32 %v596_v27, %v522_v41  ;;  %v668_v38 = vadd.f32 %v667_v46, %v524_v40  ;;  %v598_v15 = vpop.f32.mrb[5].mxu0  ;;  %v669_v45 = vpop.f32.mrb[5].mxu1 }
 0x24b   :  { %v599_v20 = vadd.f32 %v598_v15, %v523_v30  ;;  %v670_v19 = vadd.f32 %v669_v45, %v525_v10  ;;  %v12609_v10 = vld [vmem:[#allocation65_spill] sm:$0xff]  ;;  %v12612_v15 = vld [vmem:[#allocation68_spill] sm:$0xff] }
 0x24c   :  { %v672_v18 = vmul.f32 0.5, %v597_v55  ;;  %v674_v58 = vmul.f32 0.5, %v668_v38  ;;  %v12610_v55 = vld [vmem:[#allocation66_spill] sm:$0xff]  ;;  %v12611_v38 = vld [vmem:[#allocation67_spill] sm:$0xff]  ;;  %v12613_v45 = vld [vmem:[#allocation69_spill] sm:$0xff] }
 0x24d   :  { %v673_v26 = vmul.f32 0.5, %v599_v20  ;;  %v12614_v20 = vld [vmem:[#allocation70_spill] sm:$0xff] }
 0x24e   :  { %9633 = vtanh.f32 %v672_v18 }
 0x24f   :  { %9635 = vtanh.f32 %v673_v26 }
 0x250   :  { %9637 = vtanh.f32 %v670_v19 }
 0x251   :  { %9639 = vtanh.f32 %v674_v58  ;;  %v12604_v58 = vld [vmem:[#allocation60_spill] sm:$0xff] }
 0x258   :  { %v9634_v28 = vpop.eup %9633 }
 0x259   :  { %v678_v61 = vmul.f32 0.5, %v9634_v28  ;;  %v9636_v14 = vpop.eup %9635  ;;  %v12603_v28 = vld [vmem:[#allocation59_spill] sm:$0xff] }
 0x25a   :  { %v679_v60 = vmul.f32 0.5, %v9636_v14  ;;  %v9638_v7 = vpop.eup %9637  ;;  %v12600_v14 = vld [vmem:[#allocation56_spill] sm:$0xff] }
 0x25b   :  { %v681_v8 = vadd.f32 0.5, %v678_v61  ;;  %v9640_v46 = vpop.eup %9639  ;;  %v12606_v61 = vld [vmem:[#allocation62_spill] sm:$0xff] }
 0x25c   :  { %v682_v3 = vadd.f32 0.5, %v679_v60  ;;  %v680_v18 = vmul.f32 0.5, %v9640_v46  ;;  %v12605_v60 = vld [vmem:[#allocation61_spill] sm:$0xff] }
 0x25d   :  { %v686_v41 = vmul.f32 %v9638_v7, %v681_v8  ;;  %v12601_v7 = vld [vmem:[#allocation57_spill] sm:$0xff]  ;;  %v12602_v8 = vld [vmem:[#allocation58_spill] sm:$0xff] }
 0x25e   :  { %v685_v40 = vmul.f32 %v682_v3, %v10213_v57  ;;  %v683_v26 = vadd.f32 0.5, %v680_v18  ;;  %v12607_v3 = vld [vmem:[#allocation63_spill] sm:$0xff]  ;;  %v12608_v57 = vld [vmem:[#allocation64_spill] sm:$0xff]  ;;  %v12617_v46 = vld [vmem:[#allocation73_spill] sm:$0xff] }
 0x25f   :  { %v12618_v18 = vld [vmem:[#allocation74_spill] sm:$0xff] }
 0x260   :  { %v10455_v27 = vadd.f32 %v686_v41, %v685_v40  ;;  %v12615_v41 = vld [vmem:[#allocation71_spill] sm:$0xff]  ;;  %v12616_v40 = vld [vmem:[#allocation72_spill] sm:$0xff] }
 0x262   :  { %9641 = vtanh.f32 %v10455_v27 }
 0x26c   :  { %v9642_v19 = vpop.eup %9641 }
 0x26d   :  { %v10458_v30 = vmul.f32 %v9642_v19, %v683_v26  ;;  %v6926_v26 = vld [vmem:[%s12081_s3 + $0x4] sm:$0xf]  ;;  %v12619_v19 = vld [vmem:[#allocation75_spill] sm:$0xff] }
 0x26f   :  { %1222 = vmatmul.mubr.f32.vlgmr.msra.gmra.mrb[8].mxu0 %v10458_v30  ;;  %1293 = vmatmul.mubr.f32.vlgmr.msra.gmra.mrb[8].mxu1 %v10458_v30 }
 0x270   :  { %7315 = vmatpush1.bf16.msra.mxu0 %v10216_v32  ;;  %7347 = vmatpush1.bf16.msra.mxu1 %v12600_v14 }
 0x271   :  { %7317 = vmatprep.subr.bf16.mxu0 %v12601_v7  ;;  %7349 = vmatprep.subr.bf16.mxu1 %v12602_v8 }
 0x272   :  { %1381 = vmatprep.mubr.f32.mxu0 %v12545_v34  ;;  %1452 = vmatprep.mubr.f32.mxu1 %v12545_v34 }
 0x274   :  { %7319 = vmatpush1.bf16.msra.mxu0 %v12603_v28  ;;  %7351 = vmatpush1.bf16.msra.mxu1 %v12604_v58  ;;  %v12633_v28 = vld [vmem:[#allocation83_spill] sm:$0xff] }
 0x275   :  { %7321 = vmatprep.subr.bf16.mxu0 %v12605_v60  ;;  %7353 = vmatprep.subr.bf16.mxu1 %v12606_v61  ;;  %v12631_v60 = vld [vmem:[#allocation81_spill] sm:$0xff] }
 0x278   :  { %7323 = vmatpush1.bf16.msra.mxu0 %v12607_v3  ;;  %7355 = vmatpush1.bf16.msra.mxu1 %v12608_v57  ;;  %v12628_v57 = vld [vmem:[#allocation80_spill] sm:$0xff]  ;;  %v12629_v3 = vld [vmem:[#allocation50_spill] sm:$0xff] }
 0x279   :  { %7325 = vmatprep.subr.bf16.mxu0 %v12609_v10  ;;  %7357 = vmatprep.subr.bf16.mxu1 %v12610_v55  ;;  %v12627_v10 = vld [vmem:[#allocation79_spill] sm:$0xff] }
 0x27c   :  { %7327 = vmatpush1.bf16.msra.mxu0 %v12611_v38  ;;  %7359 = vmatpush1.bf16.msra.mxu1 %v12612_v15  ;;  %v12620_v38 = vld [vmem:[#allocation76_spill] sm:$0xff]  ;;  %v12621_v15 = vld [vmem:[#allocation47_spill] sm:$0xff] }
 0x27d   :  { %7329 = vmatprep.subr.bf16.mxu0 %v12613_v45  ;;  %7361 = vmatprep.subr.bf16.mxu1 %v12614_v20  ;;  %v10490_v45 = vrot.slane %v6926_v26, %v12621_v15  ;;  %v12623_v20 = vld [vmem:[#allocation77_spill] sm:$0xff] }
 0x27f   :  { %12622 = vst [vmem:[#allocation117_spill] sm:$0xff] %v10490_v45 }
 0x280   :  { %7331 = vmatpush1.bf16.msra.mxu0 %v12615_v41  ;;  %7363 = vmatpush1.bf16.msra.mxu1 %v12616_v40  ;;  %v12624_v41 = vld [vmem:[#allocation78_spill] sm:$0xff]  ;;  %v12625_v40 = vld [vmem:[#allocation48_spill] sm:$0xff] }
 0x281   :  { %7333 = vmatprep.subr.bf16.mxu0 %v12617_v46  ;;  %7365 = vmatprep.subr.bf16.mxu1 %v12618_v18  ;;  %v10495_v55 = vrot.slane %v6926_v26, %v12625_v40 }
 0x283   :  { %12626 = vst [vmem:[#allocation118_spill] sm:$0xff] %v10495_v55 }
 0x284   :  { %7335 = vmatpush1.bf16.msra.mxu0 %v12619_v19  ;;  %7367 = vmatpush1.bf16.msra.mxu1 %v12620_v38  ;;  %v10500_v19 = vrot.slane %v6926_v26, %v12629_v3 }
 0x285   :  { %7337 = vmatprep.subr.bf16.mxu0 %v12623_v20  ;;  %7369 = vmatprep.subr.bf16.mxu1 %v12624_v41  ;;  %v12632_v20 = vld [vmem:[#allocation82_spill] sm:$0xff] }
 0x286   :  { %12630 = vst [vmem:[#allocation119_spill] sm:$0xff] %v10500_v19 }
 0x288   :  { %7339 = vmatpush1.bf16.msra.mxu0 %v12627_v10  ;;  %7371 = vmatpush1.bf16.msra.mxu1 %v12628_v57  ;;  %v12634_v10 = vld [vmem:[#allocation84_spill] sm:$0xff]  ;;  %v12635_v57 = vld [vmem:[#allocation85_spill] sm:$0xff] }
 0x289   :  { %v1028_v46 = vpop.f32.mrb[6].mxu0  ;;  %v1099_v18 = vpop.f32.mrb[6].mxu1  ;;  %7341 = vmatprep.subr.bf16.mxu0 %v12631_v60  ;;  %7373 = vmatprep.subr.bf16.mxu1 %v12632_v20 }
 0x28a   :  { %v1127_v38 = vadd.f32 %v10490_v45, %v1028_v46  ;;  %v1030_v15 = vpop.f32.mrb[7].mxu0  ;;  %v1101_v61 = vpop.f32.mrb[7].mxu1  ;;  %v12636_v46 = vld [vmem:[#allocation86_spill] sm:$0xff]  ;;  %v12637_v45 = vld [vmem:[#allocation49_spill] sm:$0xff] }
 0x28b   :  { %v1128_v40 = vadd.f32 %v10495_v55, %v1030_v15  ;;  %v1130_v3 = vadd.f32 %v10500_v19, %v1101_v61  ;;  %v10512_v8 = vrot.slane %v6926_v26, %v12637_v45 }
 0x28c   :  { %v1131_v41 = vmul.f32 0.5, %v1127_v38  ;;  %7343 = vmatpush1.bf16.msra.mxu0 %v12633_v28  ;;  %7375 = vmatpush1.bf16.msra.mxu1 %v12634_v10 }
 0x28d   :  { %v1132_v58 = vmul.f32 0.5, %v1128_v40  ;;  %7377 = vmatprep.subr.bf16.mxu0 %v12635_v57  ;;  %7409 = vmatprep.subr.bf16.mxu1 %v12636_v46  ;;  %v1129_v15 = vadd.f32 %v10512_v8, %v1099_v18 }
 0x28e   :  { %9643 = vtanh.f32 %v1131_v41 }
 0x28f   :  { %9645 = vtanh.f32 %v1132_v58  ;;  %v1133_v38 = vmul.f32 0.5, %v1129_v15  ;;  %v12645_v15 = vld [vmem:[#allocation94_spill] sm:$0xff] }
 0x290   :  { %9647 = vtanh.f32 %v1130_v3 }
 0x291   :  { %9649 = vtanh.f32 %v1133_v38  ;;  %v12646_v38 = vld [vmem:[#allocation95_spill] sm:$0xff] }
 0x298   :  { %v9644_v40 = vpop.eup %9643 }
 0x299   :  { %v1137_v55 = vmul.f32 0.5, %v9644_v40  ;;  %v9646_v28 = vpop.eup %9645  ;;  %v12647_v40 = vld [vmem:[#allocation96_spill] sm:$0xff] }
 0x29a   :  { %v1138_v41 = vmul.f32 0.5, %v9646_v28  ;;  %v9648_v10 = vpop.eup %9647  ;;  %v12639_v28 = vld [vmem:[#allocation88_spill] sm:$0xff] }
 0x29b   :  { %v1140_v20 = vadd.f32 0.5, %v1137_v55  ;;  %v9650_v26 = vpop.eup %9649  ;;  %v12638_v55 = vld [vmem:[#allocation87_spill] sm:$0xff] }
 0x29c   :  { %v1141_v61 = vadd.f32 0.5, %v1138_v41  ;;  %v1139_v58 = vmul.f32 0.5, %v9650_v26  ;;  %v12648_v41 = vld [vmem:[#allocation97_spill] sm:$0xff]  ;;  %v12650_v26 = vld [vmem:[#allocation99_spill] sm:$0xff] }
 0x29d   :  { %v1145_v19 = vmul.f32 %v9648_v10, %v1140_v20  ;;  %v12640_v10 = vld [vmem:[#allocation89_spill] sm:$0xff]  ;;  %v12642_v20 = vld [vmem:[#allocation91_spill] sm:$0xff] }
 0x29e   :  { %v1144_v57 = vmul.f32 0.0, %v1141_v61  ;;  %v1142_v3 = vadd.f32 0.5, %v1139_v58  ;;  %v12649_v61 = vld [vmem:[#allocation98_spill] sm:$0xff]  ;;  %v12651_v58 = vld [vmem:[#allocation100_spill] sm:$0xff] }
 0x2a0   :  { %v10515_v60 = vadd.f32 %v1145_v19, %v1144_v57  ;;  %v12641_v57 = vld [vmem:[#allocation90_spill] sm:$0xff]  ;;  %v12644_v19 = vld [vmem:[#allocation93_spill] sm:$0xff] }
 0x2a2   :  { %9651 = vtanh.f32 %v10515_v60 }
 0x2ac   :  { %v9652_v45 = vpop.eup %9651 }
 0x2ad   :  { %v10518_v18 = vmul.f32 %v9652_v45, %v1142_v3  ;;  %v12643_v45 = vld [vmem:[#allocation92_spill] sm:$0xff]  ;;  %v12652_v3 = vld [vmem:[#allocation101_spill] sm:$0xff] }
 0x2af   :  { %1382 = vmatmul.mubr.f32.vlgmr.msra.gmra.mrb[10].mxu0 %v10518_v18  ;;  %1453 = vmatmul.mubr.f32.vlgmr.msra.gmra.mrb[10].mxu1 %v10518_v18 }
 0x2b0   :  { %7379 = vmatpush1.bf16.msra.mxu0 %v12638_v55  ;;  %7411 = vmatpush1.bf16.msra.mxu1 %v12639_v28 }
 0x2b1   :  { %7381 = vmatprep.subr.bf16.mxu0 %v12640_v10  ;;  %7413 = vmatprep.subr.bf16.mxu1 %v12641_v57 }
 0x2b2   :  { %1523 = vmatprep.mubr.f32.mxu0 %v12545_v34  ;;  %1594 = vmatprep.mubr.f32.mxu1 %v12545_v34 }
 0x2b4   :  { %7383 = vmatpush1.bf16.msra.mxu0 %v12642_v20  ;;  %7415 = vmatpush1.bf16.msra.mxu1 %v12643_v45  ;;  %v12653_v20 = vld [vmem:[#allocation102_spill] sm:$0xff]  ;;  %v12654_v45 = vld [vmem:[#allocation103_spill] sm:$0xff] }
 0x2b5   :  { %7385 = vmatprep.subr.bf16.mxu0 %v12644_v19  ;;  %7417 = vmatprep.subr.bf16.mxu1 %v12645_v15  ;;  %v12655_v19 = vld [vmem:[#allocation104_spill] sm:$0xff] }
 0x2b8   :  { %7387 = vmatpush1.bf16.msra.mxu0 %v12646_v38  ;;  %7419 = vmatpush1.bf16.msra.mxu1 %v12647_v40  ;;  %v1706_v40 = vld [vmem:[#allocation8 + $0x488] sm:$0xff]  ;;  %v1708_v38 = vld [vmem:[#allocation8 + $0x498] sm:$0xff] }
 0x2b9   :  { %7389 = vmatprep.subr.bf16.mxu0 %v12648_v41  ;;  %7421 = vmatprep.subr.bf16.mxu1 %v12649_v61  ;;  %v1700_v61 = vld [vmem:[#allocation8 + $0x458] sm:$0xff] }
 0x2ba   :  { %v1704_v41 = vld [vmem:[#allocation8 + $0x478] sm:$0xff] }
 0x2bc   :  { %7391 = vmatpush1.bf16.msra.mxu0 %v12650_v26  ;;  %7423 = vmatpush1.bf16.msra.mxu1 %v12651_v58  ;;  %v1690_v58 = vld [vmem:[#allocation8 + $0x408] sm:$0xff]  ;;  %v1692_v26 = vld [vmem:[#allocation8 + $0x418] sm:$0xff] }
 0x2bd   :  { %7393 = vmatprep.subr.bf16.mxu0 %v12652_v3  ;;  %7425 = vmatprep.subr.bf16.mxu1 %v12653_v20  ;;  %v1694_v3 = vld [vmem:[#allocation8 + $0x428] sm:$0xff]  ;;  %v1696_v20 = vld [vmem:[#allocation8 + $0x438] sm:$0xff] }
 0x2c0   :  { %7395 = vmatpush1.bf16.msra.mxu0 %v12654_v45  ;;  %7427 = vmatpush1.bf16.msra.mxu1 %v12655_v19  ;;  %v1689_v19 = vld [vmem:[#allocation8 + $0x400] sm:$0xff]  ;;  %v1702_v45 = vld [vmem:[#allocation8 + $0x468] sm:$0xff] }
 0x2c1   :  { %7397 = vmatprep.subr.bf16.mxu0 %v10374_v33  ;;  %7429 = vmatprep.subr.bf16.mxu1 %v10376_v47  ;;  %v1693_v33 = vld [vmem:[#allocation8 + $0x420] sm:$0xff]  ;;  %v1698_v47 = vld [vmem:[#allocation8 + $0x448] sm:$0xff] }
 0x2c4   :  { %7399 = vmatpush1.bf16.msra.mxu0 %v10380_v48  ;;  %7431 = vmatpush1.bf16.msra.mxu1 %v10382_v44  ;;  %v10552_v48 = vpack.c.bf16 %v1694_v3, %v1690_v58  ;;  %v10554_v44 = vpack.c.bf16 %v1696_v20, %v1692_v26  ;;  %v10564_v20 = vpack.c.bf16 %v1702_v45, %v1698_v47  ;;  %v1699_v58 = vld [vmem:[#allocation8 + $0x450] sm:$0xff] }
 0x2c5   :  { %7401 = vmatprep.subr.bf16.mxu0 %v10386_v2  ;;  %7433 = vmatprep.subr.bf16.mxu1 %v10388_v1  ;;  %v1691_v2 = vld [vmem:[#allocation8 + $0x410] sm:$0xff]  ;;  %v10566_v26 = vpack.c.bf16 %v1704_v41, %v1700_v61  ;;  %v1714_v61 = vld [vmem:[#allocation8 + $0x4c8] sm:$0xff] }
 0x2c6   :  { %12656 = vst [vmem:[#allocation87_spill] sm:$0xff] %v10552_v48  ;;  %12657 = vst [vmem:[#allocation88_spill] sm:$0xff] %v10554_v44  ;;  %v1695_v1 = vld [vmem:[#allocation8 + $0x430] sm:$0xff] }
 0x2c7   :  { %12660 = vst [vmem:[#allocation120_spill] sm:$0xff] %v10564_v20  ;;  %12661 = vst [vmem:[#allocation121_spill] sm:$0xff] %v10566_v26  ;;  %v1703_v3 = vld [vmem:[#allocation8 + $0x470] sm:$0xff] }
 0x2c8   :  { %7403 = vmatpush1.bf16.msra.mxu0 %v10392_v21  ;;  %7435 = vmatpush1.bf16.msra.mxu1 %v10394_v22  ;;  %v10558_v22 = vpack.c.bf16 %v1693_v33, %v1689_v19  ;;  %v10560_v21 = vpack.c.bf16 %v1695_v1, %v1691_v2  ;;  %v10574_v47 = vpack.c.bf16 %v1703_v3, %v1699_v58  ;;  %v1705_v2 = vld [vmem:[#allocation8 + $0x480] sm:$0xff]  ;;  %v1707_v41 = vld [vmem:[#allocation8 + $0x490] sm:$0xff] }
 0x2c9   :  { %7405 = vmatprep.subr.bf16.mxu0 %v10398_v31  ;;  %7437 = vmatprep.subr.bf16.mxu1 %v10400_v16  ;;  %v1697_v31 = vld [vmem:[#allocation8 + $0x440] sm:$0xff]  ;;  %v1715_v58 = vld [vmem:[#allocation8 + $0x4d0] sm:$0xff] }
 0x2ca   :  { %12658 = vst [vmem:[#allocation89_spill] sm:$0xff] %v10558_v22  ;;  %12659 = vst [vmem:[#allocation90_spill] sm:$0xff] %v10560_v21  ;;  %v1701_v16 = vld [vmem:[#allocation8 + $0x460] sm:$0xff]  ;;  %v1719_v3 = vld [vmem:[#allocation8 + $0x4f0] sm:$0xff] }
 0x2cb   :  { %v10572_v33 = vpack.c.bf16 %v1701_v16, %v1697_v31  ;;  %12663 = vst [vmem:[#allocation123_spill] sm:$0xff] %v10574_v47  ;;  %v1709_v1 = vld [vmem:[#allocation8 + $0x4a0] sm:$0xff] }
 0x2cc   :  { %7407 = vmatpush1.bf16.msra.mxu0 %v10404_v4  ;;  %7439 = vmatpush1.bf16.msra.mxu1 %v10406_v9  ;;  %v1710_v4 = vld [vmem:[#allocation8 + $0x4a8] sm:$0xff]  ;;  %v1712_v9 = vld [vmem:[#allocation8 + $0x4b8] sm:$0xff]  ;;  %v10586_v31 = vpack.c.bf16 %v1709_v1, %v1705_v2  ;;  %v10600_v1 = vpack.c.bf16 %v1719_v3, %v1715_v58  ;;  %v1729_v58 = vld [vmem:[#allocation8 + $0x540] sm:$0xff] }
 0x2cd   :  { %7441 = vmatprep.subr.bf16.mxu0 %v10552_v48  ;;  %7473 = vmatprep.subr.bf16.mxu1 %v10554_v44  ;;  %12662 = vst [vmem:[#allocation122_spill] sm:$0xff] %v10572_v33  ;;  %v10578_v45 = vpack.c.bf16 %v1710_v4, %v1706_v40  ;;  %v10580_v19 = vpack.c.bf16 %v1712_v9, %v1708_v38  ;;  %v1716_v44 = vld [vmem:[#allocation8 + $0x4d8] sm:$0xff]  ;;  %v1713_v4 = vld [vmem:[#allocation8 + $0x4c0] sm:$0xff] }
 0x2ce   :  { %12666 = vst [vmem:[#allocation126_spill] sm:$0xff] %v10586_v31  ;;  %v1717_v9 = vld [vmem:[#allocation8 + $0x4e0] sm:$0xff]  ;;  %12671 = vst [vmem:[#allocation131_spill] sm:$0xff] %v10600_v1 }
 0x2cf   :  { %1524 = vmatmul.mubr.f32.vlgmr.msra.gmra.mrb[10].mxu0 %v10458_v30  ;;  %1595 = vmatmul.mubr.f32.vlgmr.msra.gmra.mrb[10].mxu1 %v10458_v30  ;;  %12664 = vst [vmem:[#allocation124_spill] sm:$0xff] %v10578_v45  ;;  %12665 = vst [vmem:[#allocation125_spill] sm:$0xff] %v10580_v19  ;;  %v1711_v30 = vld [vmem:[#allocation8 + $0x4b0] sm:$0xff]  ;;  %v10598_v2 = vpack.c.bf16 %v1717_v9, %v1713_v4  ;;  %v1733_v3 = vld [vmem:[#allocation8 + $0x560] sm:$0xff] }
 0x2d0   :  { %7443 = vmatpush1.bf16.msra.mxu0 %v10558_v22  ;;  %7475 = vmatpush1.bf16.msra.mxu1 %v10560_v21  ;;  %v1718_v22 = vld [vmem:[#allocation8 + $0x4e8] sm:$0xff]  ;;  %v1720_v21 = vld [vmem:[#allocation8 + $0x4f8] sm:$0xff]  ;;  %v10588_v16 = vpack.c.bf16 %v1711_v30, %v1707_v41  ;;  %v1721_v41 = vld [vmem:[#allocation8 + $0x500] sm:$0xff] }
 0x2d1   :  { %7445 = vmatprep.subr.bf16.mxu0 %v10564_v20  ;;  %7477 = vmatprep.subr.bf16.mxu1 %v10566_v26  ;;  %v10592_v38 = vpack.c.bf16 %v1718_v22, %v1714_v61  ;;  %v10594_v40 = vpack.c.bf16 %v1720_v21, %v1716_v44  ;;  %v1722_v26 = vld [vmem:[#allocation8 + $0x508] sm:$0xff]  ;;  %v1724_v20 = vld [vmem:[#allocation8 + $0x518] sm:$0xff]  ;;  %12670 = vst [vmem:[#allocation130_spill] sm:$0xff] %v10598_v2  ;;  %v1725_v30 = vld [vmem:[#allocation8 + $0x520] sm:$0xff] }
 0x2d2   :  { %1817 = vmatprep.mubr.f32.mxu0 %v12545_v34  ;;  %1888 = vmatprep.mubr.f32.mxu1 %v12545_v34  ;;  %12667 = vst [vmem:[#allocation127_spill] sm:$0xff] %v10588_v16  ;;  %v1723_v22 = vld [vmem:[#allocation8 + $0x510] sm:$0xff]  ;;  %v10610_v4 = vpack.c.bf16 %v1725_v30, %v1721_v41  ;;  %v10622_v41 = vpack.c.bf16 %v1733_v3, %v1729_v58 }
 0x2d3   :  { %12668 = vst [vmem:[#allocation128_spill] sm:$0xff] %v10592_v38  ;;  %12669 = vst [vmem:[#allocation129_spill] sm:$0xff] %v10594_v40  ;;  %v1727_v61 = vld [vmem:[#allocation8 + $0x530] sm:$0xff] }
 0x2d4   :  { %7447 = vmatpush1.bf16.msra.mxu0 %v10572_v33  ;;  %7479 = vmatpush1.bf16.msra.mxu1 %v10574_v47  ;;  %v1726_v33 = vld [vmem:[#allocation8 + $0x528] sm:$0xff]  ;;  %v1728_v47 = vld [vmem:[#allocation8 + $0x538] sm:$0xff]  ;;  %12674 = vst [vmem:[#allocation134_spill] sm:$0xff] %v10610_v4  ;;  %v10612_v9 = vpack.c.bf16 %v1727_v61, %v1723_v22  ;;  %12678 = vst [vmem:[#allocation138_spill] sm:$0xff] %v10622_v41 }
 0x2d5   :  { %7449 = vmatprep.subr.bf16.mxu0 %v10578_v45  ;;  %7481 = vmatprep.subr.bf16.mxu1 %v10580_v19  ;;  %v10604_v44 = vpack.c.bf16 %v1726_v33, %v1722_v26  ;;  %v10606_v21 = vpack.c.bf16 %v1728_v47, %v1724_v20  ;;  %v1730_v19 = vld [vmem:[#allocation8 + $0x548] sm:$0xff]  ;;  %v1732_v45 = vld [vmem:[#allocation8 + $0x558] sm:$0xff]  ;;  %v1731_v33 = vld [vmem:[#allocation8 + $0x550] sm:$0xff] }
 0x2d6   :  { %12675 = vst [vmem:[#allocation135_spill] sm:$0xff] %v10612_v9  ;;  %v1735_v47 = vld [vmem:[#allocation8 + $0x570] sm:$0xff]  ;;  %v1737_v22 = vld [vmem:[#allocation8 + $0x580] sm:$0xff] }
 0x2d7   :  { %12672 = vst [vmem:[#allocation132_spill] sm:$0xff] %v10604_v44  ;;  %12673 = vst [vmem:[#allocation133_spill] sm:$0xff] %v10606_v21  ;;  %v10624_v30 = vpack.c.bf16 %v1735_v47, %v1731_v33  ;;  %v1741_v61 = vld [vmem:[#allocation8 + $0x5a0] sm:$0xff] }
 0x2d8   :  { %7451 = vmatpush1.bf16.msra.mxu0 %v10586_v31  ;;  %7483 = vmatpush1.bf16.msra.mxu1 %v10588_v16  ;;  %v1734_v31 = vld [vmem:[#allocation8 + $0x568] sm:$0xff]  ;;  %v1736_v16 = vld [vmem:[#allocation8 + $0x578] sm:$0xff]  ;;  %v10634_v58 = vpack.c.bf16 %v1741_v61, %v1737_v22  ;;  %v1745_v33 = vld [vmem:[#allocation8 + $0x5c0] sm:$0xff] }
 0x2d9   :  { %7453 = vmatprep.subr.bf16.mxu0 %v10592_v38  ;;  %7485 = vmatprep.subr.bf16.mxu1 %v10594_v40  ;;  %v10616_v20 = vpack.c.bf16 %v1734_v31, %v1730_v19  ;;  %v10618_v26 = vpack.c.bf16 %v1736_v16, %v1732_v45  ;;  %v1738_v40 = vld [vmem:[#allocation8 + $0x588] sm:$0xff]  ;;  %v1740_v38 = vld [vmem:[#allocation8 + $0x598] sm:$0xff]  ;;  %12679 = vst [vmem:[#allocation139_spill] sm:$0xff] %v10624_v30  ;;  %v1739_v31 = vld [vmem:[#allocation8 + $0x590] sm:$0xff] }
 0x2da   :  { %v1743_v16 = vld [vmem:[#allocation8 + $0x5b0] sm:$0xff]  ;;  %12682 = vst [vmem:[#allocation142_spill] sm:$0xff] %v10634_v58  ;;  %v1749_v47 = vld [vmem:[#allocation8 + $0x5e0] sm:$0xff] }
 0x2db   :  { %12676 = vst [vmem:[#allocation136_spill] sm:$0xff] %v10616_v20  ;;  %12677 = vst [vmem:[#allocation137_spill] sm:$0xff] %v10618_v26  ;;  %v10636_v3 = vpack.c.bf16 %v1743_v16, %v1739_v31  ;;  %v10646_v22 = vpack.c.bf16 %v1749_v47, %v1745_v33  ;;  %v1624_v31 = vld [vmem:[#allocation6 + $0x400] sm:$0xff] }
 0x2dc   :  { %7455 = vmatpush1.bf16.msra.mxu0 %v10598_v2  ;;  %7487 = vmatpush1.bf16.msra.mxu1 %v10600_v1  ;;  %v1742_v2 = vld [vmem:[#allocation8 + $0x5a8] sm:$0xff]  ;;  %v1744_v1 = vld [vmem:[#allocation8 + $0x5b8] sm:$0xff]  ;;  %v1628_v16 = vld [vmem:[#allocation6 + $0x420] sm:$0xff] }
 0x2dd   :  { %7457 = vmatprep.subr.bf16.mxu0 %v10604_v44  ;;  %7489 = vmatprep.subr.bf16.mxu1 %v10606_v21  ;;  %v10628_v45 = vpack.c.bf16 %v1742_v2, %v1738_v40  ;;  %v10630_v19 = vpack.c.bf16 %v1744_v1, %v1740_v38  ;;  %v1746_v21 = vld [vmem:[#allocation8 + $0x5c8] sm:$0xff]  ;;  %v1748_v44 = vld [vmem:[#allocation8 + $0x5d8] sm:$0xff]  ;;  %12683 = vst [vmem:[#allocation143_spill] sm:$0xff] %v10636_v3  ;;  %v1747_v2 = vld [vmem:[#allocation8 + $0x5d0] sm:$0xff] }
 0x2de   :  { %v1751_v1 = vld [vmem:[#allocation8 + $0x5f0] sm:$0xff]  ;;  %12686 = vst [vmem:[#allocation146_spill] sm:$0xff] %v10646_v22  ;;  %v10658_v33 = vpack.c.bf16 %v1628_v16, %v1624_v31 }
 0x2df   :  { %12680 = vst [vmem:[#allocation140_spill] sm:$0xff] %v10628_v45  ;;  %12681 = vst [vmem:[#allocation141_spill] sm:$0xff] %v10630_v19  ;;  %v10648_v61 = vpack.c.bf16 %v1751_v1, %v1747_v2  ;;  %v1632_v2 = vld [vmem:[#allocation6 + $0x440] sm:$0xff] }
 0x2e0   :  { %7459 = vmatpush1.bf16.msra.mxu0 %v10610_v4  ;;  %7491 = vmatpush1.bf16.msra.mxu1 %v10612_v9  ;;  %v1750_v4 = vld [vmem:[#allocation8 + $0x5e8] sm:$0xff]  ;;  %v1752_v9 = vld [vmem:[#allocation8 + $0x5f8] sm:$0xff]  ;;  %12690 = vst [vmem:[#allocation150_spill] sm:$0xff] %v10658_v33  ;;  %v1636_v1 = vld [vmem:[#allocation6 + $0x460] sm:$0xff] }
 0x2e1   :  { %7461 = vmatprep.subr.bf16.mxu0 %v10616_v20  ;;  %7493 = vmatprep.subr.bf16.mxu1 %v10618_v26  ;;  %v10640_v38 = vpack.c.bf16 %v1750_v4, %v1746_v21  ;;  %v10642_v40 = vpack.c.bf16 %v1752_v9, %v1748_v44  ;;  %v1625_v26 = vld [vmem:[#allocation6 + $0x408] sm:$0xff]  ;;  %v1627_v20 = vld [vmem:[#allocation6 + $0x418] sm:$0xff]  ;;  %12687 = vst [vmem:[#allocation147_spill] sm:$0xff] %v10648_v61  ;;  %v1626_v4 = vld [vmem:[#allocation6 + $0x410] sm:$0xff] }
 0x2e2   :  { %v1630_v9 = vld [vmem:[#allocation6 + $0x430] sm:$0xff]  ;;  %v10672_v31 = vpack.c.bf16 %v1636_v1, %v1632_v2 }
 0x2e3   :  { %12684 = vst [vmem:[#allocation144_spill] sm:$0xff] %v10640_v38  ;;  %12685 = vst [vmem:[#allocation145_spill] sm:$0xff] %v10642_v40  ;;  %v10660_v47 = vpack.c.bf16 %v1630_v9, %v1626_v4  ;;  %v1642_v4 = vld [vmem:[#allocation6 + $0x490] sm:$0xff] }
 0x2e4   :  { %7463 = vmatpush1.bf16.msra.mxu0 %v10622_v41  ;;  %7495 = vmatpush1.bf16.msra.mxu1 %v10624_v30  ;;  %v1629_v41 = vld [vmem:[#allocation6 + $0x428] sm:$0xff]  ;;  %v1631_v30 = vld [vmem:[#allocation6 + $0x438] sm:$0xff]  ;;  %12694 = vst [vmem:[#allocation154_spill] sm:$0xff] %v10672_v31  ;;  %v1646_v9 = vld [vmem:[#allocation6 + $0x4b0] sm:$0xff] }
 0x2e5   :  { %7465 = vmatprep.subr.bf16.mxu0 %v10628_v45  ;;  %7497 = vmatprep.subr.bf16.mxu1 %v10630_v19  ;;  %v10652_v44 = vpack.c.bf16 %v1629_v41, %v1625_v26  ;;  %v10654_v21 = vpack.c.bf16 %v1631_v30, %v1627_v20  ;;  %v1633_v19 = vld [vmem:[#allocation6 + $0x448] sm:$0xff]  ;;  %v1635_v45 = vld [vmem:[#allocation6 + $0x458] sm:$0xff]  ;;  %12691 = vst [vmem:[#allocation151_spill] sm:$0xff] %v10660_v47  ;;  %v1634_v41 = vld [vmem:[#allocation6 + $0x450] sm:$0xff] }
 0x2e6   :  { %v1638_v30 = vld [vmem:[#allocation6 + $0x470] sm:$0xff] }
 0x2e7   :  { %12688 = vst [vmem:[#allocation148_spill] sm:$0xff] %v10652_v44  ;;  %12689 = vst [vmem:[#allocation149_spill] sm:$0xff] %v10654_v21 }
 0x2e8   :  { %7467 = vmatpush1.bf16.msra.mxu0 %v10634_v58  ;;  %7499 = vmatpush1.bf16.msra.mxu1 %v10636_v3  ;;  %v1637_v58 = vld [vmem:[#allocation6 + $0x468] sm:$0xff]  ;;  %v1639_v3 = vld [vmem:[#allocation6 + $0x478] sm:$0xff] }
 0x2e9   :  { %7469 = vmatprep.subr.bf16.mxu0 %v10640_v38  ;;  %7501 = vmatprep.subr.bf16.mxu1 %v10642_v40  ;;  %v10664_v20 = vpack.c.bf16 %v1637_v58, %v1633_v19  ;;  %v10666_v26 = vpack.c.bf16 %v1639_v3, %v1635_v45  ;;  %v1641_v40 = vld [vmem:[#allocation6 + $0x488] sm:$0xff]  ;;  %v1643_v38 = vld [vmem:[#allocation6 + $0x498] sm:$0xff]  ;;  %v10674_v19 = vpack.c.bf16 %v1638_v30, %v1634_v41  ;;  %v1640_v45 = vld [vmem:[#allocation6 + $0x480] sm:$0xff] }
 0x2ea   :  { %v1644_v58 = vld [vmem:[#allocation6 + $0x4a0] sm:$0xff]  ;;  %v1650_v41 = vld [vmem:[#allocation6 + $0x4d0] sm:$0xff] }
 0x2eb   :  { %12692 = vst [vmem:[#allocation152_spill] sm:$0xff] %v10664_v20  ;;  %12693 = vst [vmem:[#allocation153_spill] sm:$0xff] %v10666_v26  ;;  %v10686_v2 = vpack.c.bf16 %v1644_v58, %v1640_v45  ;;  %v1654_v30 = vld [vmem:[#allocation6 + $0x4f0] sm:$0xff] }
 0x2ec   :  { %7471 = vmatpush1.bf16.msra.mxu0 %v10646_v22  ;;  %7503 = vmatpush1.bf16.msra.mxu1 %v10648_v61  ;;  %v1645_v22 = vld [vmem:[#allocation6 + $0x4a8] sm:$0xff]  ;;  %v1647_v61 = vld [vmem:[#allocation6 + $0x4b8] sm:$0xff]  ;;  %12695 = vst [vmem:[#allocation155_spill] sm:$0xff] %v10674_v19  ;;  %v10700_v58 = vpack.c.bf16 %v1654_v30, %v1650_v41  ;;  %v1664_v41 = vld [vmem:[#allocation6 + $0x540] sm:$0xff] }
 0x2ed   :  { %7505 = vmatprep.subr.bf16.mxu0 %v10652_v44  ;;  %7537 = vmatprep.subr.bf16.mxu1 %v10654_v21  ;;  %v10678_v3 = vpack.c.bf16 %v1645_v22, %v1641_v40  ;;  %v10680_v16 = vpack.c.bf16 %v1647_v61, %v1643_v38  ;;  %v1649_v21 = vld [vmem:[#allocation6 + $0x4c8] sm:$0xff]  ;;  %v1651_v44 = vld [vmem:[#allocation6 + $0x4d8] sm:$0xff]  ;;  %12698 = vst [vmem:[#allocation158_spill] sm:$0xff] %v10686_v2  ;;  %v1648_v38 = vld [vmem:[#allocation6 + $0x4c0] sm:$0xff] }
 0x2ee   :  { %v10688_v40 = vpack.c.bf16 %v1646_v9, %v1642_v4  ;;  %v1652_v22 = vld [vmem:[#allocation6 + $0x4e0] sm:$0xff]  ;;  %12703 = vst [vmem:[#allocation163_spill] sm:$0xff] %v10700_v58 }
 0x2ef   :  { %1818 = vmatmul.mubr.f32.vlgmr.msra.gmra.mrb[12].mxu0 %v12545_v34  ;;  %1889 = vmatmul.mubr.f32.vlgmr.msra.gmra.mrb[12].mxu1 %v12545_v34  ;;  %12696 = vst [vmem:[#allocation156_spill] sm:$0xff] %v10678_v3  ;;  %12697 = vst [vmem:[#allocation157_spill] sm:$0xff] %v10680_v16  ;;  %v10698_v45 = vpack.c.bf16 %v1652_v22, %v1648_v38  ;;  %v1656_v4 = vld [vmem:[#allocation6 + $0x500] sm:$0xff] }
 0x2f0   :  { %7507 = vmatpush1.bf16.msra.mxu0 %v10658_v33  ;;  %7539 = vmatpush1.bf16.msra.mxu1 %v10660_v47  ;;  %v1653_v33 = vld [vmem:[#allocation6 + $0x4e8] sm:$0xff]  ;;  %v1655_v47 = vld [vmem:[#allocation6 + $0x4f8] sm:$0xff]  ;;  %12699 = vst [vmem:[#allocation159_spill] sm:$0xff] %v10688_v40  ;;  %v1660_v9 = vld [vmem:[#allocation6 + $0x520] sm:$0xff] }
 0x2f1   :  { %7509 = vmatprep.subr.bf16.mxu0 %v10664_v20  ;;  %7541 = vmatprep.subr.bf16.mxu1 %v10666_v26  ;;  %v10692_v61 = vpack.c.bf16 %v1653_v33, %v1649_v21  ;;  %v10694_v1 = vpack.c.bf16 %v1655_v47, %v1651_v44  ;;  %v1657_v26 = vld [vmem:[#allocation6 + $0x508] sm:$0xff]  ;;  %v1659_v20 = vld [vmem:[#allocation6 + $0x518] sm:$0xff]  ;;  %12702 = vst [vmem:[#allocation162_spill] sm:$0xff] %v10698_v45  ;;  %v1658_v33 = vld [vmem:[#allocation6 + $0x510] sm:$0xff] }
 0x2f2   :  { %1959 = vmatprep.mubr.f32.mxu0 %v12545_v34  ;;  %2030 = vmatprep.mubr.f32.mxu1 %v12545_v34  ;;  %v1662_v47 = vld [vmem:[#allocation6 + $0x530] sm:$0xff]  ;;  %v10710_v38 = vpack.c.bf16 %v1660_v9, %v1656_v4  ;;  %v1668_v30 = vld [vmem:[#allocation6 + $0x560] sm:$0xff] }
 0x2f3   :  { %12700 = vst [vmem:[#allocation160_spill] sm:$0xff] %v10692_v61  ;;  %12701 = vst [vmem:[#allocation161_spill] sm:$0xff] %v10694_v1  ;;  %v10712_v22 = vpack.c.bf16 %v1662_v47, %v1658_v33  ;;  %v10722_v4 = vpack.c.bf16 %v1668_v30, %v1664_v41  ;;  %v1672_v33 = vld [vmem:[#allocation6 + $0x580] sm:$0xff] }
 0x2f4   :  { %7511 = vmatpush1.bf16.msra.mxu0 %v10672_v31  ;;  %7543 = vmatpush1.bf16.msra.mxu1 %v10674_v19  ;;  %v1661_v31 = vld [vmem:[#allocation6 + $0x528] sm:$0xff]  ;;  %v1663_v19 = vld [vmem:[#allocation6 + $0x538] sm:$0xff]  ;;  %12706 = vst [vmem:[#allocation166_spill] sm:$0xff] %v10710_v38  ;;  %v1676_v47 = vld [vmem:[#allocation6 + $0x5a0] sm:$0xff] }
 0x2f5   :  { %7513 = vmatprep.subr.bf16.mxu0 %v10678_v3  ;;  %7545 = vmatprep.subr.bf16.mxu1 %v10680_v16  ;;  %v10704_v44 = vpack.c.bf16 %v1661_v31, %v1657_v26  ;;  %v10706_v21 = vpack.c.bf16 %v1663_v19, %v1659_v20  ;;  %v1665_v16 = vld [vmem:[#allocation6 + $0x548] sm:$0xff]  ;;  %v1667_v3 = vld [vmem:[#allocation6 + $0x558] sm:$0xff]  ;;  %12707 = vst [vmem:[#allocation167_spill] sm:$0xff] %v10712_v22  ;;  %v1666_v31 = vld [vmem:[#allocation6 + $0x550] sm:$0xff] }
 0x2f6   :  { %v1670_v19 = vld [vmem:[#allocation6 + $0x570] sm:$0xff]  ;;  %12710 = vst [vmem:[#allocation170_spill] sm:$0xff] %v10722_v4  ;;  %v10734_v41 = vpack.c.bf16 %v1676_v47, %v1672_v33 }
 0x2f7   :  { %12704 = vst [vmem:[#allocation164_spill] sm:$0xff] %v10704_v44  ;;  %12705 = vst [vmem:[#allocation165_spill] sm:$0xff] %v10706_v21  ;;  %v10724_v9 = vpack.c.bf16 %v1670_v19, %v1666_v31  ;;  %v1680_v31 = vld [vmem:[#allocation6 + $0x5c0] sm:$0xff]  ;;  %v1686_v19 = vld [vmem:[#allocation6 + $0x5f0] sm:$0xff] }
 0x2f8   :  { %7515 = vmatpush1.bf16.msra.mxu0 %v10686_v2  ;;  %7547 = vmatpush1.bf16.msra.mxu1 %v10688_v40  ;;  %v1669_v2 = vld [vmem:[#allocation6 + $0x568] sm:$0xff]  ;;  %v1671_v40 = vld [vmem:[#allocation6 + $0x578] sm:$0xff]  ;;  %12714 = vst [vmem:[#allocation174_spill] sm:$0xff] %v10734_v41 }
 0x2f9   :  { %7517 = vmatprep.subr.bf16.mxu0 %v10692_v61  ;;  %7549 = vmatprep.subr.bf16.mxu1 %v10694_v1  ;;  %v10716_v20 = vpack.c.bf16 %v1669_v2, %v1665_v16  ;;  %v10718_v26 = vpack.c.bf16 %v1671_v40, %v1667_v3  ;;  %v1673_v1 = vld [vmem:[#allocation6 + $0x588] sm:$0xff]  ;;  %v1675_v61 = vld [vmem:[#allocation6 + $0x598] sm:$0xff]  ;;  %12711 = vst [vmem:[#allocation171_spill] sm:$0xff] %v10724_v9  ;;  %v1674_v2 = vld [vmem:[#allocation6 + $0x590] sm:$0xff] }
 0x2fa   :  { %v1678_v40 = vld [vmem:[#allocation6 + $0x5b0] sm:$0xff] }
 0x2fb   :  { %12708 = vst [vmem:[#allocation168_spill] sm:$0xff] %v10716_v20  ;;  %12709 = vst [vmem:[#allocation169_spill] sm:$0xff] %v10718_v26  ;;  %v10736_v30 = vpack.c.bf16 %v1678_v40, %v1674_v2  ;;  %v12725_v2 = vld [vmem:[#allocation45_spill] sm:$0xff]  ;;  %v12726_v40 = vld [vmem:[#allocation46_spill] sm:$0xff] }
 0x2fc   :  { %7519 = vmatpush1.bf16.msra.mxu0 %v10698_v45  ;;  %7551 = vmatpush1.bf16.msra.mxu1 %v10700_v58  ;;  %v1677_v45 = vld [vmem:[#allocation6 + $0x5a8] sm:$0xff]  ;;  %v1679_v58 = vld [vmem:[#allocation6 + $0x5b8] sm:$0xff] }
 0x2fd   :  { %7521 = vmatprep.subr.bf16.mxu0 %v10704_v44  ;;  %7553 = vmatprep.subr.bf16.mxu1 %v10706_v21  ;;  %v10728_v3 = vpack.c.bf16 %v1677_v45, %v1673_v1  ;;  %v10730_v16 = vpack.c.bf16 %v1679_v58, %v1675_v61  ;;  %v1681_v21 = vld [vmem:[#allocation6 + $0x5c8] sm:$0xff]  ;;  %v1683_v44 = vld [vmem:[#allocation6 + $0x5d8] sm:$0xff]  ;;  %12715 = vst [vmem:[#allocation175_spill] sm:$0xff] %v10736_v30  ;;  %v1684_v45 = vld [vmem:[#allocation6 + $0x5e0] sm:$0xff] }
 0x2fe   :  { %v1682_v58 = vld [vmem:[#allocation6 + $0x5d0] sm:$0xff]  ;;  %v10746_v33 = vpack.c.bf16 %v1684_v45, %v1680_v31 }
 0x2ff   :  { %12712 = vst [vmem:[#allocation172_spill] sm:$0xff] %v10728_v3  ;;  %12713 = vst [vmem:[#allocation173_spill] sm:$0xff] %v10730_v16  ;;  %v10748_v47 = vpack.c.bf16 %v1686_v19, %v1682_v58  ;;  %v12727_v31 = vld [vmem:[#allocation51_spill] sm:$0xff]  ;;  %v12728_v58 = vld [vmem:[#allocation53_spill] sm:$0xff] }
 0x300   :  { %7523 = vmatpush1.bf16.msra.mxu0 %v10710_v38  ;;  %7555 = vmatpush1.bf16.msra.mxu1 %v10712_v22  ;;  %v1685_v38 = vld [vmem:[#allocation6 + $0x5e8] sm:$0xff]  ;;  %v1687_v22 = vld [vmem:[#allocation6 + $0x5f8] sm:$0xff]  ;;  %12718 = vst [vmem:[#allocation178_spill] sm:$0xff] %v10746_v33  ;;  %v1149_v45 = vrot.slane %v12727_v31, 2  ;;  %v1151_v19 = vrot.slane %v12728_v58, 2 }
 0x301   :  { %7525 = vmatprep.subr.bf16.mxu0 %v10716_v20  ;;  %7557 = vmatprep.subr.bf16.mxu1 %v10718_v26  ;;  %v10740_v61 = vpack.c.bf16 %v1685_v38, %v1681_v21  ;;  %v10742_v1 = vpack.c.bf16 %v1687_v22, %v1683_v44  ;;  %12719 = vst [vmem:[#allocation179_spill] sm:$0xff] %v10748_v47  ;;  %v12721_v44 = vld [vmem:[#allocation41_spill] sm:$0xff]  ;;  %v12722_v21 = vld [vmem:[#allocation42_spill] sm:$0xff]  ;;  %v12723_v38 = vld [vmem:[#allocation43_spill] sm:$0xff] }
 0x302   :  { %v12724_v22 = vld [vmem:[#allocation44_spill] sm:$0xff] }
 0x303   :  { %12716 = vst [vmem:[#allocation176_spill] sm:$0xff] %v10740_v61  ;;  %12717 = vst [vmem:[#allocation177_spill] sm:$0xff] %v10742_v1 }
 0x304   :  { %7527 = vmatpush1.bf16.msra.mxu0 %v10722_v4  ;;  %7559 = vmatpush1.bf16.msra.mxu1 %v10724_v9 }
 0x305   :  { %7529 = vmatprep.subr.bf16.mxu0 %v10728_v3  ;;  %7561 = vmatprep.subr.bf16.mxu1 %v10730_v16 }
 0x308   :  { %7531 = vmatpush1.bf16.msra.mxu0 %v10734_v41  ;;  %7563 = vmatpush1.bf16.msra.mxu1 %v10736_v30 }
 0x309   :  { %7533 = vmatprep.subr.bf16.mxu0 %v10740_v61  ;;  %7565 = vmatprep.subr.bf16.mxu1 %v10742_v1 }
 0x30c   :  { %7535 = vmatpush1.bf16.msra.mxu0 %v10746_v33  ;;  %7567 = vmatpush1.bf16.msra.mxu1 %v10748_v47 }
 0x30d   :  { %7569 = vmatprep.subr.bf16.mxu0 %v10046_v39  ;;  %7601 = vmatprep.subr.bf16.mxu1 %v10048_v43 }
 0x30f   :  { %1960 = vmatmul.mubr.f32.vlgmr.msra.gmra.mrb[12].mxu0 %v10518_v18  ;;  %2031 = vmatmul.mubr.f32.vlgmr.msra.gmra.mrb[12].mxu1 %v10518_v18  ;;  %v12720_v18 = vld [vmem:[#allocation40_spill] sm:$0xff] }
 0x310   :  { %7571 = vmatpush1.bf16.msra.mxu0 %v10050_v50  ;;  %7603 = vmatpush1.bf16.msra.mxu1 %v10053_v51 }
 0x311   :  { %7573 = vmatprep.subr.bf16.mxu0 %v10055_v52  ;;  %7605 = vmatprep.subr.bf16.mxu1 %v10058_v56 }
 0x312   :  { %2154 = vmatprep.mubr.f32.mxu0 %v12545_v34  ;;  %2225 = vmatprep.mubr.f32.mxu1 %v12545_v34 }
 0x314   :  { %7575 = vmatpush1.bf16.msra.mxu0 %v10061_v62  ;;  %7607 = vmatpush1.bf16.msra.mxu1 %v10065_v63 }
 0x315   :  { %7577 = vmatprep.subr.bf16.mxu0 %v10067_v0  ;;  %7609 = vmatprep.subr.bf16.mxu1 %v10070_v5 }
 0x318   :  { %7579 = vmatpush1.bf16.msra.mxu0 %v10075_v11  ;;  %7611 = vmatpush1.bf16.msra.mxu1 %v10079_v12 }
 0x319   :  { %7581 = vmatprep.subr.bf16.mxu0 %v10081_v13  ;;  %7613 = vmatprep.subr.bf16.mxu1 %v10084_v17 }
 0x31c   :  { %7583 = vmatpush1.bf16.msra.mxu0 %v10087_v23  ;;  %7615 = vmatpush1.bf16.msra.mxu1 %v10091_v24 }
 0x31d   :  { %7585 = vmatprep.subr.bf16.mxu0 %v10093_v25  ;;  %7617 = vmatprep.subr.bf16.mxu1 %v10096_v29 }
 0x320   :  { %7587 = vmatpush1.bf16.msra.mxu0 %v10099_v35  ;;  %7619 = vmatpush1.bf16.msra.mxu1 %v10103_v36 }
 0x321   :  { %7589 = vmatprep.subr.bf16.mxu0 %v10105_v37  ;;  %7621 = vmatprep.subr.bf16.mxu1 %v10108_v42 }
 0x324   :  { %7591 = vmatpush1.bf16.msra.mxu0 %v10111_v49  ;;  %7623 = vmatpush1.bf16.msra.mxu1 %v10115_v53  ;;  %v12730_v53 = vld [vmem:[#allocation54_spill] sm:$0xff] }
 0x325   :  { %7593 = vmatprep.subr.bf16.mxu0 %v10117_v54  ;;  %7625 = vmatprep.subr.bf16.mxu1 %v10120_v59  ;;  %v12729_v54 = vld [vmem:[#allocation52_spill] sm:$0xff] }
 0x328   :  { %7595 = vmatpush1.bf16.msra.mxu0 %v10123_v6  ;;  %7627 = vmatpush1.bf16.msra.mxu1 %v12720_v18  ;;  %v1150_v18 = vrot.slane %v12729_v54, 2 }
 0x329   :  { %7597 = vmatprep.subr.bf16.mxu0 %v12721_v44  ;;  %7629 = vmatprep.subr.bf16.mxu1 %v12722_v21  ;;  %v1152_v44 = vrot.slane %v12730_v53, 2 }
 0x32c   :  { %7599 = vmatpush1.bf16.msra.mxu0 %v12723_v38  ;;  %7631 = vmatpush1.bf16.msra.mxu1 %v12724_v22 }
 0x32d   :  { %7633 = vmatprep.subr.bf16.mxu0 %v12725_v2  ;;  %7665 = vmatprep.subr.bf16.mxu1 %v12726_v40 }
 0x342   :  { %v1223_v59 = vpop.f32.mrb[8].mxu0  ;;  %v1294_v6 = vpop.f32.mrb[8].mxu1 }
 0x343   :  { %v1224_v49 = vadd.f32 %v1223_v59, %v1149_v45  ;;  %v1295_v21 = vadd.f32 %v1294_v6, %v1151_v19  ;;  %v1225_v42 = vpop.f32.mrb[9].mxu0  ;;  %v1296_v38 = vpop.f32.mrb[9].mxu1  ;;  %v12745_v19 = vld [vmem:[#allocation72_spill] sm:$0xff] }
 0x344   :  { %v1226_v37 = vadd.f32 %v1225_v42, %v1150_v18  ;;  %v1297_v22 = vadd.f32 %v1296_v38, %v1152_v44  ;;  %v12737_v44 = vld [vmem:[#allocation64_spill] sm:$0xff]  ;;  %v12739_v38 = vld [vmem:[#allocation66_spill] sm:$0xff] }
 0x345   :  { %v1299_v36 = vmul.f32 0.5, %v1224_v49  ;;  %v1301_v40 = vmul.f32 0.5, %v1295_v21  ;;  %v12738_v21 = vld [vmem:[#allocation65_spill] sm:$0xff] }
 0x346   :  { %v1300_v2 = vmul.f32 0.5, %v1226_v37 }
 0x347   :  { %9653 = vtanh.f32 %v1299_v36 }
 0x348   :  { %9655 = vtanh.f32 %v1300_v2  ;;  %v12741_v2 = vld [vmem:[#allocation68_spill] sm:$0xff] }
 0x349   :  { %9657 = vtanh.f32 %v1297_v22  ;;  %v12740_v22 = vld [vmem:[#allocation67_spill] sm:$0xff] }
 0x34a   :  { %9659 = vtanh.f32 %v1301_v40  ;;  %v12742_v40 = vld [vmem:[#allocation69_spill] sm:$0xff] }
 0x351   :  { %v9654_v31 = vpop.eup %9653 }
 0x352   :  { %v1305_v58 = vmul.f32 0.5, %v9654_v31  ;;  %v9656_v35 = vpop.eup %9655  ;;  %v12743_v31 = vld [vmem:[#allocation70_spill] sm:$0xff] }
 0x353   :  { %v1306_v54 = vmul.f32 0.5, %v9656_v35  ;;  %v9658_v25 = vpop.eup %9657  ;;  %v12733_v35 = vld [vmem:[#allocation60_spill] sm:$0xff] }
 0x354   :  { %v1308_v29 = vadd.f32 0.5, %v1305_v58  ;;  %v9660_v37 = vpop.eup %9659  ;;  %v12744_v58 = vld [vmem:[#allocation71_spill] sm:$0xff] }
 0x355   :  { %v1309_v53 = vadd.f32 0.5, %v1306_v54  ;;  %v1307_v36 = vmul.f32 0.5, %v9660_v37  ;;  %v12735_v54 = vld [vmem:[#allocation62_spill] sm:$0xff]  ;;  %v12748_v37 = vld [vmem:[#allocation75_spill] sm:$0xff] }
 0x356   :  { %v1313_v59 = vmul.f32 %v9658_v25, %v1308_v29  ;;  %v12731_v25 = vld [vmem:[#allocation58_spill] sm:$0xff]  ;;  %v12732_v29 = vld [vmem:[#allocation59_spill] sm:$0xff] }
 0x357   :  { %v1312_v6 = vmul.f32 %v1309_v53, %v10455_v27  ;;  %v1310_v42 = vadd.f32 0.5, %v1307_v36  ;;  %v12734_v53 = vld [vmem:[#allocation61_spill] sm:$0xff]  ;;  %v12736_v27 = vld [vmem:[#allocation63_spill] sm:$0xff]  ;;  %v12749_v36 = vld [vmem:[#allocation76_spill] sm:$0xff] }
 0x359   :  { %v10797_v45 = vadd.f32 %v1313_v59, %v1312_v6  ;;  %v12746_v59 = vld [vmem:[#allocation73_spill] sm:$0xff]  ;;  %v12747_v6 = vld [vmem:[#allocation74_spill] sm:$0xff] }
 0x35b   :  { %9661 = vtanh.f32 %v10797_v45 }
 0x365   :  { %v9662_v49 = vpop.eup %9661 }
 0x366   :  { %v10800_v18 = vmul.f32 %v9662_v49, %v1310_v42  ;;  %v12750_v42 = vld [vmem:[#allocation77_spill] sm:$0xff]  ;;  %v12751_v49 = vld [vmem:[#allocation78_spill] sm:$0xff] }
 0x368   :  { %2155 = vmatmul.mubr.f32.vlgmr.msra.gmra.mrb[14].mxu0 %v10800_v18  ;;  %2226 = vmatmul.mubr.f32.vlgmr.msra.gmra.mrb[14].mxu1 %v10800_v18 }
 0x369   :  { %7635 = vmatpush1.bf16.msra.mxu0 %v10216_v32  ;;  %7667 = vmatpush1.bf16.msra.mxu1 %v12600_v14 }
 0x36a   :  { %7637 = vmatprep.subr.bf16.mxu0 %v12601_v7  ;;  %7669 = vmatprep.subr.bf16.mxu1 %v12731_v25 }
 0x36b   :  { %2314 = vmatprep.mubr.f32.mxu0 %v12545_v34  ;;  %2385 = vmatprep.mubr.f32.mxu1 %v12545_v34 }
 0x36d   :  { %7639 = vmatpush1.bf16.msra.mxu0 %v12732_v29  ;;  %7671 = vmatpush1.bf16.msra.mxu1 %v12733_v35 }
 0x36e   :  { %7641 = vmatprep.subr.bf16.mxu0 %v12734_v53  ;;  %7673 = vmatprep.subr.bf16.mxu1 %v12735_v54 }
 0x371   :  { %7643 = vmatpush1.bf16.msra.mxu0 %v12736_v27  ;;  %7675 = vmatpush1.bf16.msra.mxu1 %v12737_v44 }
 0x372   :  { %7645 = vmatprep.subr.bf16.mxu0 %v12738_v21  ;;  %7677 = vmatprep.subr.bf16.mxu1 %v12739_v38  ;;  %v12760_v38 = vld [vmem:[#allocation118_spill] sm:$0xff] }
 0x375   :  { %7647 = vmatpush1.bf16.msra.mxu0 %v12740_v22  ;;  %7679 = vmatpush1.bf16.msra.mxu1 %v12741_v2  ;;  %v12752_v2 = vld [vmem:[#allocation79_spill] sm:$0xff] }
 0x376   :  { %7649 = vmatprep.subr.bf16.mxu0 %v12742_v40  ;;  %7681 = vmatprep.subr.bf16.mxu1 %v12743_v31  ;;  %v12753_v40 = vld [vmem:[#allocation80_spill] sm:$0xff]  ;;  %v12754_v31 = vld [vmem:[#allocation81_spill] sm:$0xff] }
 0x379   :  { %7651 = vmatpush1.bf16.msra.mxu0 %v12744_v58  ;;  %7683 = vmatpush1.bf16.msra.mxu1 %v12745_v19  ;;  %v12755_v58 = vld [vmem:[#allocation82_spill] sm:$0xff]  ;;  %v12756_v19 = vld [vmem:[#allocation83_spill] sm:$0xff] }
 0x37a   :  { %7653 = vmatprep.subr.bf16.mxu0 %v12746_v59  ;;  %7685 = vmatprep.subr.bf16.mxu1 %v12747_v6  ;;  %v12757_v59 = vld [vmem:[#allocation84_spill] sm:$0xff]  ;;  %v12758_v6 = vld [vmem:[#allocation85_spill] sm:$0xff] }
 0x37d   :  { %7655 = vmatpush1.bf16.msra.mxu0 %v12748_v37  ;;  %7687 = vmatpush1.bf16.msra.mxu1 %v12749_v36  ;;  %v12759_v37 = vld [vmem:[#allocation117_spill] sm:$0xff] }
 0x37e   :  { %7657 = vmatprep.subr.bf16.mxu0 %v12750_v42  ;;  %7689 = vmatprep.subr.bf16.mxu1 %v12751_v49 }
 0x381   :  { %7659 = vmatpush1.bf16.msra.mxu0 %v12752_v2  ;;  %7691 = vmatpush1.bf16.msra.mxu1 %v12753_v40 }
 0x382   :  { %7661 = vmatprep.subr.bf16.mxu0 %v12754_v31  ;;  %7693 = vmatprep.subr.bf16.mxu1 %v12755_v58  ;;  %v12761_v58 = vld [vmem:[#allocation119_spill] sm:$0xff] }
 0x385   :  { %7663 = vmatpush1.bf16.msra.mxu0 %v12756_v19  ;;  %7695 = vmatpush1.bf16.msra.mxu1 %v12757_v59 }
 0x386   :  { %7697 = vmatprep.subr.bf16.mxu0 %v12758_v6  ;;  %7729 = vmatprep.subr.bf16.mxu1 %v12636_v46 }
 0x3a2   :  { %v1525_v36 = vpop.f32.mrb[10].mxu0  ;;  %v1596_v42 = vpop.f32.mrb[10].mxu1 }
 0x3a3   :  { %v1601_v49 = vadd.f32 %v1525_v36, %v12759_v37  ;;  %v1527_v22 = vpop.f32.mrb[11].mxu0  ;;  %v1598_v2 = vpop.f32.mrb[11].mxu1  ;;  %v1603_v59 = vadd.f32 %v1596_v42, %v10512_v8  ;;  %v12771_v42 = vld [vmem:[#allocation101_spill] sm:$0xff] }
 0x3a4   :  { %v1602_v40 = vadd.f32 %v1527_v22, %v12760_v38  ;;  %v1604_v44 = vadd.f32 %v1598_v2, %v12761_v58 }
 0x3a5   :  { %v1605_v21 = vmul.f32 0.5, %v1601_v49  ;;  %v1607_v6 = vmul.f32 0.5, %v1603_v59  ;;  %v12772_v49 = vld [vmem:[#allocation102_spill] sm:$0xff] }
 0x3a6   :  { %v1606_v31 = vmul.f32 0.5, %v1602_v40 }
 0x3a7   :  { %9663 = vtanh.f32 %v1605_v21 }
 0x3a8   :  { %9665 = vtanh.f32 %v1606_v31 }
 0x3a9   :  { %9667 = vtanh.f32 %v1604_v44 }
 0x3aa   :  { %9669 = vtanh.f32 %v1607_v6  ;;  %v12769_v6 = vld [vmem:[#allocation99_spill] sm:$0xff] }
 0x3b1   :  { %v9664_v19 = vpop.eup %9663 }
 0x3b2   :  { %v1611_v46 = vmul.f32 0.5, %v9664_v19  ;;  %v9666_v27 = vpop.eup %9665  ;;  %v12768_v19 = vld [vmem:[#allocation98_spill] sm:$0xff] }
 0x3b3   :  { %v1612_v36 = vmul.f32 0.5, %v9666_v27  ;;  %v9668_v37 = vpop.eup %9667  ;;  %v12767_v27 = vld [vmem:[#allocation97_spill] sm:$0xff] }
 0x3b4   :  { %v1614_v54 = vadd.f32 0.5, %v1611_v46  ;;  %v9670_v21 = vpop.eup %9669  ;;  %v12763_v46 = vld [vmem:[#allocation92_spill] sm:$0xff] }
 0x3b5   :  { %v1615_v53 = vadd.f32 0.5, %v1612_v36  ;;  %v1613_v44 = vmul.f32 0.5, %v9670_v21  ;;  %v12773_v36 = vld [vmem:[#allocation103_spill] sm:$0xff]  ;;  %v12775_v21 = vld [vmem:[#allocation105_spill] sm:$0xff] }
 0x3b6   :  { %v1619_v35 = vmul.f32 %v9668_v37, %v1614_v54  ;;  %v12766_v54 = vld [vmem:[#allocation96_spill] sm:$0xff] }
 0x3b7   :  { %v1618_v22 = vmul.f32 %v1615_v53, %v10515_v60  ;;  %v1616_v2 = vadd.f32 0.5, %v1613_v44  ;;  %v12762_v60 = vld [vmem:[#allocation91_spill] sm:$0xff]  ;;  %v12770_v37 = vld [vmem:[#allocation100_spill] sm:$0xff]  ;;  %v12776_v44 = vld [vmem:[#allocation106_spill] sm:$0xff] }
 0x3b8   :  { %v12765_v53 = vld [vmem:[#allocation95_spill] sm:$0xff] }
 0x3b9   :  { %v10843_v40 = vadd.f32 %v1619_v35, %v1618_v22  ;;  %v12764_v35 = vld [vmem:[#allocation93_spill] sm:$0xff]  ;;  %v12774_v22 = vld [vmem:[#allocation104_spill] sm:$0xff] }
 0x3bb   :  { %9671 = vtanh.f32 %v10843_v40 }
 0x3c5   :  { %v9672_v31 = vpop.eup %9671 }
 0x3c6   :  { %v10846_v59 = vmul.f32 %v9672_v31, %v1616_v2  ;;  %v6927_v2 = vld [vmem:[%s12081_s3 + $0x8] sm:$0xf]  ;;  %v12777_v31 = vld [vmem:[#allocation107_spill] sm:$0xff] }
 0x3c8   :  { %2315 = vmatmul.mubr.f32.vlgmr.msra.gmra.mrb[16].mxu0 %v10846_v59  ;;  %2386 = vmatmul.mubr.f32.vlgmr.msra.gmra.mrb[16].mxu1 %v10846_v59 }
 0x3c9   :  { %7699 = vmatpush1.bf16.msra.mxu0 %v12638_v55  ;;  %7731 = vmatpush1.bf16.msra.mxu1 %v12639_v28 }
 0x3ca   :  { %7701 = vmatprep.subr.bf16.mxu0 %v12640_v10  ;;  %7733 = vmatprep.subr.bf16.mxu1 %v12641_v57 }
 0x3cb   :  { %2456 = vmatprep.mubr.f32.mxu0 %v12545_v34  ;;  %2527 = vmatprep.mubr.f32.mxu1 %v12545_v34 }
 0x3cd   :  { %7703 = vmatpush1.bf16.msra.mxu0 %v12762_v60  ;;  %7735 = vmatpush1.bf16.msra.mxu1 %v12763_v46 }
 0x3ce   :  { %7705 = vmatprep.subr.bf16.mxu0 %v12764_v35  ;;  %7737 = vmatprep.subr.bf16.mxu1 %v12645_v15  ;;  %v12789_v35 = vld [vmem:[#allocation113_spill] sm:$0xff] }
 0x3d1   :  { %7707 = vmatpush1.bf16.msra.mxu0 %v12765_v53  ;;  %7739 = vmatpush1.bf16.msra.mxu1 %v12766_v54  ;;  %v12787_v53 = vld [vmem:[#allocation50_spill] sm:$0xff] }
 0x3d2   :  { %7709 = vmatprep.subr.bf16.mxu0 %v12767_v27  ;;  %7741 = vmatprep.subr.bf16.mxu1 %v12768_v19 }
 0x3d5   :  { %7711 = vmatpush1.bf16.msra.mxu0 %v12769_v6  ;;  %7743 = vmatpush1.bf16.msra.mxu1 %v12770_v37  ;;  %v12778_v6 = vld [vmem:[#allocation108_spill] sm:$0xff]  ;;  %v12779_v37 = vld [vmem:[#allocation47_spill] sm:$0xff] }
 0x3d6   :  { %7713 = vmatprep.subr.bf16.mxu0 %v12771_v42  ;;  %7745 = vmatprep.subr.bf16.mxu1 %v12772_v49  ;;  %v10878_v42 = vrot.slane %v6927_v2, %v12779_v37  ;;  %v12781_v49 = vld [vmem:[#allocation109_spill] sm:$0xff] }
 0x3d8   :  { %12780 = vst [vmem:[#allocation118_spill] sm:$0xff] %v10878_v42 }
 0x3d9   :  { %7715 = vmatpush1.bf16.msra.mxu0 %v12773_v36  ;;  %7747 = vmatpush1.bf16.msra.mxu1 %v12774_v22  ;;  %v12782_v36 = vld [vmem:[#allocation110_spill] sm:$0xff]  ;;  %v12783_v22 = vld [vmem:[#allocation48_spill] sm:$0xff] }
 0x3da   :  { %7717 = vmatprep.subr.bf16.mxu0 %v12775_v21  ;;  %7749 = vmatprep.subr.bf16.mxu1 %v12776_v44  ;;  %v10883_v19 = vrot.slane %v6927_v2, %v12783_v22  ;;  %v12785_v21 = vld [vmem:[#allocation111_spill] sm:$0xff]  ;;  %v12786_v44 = vld [vmem:[#allocation112_spill] sm:$0xff] }
 0x3dc   :  { %12784 = vst [vmem:[#allocation119_spill] sm:$0xff] %v10883_v19 }
 0x3dd   :  { %7719 = vmatpush1.bf16.msra.mxu0 %v12777_v31  ;;  %7751 = vmatpush1.bf16.msra.mxu1 %v12778_v6  ;;  %v10888_v31 = vrot.slane %v6927_v2, %v12787_v53 }
 0x3de   :  { %7721 = vmatprep.subr.bf16.mxu0 %v12781_v49  ;;  %7753 = vmatprep.subr.bf16.mxu1 %v12782_v36  ;;  %v12790_v49 = vld [vmem:[#allocation114_spill] sm:$0xff] }
 0x3df   :  { %12788 = vst [vmem:[#allocation47_spill] sm:$0xff] %v10888_v31 }
 0x3e1   :  { %7723 = vmatpush1.bf16.msra.mxu0 %v12785_v21  ;;  %7755 = vmatpush1.bf16.msra.mxu1 %v12786_v44  ;;  %v12791_v21 = vld [vmem:[#allocation115_spill] sm:$0xff]  ;;  %v12792_v44 = vld [vmem:[#allocation116_spill] sm:$0xff] }
 0x3e2   :  { %v1961_v27 = vpop.f32.mrb[12].mxu0  ;;  %v2032_v54 = vpop.f32.mrb[12].mxu1  ;;  %7725 = vmatprep.subr.bf16.mxu0 %v12789_v35  ;;  %7757 = vmatprep.subr.bf16.mxu1 %v12790_v49 }
 0x3e3   :  { %v2060_v6 = vadd.f32 %v10878_v42, %v1961_v27  ;;  %v1963_v37 = vpop.f32.mrb[13].mxu0  ;;  %v2034_v15 = vpop.f32.mrb[13].mxu1  ;;  %v12793_v27 = vld [vmem:[#allocation88_spill] sm:$0xff]  ;;  %v12794_v42 = vld [vmem:[#allocation49_spill] sm:$0xff] }
 0x3e4   :  { %v2061_v22 = vadd.f32 %v10883_v19, %v1963_v37  ;;  %v2063_v53 = vadd.f32 %v10888_v31, %v2034_v15  ;;  %v10900_v60 = vrot.slane %v6927_v2, %v12794_v42  ;;  %v12797_v37 = vld [vmem:[#allocation90_spill] sm:$0xff]  ;;  %v12799_v15 = vld [vmem:[#allocation121_spill] sm:$0xff]  ;;  %v12801_v42 = vld [vmem:[#allocation123_spill] sm:$0xff] }
 0x3e5   :  { %v2064_v36 = vmul.f32 0.5, %v2060_v6  ;;  %7727 = vmatpush1.bf16.msra.mxu0 %v12791_v21  ;;  %7759 = vmatpush1.bf16.msra.mxu1 %v12792_v44  ;;  %v12796_v6 = vld [vmem:[#allocation89_spill] sm:$0xff]  ;;  %v12808_v44 = vld [vmem:[#allocation130_spill] sm:$0xff] }
 0x3e6   :  { %v2065_v46 = vmul.f32 0.5, %v2061_v22  ;;  %7761 = vmatprep.subr.bf16.mxu0 %v10552_v48  ;;  %7793 = vmatprep.subr.bf16.mxu1 %v12793_v27  ;;  %12795 = vst [vmem:[#allocation48_spill] sm:$0xff] %v10900_v60  ;;  %v2062_v22 = vadd.f32 %v10900_v60, %v2032_v54  ;;  %v12803_v2 = vld [vmem:[#allocation125_spill] sm:$0xff]  ;;  %v12806_v60 = vld [vmem:[#allocation128_spill] sm:$0xff] }
 0x3e7   :  { %9673 = vtanh.f32 %v2064_v36  ;;  %v12798_v36 = vld [vmem:[#allocation120_spill] sm:$0xff]  ;;  %v12807_v27 = vld [vmem:[#allocation129_spill] sm:$0xff] }
 0x3e8   :  { %9675 = vtanh.f32 %v2065_v46  ;;  %2457 = vmatmul.mubr.f32.vlgmr.msra.gmra.mrb[16].mxu0 %v10800_v18  ;;  %2528 = vmatmul.mubr.f32.vlgmr.msra.gmra.mrb[16].mxu1 %v10800_v18  ;;  %v12800_v46 = vld [vmem:[#allocation122_spill] sm:$0xff]  ;;  %v12802_v18 = vld [vmem:[#allocation124_spill] sm:$0xff] }
 0x3e9   :  { %7763 = vmatpush1.bf16.msra.mxu0 %v12796_v6  ;;  %7795 = vmatpush1.bf16.msra.mxu1 %v12797_v37  ;;  %9677 = vtanh.f32 %v2063_v53  ;;  %v2066_v37 = vmul.f32 0.5, %v2062_v22  ;;  %v12809_v22 = vld [vmem:[#allocation131_spill] sm:$0xff] }
 0x3ea   :  { %7765 = vmatprep.subr.bf16.mxu0 %v12798_v36  ;;  %7797 = vmatprep.subr.bf16.mxu1 %v12799_v15  ;;  %v12804_v36 = vld [vmem:[#allocation126_spill] sm:$0xff]  ;;  %v12805_v15 = vld [vmem:[#allocation127_spill] sm:$0xff] }
 0x3eb   :  { %2620 = vmatprep.mubr.f32.mxu0 %v12545_v34  ;;  %2691 = vmatprep.mubr.f32.mxu1 %v12545_v34  ;;  %9679 = vtanh.f32 %v2066_v37  ;;  %v12816_v37 = vld [vmem:[#allocation137_spill] sm:$0xff] }
 0x3ed   :  { %7767 = vmatpush1.bf16.msra.mxu0 %v12800_v46  ;;  %7799 = vmatpush1.bf16.msra.mxu1 %v12801_v42 }
 0x3ee   :  { %7769 = vmatprep.subr.bf16.mxu0 %v12802_v18  ;;  %7801 = vmatprep.subr.bf16.mxu1 %v12803_v2 }
 0x3f1   :  { %v9674_v53 = vpop.eup %9673  ;;  %7771 = vmatpush1.bf16.msra.mxu0 %v12804_v36  ;;  %7803 = vmatpush1.bf16.msra.mxu1 %v12805_v15  ;;  %v12811_v36 = vld [vmem:[#allocation133_spill] sm:$0xff] }
 0x3f2   :  { %v2070_v6 = vmul.f32 0.5, %v9674_v53  ;;  %v9676_v54 = vpop.eup %9675  ;;  %7773 = vmatprep.subr.bf16.mxu0 %v12806_v60  ;;  %7805 = vmatprep.subr.bf16.mxu1 %v12807_v27  ;;  %v12810_v53 = vld [vmem:[#allocation132_spill] sm:$0xff]  ;;  %v12813_v60 = vld [vmem:[#allocation134_spill] sm:$0xff]  ;;  %v12814_v27 = vld [vmem:[#allocation135_spill] sm:$0xff] }
 0x3f3   :  { %v2071_v46 = vmul.f32 0.5, %v9676_v54  ;;  %v9678_v42 = vpop.eup %9677  ;;  %v12819_v54 = vld [vmem:[#allocation140_spill] sm:$0xff] }
 0x3f4   :  { %v2073_v48 = vadd.f32 0.5, %v2070_v6  ;;  %v12815_v6 = vld [vmem:[#allocation136_spill] sm:$0xff] }
 0x3f5   :  { %v2074_v31 = vadd.f32 0.5, %v2071_v46  ;;  %7775 = vmatpush1.bf16.msra.mxu0 %v12808_v44  ;;  %7807 = vmatpush1.bf16.msra.mxu1 %v12809_v22  ;;  %v12817_v46 = vld [vmem:[#allocation138_spill] sm:$0xff] }
 0x3f6   :  { %v2078_v18 = vmul.f32 %v9678_v42, %v2073_v48  ;;  %7777 = vmatprep.subr.bf16.mxu0 %v12810_v53  ;;  %7809 = vmatprep.subr.bf16.mxu1 %v12811_v36  ;;  %v9680_v48 = vpop.eup %9679  ;;  %v12818_v42 = vld [vmem:[#allocation139_spill] sm:$0xff]  ;;  %v12825_v36 = vld [vmem:[#allocation146_spill] sm:$0xff] }
 0x3f7   :  { %v2077_v15 = vmul.f32 0.0, %v2074_v31  ;;  %v12820_v31 = vld [vmem:[#allocation141_spill] sm:$0xff] }
 0x3f9   :  { %v10923_v2 = vadd.f32 %v2078_v18, %v2077_v15  ;;  %7779 = vmatpush1.bf16.msra.mxu0 %v12813_v60  ;;  %7811 = vmatpush1.bf16.msra.mxu1 %v12814_v27  ;;  %v2072_v15 = vmul.f32 0.5, %v9680_v48  ;;  %v12821_v18 = vld [vmem:[#allocation142_spill] sm:$0xff]  ;;  %v12822_v60 = vld [vmem:[#allocation143_spill] sm:$0xff]  ;;  %v12823_v27 = vld [vmem:[#allocation144_spill] sm:$0xff] }
 0x3fa   :  { %7781 = vmatprep.subr.bf16.mxu0 %v12815_v6  ;;  %7813 = vmatprep.subr.bf16.mxu1 %v12816_v37  ;;  %v12824_v6 = vld [vmem:[#allocation145_spill] sm:$0xff]  ;;  %v12829_v48 = vld [vmem:[#allocation150_spill] sm:$0xff] }
 0x3fb   :  { %12812 = vst [vmem:[#allocation50_spill] sm:$0xff] %v10923_v2  ;;  %9681 = vtanh.f32 %v10923_v2  ;;  %v2075_v37 = vadd.f32 0.5, %v2072_v15  ;;  %v12833_v15 = vld [vmem:[#allocation154_spill] sm:$0xff] }
 0x3fd   :  { %7783 = vmatpush1.bf16.msra.mxu0 %v12817_v46  ;;  %7815 = vmatpush1.bf16.msra.mxu1 %v12818_v42  ;;  %v12826_v46 = vld [vmem:[#allocation147_spill] sm:$0xff]  ;;  %v12827_v42 = vld [vmem:[#allocation148_spill] sm:$0xff] }
 0x3fe   :  { %7785 = vmatprep.subr.bf16.mxu0 %v12819_v54  ;;  %7817 = vmatprep.subr.bf16.mxu1 %v12820_v31  ;;  %v12828_v54 = vld [vmem:[#allocation149_spill] sm:$0xff] }
 0x401   :  { %7787 = vmatpush1.bf16.msra.mxu0 %v12821_v18  ;;  %7819 = vmatpush1.bf16.msra.mxu1 %v12822_v60  ;;  %v12830_v60 = vld [vmem:[#allocation151_spill] sm:$0xff] }
 0x402   :  { %7789 = vmatprep.subr.bf16.mxu0 %v12823_v27  ;;  %7821 = vmatprep.subr.bf16.mxu1 %v12824_v6  ;;  %v12831_v27 = vld [vmem:[#allocation152_spill] sm:$0xff]  ;;  %v12832_v6 = vld [vmem:[#allocation153_spill] sm:$0xff] }
 0x405   :  { %v9682_v2 = vpop.eup %9681  ;;  %7791 = vmatpush1.bf16.msra.mxu0 %v12825_v36  ;;  %7823 = vmatpush1.bf16.msra.mxu1 %v12826_v46  ;;  %v12843_v46 = vld [vmem:[#allocation164_spill] sm:$0xff] }
 0x406   :  { %7825 = vmatprep.subr.bf16.mxu0 %v12827_v42  ;;  %7857 = vmatprep.subr.bf16.mxu1 %v12828_v54  ;;  %v2081_v31 = vmul.f32 %v9682_v2, %v2075_v37  ;;  %v12834_v42 = vld [vmem:[#allocation155_spill] sm:$0xff]  ;;  %v12835_v54 = vld [vmem:[#allocation156_spill] sm:$0xff]  ;;  %v12836_v2 = vld [vmem:[#allocation157_spill] sm:$0xff] }
 0x407   :  { %v12837_v37 = vld [vmem:[#allocation158_spill] sm:$0xff] }
 0x408   :  { %2621 = vmatmul.mubr.f32.vlgmr.msra.gmra.mrb[18].mxu0 %v2081_v31  ;;  %2692 = vmatmul.mubr.f32.vlgmr.msra.gmra.mrb[18].mxu1 %v2081_v31  ;;  %v12838_v31 = vld [vmem:[#allocation159_spill] sm:$0xff] }
 0x409   :  { %7827 = vmatpush1.bf16.msra.mxu0 %v12829_v48  ;;  %7859 = vmatpush1.bf16.msra.mxu1 %v12830_v60  ;;  %v12839_v60 = vld [vmem:[#allocation160_spill] sm:$0xff]  ;;  %v12842_v48 = vld [vmem:[#allocation163_spill] sm:$0xff] }
 0x40a   :  { %7829 = vmatprep.subr.bf16.mxu0 %v12831_v27  ;;  %7861 = vmatprep.subr.bf16.mxu1 %v12832_v6  ;;  %v12840_v27 = vld [vmem:[#allocation161_spill] sm:$0xff]  ;;  %v12841_v6 = vld [vmem:[#allocation162_spill] sm:$0xff] }
 0x40b   :  { %2762 = vmatprep.mubr.f32.mxu0 %v12545_v34  ;;  %2833 = vmatprep.mubr.f32.mxu1 %v12545_v34 }
 0x40d   :  { %7831 = vmatpush1.bf16.msra.mxu0 %v12833_v15  ;;  %7863 = vmatpush1.bf16.msra.mxu1 %v12834_v42  ;;  %v12844_v15 = vld [vmem:[#allocation165_spill] sm:$0xff]  ;;  %v12845_v42 = vld [vmem:[#allocation166_spill] sm:$0xff] }
 0x40e   :  { %7833 = vmatprep.subr.bf16.mxu0 %v12835_v54  ;;  %7865 = vmatprep.subr.bf16.mxu1 %v12836_v2  ;;  %v12846_v54 = vld [vmem:[#allocation167_spill] sm:$0xff] }
 0x411   :  { %7835 = vmatpush1.bf16.msra.mxu0 %v12837_v37  ;;  %7867 = vmatpush1.bf16.msra.mxu1 %v12838_v31 }
 0x412   :  { %7837 = vmatprep.subr.bf16.mxu0 %v12839_v60  ;;  %7869 = vmatprep.subr.bf16.mxu1 %v12840_v27 }
 0x415   :  { %7839 = vmatpush1.bf16.msra.mxu0 %v12841_v6  ;;  %7871 = vmatpush1.bf16.msra.mxu1 %v12842_v48 }
 0x416   :  { %7841 = vmatprep.subr.bf16.mxu0 %v12843_v46  ;;  %7873 = vmatprep.subr.bf16.mxu1 %v12844_v15 }
 0x419   :  { %7843 = vmatpush1.bf16.msra.mxu0 %v12845_v42  ;;  %7875 = vmatpush1.bf16.msra.mxu1 %v12846_v54 }
 0x41a   :  { %7845 = vmatprep.subr.bf16.mxu0 %v10716_v20  ;;  %7877 = vmatprep.subr.bf16.mxu1 %v10718_v26 }
 0x41d   :  { %7847 = vmatpush1.bf16.msra.mxu0 %v10722_v4  ;;  %7879 = vmatpush1.bf16.msra.mxu1 %v10724_v9 }
 0x41e   :  { %7849 = vmatprep.subr.bf16.mxu0 %v10728_v3  ;;  %7881 = vmatprep.subr.bf16.mxu1 %v10730_v16  ;;  %v12862_v16 = vld [vmem:[#allocation40_spill] sm:$0xff] }
 0x421   :  { %7851 = vmatpush1.bf16.msra.mxu0 %v10734_v41  ;;  %7883 = vmatpush1.bf16.msra.mxu1 %v10736_v30  ;;  %v12861_v41 = vld [vmem:[#allocation39_spill] sm:$0xff] }
 0x422   :  { %7853 = vmatprep.subr.bf16.mxu0 %v10740_v61  ;;  %7885 = vmatprep.subr.bf16.mxu1 %v10742_v1  ;;  %v12858_v1 = vld [vmem:[#allocation36_spill] sm:$0xff] }
 0x425   :  { %7855 = vmatpush1.bf16.msra.mxu0 %v10746_v33  ;;  %7887 = vmatpush1.bf16.msra.mxu1 %v10748_v47  ;;  %v12857_v33 = vld [vmem:[#allocation35_spill] sm:$0xff] }
 0x426   :  { %7889 = vmatprep.subr.bf16.mxu0 %v10046_v39  ;;  %7921 = vmatprep.subr.bf16.mxu1 %v10048_v43 }
 0x428   :  { %2763 = vmatmul.mubr.f32.vlgmr.msra.gmra.mrb[18].mxu0 %v10846_v59  ;;  %2834 = vmatmul.mubr.f32.vlgmr.msra.gmra.mrb[18].mxu1 %v10846_v59  ;;  %v12847_v59 = vld [vmem:[#allocation29_spill] sm:$0xff] }
 0x429   :  { %7891 = vmatpush1.bf16.msra.mxu0 %v10050_v50  ;;  %7923 = vmatpush1.bf16.msra.mxu1 %v10053_v51  ;;  %v12855_v51 = vld [vmem:[#allocation52_spill] sm:$0xff]  ;;  %v12856_v50 = vld [vmem:[#allocation54_spill] sm:$0xff] }
 0x42a   :  { %7893 = vmatprep.subr.bf16.mxu0 %v10055_v52  ;;  %7925 = vmatprep.subr.bf16.mxu1 %v10058_v56  ;;  %v12852_v56 = vld [vmem:[#allocation53_spill] sm:$0xff] }
 0x42b   :  { %2934 = vmatprep.mubr.f32.mxu0 %v12545_v34  ;;  %3005 = vmatprep.mubr.f32.mxu1 %v12545_v34  ;;  %v12853_v52 = vld [vmem:[#allocation33_spill] sm:$0xff] }
 0x42d   :  { %7895 = vmatpush1.bf16.msra.mxu0 %v10061_v62  ;;  %7927 = vmatpush1.bf16.msra.mxu1 %v10065_v63  ;;  %v12848_v62 = vld [vmem:[#allocation30_spill] sm:$0xff]  ;;  %v12849_v63 = vld [vmem:[#allocation31_spill] sm:$0xff] }
 0x42e   :  { %7897 = vmatprep.subr.bf16.mxu0 %v10067_v0  ;;  %7929 = vmatprep.subr.bf16.mxu1 %v10070_v5  ;;  %v12850_v0 = vld [vmem:[#allocation32_spill] sm:$0xff]  ;;  %v12851_v5 = vld [vmem:[#allocation51_spill] sm:$0xff] }
 0x431   :  { %7899 = vmatpush1.bf16.msra.mxu0 %v10075_v11  ;;  %7931 = vmatpush1.bf16.msra.mxu1 %v10079_v12  ;;  %v2082_v11 = vrot.slane %v12851_v5, 3  ;;  %v2084_v12 = vrot.slane %v12852_v56, 3 }
 0x432   :  { %7901 = vmatprep.subr.bf16.mxu0 %v10081_v13  ;;  %7933 = vmatprep.subr.bf16.mxu1 %v10084_v17  ;;  %v12854_v13 = vld [vmem:[#allocation34_spill] sm:$0xff] }
 0x435   :  { %7903 = vmatpush1.bf16.msra.mxu0 %v10087_v23  ;;  %7935 = vmatpush1.bf16.msra.mxu1 %v10091_v24  ;;  %v2083_v24 = vrot.slane %v12855_v51, 3 }
 0x436   :  { %7905 = vmatprep.subr.bf16.mxu0 %v12847_v59  ;;  %7937 = vmatprep.subr.bf16.mxu1 %v12848_v62  ;;  %v2085_v59 = vrot.slane %v12856_v50, 3 }
 0x439   :  { %7907 = vmatpush1.bf16.msra.mxu0 %v12849_v63  ;;  %7939 = vmatpush1.bf16.msra.mxu1 %v12850_v0 }
 0x43a   :  { %7909 = vmatprep.subr.bf16.mxu0 %v12853_v52  ;;  %7941 = vmatprep.subr.bf16.mxu1 %v12854_v13  ;;  %v12859_v52 = vld [vmem:[#allocation37_spill] sm:$0xff]  ;;  %v12860_v13 = vld [vmem:[#allocation38_spill] sm:$0xff] }
 0x43b   :  { %v2156_v17 = vpop.f32.mrb[14].mxu0  ;;  %v2227_v23 = vpop.f32.mrb[14].mxu1 }
 0x43c   :  { %v2157_v43 = vadd.f32 %v2156_v17, %v2082_v11  ;;  %v2228_v62 = vadd.f32 %v2227_v23, %v2084_v12  ;;  %v2158_v39 = vpop.f32.mrb[15].mxu0  ;;  %v2229_v63 = vpop.f32.mrb[15].mxu1  ;;  %v12863_v11 = vld [vmem:[#allocation41_spill] sm:$0xff]  ;;  %v12866_v12 = vld [vmem:[#allocation44_spill] sm:$0xff]  ;;  %v12868_v17 = vld [vmem:[#allocation46_spill] sm:$0xff] }
 0x43d   :  { %v2159_v47 = vadd.f32 %v2158_v39, %v2083_v24  ;;  %v2230_v0 = vadd.f32 %v2229_v63, %v2085_v59  ;;  %7911 = vmatpush1.bf16.msra.mxu0 %v12857_v33  ;;  %7943 = vmatpush1.bf16.msra.mxu1 %v12858_v1  ;;  %v12864_v39 = vld [vmem:[#allocation42_spill] sm:$0xff]  ;;  %v12865_v63 = vld [vmem:[#allocation43_spill] sm:$0xff] }
 0x43e   :  { %v2232_v61 = vmul.f32 0.5, %v2157_v43  ;;  %7913 = vmatprep.subr.bf16.mxu0 %v12859_v52  ;;  %7945 = vmatprep.subr.bf16.mxu1 %v12860_v13  ;;  %v12867_v43 = vld [vmem:[#allocation45_spill] sm:$0xff]  ;;  %v2234_v23 = vmul.f32 0.5, %v2228_v62 }
 0x43f   :  { %v2233_v30 = vmul.f32 0.5, %v2159_v47 }
 0x440   :  { %9683 = vtanh.f32 %v2232_v61 }
 0x441   :  { %7915 = vmatpush1.bf16.msra.mxu0 %v12861_v41  ;;  %7947 = vmatpush1.bf16.msra.mxu1 %v12862_v16  ;;  %9685 = vtanh.f32 %v2233_v30 }
 0x442   :  { %7917 = vmatprep.subr.bf16.mxu0 %v12863_v11  ;;  %7949 = vmatprep.subr.bf16.mxu1 %v12864_v39  ;;  %9687 = vtanh.f32 %v2230_v0 }
 0x443   :  { %9689 = vtanh.f32 %v2234_v23  ;;  %v12877_v23 = vld [vmem:[#allocation68_spill] sm:$0xff] }
 0x445   :  { %7919 = vmatpush1.bf16.msra.mxu0 %v12865_v63  ;;  %7951 = vmatpush1.bf16.msra.mxu1 %v12866_v12 }
 0x446   :  { %7953 = vmatprep.subr.bf16.mxu0 %v12867_v43  ;;  %7985 = vmatprep.subr.bf16.mxu1 %v12868_v17 }
 0x44a   :  { %v9684_v24 = vpop.eup %9683 }
 0x44b   :  { %v2238_v61 = vmul.f32 0.5, %v9684_v24  ;;  %v9686_v47 = vpop.eup %9685  ;;  %v12878_v24 = vld [vmem:[#allocation69_spill] sm:$0xff] }
 0x44c   :  { %v2239_v30 = vmul.f32 0.5, %v9686_v47  ;;  %v9688_v16 = vpop.eup %9687  ;;  %v12880_v47 = vld [vmem:[#allocation71_spill] sm:$0xff] }
 0x44d   :  { %v2241_v59 = vadd.f32 0.5, %v2238_v61  ;;  %v9690_v12 = vpop.eup %9689  ;;  %v12879_v61 = vld [vmem:[#allocation70_spill] sm:$0xff] }
 0x44e   :  { %v2242_v11 = vadd.f32 0.5, %v2239_v30  ;;  %v2240_v43 = vmul.f32 0.5, %v9690_v12  ;;  %v12874_v12 = vld [vmem:[#allocation65_spill] sm:$0xff] }
 0x44f   :  { %v2246_v41 = vmul.f32 %v9688_v16, %v2241_v59  ;;  %v12869_v16 = vld [vmem:[#allocation60_spill] sm:$0xff]  ;;  %v12882_v30 = vld [vmem:[#allocation73_spill] sm:$0xff] }
 0x450   :  { %v2245_v0 = vmul.f32 %v2242_v11, %v10797_v45  ;;  %v2243_v63 = vadd.f32 0.5, %v2240_v43  ;;  %v12871_v45 = vld [vmem:[#allocation62_spill] sm:$0xff]  ;;  %v12872_v11 = vld [vmem:[#allocation63_spill] sm:$0xff]  ;;  %v12881_v59 = vld [vmem:[#allocation72_spill] sm:$0xff] }
 0x451   :  { %v12875_v43 = vld [vmem:[#allocation66_spill] sm:$0xff] }
 0x452   :  { %v11017_v39 = vadd.f32 %v2246_v41, %v2245_v0  ;;  %v12870_v41 = vld [vmem:[#allocation61_spill] sm:$0xff]  ;;  %v12883_v0 = vld [vmem:[#allocation74_spill] sm:$0xff] }
 0x454   :  { %9691 = vtanh.f32 %v11017_v39 }
 0x45e   :  { %v9692_v17 = vpop.eup %9691 }
 0x45f   :  { %v11020_v62 = vmul.f32 %v9692_v17, %v2243_v63  ;;  %v12873_v63 = vld [vmem:[#allocation64_spill] sm:$0xff]  ;;  %v12876_v17 = vld [vmem:[#allocation67_spill] sm:$0xff] }
 0x461   :  { %2935 = vmatmul.mubr.f32.vlgmr.msra.gmra.mrb[20].mxu0 %v11020_v62  ;;  %3006 = vmatmul.mubr.f32.vlgmr.msra.gmra.mrb[20].mxu1 %v11020_v62 }
 0x462   :  { %7955 = vmatpush1.bf16.msra.mxu0 %v10216_v32  ;;  %7987 = vmatpush1.bf16.msra.mxu1 %v12600_v14 }
 0x463   :  { %7957 = vmatprep.subr.bf16.mxu0 %v12601_v7  ;;  %7989 = vmatprep.subr.bf16.mxu1 %v12731_v25 }
 0x464   :  { %3094 = vmatprep.mubr.f32.mxu0 %v12545_v34  ;;  %3165 = vmatprep.mubr.f32.mxu1 %v12545_v34 }
 0x466   :  { %7959 = vmatpush1.bf16.msra.mxu0 %v12732_v29  ;;  %7991 = vmatpush1.bf16.msra.mxu1 %v12869_v16 }
 0x467   :  { %7961 = vmatprep.subr.bf16.mxu0 %v12870_v41  ;;  %7993 = vmatprep.subr.bf16.mxu1 %v12871_v45 }
 0x46a   :  { %7963 = vmatpush1.bf16.msra.mxu0 %v12872_v11  ;;  %7995 = vmatpush1.bf16.msra.mxu1 %v12873_v63  ;;  %v12884_v63 = vld [vmem:[#allocation75_spill] sm:$0xff]  ;;  %v12896_v11 = vld [vmem:[#allocation117_spill] sm:$0xff] }
 0x46b   :  { %7965 = vmatprep.subr.bf16.mxu0 %v12874_v12  ;;  %7997 = vmatprep.subr.bf16.mxu1 %v12875_v43  ;;  %v12885_v12 = vld [vmem:[#allocation76_spill] sm:$0xff]  ;;  %v12886_v43 = vld [vmem:[#allocation77_spill] sm:$0xff] }
 0x46e   :  { %7967 = vmatpush1.bf16.msra.mxu0 %v12876_v17  ;;  %7999 = vmatpush1.bf16.msra.mxu1 %v12877_v23  ;;  %v12887_v17 = vld [vmem:[#allocation78_spill] sm:$0xff]  ;;  %v12888_v23 = vld [vmem:[#allocation79_spill] sm:$0xff] }
 0x46f   :  { %7969 = vmatprep.subr.bf16.mxu0 %v12878_v24  ;;  %8001 = vmatprep.subr.bf16.mxu1 %v12879_v61  ;;  %v12889_v24 = vld [vmem:[#allocation80_spill] sm:$0xff]  ;;  %v12890_v61 = vld [vmem:[#allocation81_spill] sm:$0xff] }
 0x472   :  { %7971 = vmatpush1.bf16.msra.mxu0 %v12880_v47  ;;  %8003 = vmatpush1.bf16.msra.mxu1 %v12881_v59  ;;  %v12891_v47 = vld [vmem:[#allocation82_spill] sm:$0xff]  ;;  %v12892_v59 = vld [vmem:[#allocation83_spill] sm:$0xff] }
 0x473   :  { %7973 = vmatprep.subr.bf16.mxu0 %v12882_v30  ;;  %8005 = vmatprep.subr.bf16.mxu1 %v12883_v0  ;;  %v12893_v30 = vld [vmem:[#allocation84_spill] sm:$0xff]  ;;  %v12894_v0 = vld [vmem:[#allocation85_spill] sm:$0xff] }
 0x476   :  { %7975 = vmatpush1.bf16.msra.mxu0 %v12884_v63  ;;  %8007 = vmatpush1.bf16.msra.mxu1 %v12885_v12  ;;  %v12895_v63 = vld [vmem:[#allocation86_spill] sm:$0xff] }
 0x477   :  { %7977 = vmatprep.subr.bf16.mxu0 %v12886_v43  ;;  %8009 = vmatprep.subr.bf16.mxu1 %v12887_v17 }
 0x47a   :  { %7979 = vmatpush1.bf16.msra.mxu0 %v12888_v23  ;;  %8011 = vmatpush1.bf16.msra.mxu1 %v12889_v24 }
 0x47b   :  { %7981 = vmatprep.subr.bf16.mxu0 %v12890_v61  ;;  %8013 = vmatprep.subr.bf16.mxu1 %v12891_v47 }
 0x47e   :  { %7983 = vmatpush1.bf16.msra.mxu0 %v12892_v59  ;;  %8015 = vmatpush1.bf16.msra.mxu1 %v12893_v30 }
 0x47f   :  { %8017 = vmatprep.subr.bf16.mxu0 %v12894_v0  ;;  %8049 = vmatprep.subr.bf16.mxu1 %v12895_v63 }
 0x4bb   :  { %v2458_v12 = vpop.f32.mrb[16].mxu0  ;;  %v2529_v43 = vpop.f32.mrb[16].mxu1 }
 0x4bc   :  { %v2534_v17 = vadd.f32 %v2458_v12, %v12896_v11  ;;  %v2460_v45 = vpop.f32.mrb[17].mxu0  ;;  %v2531_v23 = vpop.f32.mrb[17].mxu1  ;;  %v2536_v30 = vadd.f32 %v2529_v43, %v10512_v8 }
 0x4bd   :  { %v2535_v24 = vadd.f32 %v2460_v45, %v12760_v38  ;;  %v2537_v47 = vadd.f32 %v2531_v23, %v12761_v58 }
 0x4be   :  { %v2538_v41 = vmul.f32 0.5, %v2534_v17  ;;  %v2540_v0 = vmul.f32 0.5, %v2536_v30  ;;  %v12906_v30 = vld [vmem:[#allocation100_spill] sm:$0xff] }
 0x4bf   :  { %v2539_v61 = vmul.f32 0.5, %v2535_v24 }
 0x4c0   :  { %9693 = vtanh.f32 %v2538_v41 }
 0x4c1   :  { %9695 = vtanh.f32 %v2539_v61 }
 0x4c2   :  { %9697 = vtanh.f32 %v2537_v47  ;;  %v12904_v47 = vld [vmem:[#allocation98_spill] sm:$0xff] }
 0x4c3   :  { %9699 = vtanh.f32 %v2540_v0  ;;  %v12907_v0 = vld [vmem:[#allocation101_spill] sm:$0xff] }
 0x4ca   :  { %v9694_v59 = vpop.eup %9693 }
 0x4cb   :  { %v2544_v63 = vmul.f32 0.5, %v9694_v59  ;;  %v9696_v16 = vpop.eup %9695  ;;  %v12905_v59 = vld [vmem:[#allocation99_spill] sm:$0xff] }
 0x4cc   :  { %v2545_v12 = vmul.f32 0.5, %v9696_v16  ;;  %v9698_v11 = vpop.eup %9697  ;;  %v12901_v16 = vld [vmem:[#allocation95_spill] sm:$0xff] }
 0x4cd   :  { %v2547_v29 = vadd.f32 0.5, %v2544_v63  ;;  %v9700_v41 = vpop.eup %9699  ;;  %v12903_v63 = vld [vmem:[#allocation97_spill] sm:$0xff] }
 0x4ce   :  { %v2548_v25 = vadd.f32 0.5, %v2545_v12  ;;  %v2546_v23 = vmul.f32 0.5, %v9700_v41  ;;  %v12908_v12 = vld [vmem:[#allocation102_spill] sm:$0xff]  ;;  %v12910_v41 = vld [vmem:[#allocation104_spill] sm:$0xff] }
 0x4cf   :  { %v2552_v7 = vmul.f32 %v9698_v11, %v2547_v29  ;;  %v12899_v29 = vld [vmem:[#allocation93_spill] sm:$0xff]  ;;  %v12902_v11 = vld [vmem:[#allocation96_spill] sm:$0xff] }
 0x4d0   :  { %v2551_v45 = vmul.f32 %v2548_v25, %v10843_v40  ;;  %v2549_v24 = vadd.f32 0.5, %v2546_v23  ;;  %v12898_v25 = vld [vmem:[#allocation92_spill] sm:$0xff]  ;;  %v12900_v40 = vld [vmem:[#allocation94_spill] sm:$0xff]  ;;  %v12911_v23 = vld [vmem:[#allocation105_spill] sm:$0xff] }
 0x4d2   :  { %v11063_v17 = vadd.f32 %v2552_v7, %v2551_v45  ;;  %v12897_v7 = vld [vmem:[#allocation91_spill] sm:$0xff] }
 0x4d3   :  { %v12909_v45 = vld [vmem:[#allocation103_spill] sm:$0xff] }
 0x4d4   :  { %9701 = vtanh.f32 %v11063_v17 }
 0x4de   :  { %v9702_v43 = vpop.eup %9701 }
 0x4df   :  { %v11066_v61 = vmul.f32 %v9702_v43, %v2549_v24  ;;  %v12912_v24 = vld [vmem:[#allocation106_spill] sm:$0xff]  ;;  %v12913_v43 = vld [vmem:[#allocation107_spill] sm:$0xff] }
 0x4e1   :  { %3095 = vmatmul.mubr.f32.vlgmr.msra.gmra.mrb[22].mxu0 %v11066_v61  ;;  %3166 = vmatmul.mubr.f32.vlgmr.msra.gmra.mrb[22].mxu1 %v11066_v61 }
 0x4e2   :  { %8019 = vmatpush1.bf16.msra.mxu0 %v12638_v55  ;;  %8051 = vmatpush1.bf16.msra.mxu1 %v12639_v28 }
 0x4e3   :  { %8021 = vmatprep.subr.bf16.mxu0 %v12640_v10  ;;  %8053 = vmatprep.subr.bf16.mxu1 %v12641_v57 }
 0x4e4   :  { %3236 = vmatprep.mubr.f32.mxu0 %v12545_v34  ;;  %3307 = vmatprep.mubr.f32.mxu1 %v12545_v34 }
 0x4e6   :  { %8023 = vmatpush1.bf16.msra.mxu0 %v12897_v7  ;;  %8055 = vmatpush1.bf16.msra.mxu1 %v12898_v25 }
 0x4e7   :  { %8025 = vmatprep.subr.bf16.mxu0 %v12899_v29  ;;  %8057 = vmatprep.subr.bf16.mxu1 %v12900_v40 }
 0x4ea   :  { %8027 = vmatpush1.bf16.msra.mxu0 %v12901_v16  ;;  %8059 = vmatpush1.bf16.msra.mxu1 %v12902_v11  ;;  %v12919_v11 = vld [vmem:[#allocation118_spill] sm:$0xff] }
 0x4eb   :  { %8029 = vmatprep.subr.bf16.mxu0 %v12903_v63  ;;  %8061 = vmatprep.subr.bf16.mxu1 %v12904_v47  ;;  %v12914_v63 = vld [vmem:[#allocation108_spill] sm:$0xff]  ;;  %v12915_v47 = vld [vmem:[#allocation109_spill] sm:$0xff] }
 0x4ee   :  { %8031 = vmatpush1.bf16.msra.mxu0 %v12905_v59  ;;  %8063 = vmatpush1.bf16.msra.mxu1 %v12906_v30  ;;  %v12916_v59 = vld [vmem:[#allocation110_spill] sm:$0xff]  ;;  %v12917_v30 = vld [vmem:[#allocation111_spill] sm:$0xff] }
 0x4ef   :  { %8033 = vmatprep.subr.bf16.mxu0 %v12907_v0  ;;  %8065 = vmatprep.subr.bf16.mxu1 %v12908_v12  ;;  %v12918_v0 = vld [vmem:[#allocation112_spill] sm:$0xff] }
 0x4f2   :  { %8035 = vmatpush1.bf16.msra.mxu0 %v12909_v45  ;;  %8067 = vmatpush1.bf16.msra.mxu1 %v12910_v41 }
 0x4f3   :  { %8037 = vmatprep.subr.bf16.mxu0 %v12911_v23  ;;  %8069 = vmatprep.subr.bf16.mxu1 %v12912_v24  ;;  %v12922_v24 = vld [vmem:[#allocation87_spill] sm:$0xff] }
 0x4f6   :  { %8039 = vmatpush1.bf16.msra.mxu0 %v12913_v43  ;;  %8071 = vmatpush1.bf16.msra.mxu1 %v12914_v63 }
 0x4f7   :  { %8041 = vmatprep.subr.bf16.mxu0 %v12915_v47  ;;  %8073 = vmatprep.subr.bf16.mxu1 %v12916_v59  ;;  %v12920_v59 = vld [vmem:[#allocation116_spill] sm:$0xff] }
 0x4fa   :  { %8043 = vmatpush1.bf16.msra.mxu0 %v12917_v30  ;;  %8075 = vmatpush1.bf16.msra.mxu1 %v12918_v0  ;;  %v12921_v0 = vld [vmem:[#allocation47_spill] sm:$0xff] }
 0x4fb   :  { %v2764_v12 = vpop.f32.mrb[18].mxu0  ;;  %v2835_v45 = vpop.f32.mrb[18].mxu1  ;;  %8045 = vmatprep.subr.bf16.mxu0 %v12789_v35  ;;  %8077 = vmatprep.subr.bf16.mxu1 %v12790_v49  ;;  %v12924_v49 = vld [vmem:[#allocation89_spill] sm:$0xff] }
 0x4fc   :  { %v2840_v41 = vadd.f32 %v2764_v12, %v12919_v11  ;;  %v2766_v16 = vpop.f32.mrb[19].mxu0  ;;  %v2837_v23 = vpop.f32.mrb[19].mxu1  ;;  %v12923_v12 = vld [vmem:[#allocation88_spill] sm:$0xff] }
 0x4fd   :  { %v2841_v63 = vadd.f32 %v2766_v16, %v10883_v19  ;;  %v2843_v30 = vadd.f32 %v2837_v23, %v12921_v0  ;;  %v12925_v16 = vld [vmem:[#allocation90_spill] sm:$0xff]  ;;  %v12936_v0 = vld [vmem:[#allocation129_spill] sm:$0xff] }
 0x4fe   :  { %v2844_v43 = vmul.f32 0.5, %v2840_v41  ;;  %8047 = vmatpush1.bf16.msra.mxu0 %v12791_v21  ;;  %8079 = vmatpush1.bf16.msra.mxu1 %v12920_v59  ;;  %v12927_v41 = vld [vmem:[#allocation121_spill] sm:$0xff] }
 0x4ff   :  { %v2845_v47 = vmul.f32 0.5, %v2841_v63  ;;  %8081 = vmatprep.subr.bf16.mxu0 %v12922_v24  ;;  %8113 = vmatprep.subr.bf16.mxu1 %v12923_v12  ;;  %v12926_v63 = vld [vmem:[#allocation120_spill] sm:$0xff]  ;;  %v12930_v12 = vld [vmem:[#allocation123_spill] sm:$0xff] }
 0x500   :  { %9703 = vtanh.f32 %v2844_v43  ;;  %v12928_v43 = vld [vmem:[#allocation48_spill] sm:$0xff] }
 0x501   :  { %9705 = vtanh.f32 %v2845_v47  ;;  %3237 = vmatmul.mubr.f32.vlgmr.msra.gmra.mrb[22].mxu0 %v11020_v62  ;;  %3308 = vmatmul.mubr.f32.vlgmr.msra.gmra.mrb[22].mxu1 %v11020_v62  ;;  %v2842_v23 = vadd.f32 %v2835_v45, %v12928_v43  ;;  %v12929_v47 = vld [vmem:[#allocation122_spill] sm:$0xff]  ;;  %v12931_v62 = vld [vmem:[#allocation124_spill] sm:$0xff] }
 0x502   :  { %8083 = vmatpush1.bf16.msra.mxu0 %v12924_v49  ;;  %8115 = vmatpush1.bf16.msra.mxu1 %v12925_v16  ;;  %9707 = vtanh.f32 %v2843_v30  ;;  %v12932_v49 = vld [vmem:[#allocation125_spill] sm:$0xff]  ;;  %v12935_v43 = vld [vmem:[#allocation128_spill] sm:$0xff] }
 0x503   :  { %8085 = vmatprep.subr.bf16.mxu0 %v12926_v63  ;;  %8117 = vmatprep.subr.bf16.mxu1 %v12927_v41  ;;  %v2846_v16 = vmul.f32 0.5, %v2842_v23  ;;  %v12933_v63 = vld [vmem:[#allocation126_spill] sm:$0xff]  ;;  %v12934_v41 = vld [vmem:[#allocation127_spill] sm:$0xff]  ;;  %v12937_v23 = vld [vmem:[#allocation133_spill] sm:$0xff] }
 0x504   :  { %3400 = vmatprep.mubr.f32.mxu0 %v12545_v34  ;;  %3471 = vmatprep.mubr.f32.mxu1 %v12545_v34 }
 0x505   :  { %9709 = vtanh.f32 %v2846_v16  ;;  %v12941_v16 = vld [vmem:[#allocation136_spill] sm:$0xff] }
 0x506   :  { %8087 = vmatpush1.bf16.msra.mxu0 %v12929_v47  ;;  %8119 = vmatpush1.bf16.msra.mxu1 %v12930_v12 }
 0x507   :  { %8089 = vmatprep.subr.bf16.mxu0 %v12931_v62  ;;  %8121 = vmatprep.subr.bf16.mxu1 %v12932_v49 }
 0x50a   :  { %v9704_v30 = vpop.eup %9703  ;;  %8091 = vmatpush1.bf16.msra.mxu0 %v12933_v63  ;;  %8123 = vmatpush1.bf16.msra.mxu1 %v12934_v41 }
 0x50b   :  { %v2850_v24 = vmul.f32 0.5, %v9704_v30  ;;  %v9706_v45 = vpop.eup %9705  ;;  %8093 = vmatprep.subr.bf16.mxu0 %v12935_v43  ;;  %8125 = vmatprep.subr.bf16.mxu1 %v12936_v0  ;;  %v12938_v30 = vld [vmem:[#allocation50_spill] sm:$0xff] }
 0x50c   :  { %v2851_v47 = vmul.f32 0.5, %v9706_v45  ;;  %v9708_v12 = vpop.eup %9707  ;;  %v12939_v43 = vld [vmem:[#allocation134_spill] sm:$0xff]  ;;  %v12944_v45 = vld [vmem:[#allocation139_spill] sm:$0xff] }
 0x50d   :  { %v2853_v59 = vadd.f32 0.5, %v2850_v24  ;;  %v12940_v24 = vld [vmem:[#allocation135_spill] sm:$0xff] }
 0x50e   :  { %v2854_v21 = vadd.f32 0.5, %v2851_v47  ;;  %8095 = vmatpush1.bf16.msra.mxu0 %v12808_v44  ;;  %8127 = vmatpush1.bf16.msra.mxu1 %v12809_v22  ;;  %v12942_v47 = vld [vmem:[#allocation137_spill] sm:$0xff] }
 0x50f   :  { %v2858_v62 = vmul.f32 %v9708_v12, %v2853_v59  ;;  %8097 = vmatprep.subr.bf16.mxu0 %v12810_v53  ;;  %8129 = vmatprep.subr.bf16.mxu1 %v12937_v23  ;;  %v9710_v59 = vpop.eup %9709  ;;  %v12943_v12 = vld [vmem:[#allocation138_spill] sm:$0xff]  ;;  %v12945_v23 = vld [vmem:[#allocation140_spill] sm:$0xff] }
 0x510   :  { %v2857_v41 = vmul.f32 %v2854_v21, %v12938_v30  ;;  %v12946_v21 = vld [vmem:[#allocation141_spill] sm:$0xff]  ;;  %v12948_v30 = vld [vmem:[#allocation144_spill] sm:$0xff] }
 0x512   :  { %v11129_v63 = vadd.f32 %v2858_v62, %v2857_v41  ;;  %8099 = vmatpush1.bf16.msra.mxu0 %v12939_v43  ;;  %8131 = vmatpush1.bf16.msra.mxu1 %v12940_v24  ;;  %v2852_v41 = vmul.f32 0.5, %v9710_v59  ;;  %v12947_v62 = vld [vmem:[#allocation143_spill] sm:$0xff]  ;;  %v12953_v59 = vld [vmem:[#allocation150_spill] sm:$0xff] }
 0x513   :  { %8101 = vmatprep.subr.bf16.mxu0 %v12941_v16  ;;  %8133 = vmatprep.subr.bf16.mxu1 %v12942_v47  ;;  %v12949_v16 = vld [vmem:[#allocation145_spill] sm:$0xff] }
 0x514   :  { %9711 = vtanh.f32 %v11129_v63  ;;  %v2855_v47 = vadd.f32 0.5, %v2852_v41  ;;  %v12957_v41 = vld [vmem:[#allocation154_spill] sm:$0xff] }
 0x516   :  { %8103 = vmatpush1.bf16.msra.mxu0 %v12943_v12  ;;  %8135 = vmatpush1.bf16.msra.mxu1 %v12944_v45  ;;  %v12950_v12 = vld [vmem:[#allocation147_spill] sm:$0xff]  ;;  %v12951_v45 = vld [vmem:[#allocation148_spill] sm:$0xff] }
 0x517   :  { %8105 = vmatprep.subr.bf16.mxu0 %v12945_v23  ;;  %8137 = vmatprep.subr.bf16.mxu1 %v12946_v21  ;;  %v12952_v23 = vld [vmem:[#allocation149_spill] sm:$0xff] }
 0x51a   :  { %8107 = vmatpush1.bf16.msra.mxu0 %v12821_v18  ;;  %8139 = vmatpush1.bf16.msra.mxu1 %v12947_v62  ;;  %v12954_v62 = vld [vmem:[#allocation151_spill] sm:$0xff] }
 0x51b   :  { %8109 = vmatprep.subr.bf16.mxu0 %v12948_v30  ;;  %8141 = vmatprep.subr.bf16.mxu1 %v12949_v16  ;;  %v12955_v30 = vld [vmem:[#allocation152_spill] sm:$0xff]  ;;  %v12956_v16 = vld [vmem:[#allocation153_spill] sm:$0xff] }
 0x51e   :  { %v9712_v24 = vpop.eup %9711  ;;  %8111 = vmatpush1.bf16.msra.mxu0 %v12825_v36  ;;  %8143 = vmatpush1.bf16.msra.mxu1 %v12950_v12 }
 0x51f   :  { %8145 = vmatprep.subr.bf16.mxu0 %v12951_v45  ;;  %8177 = vmatprep.subr.bf16.mxu1 %v12952_v23  ;;  %v2861_v21 = vmul.f32 %v9712_v24, %v2855_v47  ;;  %v12958_v45 = vld [vmem:[#allocation155_spill] sm:$0xff]  ;;  %v12959_v23 = vld [vmem:[#allocation156_spill] sm:$0xff]  ;;  %v2862_v24 = vrot.slane %v12851_v5, 4  ;;  %v2864_v47 = vrot.slane %v12852_v56, 4 }
 0x521   :  { %3401 = vmatmul.mubr.f32.vlgmr.msra.gmra.mrb[24].mxu0 %v2861_v21  ;;  %3472 = vmatmul.mubr.f32.vlgmr.msra.gmra.mrb[24].mxu1 %v2861_v21 }
 0x522   :  { %8147 = vmatpush1.bf16.msra.mxu0 %v12953_v59  ;;  %8179 = vmatpush1.bf16.msra.mxu1 %v12954_v62 }
 0x523   :  { %8149 = vmatprep.subr.bf16.mxu0 %v12955_v30  ;;  %8181 = vmatprep.subr.bf16.mxu1 %v12956_v16 }
 0x524   :  { %3542 = vmatprep.mubr.f32.mxu0 %v12545_v34  ;;  %3613 = vmatprep.mubr.f32.mxu1 %v12545_v34 }
 0x526   :  { %8151 = vmatpush1.bf16.msra.mxu0 %v12957_v41  ;;  %8183 = vmatpush1.bf16.msra.mxu1 %v12958_v45 }
 0x527   :  { %8153 = vmatprep.subr.bf16.mxu0 %v12959_v23  ;;  %8185 = vmatprep.subr.bf16.mxu1 %v12836_v2  ;;  %v12961_v2 = vld [vmem:[#allocation174_spill] sm:$0xff]  ;;  %v12962_v23 = vld [vmem:[#allocation175_spill] sm:$0xff] }
 0x52a   :  { %8155 = vmatpush1.bf16.msra.mxu0 %v12837_v37  ;;  %8187 = vmatpush1.bf16.msra.mxu1 %v12838_v31  ;;  %v12960_v31 = vld [vmem:[#allocation173_spill] sm:$0xff] }
 0x52b   :  { %8157 = vmatprep.subr.bf16.mxu0 %v12839_v60  ;;  %8189 = vmatprep.subr.bf16.mxu1 %v12840_v27 }
 0x52e   :  { %8159 = vmatpush1.bf16.msra.mxu0 %v12841_v6  ;;  %8191 = vmatpush1.bf16.msra.mxu1 %v12842_v48  ;;  %v2863_v48 = vrot.slane %v12855_v51, 4 }
 0x52f   :  { %8161 = vmatprep.subr.bf16.mxu0 %v12843_v46  ;;  %8193 = vmatprep.subr.bf16.mxu1 %v12844_v15  ;;  %v2865_v46 = vrot.slane %v12856_v50, 4 }
 0x532   :  { %8163 = vmatpush1.bf16.msra.mxu0 %v12845_v42  ;;  %8195 = vmatpush1.bf16.msra.mxu1 %v12846_v54 }
 0x533   :  { %8165 = vmatprep.subr.bf16.mxu0 %v10716_v20  ;;  %8197 = vmatprep.subr.bf16.mxu1 %v10718_v26 }
 0x534   :  { %v2936_v21 = vpop.f32.mrb[20].mxu0  ;;  %v3007_v6 = vpop.f32.mrb[20].mxu1 }
 0x535   :  { %v2937_v27 = vadd.f32 %v2936_v21, %v2862_v24  ;;  %v3008_v15 = vadd.f32 %v3007_v6, %v2864_v47  ;;  %v2938_v60 = vpop.f32.mrb[21].mxu0  ;;  %v3009_v42 = vpop.f32.mrb[21].mxu1  ;;  %v12963_v6 = vld [vmem:[#allocation176_spill] sm:$0xff]  ;;  %v12964_v24 = vld [vmem:[#allocation177_spill] sm:$0xff]  ;;  %v12965_v47 = vld [vmem:[#allocation178_spill] sm:$0xff] }
 0x536   :  { %8167 = vmatpush1.bf16.msra.mxu0 %v10722_v4  ;;  %8199 = vmatpush1.bf16.msra.mxu1 %v10724_v9  ;;  %v2939_v20 = vadd.f32 %v2938_v60, %v2863_v48  ;;  %v3010_v26 = vadd.f32 %v3009_v42, %v2865_v46  ;;  %v12966_v60 = vld [vmem:[#allocation179_spill] sm:$0xff]  ;;  %v12968_v46 = vld [vmem:[#allocation14_spill] sm:$0xff]  ;;  %v12970_v42 = vld [vmem:[#allocation16_spill] sm:$0xff] }
 0x537   :  { %v3012_v54 = vmul.f32 0.5, %v2937_v27  ;;  %8169 = vmatprep.subr.bf16.mxu0 %v10728_v3  ;;  %8201 = vmatprep.subr.bf16.mxu1 %v12960_v31  ;;  %v12967_v27 = vld [vmem:[#allocation13_spill] sm:$0xff] }
 0x538   :  { %v3013_v37 = vmul.f32 0.5, %v2939_v20  ;;  %v12969_v20 = vld [vmem:[#allocation15_spill] sm:$0xff]  ;;  %v12971_v48 = vld [vmem:[#allocation17_spill] sm:$0xff] }
 0x539   :  { %9713 = vtanh.f32 %v3012_v54 }
 0x53a   :  { %8171 = vmatpush1.bf16.msra.mxu0 %v12961_v2  ;;  %8203 = vmatpush1.bf16.msra.mxu1 %v12962_v23  ;;  %9715 = vtanh.f32 %v3013_v37  ;;  %v12978_v23 = vld [vmem:[#allocation24_spill] sm:$0xff] }
 0x53b   :  { %8173 = vmatprep.subr.bf16.mxu0 %v12963_v6  ;;  %8205 = vmatprep.subr.bf16.mxu1 %v12964_v24  ;;  %9717 = vtanh.f32 %v3010_v26  ;;  %v12972_v26 = vld [vmem:[#allocation18_spill] sm:$0xff]  ;;  %v12977_v6 = vld [vmem:[#allocation23_spill] sm:$0xff] }
 0x53e   :  { %8175 = vmatpush1.bf16.msra.mxu0 %v12965_v47  ;;  %8207 = vmatpush1.bf16.msra.mxu1 %v12966_v60  ;;  %v12973_v60 = vld [vmem:[#allocation19_spill] sm:$0xff]  ;;  %v12975_v47 = vld [vmem:[#allocation21_spill] sm:$0xff] }
 0x53f   :  { %8209 = vmatprep.subr.bf16.mxu0 %v12967_v27  ;;  %8241 = vmatprep.subr.bf16.mxu1 %v12968_v46 }
 0x541   :  { %3543 = vmatmul.mubr.f32.vlgmr.msra.gmra.mrb[24].mxu0 %v11066_v61  ;;  %3614 = vmatmul.mubr.f32.vlgmr.msra.gmra.mrb[24].mxu1 %v11066_v61  ;;  %v12974_v61 = vld [vmem:[#allocation20_spill] sm:$0xff] }
 0x542   :  { %8211 = vmatpush1.bf16.msra.mxu0 %v12969_v20  ;;  %8243 = vmatpush1.bf16.msra.mxu1 %v12970_v42  ;;  %v12976_v42 = vld [vmem:[#allocation22_spill] sm:$0xff] }
 0x543   :  { %v9714_v54 = vpop.eup %9713  ;;  %8213 = vmatprep.subr.bf16.mxu0 %v12971_v48  ;;  %8245 = vmatprep.subr.bf16.mxu1 %v12972_v26  ;;  %v3014_v48 = vmul.f32 0.5, %v3008_v15  ;;  %v12983_v15 = vld [vmem:[#allocation29_spill] sm:$0xff] }
 0x544   :  { %v3018_v37 = vmul.f32 0.5, %v9714_v54  ;;  %3714 = vmatprep.mubr.f32.mxu0 %v12545_v34  ;;  %3785 = vmatprep.mubr.f32.mxu1 %v12545_v34  ;;  %v9716_v21 = vpop.eup %9715 }
 0x545   :  { %v3019_v27 = vmul.f32 0.5, %v9716_v21  ;;  %v9718_v20 = vpop.eup %9717  ;;  %v12980_v21 = vld [vmem:[#allocation26_spill] sm:$0xff]  ;;  %9719 = vtanh.f32 %v3014_v48 }
 0x546   :  { %v3021_v46 = vadd.f32 0.5, %v3018_v37  ;;  %8215 = vmatpush1.bf16.msra.mxu0 %v12973_v60  ;;  %8247 = vmatpush1.bf16.msra.mxu1 %v12974_v61  ;;  %v12979_v37 = vld [vmem:[#allocation25_spill] sm:$0xff]  ;;  %v12981_v60 = vld [vmem:[#allocation27_spill] sm:$0xff] }
 0x547   :  { %8217 = vmatprep.subr.bf16.mxu0 %v12975_v47  ;;  %8249 = vmatprep.subr.bf16.mxu1 %v12976_v42  ;;  %v3022_v24 = vadd.f32 0.5, %v3019_v27  ;;  %v12982_v47 = vld [vmem:[#allocation28_spill] sm:$0xff]  ;;  %v12984_v27 = vld [vmem:[#allocation30_spill] sm:$0xff] }
 0x548   :  { %v3026_v26 = vmul.f32 %v9718_v20, %v3021_v46  ;;  %v12987_v46 = vld [vmem:[#allocation33_spill] sm:$0xff]  ;;  %v12988_v20 = vld [vmem:[#allocation34_spill] sm:$0xff] }
 0x549   :  { %v3025_v54 = vmul.f32 %v3022_v24, %v11017_v39  ;;  %v12985_v39 = vld [vmem:[#allocation31_spill] sm:$0xff]  ;;  %v12986_v24 = vld [vmem:[#allocation32_spill] sm:$0xff] }
 0x54a   :  { %8219 = vmatpush1.bf16.msra.mxu0 %v12977_v6  ;;  %8251 = vmatpush1.bf16.msra.mxu1 %v12978_v23 }
 0x54b   :  { %8221 = vmatprep.subr.bf16.mxu0 %v12979_v37  ;;  %8253 = vmatprep.subr.bf16.mxu1 %v12980_v21  ;;  %v11203_v61 = vadd.f32 %v3026_v26, %v3025_v54  ;;  %v12989_v54 = vld [vmem:[#allocation39_spill] sm:$0xff] }
 0x54d   :  { %9721 = vtanh.f32 %v11203_v61 }
 0x54e   :  { %8223 = vmatpush1.bf16.msra.mxu0 %v12981_v60  ;;  %8255 = vmatpush1.bf16.msra.mxu1 %v12982_v47 }
 0x54f   :  { %8225 = vmatprep.subr.bf16.mxu0 %v12983_v15  ;;  %8257 = vmatprep.subr.bf16.mxu1 %v12984_v27  ;;  %v9720_v48 = vpop.eup %9719  ;;  %v12990_v27 = vld [vmem:[#allocation40_spill] sm:$0xff]  ;;  %v12993_v15 = vld [vmem:[#allocation43_spill] sm:$0xff] }
 0x550   :  { %v3020_v26 = vmul.f32 0.5, %v9720_v48  ;;  %v12997_v48 = vld [vmem:[#allocation57_spill] sm:$0xff] }
 0x552   :  { %8227 = vmatpush1.bf16.msra.mxu0 %v12985_v39  ;;  %8259 = vmatpush1.bf16.msra.mxu1 %v12986_v24  ;;  %v12991_v39 = vld [vmem:[#allocation41_spill] sm:$0xff]  ;;  %v12992_v24 = vld [vmem:[#allocation42_spill] sm:$0xff] }
 0x553   :  { %8229 = vmatprep.subr.bf16.mxu0 %v12987_v46  ;;  %8261 = vmatprep.subr.bf16.mxu1 %v12988_v20  ;;  %v3023_v20 = vadd.f32 0.5, %v3020_v26  ;;  %v12998_v26 = vld [vmem:[#allocation58_spill] sm:$0xff] }
 0x556   :  { %8231 = vmatpush1.bf16.msra.mxu0 %v12857_v33  ;;  %8263 = vmatpush1.bf16.msra.mxu1 %v12858_v1  ;;  %v12994_v33 = vld [vmem:[#allocation44_spill] sm:$0xff] }
 0x557   :  { %8233 = vmatprep.subr.bf16.mxu0 %v12859_v52  ;;  %8265 = vmatprep.subr.bf16.mxu1 %v12860_v13  ;;  %v9722_v46 = vpop.eup %9721  ;;  %v12995_v52 = vld [vmem:[#allocation45_spill] sm:$0xff]  ;;  %v12996_v13 = vld [vmem:[#allocation46_spill] sm:$0xff] }
 0x558   :  { %v11224_v1 = vmul.f32 %v9722_v46, %v3023_v20  ;;  %v12999_v46 = vld [vmem:[#allocation59_spill] sm:$0xff]  ;;  %v13000_v20 = vld [vmem:[#allocation60_spill] sm:$0xff] }
 0x55a   :  { %8235 = vmatpush1.bf16.msra.mxu0 %v12989_v54  ;;  %8267 = vmatpush1.bf16.msra.mxu1 %v12990_v27 }
 0x55b   :  { %8237 = vmatprep.subr.bf16.mxu0 %v12991_v39  ;;  %8269 = vmatprep.subr.bf16.mxu1 %v12992_v24  ;;  %v13009_v24 = vld [vmem:[#allocation69_spill] sm:$0xff] }
 0x55c   :  { %v13027_v39 = vld [vmem:[#allocation117_spill] sm:$0xff] }
 0x55e   :  { %8239 = vmatpush1.bf16.msra.mxu0 %v12993_v15  ;;  %8271 = vmatpush1.bf16.msra.mxu1 %v12994_v33  ;;  %v13003_v33 = vld [vmem:[#allocation63_spill] sm:$0xff]  ;;  %v13008_v15 = vld [vmem:[#allocation68_spill] sm:$0xff] }
 0x55f   :  { %8273 = vmatprep.subr.bf16.mxu0 %v12995_v52  ;;  %8305 = vmatprep.subr.bf16.mxu1 %v12996_v13  ;;  %v13001_v13 = vld [vmem:[#allocation61_spill] sm:$0xff]  ;;  %v13002_v52 = vld [vmem:[#allocation62_spill] sm:$0xff] }
 0x561   :  { %3715 = vmatmul.mubr.f32.vlgmr.msra.gmra.mrb[26].mxu0 %v11224_v1  ;;  %3786 = vmatmul.mubr.f32.vlgmr.msra.gmra.mrb[26].mxu1 %v11224_v1 }
 0x562   :  { %8275 = vmatpush1.bf16.msra.mxu0 %v10216_v32  ;;  %8307 = vmatpush1.bf16.msra.mxu1 %v12600_v14  ;;  %v13004_v32 = vld [vmem:[#allocation64_spill] sm:$0xff]  ;;  %v13005_v14 = vld [vmem:[#allocation65_spill] sm:$0xff] }
 0x563   :  { %8277 = vmatprep.subr.bf16.mxu0 %v12997_v48  ;;  %8309 = vmatprep.subr.bf16.mxu1 %v12998_v26  ;;  %v13006_v48 = vld [vmem:[#allocation66_spill] sm:$0xff]  ;;  %v13007_v26 = vld [vmem:[#allocation67_spill] sm:$0xff] }
 0x564   :  { %3874 = vmatprep.mubr.f32.mxu0 %v12545_v34  ;;  %3945 = vmatprep.mubr.f32.mxu1 %v12545_v34 }
 0x566   :  { %8279 = vmatpush1.bf16.msra.mxu0 %v12999_v46  ;;  %8311 = vmatpush1.bf16.msra.mxu1 %v13000_v20  ;;  %v13010_v46 = vld [vmem:[#allocation70_spill] sm:$0xff]  ;;  %v13011_v20 = vld [vmem:[#allocation71_spill] sm:$0xff] }
 0x567   :  { %8281 = vmatprep.subr.bf16.mxu0 %v13001_v13  ;;  %8313 = vmatprep.subr.bf16.mxu1 %v13002_v52  ;;  %v13012_v13 = vld [vmem:[#allocation72_spill] sm:$0xff]  ;;  %v13013_v52 = vld [vmem:[#allocation73_spill] sm:$0xff] }
 0x56a   :  { %8283 = vmatpush1.bf16.msra.mxu0 %v13003_v33  ;;  %8315 = vmatpush1.bf16.msra.mxu1 %v13004_v32  ;;  %v13014_v33 = vld [vmem:[#allocation74_spill] sm:$0xff]  ;;  %v13015_v32 = vld [vmem:[#allocation75_spill] sm:$0xff] }
 0x56b   :  { %8285 = vmatprep.subr.bf16.mxu0 %v13005_v14  ;;  %8317 = vmatprep.subr.bf16.mxu1 %v13006_v48  ;;  %v13016_v14 = vld [vmem:[#allocation76_spill] sm:$0xff]  ;;  %v13017_v48 = vld [vmem:[#allocation77_spill] sm:$0xff] }
 0x56e   :  { %8287 = vmatpush1.bf16.msra.mxu0 %v13007_v26  ;;  %8319 = vmatpush1.bf16.msra.mxu1 %v13008_v15  ;;  %v13018_v26 = vld [vmem:[#allocation78_spill] sm:$0xff]  ;;  %v13019_v15 = vld [vmem:[#allocation79_spill] sm:$0xff] }
 0x56f   :  { %8289 = vmatprep.subr.bf16.mxu0 %v13009_v24  ;;  %8321 = vmatprep.subr.bf16.mxu1 %v13010_v46  ;;  %v13020_v24 = vld [vmem:[#allocation80_spill] sm:$0xff]  ;;  %v13021_v46 = vld [vmem:[#allocation81_spill] sm:$0xff] }
 0x572   :  { %8291 = vmatpush1.bf16.msra.mxu0 %v13011_v20  ;;  %8323 = vmatpush1.bf16.msra.mxu1 %v13012_v13  ;;  %v13022_v20 = vld [vmem:[#allocation82_spill] sm:$0xff]  ;;  %v13023_v13 = vld [vmem:[#allocation83_spill] sm:$0xff] }
 0x573   :  { %8293 = vmatprep.subr.bf16.mxu0 %v13013_v52  ;;  %8325 = vmatprep.subr.bf16.mxu1 %v13014_v33  ;;  %v13024_v52 = vld [vmem:[#allocation84_spill] sm:$0xff]  ;;  %v13025_v33 = vld [vmem:[#allocation85_spill] sm:$0xff] }
 0x576   :  { %8295 = vmatpush1.bf16.msra.mxu0 %v13015_v32  ;;  %8327 = vmatpush1.bf16.msra.mxu1 %v13016_v14  ;;  %v13026_v32 = vld [vmem:[#allocation86_spill] sm:$0xff] }
 0x577   :  { %8297 = vmatprep.subr.bf16.mxu0 %v13017_v48  ;;  %8329 = vmatprep.subr.bf16.mxu1 %v13018_v26 }
 0x57a   :  { %8299 = vmatpush1.bf16.msra.mxu0 %v13019_v15  ;;  %8331 = vmatpush1.bf16.msra.mxu1 %v13020_v24 }
 0x57b   :  { %8301 = vmatprep.subr.bf16.mxu0 %v13021_v46  ;;  %8333 = vmatprep.subr.bf16.mxu1 %v13022_v20 }
 0x57e   :  { %8303 = vmatpush1.bf16.msra.mxu0 %v13023_v13  ;;  %8335 = vmatpush1.bf16.msra.mxu1 %v13024_v52 }
 0x57f   :  { %8337 = vmatprep.subr.bf16.mxu0 %v13025_v33  ;;  %8369 = vmatprep.subr.bf16.mxu1 %v13026_v32 }
 0x5d4   :  { %v3238_v14 = vpop.f32.mrb[22].mxu0  ;;  %v3309_v48 = vpop.f32.mrb[22].mxu1 }
 0x5d5   :  { %v3314_v26 = vadd.f32 %v3238_v14, %v13027_v39  ;;  %v3240_v27 = vpop.f32.mrb[23].mxu0  ;;  %v3311_v15 = vpop.f32.mrb[23].mxu1  ;;  %v3316_v52 = vadd.f32 %v3309_v48, %v10512_v8 }
 0x5d6   :  { %v3315_v24 = vadd.f32 %v3240_v27, %v12760_v38  ;;  %v3317_v20 = vadd.f32 %v3311_v15, %v12761_v58 }
 0x5d7   :  { %v3318_v54 = vmul.f32 0.5, %v3314_v26  ;;  %v3320_v33 = vmul.f32 0.5, %v3316_v52 }
 0x5d8   :  { %v3319_v46 = vmul.f32 0.5, %v3315_v24 }
 0x5d9   :  { %9723 = vtanh.f32 %v3318_v54 }
 0x5da   :  { %9725 = vtanh.f32 %v3319_v46  ;;  %v13037_v46 = vld [vmem:[#allocation104_spill] sm:$0xff] }
 0x5db   :  { %9727 = vtanh.f32 %v3317_v20  ;;  %v13038_v20 = vld [vmem:[#allocation105_spill] sm:$0xff] }
 0x5dc   :  { %9729 = vtanh.f32 %v3320_v33  ;;  %v13030_v33 = vld [vmem:[#allocation97_spill] sm:$0xff] }
 0x5e3   :  { %v9724_v13 = vpop.eup %9723 }
 0x5e4   :  { %v3324_v32 = vmul.f32 0.5, %v9724_v13  ;;  %v9726_v47 = vpop.eup %9725  ;;  %v13028_v13 = vld [vmem:[#allocation95_spill] sm:$0xff] }
 0x5e5   :  { %v3325_v14 = vmul.f32 0.5, %v9726_v47  ;;  %v9728_v39 = vpop.eup %9727  ;;  %v13032_v47 = vld [vmem:[#allocation99_spill] sm:$0xff] }
 0x5e6   :  { %v3327_v60 = vadd.f32 0.5, %v3324_v32  ;;  %v9730_v15 = vpop.eup %9729  ;;  %v13029_v32 = vld [vmem:[#allocation96_spill] sm:$0xff] }
 0x5e7   :  { %v3328_v21 = vadd.f32 0.5, %v3325_v14  ;;  %v3326_v54 = vmul.f32 0.5, %v9730_v15  ;;  %v13039_v14 = vld [vmem:[#allocation106_spill] sm:$0xff]  ;;  %v13041_v15 = vld [vmem:[#allocation108_spill] sm:$0xff] }
 0x5e8   :  { %v3332_v37 = vmul.f32 %v9728_v39, %v3327_v60  ;;  %v13033_v60 = vld [vmem:[#allocation100_spill] sm:$0xff]  ;;  %v13036_v39 = vld [vmem:[#allocation103_spill] sm:$0xff] }
 0x5e9   :  { %v3331_v27 = vmul.f32 %v3328_v21, %v11063_v17  ;;  %v3329_v26 = vadd.f32 0.5, %v3326_v54  ;;  %v13031_v17 = vld [vmem:[#allocation98_spill] sm:$0xff]  ;;  %v13042_v54 = vld [vmem:[#allocation109_spill] sm:$0xff] }
 0x5ea   :  { %v13035_v21 = vld [vmem:[#allocation102_spill] sm:$0xff] }
 0x5eb   :  { %v11269_v24 = vadd.f32 %v3332_v37, %v3331_v27  ;;  %v13034_v37 = vld [vmem:[#allocation101_spill] sm:$0xff]  ;;  %v13040_v27 = vld [vmem:[#allocation107_spill] sm:$0xff] }
 0x5ed   :  { %9731 = vtanh.f32 %v11269_v24 }
 0x5f7   :  { %v9732_v48 = vpop.eup %9731 }
 0x5f8   :  { %v11272_v52 = vmul.f32 %v9732_v48, %v3329_v26  ;;  %v13043_v26 = vld [vmem:[#allocation110_spill] sm:$0xff]  ;;  %v13044_v48 = vld [vmem:[#allocation111_spill] sm:$0xff] }
 0x5fa   :  { %3875 = vmatmul.mubr.f32.vlgmr.msra.gmra.mrb[28].mxu0 %v11272_v52  ;;  %3946 = vmatmul.mubr.f32.vlgmr.msra.gmra.mrb[28].mxu1 %v11272_v52 }
 0x5fb   :  { %8339 = vmatpush1.bf16.msra.mxu0 %v12638_v55  ;;  %8371 = vmatpush1.bf16.msra.mxu1 %v12639_v28 }
 0x5fc   :  { %8341 = vmatprep.subr.bf16.mxu0 %v12640_v10  ;;  %8373 = vmatprep.subr.bf16.mxu1 %v12641_v57 }
 0x5fd   :  { %4016 = vmatprep.mubr.f32.mxu0 %v12545_v34  ;;  %4087 = vmatprep.mubr.f32.mxu1 %v12545_v34 }
 0x5ff   :  { %8343 = vmatpush1.bf16.msra.mxu0 %v12897_v7  ;;  %8375 = vmatpush1.bf16.msra.mxu1 %v12898_v25 }
 0x600   :  { %8345 = vmatprep.subr.bf16.mxu0 %v12899_v29  ;;  %8377 = vmatprep.subr.bf16.mxu1 %v12900_v40 }
 0x603   :  { %8347 = vmatpush1.bf16.msra.mxu0 %v13028_v13  ;;  %8379 = vmatpush1.bf16.msra.mxu1 %v13029_v32 }
 0x604   :  { %8349 = vmatprep.subr.bf16.mxu0 %v13030_v33  ;;  %8381 = vmatprep.subr.bf16.mxu1 %v13031_v17  ;;  %v13050_v17 = vld [vmem:[#allocation87_spill] sm:$0xff] }
 0x607   :  { %8351 = vmatpush1.bf16.msra.mxu0 %v13032_v47  ;;  %8383 = vmatpush1.bf16.msra.mxu1 %v13033_v60  ;;  %v13047_v47 = vld [vmem:[#allocation115_spill] sm:$0xff] }
 0x608   :  { %8353 = vmatprep.subr.bf16.mxu0 %v13034_v37  ;;  %8385 = vmatprep.subr.bf16.mxu1 %v13035_v21  ;;  %v13045_v37 = vld [vmem:[#allocation112_spill] sm:$0xff] }
 0x60b   :  { %8355 = vmatpush1.bf16.msra.mxu0 %v13036_v39  ;;  %8387 = vmatpush1.bf16.msra.mxu1 %v13037_v46 }
 0x60c   :  { %8357 = vmatprep.subr.bf16.mxu0 %v13038_v20  ;;  %8389 = vmatprep.subr.bf16.mxu1 %v13039_v14  ;;  %v13046_v14 = vld [vmem:[#allocation114_spill] sm:$0xff] }
 0x60f   :  { %8359 = vmatpush1.bf16.msra.mxu0 %v13040_v27  ;;  %8391 = vmatpush1.bf16.msra.mxu1 %v13041_v15 }
 0x610   :  { %8361 = vmatprep.subr.bf16.mxu0 %v13042_v54  ;;  %8393 = vmatprep.subr.bf16.mxu1 %v13043_v26  ;;  %v13048_v26 = vld [vmem:[#allocation116_spill] sm:$0xff] }
 0x613   :  { %8363 = vmatpush1.bf16.msra.mxu0 %v13044_v48  ;;  %8395 = vmatpush1.bf16.msra.mxu1 %v13045_v37  ;;  %v13049_v37 = vld [vmem:[#allocation47_spill] sm:$0xff] }
 0x614   :  { %v3544_v21 = vpop.f32.mrb[24].mxu0  ;;  %v3615_v39 = vpop.f32.mrb[24].mxu1  ;;  %8365 = vmatprep.subr.bf16.mxu0 %v12789_v35  ;;  %8397 = vmatprep.subr.bf16.mxu1 %v13046_v14  ;;  %v13052_v14 = vld [vmem:[#allocation89_spill] sm:$0xff] }
 0x615   :  { %v3620_v46 = vadd.f32 %v3544_v21, %v12919_v11  ;;  %v3546_v60 = vpop.f32.mrb[25].mxu0  ;;  %v3617_v20 = vpop.f32.mrb[25].mxu1  ;;  %v13051_v21 = vld [vmem:[#allocation88_spill] sm:$0xff] }
 0x616   :  { %v3621_v15 = vadd.f32 %v3546_v60, %v10883_v19  ;;  %v3623_v48 = vadd.f32 %v3617_v20, %v13049_v37  ;;  %v13053_v60 = vld [vmem:[#allocation90_spill] sm:$0xff] }
 0x617   :  { %v3624_v27 = vmul.f32 0.5, %v3620_v46  ;;  %8367 = vmatpush1.bf16.msra.mxu0 %v13047_v47  ;;  %8399 = vmatpush1.bf16.msra.mxu1 %v13048_v26  ;;  %v13054_v46 = vld [vmem:[#allocation120_spill] sm:$0xff] }
 0x618   :  { %v3625_v54 = vmul.f32 0.5, %v3621_v15  ;;  %8401 = vmatprep.subr.bf16.mxu0 %v13050_v17  ;;  %8433 = vmatprep.subr.bf16.mxu1 %v13051_v21  ;;  %v13055_v15 = vld [vmem:[#allocation121_spill] sm:$0xff]  ;;  %v13058_v21 = vld [vmem:[#allocation123_spill] sm:$0xff] }
 0x619   :  { %9733 = vtanh.f32 %v3624_v27  ;;  %v13056_v27 = vld [vmem:[#allocation48_spill] sm:$0xff] }
 0x61a   :  { %9735 = vtanh.f32 %v3625_v54  ;;  %4017 = vmatmul.mubr.f32.vlgmr.msra.gmra.mrb[28].mxu0 %v11224_v1  ;;  %4088 = vmatmul.mubr.f32.vlgmr.msra.gmra.mrb[28].mxu1 %v11224_v1  ;;  %v3622_v20 = vadd.f32 %v3615_v39, %v13056_v27  ;;  %v13057_v54 = vld [vmem:[#allocation122_spill] sm:$0xff]  ;;  %v13059_v1 = vld [vmem:[#allocation124_spill] sm:$0xff] }
 0x61b   :  { %8403 = vmatpush1.bf16.msra.mxu0 %v13052_v14  ;;  %8435 = vmatpush1.bf16.msra.mxu1 %v13053_v60  ;;  %9737 = vtanh.f32 %v3623_v48  ;;  %v13062_v27 = vld [vmem:[#allocation128_spill] sm:$0xff] }
 0x61c   :  { %8405 = vmatprep.subr.bf16.mxu0 %v13054_v46  ;;  %8437 = vmatprep.subr.bf16.mxu1 %v13055_v15  ;;  %v3626_v60 = vmul.f32 0.5, %v3622_v20  ;;  %v13060_v46 = vld [vmem:[#allocation126_spill] sm:$0xff]  ;;  %v13061_v15 = vld [vmem:[#allocation127_spill] sm:$0xff]  ;;  %v13063_v20 = vld [vmem:[#allocation133_spill] sm:$0xff] }
 0x61d   :  { %4180 = vmatprep.mubr.f32.mxu0 %v12545_v34  ;;  %4251 = vmatprep.mubr.f32.mxu1 %v12545_v34 }
 0x61e   :  { %9739 = vtanh.f32 %v3626_v60  ;;  %v13066_v60 = vld [vmem:[#allocation136_spill] sm:$0xff] }
 0x61f   :  { %8407 = vmatpush1.bf16.msra.mxu0 %v13057_v54  ;;  %8439 = vmatpush1.bf16.msra.mxu1 %v13058_v21 }
 0x620   :  { %8409 = vmatprep.subr.bf16.mxu0 %v13059_v1  ;;  %8441 = vmatprep.subr.bf16.mxu1 %v12932_v49 }
 0x623   :  { %v9734_v48 = vpop.eup %9733  ;;  %8411 = vmatpush1.bf16.msra.mxu0 %v13060_v46  ;;  %8443 = vmatpush1.bf16.msra.mxu1 %v13061_v15 }
 0x624   :  { %v3630_v14 = vmul.f32 0.5, %v9734_v48  ;;  %v9736_v39 = vpop.eup %9735  ;;  %8413 = vmatprep.subr.bf16.mxu0 %v13062_v27  ;;  %8445 = vmatprep.subr.bf16.mxu1 %v12936_v0 }
 0x625   :  { %v3631_v54 = vmul.f32 0.5, %v9736_v39  ;;  %v9738_v21 = vpop.eup %9737  ;;  %v13069_v39 = vld [vmem:[#allocation139_spill] sm:$0xff] }
 0x626   :  { %v3633_v17 = vadd.f32 0.5, %v3630_v14  ;;  %v13065_v14 = vld [vmem:[#allocation135_spill] sm:$0xff] }
 0x627   :  { %v3634_v37 = vadd.f32 0.5, %v3631_v54  ;;  %8415 = vmatpush1.bf16.msra.mxu0 %v12808_v44  ;;  %8447 = vmatpush1.bf16.msra.mxu1 %v12809_v22  ;;  %v13067_v54 = vld [vmem:[#allocation137_spill] sm:$0xff] }
 0x628   :  { %v3638_v1 = vmul.f32 %v9738_v21, %v3633_v17  ;;  %8417 = vmatprep.subr.bf16.mxu0 %v12810_v53  ;;  %8449 = vmatprep.subr.bf16.mxu1 %v13063_v20  ;;  %v9740_v17 = vpop.eup %9739  ;;  %v13068_v21 = vld [vmem:[#allocation138_spill] sm:$0xff]  ;;  %v13070_v20 = vld [vmem:[#allocation140_spill] sm:$0xff] }
 0x629   :  { %v3637_v48 = vmul.f32 %v3634_v37, %v11129_v63  ;;  %v13071_v63 = vld [vmem:[#allocation141_spill] sm:$0xff]  ;;  %v3632_v37 = vmul.f32 0.5, %v9740_v17  ;;  %v13073_v17 = vld [vmem:[#allocation144_spill] sm:$0xff] }
 0x62b   :  { %v11335_v15 = vadd.f32 %v3638_v1, %v3637_v48  ;;  %8419 = vmatpush1.bf16.msra.mxu0 %v12939_v43  ;;  %8451 = vmatpush1.bf16.msra.mxu1 %v13065_v14  ;;  %v3642_v1 = vrot.slane %v12851_v5, 5  ;;  %v3644_v48 = vrot.slane %v12852_v56, 5  ;;  %v3643_v43 = vrot.slane %v12855_v51, 5  ;;  %v13074_v5 = vld [vmem:[#allocation145_spill] sm:$0xff] }
 0x62c   :  { %8421 = vmatprep.subr.bf16.mxu0 %v13066_v60  ;;  %8453 = vmatprep.subr.bf16.mxu1 %v13067_v54  ;;  %v13072_v60 = vld [vmem:[#allocation143_spill] sm:$0xff] }
 0x62d   :  { %13064 = vst [vmem:[#allocation49_spill] sm:$0xff] %v11335_v15  ;;  %9741 = vtanh.f32 %v11335_v15 }
 0x62f   :  { %8423 = vmatpush1.bf16.msra.mxu0 %v13068_v21  ;;  %8455 = vmatpush1.bf16.msra.mxu1 %v13069_v39  ;;  %v3645_v21 = vrot.slane %v12856_v50, 5 }
 0x630   :  { %8425 = vmatprep.subr.bf16.mxu0 %v13070_v20  ;;  %8457 = vmatprep.subr.bf16.mxu1 %v13071_v63 }
 0x633   :  { %8427 = vmatpush1.bf16.msra.mxu0 %v12821_v18  ;;  %8459 = vmatpush1.bf16.msra.mxu1 %v13072_v60  ;;  %v3635_v18 = vadd.f32 0.5, %v3632_v37 }
 0x634   :  { %v3716_v54 = vpop.f32.mrb[26].mxu0  ;;  %v3787_v14 = vpop.f32.mrb[26].mxu1  ;;  %8429 = vmatprep.subr.bf16.mxu0 %v13073_v17  ;;  %8461 = vmatprep.subr.bf16.mxu1 %v13074_v5 }
 0x635   :  { %v3717_v39 = vadd.f32 %v3716_v54, %v3642_v1  ;;  %v11352_v15 = vadd.f32 %v3787_v14, %v3644_v48  ;;  %v3718_v20 = vpop.f32.mrb[27].mxu0  ;;  %v3789_v63 = vpop.f32.mrb[27].mxu1  ;;  %v13075_v54 = vld [vmem:[#allocation148_spill] sm:$0xff]  ;;  %v13076_v14 = vld [vmem:[#allocation149_spill] sm:$0xff] }
 0x636   :  { %v3719_v56 = vadd.f32 %v3718_v20, %v3643_v43  ;;  %v3790_v53 = vadd.f32 %v3789_v63, %v3645_v21  ;;  %v13079_v43 = vld [vmem:[#allocation158_spill] sm:$0xff]  ;;  %v13082_v21 = vld [vmem:[#allocation161_spill] sm:$0xff] }
 0x637   :  { %v3792_v22 = vmul.f32 0.5, %v3717_v39  ;;  %v9742_v60 = vpop.eup %9741  ;;  %8431 = vmatpush1.bf16.msra.mxu0 %v12825_v36  ;;  %8463 = vmatpush1.bf16.msra.mxu1 %v12950_v12 }
 0x638   :  { %v3793_v44 = vmul.f32 0.5, %v3719_v56  ;;  %8465 = vmatprep.subr.bf16.mxu0 %v13075_v54  ;;  %8497 = vmatprep.subr.bf16.mxu1 %v13076_v14  ;;  %v3641_v1 = vmul.f32 %v9742_v60, %v3635_v18  ;;  %v13077_v56 = vld [vmem:[#allocation156_spill] sm:$0xff] }
 0x639   :  { %9743 = vtanh.f32 %v3792_v22  ;;  %v13081_v60 = vld [vmem:[#allocation160_spill] sm:$0xff] }
 0x63a   :  { %9745 = vtanh.f32 %v3793_v44  ;;  %4181 = vmatmul.mubr.f32.vlgmr.msra.gmra.mrb[30].mxu0 %v3641_v1  ;;  %4252 = vmatmul.mubr.f32.vlgmr.msra.gmra.mrb[30].mxu1 %v3641_v1  ;;  %v13078_v44 = vld [vmem:[#allocation157_spill] sm:$0xff] }
 0x63b   :  { %8467 = vmatpush1.bf16.msra.mxu0 %v12953_v59  ;;  %8499 = vmatpush1.bf16.msra.mxu1 %v12954_v62  ;;  %9747 = vtanh.f32 %v3790_v53  ;;  %v13080_v53 = vld [vmem:[#allocation159_spill] sm:$0xff] }
 0x63c   :  { %8469 = vmatprep.subr.bf16.mxu0 %v12955_v30  ;;  %8501 = vmatprep.subr.bf16.mxu1 %v12956_v16 }
 0x63d   :  { %4322 = vmatprep.mubr.f32.mxu0 %v12545_v34  ;;  %4393 = vmatprep.mubr.f32.mxu1 %v12545_v34 }
 0x63f   :  { %8471 = vmatpush1.bf16.msra.mxu0 %v12957_v41  ;;  %8503 = vmatpush1.bf16.msra.mxu1 %v12958_v45  ;;  %v13083_v45 = vld [vmem:[#allocation162_spill] sm:$0xff] }
 0x640   :  { %8473 = vmatprep.subr.bf16.mxu0 %v13077_v56  ;;  %8505 = vmatprep.subr.bf16.mxu1 %v13078_v44  ;;  %v13084_v56 = vld [vmem:[#allocation163_spill] sm:$0xff]  ;;  %v13085_v44 = vld [vmem:[#allocation164_spill] sm:$0xff] }
 0x643   :  { %v9744_v22 = vpop.eup %9743  ;;  %8475 = vmatpush1.bf16.msra.mxu0 %v13079_v43  ;;  %8507 = vmatpush1.bf16.msra.mxu1 %v13080_v53 }
 0x644   :  { %v3798_v18 = vmul.f32 0.5, %v9744_v22  ;;  %v9746_v20 = vpop.eup %9745  ;;  %8477 = vmatprep.subr.bf16.mxu0 %v13081_v60  ;;  %8509 = vmatprep.subr.bf16.mxu1 %v13082_v21  ;;  %v13086_v22 = vld [vmem:[#allocation165_spill] sm:$0xff]  ;;  %v13087_v60 = vld [vmem:[#allocation166_spill] sm:$0xff]  ;;  %v13088_v21 = vld [vmem:[#allocation167_spill] sm:$0xff] }
 0x645   :  { %v3799_v63 = vmul.f32 0.5, %v9746_v20  ;;  %v9748_v37 = vpop.eup %9747  ;;  %v13090_v20 = vld [vmem:[#allocation169_spill] sm:$0xff] }
 0x646   :  { %v3801_v39 = vadd.f32 0.5, %v3798_v18  ;;  %v13089_v18 = vld [vmem:[#allocation168_spill] sm:$0xff] }
 0x647   :  { %v3802_v48 = vadd.f32 0.5, %v3799_v63  ;;  %8479 = vmatpush1.bf16.msra.mxu0 %v13083_v45  ;;  %8511 = vmatpush1.bf16.msra.mxu1 %v13084_v56  ;;  %v13094_v63 = vld [vmem:[#allocation178_spill] sm:$0xff] }
 0x648   :  { %v3806_v1 = vmul.f32 %v9748_v37, %v3801_v39  ;;  %8481 = vmatprep.subr.bf16.mxu0 %v13085_v44  ;;  %8513 = vmatprep.subr.bf16.mxu1 %v13086_v22  ;;  %v13093_v39 = vld [vmem:[#allocation177_spill] sm:$0xff]  ;;  %v13095_v37 = vld [vmem:[#allocation179_spill] sm:$0xff] }
 0x649   :  { %v3805_v53 = vmul.f32 %v3802_v48, %v11203_v61  ;;  %v13091_v61 = vld [vmem:[#allocation175_spill] sm:$0xff]  ;;  %v13096_v48 = vld [vmem:[#allocation13_spill] sm:$0xff] }
 0x64b   :  { %v11379_v43 = vadd.f32 %v3806_v1, %v3805_v53  ;;  %8483 = vmatpush1.bf16.msra.mxu0 %v13087_v60  ;;  %8515 = vmatpush1.bf16.msra.mxu1 %v13088_v21  ;;  %v13092_v53 = vld [vmem:[#allocation176_spill] sm:$0xff]  ;;  %v13097_v1 = vld [vmem:[#allocation14_spill] sm:$0xff] }
 0x64c   :  { %8485 = vmatprep.subr.bf16.mxu0 %v13089_v18  ;;  %8517 = vmatprep.subr.bf16.mxu1 %v13090_v20 }
 0x64f   :  { %8487 = vmatpush1.bf16.msra.mxu0 %v10722_v4  ;;  %8519 = vmatpush1.bf16.msra.mxu1 %v10724_v9 }
 0x650   :  { %8489 = vmatprep.subr.bf16.mxu0 %v10728_v3  ;;  %8521 = vmatprep.subr.bf16.mxu1 %v12960_v31  ;;  %v13098_v31 = vld [vmem:[#allocation15_spill] sm:$0xff] }
 0x653   :  { %8491 = vmatpush1.bf16.msra.mxu0 %v12961_v2  ;;  %8523 = vmatpush1.bf16.msra.mxu1 %v13091_v61  ;;  %v13099_v2 = vld [vmem:[#allocation16_spill] sm:$0xff]  ;;  %v13100_v61 = vld [vmem:[#allocation17_spill] sm:$0xff] }
 0x654   :  { %8493 = vmatprep.subr.bf16.mxu0 %v13092_v53  ;;  %8525 = vmatprep.subr.bf16.mxu1 %v13093_v39  ;;  %v13101_v53 = vld [vmem:[#allocation18_spill] sm:$0xff] }
 0x657   :  { %8495 = vmatpush1.bf16.msra.mxu0 %v13094_v63  ;;  %8527 = vmatpush1.bf16.msra.mxu1 %v13095_v37  ;;  %v13102_v37 = vld [vmem:[#allocation19_spill] sm:$0xff] }
 0x658   :  { %8529 = vmatprep.subr.bf16.mxu0 %v13096_v48  ;;  %8561 = vmatprep.subr.bf16.mxu1 %v13097_v1  ;;  %v13103_v48 = vld [vmem:[#allocation20_spill] sm:$0xff]  ;;  %v13104_v1 = vld [vmem:[#allocation21_spill] sm:$0xff]  ;;  %v13123_v63 = vld [vmem:[#allocation43_spill] sm:$0xff] }
 0x65a   :  { %4323 = vmatmul.mubr.f32.vlgmr.msra.gmra.mrb[30].mxu0 %v11272_v52  ;;  %4394 = vmatmul.mubr.f32.vlgmr.msra.gmra.mrb[30].mxu1 %v11272_v52  ;;  %v3794_v52 = vmul.f32 0.5, %v11352_v15  ;;  %v13111_v15 = vld [vmem:[#allocation31_spill] sm:$0xff] }
 0x65b   :  { %8531 = vmatpush1.bf16.msra.mxu0 %v13098_v31  ;;  %8563 = vmatpush1.bf16.msra.mxu1 %v13099_v2  ;;  %v13107_v2 = vld [vmem:[#allocation27_spill] sm:$0xff]  ;;  %v13120_v31 = vld [vmem:[#allocation40_spill] sm:$0xff] }
 0x65c   :  { %8533 = vmatprep.subr.bf16.mxu0 %v13100_v61  ;;  %8565 = vmatprep.subr.bf16.mxu1 %v13101_v53  ;;  %v13105_v61 = vld [vmem:[#allocation25_spill] sm:$0xff]  ;;  %v13106_v53 = vld [vmem:[#allocation26_spill] sm:$0xff]  ;;  %9749 = vtanh.f32 %v3794_v52  ;;  %v13115_v52 = vld [vmem:[#allocation35_spill] sm:$0xff] }
 0x65d   :  { %4494 = vmatprep.mubr.f32.mxu0 %v12545_v34  ;;  %4565 = vmatprep.mubr.f32.mxu1 %v12545_v34  ;;  %9751 = vtanh.f32 %v11379_v43 }
 0x65f   :  { %8535 = vmatpush1.bf16.msra.mxu0 %v13102_v37  ;;  %8567 = vmatpush1.bf16.msra.mxu1 %v13103_v48  ;;  %v13108_v37 = vld [vmem:[#allocation28_spill] sm:$0xff]  ;;  %v13109_v48 = vld [vmem:[#allocation29_spill] sm:$0xff] }
 0x660   :  { %8537 = vmatprep.subr.bf16.mxu0 %v13104_v1  ;;  %8569 = vmatprep.subr.bf16.mxu1 %v12976_v42  ;;  %v13110_v1 = vld [vmem:[#allocation30_spill] sm:$0xff]  ;;  %v13119_v42 = vld [vmem:[#allocation39_spill] sm:$0xff] }
 0x663   :  { %8539 = vmatpush1.bf16.msra.mxu0 %v12977_v6  ;;  %8571 = vmatpush1.bf16.msra.mxu1 %v12978_v23  ;;  %v13112_v6 = vld [vmem:[#allocation32_spill] sm:$0xff]  ;;  %v13113_v23 = vld [vmem:[#allocation33_spill] sm:$0xff] }
 0x664   :  { %8541 = vmatprep.subr.bf16.mxu0 %v13105_v61  ;;  %8573 = vmatprep.subr.bf16.mxu1 %v13106_v53  ;;  %v13114_v61 = vld [vmem:[#allocation34_spill] sm:$0xff] }
 0x666   :  { %v9750_v53 = vpop.eup %9749 }
 0x667   :  { %8543 = vmatpush1.bf16.msra.mxu0 %v13107_v2  ;;  %8575 = vmatpush1.bf16.msra.mxu1 %v13108_v37  ;;  %v13116_v2 = vld [vmem:[#allocation36_spill] sm:$0xff]  ;;  %v13117_v37 = vld [vmem:[#allocation37_spill] sm:$0xff] }
 0x668   :  { %8545 = vmatprep.subr.bf16.mxu0 %v13109_v48  ;;  %8577 = vmatprep.subr.bf16.mxu1 %v13110_v1  ;;  %v13118_v48 = vld [vmem:[#allocation38_spill] sm:$0xff]  ;;  %v3800_v1 = vmul.f32 0.5, %v9750_v53  ;;  %v13127_v53 = vld [vmem:[#allocation55_spill] sm:$0xff] }
 0x66b   :  { %8547 = vmatpush1.bf16.msra.mxu0 %v13111_v15  ;;  %8579 = vmatpush1.bf16.msra.mxu1 %v13112_v6  ;;  %v13121_v15 = vld [vmem:[#allocation41_spill] sm:$0xff]  ;;  %v13122_v6 = vld [vmem:[#allocation42_spill] sm:$0xff] }
 0x66c   :  { %8549 = vmatprep.subr.bf16.mxu0 %v13113_v23  ;;  %8581 = vmatprep.subr.bf16.mxu1 %v13114_v61  ;;  %v9752_v23 = vpop.eup %9751  ;;  %v3803_v61 = vadd.f32 0.5, %v3800_v1  ;;  %v13130_v1 = vld [vmem:[#allocation58_spill] sm:$0xff] }
 0x66f   :  { %8551 = vmatpush1.bf16.msra.mxu0 %v13115_v52  ;;  %8583 = vmatpush1.bf16.msra.mxu1 %v13116_v2  ;;  %v13124_v52 = vld [vmem:[#allocation44_spill] sm:$0xff]  ;;  %v11433_v2 = vmul.f32 %v9752_v23, %v3803_v61  ;;  %v13131_v23 = vld [vmem:[#allocation59_spill] sm:$0xff] }
 0x670   :  { %8553 = vmatprep.subr.bf16.mxu0 %v13117_v37  ;;  %8585 = vmatprep.subr.bf16.mxu1 %v13118_v48  ;;  %v13125_v37 = vld [vmem:[#allocation45_spill] sm:$0xff]  ;;  %v13126_v48 = vld [vmem:[#allocation46_spill] sm:$0xff]  ;;  %v13132_v61 = vld [vmem:[#allocation60_spill] sm:$0xff] }
 0x673   :  { %8555 = vmatpush1.bf16.msra.mxu0 %v13119_v42  ;;  %8587 = vmatpush1.bf16.msra.mxu1 %v13120_v31  ;;  %v13141_v31 = vld [vmem:[#allocation69_spill] sm:$0xff] }
 0x674   :  { %8557 = vmatprep.subr.bf16.mxu0 %v13121_v15  ;;  %8589 = vmatprep.subr.bf16.mxu1 %v13122_v6  ;;  %v13128_v15 = vld [vmem:[#allocation56_spill] sm:$0xff]  ;;  %v13129_v6 = vld [vmem:[#allocation57_spill] sm:$0xff] }
 0x675   :  { %v13159_v42 = vld [vmem:[#allocation117_spill] sm:$0xff] }
 0x677   :  { %8559 = vmatpush1.bf16.msra.mxu0 %v13123_v63  ;;  %8591 = vmatpush1.bf16.msra.mxu1 %v13124_v52  ;;  %v13135_v52 = vld [vmem:[#allocation63_spill] sm:$0xff]  ;;  %v13140_v63 = vld [vmem:[#allocation68_spill] sm:$0xff] }
 0x678   :  { %8593 = vmatprep.subr.bf16.mxu0 %v13125_v37  ;;  %8625 = vmatprep.subr.bf16.mxu1 %v13126_v48  ;;  %v13133_v48 = vld [vmem:[#allocation61_spill] sm:$0xff]  ;;  %v13134_v37 = vld [vmem:[#allocation62_spill] sm:$0xff] }
 0x67a   :  { %4495 = vmatmul.mubr.f32.vlgmr.msra.gmra.mrb[32].mxu0 %v11433_v2  ;;  %4566 = vmatmul.mubr.f32.vlgmr.msra.gmra.mrb[32].mxu1 %v11433_v2 }
 0x67b   :  { %8595 = vmatpush1.bf16.msra.mxu0 %v13127_v53  ;;  %8627 = vmatpush1.bf16.msra.mxu1 %v13128_v15  ;;  %v13136_v53 = vld [vmem:[#allocation64_spill] sm:$0xff]  ;;  %v13137_v15 = vld [vmem:[#allocation65_spill] sm:$0xff] }
 0x67c   :  { %8597 = vmatprep.subr.bf16.mxu0 %v13129_v6  ;;  %8629 = vmatprep.subr.bf16.mxu1 %v13130_v1  ;;  %v13138_v6 = vld [vmem:[#allocation66_spill] sm:$0xff]  ;;  %v13139_v1 = vld [vmem:[#allocation67_spill] sm:$0xff] }
 0x67d   :  { %4654 = vmatprep.mubr.f32.mxu0 %v12545_v34  ;;  %4725 = vmatprep.mubr.f32.mxu1 %v12545_v34 }
 0x67f   :  { %8599 = vmatpush1.bf16.msra.mxu0 %v13131_v23  ;;  %8631 = vmatpush1.bf16.msra.mxu1 %v13132_v61  ;;  %v13142_v23 = vld [vmem:[#allocation70_spill] sm:$0xff]  ;;  %v13143_v61 = vld [vmem:[#allocation71_spill] sm:$0xff] }
 0x680   :  { %8601 = vmatprep.subr.bf16.mxu0 %v13133_v48  ;;  %8633 = vmatprep.subr.bf16.mxu1 %v13134_v37  ;;  %v13144_v48 = vld [vmem:[#allocation72_spill] sm:$0xff]  ;;  %v13145_v37 = vld [vmem:[#allocation73_spill] sm:$0xff] }
 0x683   :  { %8603 = vmatpush1.bf16.msra.mxu0 %v13135_v52  ;;  %8635 = vmatpush1.bf16.msra.mxu1 %v13136_v53  ;;  %v13146_v52 = vld [vmem:[#allocation74_spill] sm:$0xff]  ;;  %v13147_v53 = vld [vmem:[#allocation75_spill] sm:$0xff] }
 0x684   :  { %8605 = vmatprep.subr.bf16.mxu0 %v13137_v15  ;;  %8637 = vmatprep.subr.bf16.mxu1 %v13138_v6  ;;  %v13148_v15 = vld [vmem:[#allocation76_spill] sm:$0xff]  ;;  %v13149_v6 = vld [vmem:[#allocation77_spill] sm:$0xff] }
 0x687   :  { %8607 = vmatpush1.bf16.msra.mxu0 %v13139_v1  ;;  %8639 = vmatpush1.bf16.msra.mxu1 %v13140_v63  ;;  %v13150_v1 = vld [vmem:[#allocation78_spill] sm:$0xff]  ;;  %v13151_v63 = vld [vmem:[#allocation79_spill] sm:$0xff] }
 0x688   :  { %8609 = vmatprep.subr.bf16.mxu0 %v13141_v31  ;;  %8641 = vmatprep.subr.bf16.mxu1 %v13142_v23  ;;  %v13152_v31 = vld [vmem:[#allocation80_spill] sm:$0xff]  ;;  %v13153_v23 = vld [vmem:[#allocation81_spill] sm:$0xff] }
 0x68b   :  { %8611 = vmatpush1.bf16.msra.mxu0 %v13143_v61  ;;  %8643 = vmatpush1.bf16.msra.mxu1 %v13144_v48  ;;  %v13154_v61 = vld [vmem:[#allocation82_spill] sm:$0xff]  ;;  %v13155_v48 = vld [vmem:[#allocation83_spill] sm:$0xff] }
 0x68c   :  { %8613 = vmatprep.subr.bf16.mxu0 %v13145_v37  ;;  %8645 = vmatprep.subr.bf16.mxu1 %v13146_v52  ;;  %v13156_v37 = vld [vmem:[#allocation84_spill] sm:$0xff]  ;;  %v13157_v52 = vld [vmem:[#allocation85_spill] sm:$0xff] }
 0x68f   :  { %8615 = vmatpush1.bf16.msra.mxu0 %v13147_v53  ;;  %8647 = vmatpush1.bf16.msra.mxu1 %v13148_v15  ;;  %v13158_v53 = vld [vmem:[#allocation86_spill] sm:$0xff] }
 0x690   :  { %8617 = vmatprep.subr.bf16.mxu0 %v13149_v6  ;;  %8649 = vmatprep.subr.bf16.mxu1 %v13150_v1 }
 0x693   :  { %8619 = vmatpush1.bf16.msra.mxu0 %v13151_v63  ;;  %8651 = vmatpush1.bf16.msra.mxu1 %v13152_v31 }
 0x694   :  { %8621 = vmatprep.subr.bf16.mxu0 %v13153_v23  ;;  %8653 = vmatprep.subr.bf16.mxu1 %v13154_v61 }
 0x697   :  { %8623 = vmatpush1.bf16.msra.mxu0 %v13155_v48  ;;  %8655 = vmatpush1.bf16.msra.mxu1 %v13156_v37 }
 0x698   :  { %8657 = vmatprep.subr.bf16.mxu0 %v13157_v52  ;;  %8689 = vmatprep.subr.bf16.mxu1 %v13158_v53 }
 0x6ed   :  { %v4018_v15 = vpop.f32.mrb[28].mxu0  ;;  %v4089_v6 = vpop.f32.mrb[28].mxu1 }
 0x6ee   :  { %v4094_v1 = vadd.f32 %v4018_v15, %v13159_v42  ;;  %v4020_v39 = vpop.f32.mrb[29].mxu0  ;;  %v4091_v63 = vpop.f32.mrb[29].mxu1  ;;  %v4096_v37 = vadd.f32 %v4089_v6, %v10512_v8 }
 0x6ef   :  { %v4095_v31 = vadd.f32 %v4020_v39, %v12760_v38  ;;  %v4097_v61 = vadd.f32 %v4091_v63, %v12761_v58 }
 0x6f0   :  { %v4098_v3 = vmul.f32 0.5, %v4094_v1  ;;  %v4100_v52 = vmul.f32 0.5, %v4096_v37 }
 0x6f1   :  { %v4099_v23 = vmul.f32 0.5, %v4095_v31 }
 0x6f2   :  { %9753 = vtanh.f32 %v4098_v3 }
 0x6f3   :  { %9755 = vtanh.f32 %v4099_v23  ;;  %v13169_v23 = vld [vmem:[#allocation107_spill] sm:$0xff] }
 0x6f4   :  { %9757 = vtanh.f32 %v4097_v61  ;;  %v13170_v61 = vld [vmem:[#allocation108_spill] sm:$0xff] }
 0x6f5   :  { %9759 = vtanh.f32 %v4100_v52  ;;  %v13167_v52 = vld [vmem:[#allocation105_spill] sm:$0xff] }
 0x6fc   :  { %v9754_v48 = vpop.eup %9753 }
 0x6fd   :  { %v4104_v53 = vmul.f32 0.5, %v9754_v48  ;;  %v9756_v9 = vpop.eup %9755  ;;  %v13166_v48 = vld [vmem:[#allocation104_spill] sm:$0xff] }
 0x6fe   :  { %v4105_v15 = vmul.f32 0.5, %v9756_v9  ;;  %v9758_v42 = vpop.eup %9757  ;;  %v13161_v9 = vld [vmem:[#allocation99_spill] sm:$0xff] }
 0x6ff   :  { %v4107_v4 = vadd.f32 0.5, %v4104_v53  ;;  %v9760_v3 = vpop.eup %9759  ;;  %v13168_v53 = vld [vmem:[#allocation106_spill] sm:$0xff] }
 0x700   :  { %v4108_v20 = vadd.f32 0.5, %v4105_v15  ;;  %v4106_v63 = vmul.f32 0.5, %v9760_v3  ;;  %v13171_v15 = vld [vmem:[#allocation109_spill] sm:$0xff]  ;;  %v13173_v3 = vld [vmem:[#allocation111_spill] sm:$0xff] }
 0x701   :  { %v4112_v18 = vmul.f32 %v9758_v42, %v4107_v4  ;;  %v13160_v4 = vld [vmem:[#allocation98_spill] sm:$0xff]  ;;  %v13162_v42 = vld [vmem:[#allocation100_spill] sm:$0xff] }
 0x702   :  { %v4111_v39 = vmul.f32 %v4108_v20, %v11269_v24  ;;  %v4109_v1 = vadd.f32 0.5, %v4106_v63  ;;  %v13163_v24 = vld [vmem:[#allocation101_spill] sm:$0xff]  ;;  %v13165_v20 = vld [vmem:[#allocation103_spill] sm:$0xff]  ;;  %v13174_v63 = vld [vmem:[#allocation112_spill] sm:$0xff] }
 0x704   :  { %v11478_v31 = vadd.f32 %v4112_v18, %v4111_v39  ;;  %v13164_v18 = vld [vmem:[#allocation102_spill] sm:$0xff] }
 0x705   :  { %v13172_v39 = vld [vmem:[#allocation110_spill] sm:$0xff] }
 0x706   :  { %9761 = vtanh.f32 %v11478_v31 }
 0x710   :  { %v9762_v6 = vpop.eup %9761 }
 0x711   :  { %v11481_v37 = vmul.f32 %v9762_v6, %v4109_v1 }
 0x713   :  { %4655 = vmatmul.mubr.f32.vlgmr.msra.gmra.mrb[34].mxu0 %v11481_v37  ;;  %4726 = vmatmul.mubr.f32.vlgmr.msra.gmra.mrb[34].mxu1 %v11481_v37 }
 0x714   :  { %8659 = vmatpush1.bf16.msra.mxu0 %v12638_v55  ;;  %8691 = vmatpush1.bf16.msra.mxu1 %v12639_v28 }
 0x715   :  { %8661 = vmatprep.subr.bf16.mxu0 %v12640_v10  ;;  %8693 = vmatprep.subr.bf16.mxu1 %v12641_v57 }
 0x716   :  { %4796 = vmatprep.mubr.f32.mxu0 %v12545_v34  ;;  %4867 = vmatprep.mubr.f32.mxu1 %v12545_v34 }
 0x718   :  { %8663 = vmatpush1.bf16.msra.mxu0 %v12897_v7  ;;  %8695 = vmatpush1.bf16.msra.mxu1 %v12898_v25 }
 0x719   :  { %8665 = vmatprep.subr.bf16.mxu0 %v12899_v29  ;;  %8697 = vmatprep.subr.bf16.mxu1 %v12900_v40 }
 0x71c   :  { %8667 = vmatpush1.bf16.msra.mxu0 %v13028_v13  ;;  %8699 = vmatpush1.bf16.msra.mxu1 %v13029_v32 }
 0x71d   :  { %8669 = vmatprep.subr.bf16.mxu0 %v13030_v33  ;;  %8701 = vmatprep.subr.bf16.mxu1 %v13160_v4 }
 0x720   :  { %8671 = vmatpush1.bf16.msra.mxu0 %v13161_v9  ;;  %8703 = vmatpush1.bf16.msra.mxu1 %v13162_v42 }
 0x721   :  { %8673 = vmatprep.subr.bf16.mxu0 %v13163_v24  ;;  %8705 = vmatprep.subr.bf16.mxu1 %v13164_v18 }
 0x724   :  { %8675 = vmatpush1.bf16.msra.mxu0 %v13165_v20  ;;  %8707 = vmatpush1.bf16.msra.mxu1 %v13166_v48 }
 0x725   :  { %8677 = vmatprep.subr.bf16.mxu0 %v13167_v52  ;;  %8709 = vmatprep.subr.bf16.mxu1 %v13168_v53  ;;  %v13175_v53 = vld [vmem:[#allocation114_spill] sm:$0xff] }
 0x728   :  { %8679 = vmatpush1.bf16.msra.mxu0 %v13169_v23  ;;  %8711 = vmatpush1.bf16.msra.mxu1 %v13170_v61 }
 0x729   :  { %8681 = vmatprep.subr.bf16.mxu0 %v13171_v15  ;;  %8713 = vmatprep.subr.bf16.mxu1 %v13172_v39  ;;  %v13177_v39 = vld [vmem:[#allocation87_spill] sm:$0xff] }
 0x72c   :  { %8683 = vmatpush1.bf16.msra.mxu0 %v13173_v3  ;;  %8715 = vmatpush1.bf16.msra.mxu1 %v13174_v63  ;;  %v13176_v63 = vld [vmem:[#allocation47_spill] sm:$0xff] }
 0x72d   :  { %v4324_v1 = vpop.f32.mrb[30].mxu0  ;;  %v4395_v6 = vpop.f32.mrb[30].mxu1  ;;  %8685 = vmatprep.subr.bf16.mxu0 %v12789_v35  ;;  %8717 = vmatprep.subr.bf16.mxu1 %v13175_v53  ;;  %v13179_v53 = vld [vmem:[#allocation89_spill] sm:$0xff] }
 0x72e   :  { %v4400_v48 = vadd.f32 %v4324_v1, %v12919_v11  ;;  %v4326_v20 = vpop.f32.mrb[31].mxu0  ;;  %v4397_v52 = vpop.f32.mrb[31].mxu1  ;;  %v13178_v1 = vld [vmem:[#allocation88_spill] sm:$0xff] }
 0x72f   :  { %v4401_v61 = vadd.f32 %v4326_v20, %v10883_v19  ;;  %v4403_v3 = vadd.f32 %v4397_v52, %v13176_v63  ;;  %v13180_v20 = vld [vmem:[#allocation90_spill] sm:$0xff] }
 0x730   :  { %v4404_v23 = vmul.f32 0.5, %v4400_v48  ;;  %8687 = vmatpush1.bf16.msra.mxu0 %v13047_v47  ;;  %8719 = vmatpush1.bf16.msra.mxu1 %v13048_v26  ;;  %v13181_v48 = vld [vmem:[#allocation120_spill] sm:$0xff] }
 0x731   :  { %v4405_v15 = vmul.f32 0.5, %v4401_v61  ;;  %8721 = vmatprep.subr.bf16.mxu0 %v13177_v39  ;;  %8753 = vmatprep.subr.bf16.mxu1 %v13178_v1  ;;  %v13182_v61 = vld [vmem:[#allocation121_spill] sm:$0xff]  ;;  %v13185_v1 = vld [vmem:[#allocation123_spill] sm:$0xff]  ;;  %v13188_v39 = vld [vmem:[#allocation130_spill] sm:$0xff] }
 0x732   :  { %9763 = vtanh.f32 %v4404_v23  ;;  %v13183_v23 = vld [vmem:[#allocation48_spill] sm:$0xff] }
 0x733   :  { %9765 = vtanh.f32 %v4405_v15  ;;  %4797 = vmatmul.mubr.f32.vlgmr.msra.gmra.mrb[34].mxu0 %v11433_v2  ;;  %4868 = vmatmul.mubr.f32.vlgmr.msra.gmra.mrb[34].mxu1 %v11433_v2  ;;  %v4402_v52 = vadd.f32 %v4395_v6, %v13183_v23  ;;  %v13184_v15 = vld [vmem:[#allocation122_spill] sm:$0xff]  ;;  %v13186_v2 = vld [vmem:[#allocation124_spill] sm:$0xff] }
 0x734   :  { %8723 = vmatpush1.bf16.msra.mxu0 %v13179_v53  ;;  %8755 = vmatpush1.bf16.msra.mxu1 %v13180_v20  ;;  %9767 = vtanh.f32 %v4403_v3 }
 0x735   :  { %8725 = vmatprep.subr.bf16.mxu0 %v13181_v48  ;;  %8757 = vmatprep.subr.bf16.mxu1 %v13182_v61  ;;  %v4406_v20 = vmul.f32 0.5, %v4402_v52  ;;  %v13187_v61 = vld [vmem:[#allocation127_spill] sm:$0xff] }
 0x736   :  { %4960 = vmatprep.mubr.f32.mxu0 %v12545_v34  ;;  %5031 = vmatprep.mubr.f32.mxu1 %v12545_v34  ;;  %v13189_v52 = vld [vmem:[#allocation131_spill] sm:$0xff] }
 0x737   :  { %9769 = vtanh.f32 %v4406_v20  ;;  %v13196_v20 = vld [vmem:[#allocation136_spill] sm:$0xff] }
 0x738   :  { %8727 = vmatpush1.bf16.msra.mxu0 %v13184_v15  ;;  %8759 = vmatpush1.bf16.msra.mxu1 %v13185_v1 }
 0x739   :  { %8729 = vmatprep.subr.bf16.mxu0 %v13186_v2  ;;  %8761 = vmatprep.subr.bf16.mxu1 %v12932_v49 }
 0x73c   :  { %v9764_v3 = vpop.eup %9763  ;;  %8731 = vmatpush1.bf16.msra.mxu0 %v13060_v46  ;;  %8763 = vmatpush1.bf16.msra.mxu1 %v13187_v61  ;;  %v13191_v46 = vld [vmem:[#allocation133_spill] sm:$0xff] }
 0x73d   :  { %v4410_v53 = vmul.f32 0.5, %v9764_v3  ;;  %v9766_v6 = vpop.eup %9765  ;;  %8733 = vmatprep.subr.bf16.mxu0 %v13062_v27  ;;  %8765 = vmatprep.subr.bf16.mxu1 %v12936_v0  ;;  %v13190_v3 = vld [vmem:[#allocation132_spill] sm:$0xff]  ;;  %v13192_v61 = vld [vmem:[#allocation49_spill] sm:$0xff]  ;;  %v13194_v27 = vld [vmem:[#allocation134_spill] sm:$0xff] }
 0x73e   :  { %v4411_v15 = vmul.f32 0.5, %v9766_v6  ;;  %v9768_v1 = vpop.eup %9767  ;;  %v13199_v6 = vld [vmem:[#allocation139_spill] sm:$0xff] }
 0x73f   :  { %v4413_v23 = vadd.f32 0.5, %v4410_v53  ;;  %v13195_v53 = vld [vmem:[#allocation135_spill] sm:$0xff] }
 0x740   :  { %v4414_v48 = vadd.f32 0.5, %v4411_v15  ;;  %8735 = vmatpush1.bf16.msra.mxu0 %v13188_v39  ;;  %8767 = vmatpush1.bf16.msra.mxu1 %v13189_v52  ;;  %v13197_v15 = vld [vmem:[#allocation137_spill] sm:$0xff]  ;;  %v4423_v52 = vrot.slane %v12855_v51, 6 }
 0x741   :  { %v4418_v2 = vmul.f32 %v9768_v1, %v4413_v23  ;;  %8737 = vmatprep.subr.bf16.mxu0 %v13190_v3  ;;  %8769 = vmatprep.subr.bf16.mxu1 %v13191_v46  ;;  %v9770_v1 = vpop.eup %9769  ;;  %v13198_v23 = vld [vmem:[#allocation138_spill] sm:$0xff]  ;;  %v13200_v46 = vld [vmem:[#allocation140_spill] sm:$0xff] }
 0x742   :  { %v4417_v49 = vmul.f32 %v4414_v48, %v13192_v61  ;;  %v13201_v48 = vld [vmem:[#allocation141_spill] sm:$0xff]  ;;  %v13202_v61 = vld [vmem:[#allocation51_spill] sm:$0xff]  ;;  %v13204_v3 = vld [vmem:[#allocation142_spill] sm:$0xff] }
 0x744   :  { %v11544_v63 = vadd.f32 %v4418_v2, %v4417_v49  ;;  %8739 = vmatpush1.bf16.msra.mxu0 %v13194_v27  ;;  %8771 = vmatpush1.bf16.msra.mxu1 %v13195_v53  ;;  %v4412_v49 = vmul.f32 0.5, %v9770_v1  ;;  %v4422_v2 = vrot.slane %v13202_v61, 6  ;;  %v13203_v27 = vld [vmem:[#allocation53_spill] sm:$0xff] }
 0x745   :  { %8741 = vmatprep.subr.bf16.mxu0 %v13196_v20  ;;  %8773 = vmatprep.subr.bf16.mxu1 %v13197_v15  ;;  %v4424_v53 = vrot.slane %v13203_v27, 6  ;;  %v13205_v20 = vld [vmem:[#allocation143_spill] sm:$0xff] }
 0x746   :  { %13193 = vst [vmem:[#allocation146_spill] sm:$0xff] %v11544_v63  ;;  %9771 = vtanh.f32 %v11544_v63 }
 0x748   :  { %8743 = vmatpush1.bf16.msra.mxu0 %v13198_v23  ;;  %8775 = vmatpush1.bf16.msra.mxu1 %v13199_v6  ;;  %v4425_v23 = vrot.slane %v12856_v50, 6 }
 0x749   :  { %8745 = vmatprep.subr.bf16.mxu0 %v13200_v46  ;;  %8777 = vmatprep.subr.bf16.mxu1 %v13201_v48 }
 0x74c   :  { %8747 = vmatpush1.bf16.msra.mxu0 %v13204_v3  ;;  %8779 = vmatpush1.bf16.msra.mxu1 %v13205_v20  ;;  %v4415_v3 = vadd.f32 0.5, %v4412_v49 }
 0x74d   :  { %v4496_v15 = vpop.f32.mrb[32].mxu0  ;;  %v4567_v63 = vpop.f32.mrb[32].mxu1  ;;  %8749 = vmatprep.subr.bf16.mxu0 %v13073_v17  ;;  %8781 = vmatprep.subr.bf16.mxu1 %v13074_v5 }
 0x74e   :  { %v4497_v6 = vadd.f32 %v4496_v15, %v4422_v2  ;;  %v11561_v39 = vadd.f32 %v4567_v63, %v4424_v53  ;;  %v4498_v46 = vpop.f32.mrb[33].mxu0  ;;  %v4569_v48 = vpop.f32.mrb[33].mxu1 }
 0x74f   :  { %v4499_v1 = vadd.f32 %v4498_v46, %v4423_v52  ;;  %v4570_v27 = vadd.f32 %v4569_v48, %v4425_v23  ;;  %v13206_v46 = vld [vmem:[#allocation155_spill] sm:$0xff]  ;;  %v13208_v52 = vld [vmem:[#allocation157_spill] sm:$0xff]  ;;  %v13211_v23 = vld [vmem:[#allocation160_spill] sm:$0xff] }
 0x750   :  { %v4572_v61 = vmul.f32 0.5, %v4497_v6  ;;  %v9772_v20 = vpop.eup %9771  ;;  %8751 = vmatpush1.bf16.msra.mxu0 %v12825_v36  ;;  %8783 = vmatpush1.bf16.msra.mxu1 %v12950_v12  ;;  %v13212_v6 = vld [vmem:[#allocation161_spill] sm:$0xff] }
 0x751   :  { %v4573_v0 = vmul.f32 0.5, %v4499_v1  ;;  %8785 = vmatprep.subr.bf16.mxu0 %v13075_v54  ;;  %8817 = vmatprep.subr.bf16.mxu1 %v13076_v14  ;;  %v4421_v63 = vmul.f32 %v9772_v20, %v4415_v3  ;;  %v13209_v20 = vld [vmem:[#allocation158_spill] sm:$0xff] }
 0x752   :  { %9773 = vtanh.f32 %v4572_v61 }
 0x753   :  { %9775 = vtanh.f32 %v4573_v0  ;;  %4961 = vmatmul.mubr.f32.vlgmr.msra.gmra.mrb[36].mxu0 %v4421_v63  ;;  %5032 = vmatmul.mubr.f32.vlgmr.msra.gmra.mrb[36].mxu1 %v4421_v63  ;;  %v13207_v0 = vld [vmem:[#allocation156_spill] sm:$0xff] }
 0x754   :  { %8787 = vmatpush1.bf16.msra.mxu0 %v12953_v59  ;;  %8819 = vmatpush1.bf16.msra.mxu1 %v12954_v62  ;;  %9777 = vtanh.f32 %v4570_v27  ;;  %v13210_v27 = vld [vmem:[#allocation159_spill] sm:$0xff] }
 0x755   :  { %8789 = vmatprep.subr.bf16.mxu0 %v12955_v30  ;;  %8821 = vmatprep.subr.bf16.mxu1 %v12956_v16 }
 0x756   :  { %5102 = vmatprep.mubr.f32.mxu0 %v12545_v34  ;;  %5173 = vmatprep.mubr.f32.mxu1 %v12545_v34 }
 0x758   :  { %8791 = vmatpush1.bf16.msra.mxu0 %v12957_v41  ;;  %8823 = vmatpush1.bf16.msra.mxu1 %v13206_v46 }
 0x759   :  { %8793 = vmatprep.subr.bf16.mxu0 %v13207_v0  ;;  %8825 = vmatprep.subr.bf16.mxu1 %v13208_v52 }
 0x75c   :  { %v9774_v3 = vpop.eup %9773  ;;  %8795 = vmatpush1.bf16.msra.mxu0 %v13209_v20  ;;  %8827 = vmatpush1.bf16.msra.mxu1 %v13210_v27 }
 0x75d   :  { %v4578_v53 = vmul.f32 0.5, %v9774_v3  ;;  %v9776_v15 = vpop.eup %9775  ;;  %8797 = vmatprep.subr.bf16.mxu0 %v13211_v23  ;;  %8829 = vmatprep.subr.bf16.mxu1 %v13212_v6 }
 0x75e   :  { %v4579_v49 = vmul.f32 0.5, %v9776_v15  ;;  %v9778_v61 = vpop.eup %9777  ;;  %v13215_v15 = vld [vmem:[#allocation169_spill] sm:$0xff] }
 0x75f   :  { %v4581_v48 = vadd.f32 0.5, %v4578_v53  ;;  %v13214_v53 = vld [vmem:[#allocation168_spill] sm:$0xff] }
 0x760   :  { %v4582_v2 = vadd.f32 0.5, %v4579_v49  ;;  %8799 = vmatpush1.bf16.msra.mxu0 %v13083_v45  ;;  %8831 = vmatpush1.bf16.msra.mxu1 %v13084_v56  ;;  %v13217_v49 = vld [vmem:[#allocation171_spill] sm:$0xff] }
 0x761   :  { %v4586_v1 = vmul.f32 %v9778_v61, %v4581_v48  ;;  %8801 = vmatprep.subr.bf16.mxu0 %v13085_v44  ;;  %8833 = vmatprep.subr.bf16.mxu1 %v13086_v22  ;;  %v13216_v48 = vld [vmem:[#allocation170_spill] sm:$0xff]  ;;  %v13218_v61 = vld [vmem:[#allocation172_spill] sm:$0xff]  ;;  %v13219_v44 = vld [vmem:[#allocation173_spill] sm:$0xff] }
 0x762   :  { %v4585_v63 = vmul.f32 %v4582_v2, %v11379_v43  ;;  %v13220_v22 = vld [vmem:[#allocation174_spill] sm:$0xff]  ;;  %v13221_v43 = vld [vmem:[#allocation175_spill] sm:$0xff]  ;;  %v13222_v2 = vld [vmem:[#allocation176_spill] sm:$0xff] }
 0x764   :  { %v11588_v3 = vadd.f32 %v4586_v1, %v4585_v63  ;;  %8803 = vmatpush1.bf16.msra.mxu0 %v13087_v60  ;;  %8835 = vmatpush1.bf16.msra.mxu1 %v13088_v21  ;;  %v13223_v1 = vld [vmem:[#allocation177_spill] sm:$0xff]  ;;  %v13224_v63 = vld [vmem:[#allocation178_spill] sm:$0xff] }
 0x765   :  { %8805 = vmatprep.subr.bf16.mxu0 %v13214_v53  ;;  %8837 = vmatprep.subr.bf16.mxu1 %v13215_v15  ;;  %v13225_v53 = vld [vmem:[#allocation179_spill] sm:$0xff]  ;;  %v13226_v15 = vld [vmem:[#allocation13_spill] sm:$0xff] }
 0x766   :  { %13213 = vst [vmem:[#allocation52_spill] sm:$0xff] %v11588_v3 }
 0x768   :  { %8807 = vmatpush1.bf16.msra.mxu0 %v13216_v48  ;;  %8839 = vmatpush1.bf16.msra.mxu1 %v13217_v49  ;;  %v13227_v48 = vld [vmem:[#allocation14_spill] sm:$0xff]  ;;  %v13256_v49 = vld [vmem:[#allocation43_spill] sm:$0xff] }
 0x769   :  { %8809 = vmatprep.subr.bf16.mxu0 %v13218_v61  ;;  %8841 = vmatprep.subr.bf16.mxu1 %v13219_v44  ;;  %v13228_v44 = vld [vmem:[#allocation15_spill] sm:$0xff]  ;;  %v13253_v61 = vld [vmem:[#allocation40_spill] sm:$0xff] }
 0x76c   :  { %8811 = vmatpush1.bf16.msra.mxu0 %v13220_v22  ;;  %8843 = vmatpush1.bf16.msra.mxu1 %v13221_v43  ;;  %v13229_v22 = vld [vmem:[#allocation16_spill] sm:$0xff]  ;;  %v13230_v43 = vld [vmem:[#allocation17_spill] sm:$0xff] }
 0x76d   :  { %8813 = vmatprep.subr.bf16.mxu0 %v13222_v2  ;;  %8845 = vmatprep.subr.bf16.mxu1 %v13223_v1  ;;  %v13231_v2 = vld [vmem:[#allocation18_spill] sm:$0xff]  ;;  %v13240_v1 = vld [vmem:[#allocation27_spill] sm:$0xff] }
 0x770   :  { %8815 = vmatpush1.bf16.msra.mxu0 %v13224_v63  ;;  %8847 = vmatpush1.bf16.msra.mxu1 %v13225_v53  ;;  %v13232_v53 = vld [vmem:[#allocation19_spill] sm:$0xff]  ;;  %v13235_v63 = vld [vmem:[#allocation22_spill] sm:$0xff] }
 0x771   :  { %8849 = vmatprep.subr.bf16.mxu0 %v13226_v15  ;;  %8881 = vmatprep.subr.bf16.mxu1 %v13227_v48  ;;  %v13233_v15 = vld [vmem:[#allocation20_spill] sm:$0xff]  ;;  %v13234_v48 = vld [vmem:[#allocation21_spill] sm:$0xff] }
 0x773   :  { %5103 = vmatmul.mubr.f32.vlgmr.msra.gmra.mrb[36].mxu0 %v11481_v37  ;;  %5174 = vmatmul.mubr.f32.vlgmr.msra.gmra.mrb[36].mxu1 %v11481_v37  ;;  %v13236_v37 = vld [vmem:[#allocation23_spill] sm:$0xff] }
 0x774   :  { %8851 = vmatpush1.bf16.msra.mxu0 %v13228_v44  ;;  %8883 = vmatpush1.bf16.msra.mxu1 %v13229_v22  ;;  %v4574_v44 = vmul.f32 0.5, %v11561_v39  ;;  %v13237_v22 = vld [vmem:[#allocation24_spill] sm:$0xff]  ;;  %v13244_v39 = vld [vmem:[#allocation31_spill] sm:$0xff] }
 0x775   :  { %8853 = vmatprep.subr.bf16.mxu0 %v13230_v43  ;;  %8885 = vmatprep.subr.bf16.mxu1 %v13231_v2  ;;  %v13238_v43 = vld [vmem:[#allocation25_spill] sm:$0xff]  ;;  %v13239_v2 = vld [vmem:[#allocation26_spill] sm:$0xff] }
 0x776   :  { %5274 = vmatprep.mubr.f32.mxu0 %v12545_v34  ;;  %5345 = vmatprep.mubr.f32.mxu1 %v12545_v34  ;;  %9779 = vtanh.f32 %v4574_v44  ;;  %v13248_v44 = vld [vmem:[#allocation35_spill] sm:$0xff] }
 0x777   :  { %9781 = vtanh.f32 %v11588_v3 }
 0x778   :  { %8855 = vmatpush1.bf16.msra.mxu0 %v13232_v53  ;;  %8887 = vmatpush1.bf16.msra.mxu1 %v13233_v15  ;;  %v13241_v53 = vld [vmem:[#allocation28_spill] sm:$0xff]  ;;  %v13242_v15 = vld [vmem:[#allocation29_spill] sm:$0xff] }
 0x779   :  { %8857 = vmatprep.subr.bf16.mxu0 %v13234_v48  ;;  %8889 = vmatprep.subr.bf16.mxu1 %v13235_v63  ;;  %v13243_v48 = vld [vmem:[#allocation30_spill] sm:$0xff]  ;;  %v13245_v63 = vld [vmem:[#allocation32_spill] sm:$0xff] }
 0x77c   :  { %8859 = vmatpush1.bf16.msra.mxu0 %v13236_v37  ;;  %8891 = vmatpush1.bf16.msra.mxu1 %v13237_v22  ;;  %v13246_v37 = vld [vmem:[#allocation33_spill] sm:$0xff]  ;;  %v13247_v22 = vld [vmem:[#allocation34_spill] sm:$0xff] }
 0x77d   :  { %8861 = vmatprep.subr.bf16.mxu0 %v13238_v43  ;;  %8893 = vmatprep.subr.bf16.mxu1 %v13239_v2  ;;  %v13250_v2 = vld [vmem:[#allocation37_spill] sm:$0xff] }
 0x780   :  { %8863 = vmatpush1.bf16.msra.mxu0 %v13240_v1  ;;  %8895 = vmatpush1.bf16.msra.mxu1 %v13241_v53  ;;  %v9780_v43 = vpop.eup %9779  ;;  %v13249_v1 = vld [vmem:[#allocation36_spill] sm:$0xff]  ;;  %v13251_v53 = vld [vmem:[#allocation38_spill] sm:$0xff] }
 0x781   :  { %8865 = vmatprep.subr.bf16.mxu0 %v13242_v15  ;;  %8897 = vmatprep.subr.bf16.mxu1 %v13243_v48  ;;  %v4580_v15 = vmul.f32 0.5, %v9780_v43  ;;  %v13252_v48 = vld [vmem:[#allocation39_spill] sm:$0xff]  ;;  %v13261_v43 = vld [vmem:[#allocation56_spill] sm:$0xff] }
 0x784   :  { %8867 = vmatpush1.bf16.msra.mxu0 %v13244_v39  ;;  %8899 = vmatpush1.bf16.msra.mxu1 %v13245_v63  ;;  %v13254_v39 = vld [vmem:[#allocation41_spill] sm:$0xff]  ;;  %v13255_v63 = vld [vmem:[#allocation42_spill] sm:$0xff] }
 0x785   :  { %8869 = vmatprep.subr.bf16.mxu0 %v13246_v37  ;;  %8901 = vmatprep.subr.bf16.mxu1 %v13247_v22  ;;  %v9782_v37 = vpop.eup %9781  ;;  %v4583_v22 = vadd.f32 0.5, %v4580_v15  ;;  %v13263_v15 = vld [vmem:[#allocation58_spill] sm:$0xff] }
 0x788   :  { %8871 = vmatpush1.bf16.msra.mxu0 %v13248_v44  ;;  %8903 = vmatpush1.bf16.msra.mxu1 %v13249_v1  ;;  %v13257_v44 = vld [vmem:[#allocation44_spill] sm:$0xff]  ;;  %v11642_v1 = vmul.f32 %v9782_v37, %v4583_v22  ;;  %v13267_v37 = vld [vmem:[#allocation62_spill] sm:$0xff]  ;;  %v13268_v22 = vld [vmem:[#allocation63_spill] sm:$0xff] }
 0x789   :  { %8873 = vmatprep.subr.bf16.mxu0 %v13250_v2  ;;  %8905 = vmatprep.subr.bf16.mxu1 %v13251_v53  ;;  %v13258_v2 = vld [vmem:[#allocation45_spill] sm:$0xff]  ;;  %v13259_v53 = vld [vmem:[#allocation46_spill] sm:$0xff] }
 0x78c   :  { %8875 = vmatpush1.bf16.msra.mxu0 %v13252_v48  ;;  %8907 = vmatpush1.bf16.msra.mxu1 %v13253_v61  ;;  %v13260_v61 = vld [vmem:[#allocation55_spill] sm:$0xff]  ;;  %v13262_v48 = vld [vmem:[#allocation57_spill] sm:$0xff] }
 0x78d   :  { %8877 = vmatprep.subr.bf16.mxu0 %v13254_v39  ;;  %8909 = vmatprep.subr.bf16.mxu1 %v13255_v63  ;;  %v13265_v39 = vld [vmem:[#allocation60_spill] sm:$0xff]  ;;  %v13266_v63 = vld [vmem:[#allocation61_spill] sm:$0xff] }
 0x790   :  { %8879 = vmatpush1.bf16.msra.mxu0 %v13256_v49  ;;  %8911 = vmatpush1.bf16.msra.mxu1 %v13257_v44  ;;  %v13264_v49 = vld [vmem:[#allocation59_spill] sm:$0xff]  ;;  %v13269_v44 = vld [vmem:[#allocation64_spill] sm:$0xff] }
 0x791   :  { %8913 = vmatprep.subr.bf16.mxu0 %v13258_v2  ;;  %8945 = vmatprep.subr.bf16.mxu1 %v13259_v53  ;;  %v13274_v53 = vld [vmem:[#allocation69_spill] sm:$0xff] }
 0x792   :  { %v13292_v2 = vld [vmem:[#allocation117_spill] sm:$0xff] }
 0x793   :  { %5275 = vmatmul.mubr.f32.vlgmr.msra.gmra.mrb[38].mxu0 %v11642_v1  ;;  %5346 = vmatmul.mubr.f32.vlgmr.msra.gmra.mrb[38].mxu1 %v11642_v1 }
 0x794   :  { %8915 = vmatpush1.bf16.msra.mxu0 %v13260_v61  ;;  %8947 = vmatpush1.bf16.msra.mxu1 %v13261_v43  ;;  %v13270_v43 = vld [vmem:[#allocation65_spill] sm:$0xff]  ;;  %v13273_v61 = vld [vmem:[#allocation68_spill] sm:$0xff] }
 0x795   :  { %8917 = vmatprep.subr.bf16.mxu0 %v13262_v48  ;;  %8949 = vmatprep.subr.bf16.mxu1 %v13263_v15  ;;  %v13271_v48 = vld [vmem:[#allocation66_spill] sm:$0xff]  ;;  %v13272_v15 = vld [vmem:[#allocation67_spill] sm:$0xff] }
 0x796   :  { %5434 = vmatprep.mubr.f32.mxu0 %v12545_v34  ;;  %5505 = vmatprep.mubr.f32.mxu1 %v12545_v34 }
 0x798   :  { %8919 = vmatpush1.bf16.msra.mxu0 %v13264_v49  ;;  %8951 = vmatpush1.bf16.msra.mxu1 %v13265_v39  ;;  %v13275_v49 = vld [vmem:[#allocation70_spill] sm:$0xff]  ;;  %v13276_v39 = vld [vmem:[#allocation71_spill] sm:$0xff] }
 0x799   :  { %8921 = vmatprep.subr.bf16.mxu0 %v13266_v63  ;;  %8953 = vmatprep.subr.bf16.mxu1 %v13267_v37  ;;  %v13277_v63 = vld [vmem:[#allocation72_spill] sm:$0xff]  ;;  %v13278_v37 = vld [vmem:[#allocation73_spill] sm:$0xff] }
 0x79c   :  { %8923 = vmatpush1.bf16.msra.mxu0 %v13268_v22  ;;  %8955 = vmatpush1.bf16.msra.mxu1 %v13269_v44  ;;  %v13279_v22 = vld [vmem:[#allocation74_spill] sm:$0xff]  ;;  %v13280_v44 = vld [vmem:[#allocation75_spill] sm:$0xff] }
 0x79d   :  { %8925 = vmatprep.subr.bf16.mxu0 %v13270_v43  ;;  %8957 = vmatprep.subr.bf16.mxu1 %v13271_v48  ;;  %v13281_v43 = vld [vmem:[#allocation76_spill] sm:$0xff]  ;;  %v13282_v48 = vld [vmem:[#allocation77_spill] sm:$0xff] }
 0x7a0   :  { %8927 = vmatpush1.bf16.msra.mxu0 %v13272_v15  ;;  %8959 = vmatpush1.bf16.msra.mxu1 %v13273_v61  ;;  %v13283_v15 = vld [vmem:[#allocation78_spill] sm:$0xff]  ;;  %v13284_v61 = vld [vmem:[#allocation79_spill] sm:$0xff] }
 0x7a1   :  { %8929 = vmatprep.subr.bf16.mxu0 %v13274_v53  ;;  %8961 = vmatprep.subr.bf16.mxu1 %v13275_v49  ;;  %v13285_v53 = vld [vmem:[#allocation80_spill] sm:$0xff]  ;;  %v13286_v49 = vld [vmem:[#allocation81_spill] sm:$0xff] }
 0x7a4   :  { %8931 = vmatpush1.bf16.msra.mxu0 %v13276_v39  ;;  %8963 = vmatpush1.bf16.msra.mxu1 %v13277_v63  ;;  %v13287_v39 = vld [vmem:[#allocation82_spill] sm:$0xff]  ;;  %v13288_v63 = vld [vmem:[#allocation83_spill] sm:$0xff] }
 0x7a5   :  { %8933 = vmatprep.subr.bf16.mxu0 %v13278_v37  ;;  %8965 = vmatprep.subr.bf16.mxu1 %v13279_v22  ;;  %v13289_v37 = vld [vmem:[#allocation84_spill] sm:$0xff]  ;;  %v13290_v22 = vld [vmem:[#allocation85_spill] sm:$0xff] }
 0x7a8   :  { %8935 = vmatpush1.bf16.msra.mxu0 %v13280_v44  ;;  %8967 = vmatpush1.bf16.msra.mxu1 %v13281_v43  ;;  %v13291_v44 = vld [vmem:[#allocation86_spill] sm:$0xff] }
 0x7a9   :  { %8937 = vmatprep.subr.bf16.mxu0 %v13282_v48  ;;  %8969 = vmatprep.subr.bf16.mxu1 %v13283_v15 }
 0x7ac   :  { %8939 = vmatpush1.bf16.msra.mxu0 %v13284_v61  ;;  %8971 = vmatpush1.bf16.msra.mxu1 %v13285_v53 }
 0x7ad   :  { %8941 = vmatprep.subr.bf16.mxu0 %v13286_v49  ;;  %8973 = vmatprep.subr.bf16.mxu1 %v13287_v39 }
 0x7b0   :  { %8943 = vmatpush1.bf16.msra.mxu0 %v13288_v63  ;;  %8975 = vmatpush1.bf16.msra.mxu1 %v13289_v37 }
 0x7b1   :  { %8977 = vmatprep.subr.bf16.mxu0 %v13290_v22  ;;  %9009 = vmatprep.subr.bf16.mxu1 %v13291_v44 }
 0x806   :  { %v4798_v43 = vpop.f32.mrb[34].mxu0  ;;  %v4869_v48 = vpop.f32.mrb[34].mxu1 }
 0x807   :  { %v4874_v15 = vadd.f32 %v4798_v43, %v13292_v2  ;;  %v4800_v21 = vpop.f32.mrb[35].mxu0  ;;  %v4871_v61 = vpop.f32.mrb[35].mxu1  ;;  %v4876_v37 = vadd.f32 %v4869_v48, %v10512_v8 }
 0x808   :  { %v4875_v53 = vadd.f32 %v4800_v21, %v12760_v38  ;;  %v4877_v39 = vadd.f32 %v4871_v61, %v12761_v58 }
 0x809   :  { %v4878_v60 = vmul.f32 0.5, %v4874_v15  ;;  %v4880_v22 = vmul.f32 0.5, %v4876_v37  ;;  %v13301_v37 = vld [vmem:[#allocation111_spill] sm:$0xff] }
 0x80a   :  { %v4879_v49 = vmul.f32 0.5, %v4875_v53 }
 0x80b   :  { %9783 = vtanh.f32 %v4878_v60 }
 0x80c   :  { %9785 = vtanh.f32 %v4879_v49 }
 0x80d   :  { %9787 = vtanh.f32 %v4877_v39  ;;  %v13299_v39 = vld [vmem:[#allocation109_spill] sm:$0xff] }
 0x80e   :  { %9789 = vtanh.f32 %v4880_v22  ;;  %v13302_v22 = vld [vmem:[#allocation112_spill] sm:$0xff] }
 0x815   :  { %v9784_v63 = vpop.eup %9783 }
 0x816   :  { %v4884_v44 = vmul.f32 0.5, %v9784_v63  ;;  %v9786_v3 = vpop.eup %9785  ;;  %v13300_v63 = vld [vmem:[#allocation110_spill] sm:$0xff] }
 0x817   :  { %v4885_v43 = vmul.f32 0.5, %v9786_v3  ;;  %v9788_v2 = vpop.eup %9787  ;;  %v13297_v3 = vld [vmem:[#allocation107_spill] sm:$0xff] }
 0x818   :  { %v4887_v56 = vadd.f32 0.5, %v4884_v44  ;;  %v9790_v60 = vpop.eup %9789 }
 0x819   :  { %v4888_v45 = vadd.f32 0.5, %v4885_v43  ;;  %v4886_v61 = vmul.f32 0.5, %v9790_v60 }
 0x81a   :  { %v4892_v6 = vmul.f32 %v9788_v2, %v4887_v56  ;;  %v13294_v56 = vld [vmem:[#allocation104_spill] sm:$0xff] }
 0x81b   :  { %v4891_v21 = vmul.f32 %v4888_v45, %v11478_v31  ;;  %v4889_v15 = vadd.f32 0.5, %v4886_v61  ;;  %v13293_v45 = vld [vmem:[#allocation103_spill] sm:$0xff]  ;;  %v13295_v31 = vld [vmem:[#allocation105_spill] sm:$0xff]  ;;  %v13298_v2 = vld [vmem:[#allocation108_spill] sm:$0xff] }
 0x81d   :  { %v11687_v53 = vadd.f32 %v4892_v6, %v4891_v21  ;;  %v13296_v6 = vld [vmem:[#allocation106_spill] sm:$0xff] }
 0x81f   :  { %9791 = vtanh.f32 %v11687_v53 }
 0x829   :  { %v9792_v48 = vpop.eup %9791 }
 0x82a   :  { %v11690_v49 = vmul.f32 %v9792_v48, %v4889_v15  ;;  %v13303_v15 = vld [vmem:[#allocation114_spill] sm:$0xff] }
 0x82c   :  { %5435 = vmatmul.mubr.f32.vlgmr.msra.gmra.mrb[40].mxu0 %v11690_v49  ;;  %5506 = vmatmul.mubr.f32.vlgmr.msra.gmra.mrb[40].mxu1 %v11690_v49 }
 0x82d   :  { %8979 = vmatpush1.bf16.msra.mxu0 %v12638_v55  ;;  %9011 = vmatpush1.bf16.msra.mxu1 %v12639_v28 }
 0x82e   :  { %8981 = vmatprep.subr.bf16.mxu0 %v12640_v10  ;;  %9013 = vmatprep.subr.bf16.mxu1 %v12641_v57 }
 0x82f   :  { %5576 = vmatprep.mubr.f32.mxu0 %v12545_v34  ;;  %5647 = vmatprep.mubr.f32.mxu1 %v12545_v34 }
 0x831   :  { %8983 = vmatpush1.bf16.msra.mxu0 %v12897_v7  ;;  %9015 = vmatpush1.bf16.msra.mxu1 %v12898_v25 }
 0x832   :  { %8985 = vmatprep.subr.bf16.mxu0 %v12899_v29  ;;  %9017 = vmatprep.subr.bf16.mxu1 %v12900_v40 }
 0x835   :  { %8987 = vmatpush1.bf16.msra.mxu0 %v13028_v13  ;;  %9019 = vmatpush1.bf16.msra.mxu1 %v13029_v32 }
 0x836   :  { %8989 = vmatprep.subr.bf16.mxu0 %v13030_v33  ;;  %9021 = vmatprep.subr.bf16.mxu1 %v13160_v4 }
 0x839   :  { %8991 = vmatpush1.bf16.msra.mxu0 %v13161_v9  ;;  %9023 = vmatpush1.bf16.msra.mxu1 %v13162_v42 }
 0x83a   :  { %8993 = vmatprep.subr.bf16.mxu0 %v13163_v24  ;;  %9025 = vmatprep.subr.bf16.mxu1 %v13164_v18 }
 0x83d   :  { %8995 = vmatpush1.bf16.msra.mxu0 %v13293_v45  ;;  %9027 = vmatpush1.bf16.msra.mxu1 %v13294_v56 }
 0x83e   :  { %8997 = vmatprep.subr.bf16.mxu0 %v13295_v31  ;;  %9029 = vmatprep.subr.bf16.mxu1 %v13296_v6 }
 0x841   :  { %8999 = vmatpush1.bf16.msra.mxu0 %v13297_v3  ;;  %9031 = vmatpush1.bf16.msra.mxu1 %v13298_v2 }
 0x842   :  { %9001 = vmatprep.subr.bf16.mxu0 %v13299_v39  ;;  %9033 = vmatprep.subr.bf16.mxu1 %v13300_v63  ;;  %v13305_v63 = vld [vmem:[#allocation87_spill] sm:$0xff] }
 0x845   :  { %9003 = vmatpush1.bf16.msra.mxu0 %v13301_v37  ;;  %9035 = vmatpush1.bf16.msra.mxu1 %v13302_v22  ;;  %v13304_v22 = vld [vmem:[#allocation47_spill] sm:$0xff] }
 0x846   :  { %v5104_v44 = vpop.f32.mrb[36].mxu0  ;;  %v5175_v43 = vpop.f32.mrb[36].mxu1  ;;  %9005 = vmatprep.subr.bf16.mxu0 %v12789_v35  ;;  %9037 = vmatprep.subr.bf16.mxu1 %v13303_v15  ;;  %v13307_v15 = vld [vmem:[#allocation89_spill] sm:$0xff] }
 0x847   :  { %v5180_v21 = vadd.f32 %v5104_v44, %v12919_v11  ;;  %v5106_v60 = vpop.f32.mrb[37].mxu0  ;;  %v5177_v61 = vpop.f32.mrb[37].mxu1  ;;  %v13306_v44 = vld [vmem:[#allocation88_spill] sm:$0xff] }
 0x848   :  { %v5181_v48 = vadd.f32 %v5106_v60, %v10883_v19  ;;  %v5183_v37 = vadd.f32 %v5177_v61, %v13304_v22  ;;  %v13309_v60 = vld [vmem:[#allocation120_spill] sm:$0xff]  ;;  %v13319_v22 = vld [vmem:[#allocation129_spill] sm:$0xff]  ;;  %v13320_v19 = vld [vmem:[#allocation130_spill] sm:$0xff] }
 0x849   :  { %v5184_v2 = vmul.f32 0.5, %v5180_v21  ;;  %9007 = vmatpush1.bf16.msra.mxu0 %v13047_v47  ;;  %9039 = vmatpush1.bf16.msra.mxu1 %v13048_v26  ;;  %v13308_v21 = vld [vmem:[#allocation90_spill] sm:$0xff] }
 0x84a   :  { %v5185_v39 = vmul.f32 0.5, %v5181_v48  ;;  %9041 = vmatprep.subr.bf16.mxu0 %v13305_v63  ;;  %9073 = vmatprep.subr.bf16.mxu1 %v13306_v44  ;;  %v13310_v48 = vld [vmem:[#allocation121_spill] sm:$0xff]  ;;  %v13313_v44 = vld [vmem:[#allocation123_spill] sm:$0xff] }
 0x84b   :  { %9793 = vtanh.f32 %v5184_v2  ;;  %v13311_v2 = vld [vmem:[#allocation48_spill] sm:$0xff] }
 0x84c   :  { %9795 = vtanh.f32 %v5185_v39  ;;  %5577 = vmatmul.mubr.f32.vlgmr.msra.gmra.mrb[40].mxu0 %v11642_v1  ;;  %5648 = vmatmul.mubr.f32.vlgmr.msra.gmra.mrb[40].mxu1 %v11642_v1  ;;  %v5182_v61 = vadd.f32 %v5175_v43, %v13311_v2  ;;  %v13312_v39 = vld [vmem:[#allocation122_spill] sm:$0xff]  ;;  %v13314_v1 = vld [vmem:[#allocation124_spill] sm:$0xff] }
 0x84d   :  { %9043 = vmatpush1.bf16.msra.mxu0 %v13307_v15  ;;  %9075 = vmatpush1.bf16.msra.mxu1 %v13308_v21  ;;  %9797 = vtanh.f32 %v5183_v37  ;;  %v13315_v15 = vld [vmem:[#allocation125_spill] sm:$0xff]  ;;  %v13318_v2 = vld [vmem:[#allocation128_spill] sm:$0xff] }
 0x84e   :  { %9045 = vmatprep.subr.bf16.mxu0 %v13309_v60  ;;  %9077 = vmatprep.subr.bf16.mxu1 %v13310_v48  ;;  %v5186_v21 = vmul.f32 0.5, %v5182_v61  ;;  %v13316_v60 = vld [vmem:[#allocation126_spill] sm:$0xff]  ;;  %v13317_v48 = vld [vmem:[#allocation127_spill] sm:$0xff] }
 0x84f   :  { %5740 = vmatprep.mubr.f32.mxu0 %v12545_v34  ;;  %5811 = vmatprep.mubr.f32.mxu1 %v12545_v34  ;;  %v13321_v61 = vld [vmem:[#allocation131_spill] sm:$0xff] }
 0x850   :  { %9799 = vtanh.f32 %v5186_v21  ;;  %v13328_v21 = vld [vmem:[#allocation136_spill] sm:$0xff] }
 0x851   :  { %9047 = vmatpush1.bf16.msra.mxu0 %v13312_v39  ;;  %9079 = vmatpush1.bf16.msra.mxu1 %v13313_v44 }
 0x852   :  { %9049 = vmatprep.subr.bf16.mxu0 %v13314_v1  ;;  %9081 = vmatprep.subr.bf16.mxu1 %v13315_v15 }
 0x855   :  { %v9794_v37 = vpop.eup %9793  ;;  %9051 = vmatpush1.bf16.msra.mxu0 %v13316_v60  ;;  %9083 = vmatpush1.bf16.msra.mxu1 %v13317_v48  ;;  %v13323_v60 = vld [vmem:[#allocation133_spill] sm:$0xff]  ;;  %v13324_v48 = vld [vmem:[#allocation146_spill] sm:$0xff] }
 0x856   :  { %v5190_v63 = vmul.f32 0.5, %v9794_v37  ;;  %v9796_v43 = vpop.eup %9795  ;;  %9053 = vmatprep.subr.bf16.mxu0 %v13318_v2  ;;  %9085 = vmatprep.subr.bf16.mxu1 %v13319_v22  ;;  %v13322_v37 = vld [vmem:[#allocation132_spill] sm:$0xff]  ;;  %v13326_v2 = vld [vmem:[#allocation134_spill] sm:$0xff] }
 0x857   :  { %v5191_v39 = vmul.f32 0.5, %v9796_v43  ;;  %v9798_v44 = vpop.eup %9797  ;;  %v13331_v43 = vld [vmem:[#allocation139_spill] sm:$0xff] }
 0x858   :  { %v5193_v26 = vadd.f32 0.5, %v5190_v63  ;;  %v13327_v63 = vld [vmem:[#allocation135_spill] sm:$0xff] }
 0x859   :  { %v5194_v47 = vadd.f32 0.5, %v5191_v39  ;;  %9055 = vmatpush1.bf16.msra.mxu0 %v13320_v19  ;;  %9087 = vmatpush1.bf16.msra.mxu1 %v13321_v61  ;;  %v13329_v39 = vld [vmem:[#allocation137_spill] sm:$0xff]  ;;  %v5203_v61 = vrot.slane %v12855_v51, 7 }
 0x85a   :  { %v5198_v1 = vmul.f32 %v9798_v44, %v5193_v26  ;;  %9057 = vmatprep.subr.bf16.mxu0 %v13322_v37  ;;  %9089 = vmatprep.subr.bf16.mxu1 %v13323_v60  ;;  %v9800_v26 = vpop.eup %9799  ;;  %v13330_v44 = vld [vmem:[#allocation138_spill] sm:$0xff]  ;;  %v13332_v60 = vld [vmem:[#allocation140_spill] sm:$0xff] }
 0x85b   :  { %v5197_v15 = vmul.f32 %v5194_v47, %v13324_v48  ;;  %v13333_v47 = vld [vmem:[#allocation141_spill] sm:$0xff]  ;;  %v13334_v48 = vld [vmem:[#allocation51_spill] sm:$0xff]  ;;  %v13336_v37 = vld [vmem:[#allocation142_spill] sm:$0xff] }
 0x85d   :  { %v11753_v35 = vadd.f32 %v5198_v1, %v5197_v15  ;;  %9059 = vmatpush1.bf16.msra.mxu0 %v13326_v2  ;;  %9091 = vmatpush1.bf16.msra.mxu1 %v13327_v63  ;;  %v5192_v15 = vmul.f32 0.5, %v9800_v26  ;;  %v5202_v1 = vrot.slane %v13334_v48, 7  ;;  %v13335_v2 = vld [vmem:[#allocation53_spill] sm:$0xff] }
 0x85e   :  { %9061 = vmatprep.subr.bf16.mxu0 %v13328_v21  ;;  %9093 = vmatprep.subr.bf16.mxu1 %v13329_v39  ;;  %v5204_v63 = vrot.slane %v13335_v2, 7  ;;  %v13337_v21 = vld [vmem:[#allocation143_spill] sm:$0xff] }
 0x85f   :  { %13325 = vst [vmem:[#allocation54_spill] sm:$0xff] %v11753_v35  ;;  %9801 = vtanh.f32 %v11753_v35  ;;  %v5195_v48 = vadd.f32 0.5, %v5192_v15  ;;  %v13342_v15 = vld [vmem:[#allocation165_spill] sm:$0xff] }
 0x861   :  { %9063 = vmatpush1.bf16.msra.mxu0 %v13330_v44  ;;  %9095 = vmatpush1.bf16.msra.mxu1 %v13331_v43  ;;  %v5205_v44 = vrot.slane %v12856_v50, 7 }
 0x862   :  { %9065 = vmatprep.subr.bf16.mxu0 %v13332_v60  ;;  %9097 = vmatprep.subr.bf16.mxu1 %v13333_v47 }
 0x865   :  { %9067 = vmatpush1.bf16.msra.mxu0 %v13336_v37  ;;  %9099 = vmatpush1.bf16.msra.mxu1 %v13337_v21 }
 0x866   :  { %v5276_v39 = vpop.f32.mrb[38].mxu0  ;;  %v5347_v35 = vpop.f32.mrb[38].mxu1  ;;  %9069 = vmatprep.subr.bf16.mxu0 %v13073_v17  ;;  %9101 = vmatprep.subr.bf16.mxu1 %v13074_v5 }
 0x867   :  { %v5277_v43 = vadd.f32 %v5276_v39, %v5202_v1  ;;  %v5348_v19 = vadd.f32 %v5347_v35, %v5204_v63  ;;  %v5278_v60 = vpop.f32.mrb[39].mxu0  ;;  %v5349_v22 = vpop.f32.mrb[39].mxu1  ;;  %v13343_v1 = vld [vmem:[#allocation52_spill] sm:$0xff] }
 0x868   :  { %v5279_v26 = vadd.f32 %v5278_v60, %v5203_v61  ;;  %v5350_v2 = vadd.f32 %v5349_v22, %v5205_v44  ;;  %v13338_v61 = vld [vmem:[#allocation161_spill] sm:$0xff] }
 0x869   :  { %v5352_v37 = vmul.f32 0.5, %v5277_v43  ;;  %v9802_v47 = vpop.eup %9801  ;;  %9071 = vmatpush1.bf16.msra.mxu0 %v12825_v36  ;;  %9103 = vmatpush1.bf16.msra.mxu1 %v12950_v12  ;;  %v5354_v51 = vmul.f32 0.5, %v5348_v19  ;;  %v13339_v43 = vld [vmem:[#allocation162_spill] sm:$0xff]  ;;  %v13340_v19 = vld [vmem:[#allocation163_spill] sm:$0xff] }
 0x86a   :  { %v5353_v21 = vmul.f32 0.5, %v5279_v26  ;;  %9105 = vmatprep.subr.bf16.mxu0 %v13075_v54  ;;  %9137 = vmatprep.subr.bf16.mxu1 %v13076_v14  ;;  %v5201_v50 = vmul.f32 %v9802_v47, %v5195_v48  ;;  %v13341_v47 = vld [vmem:[#allocation164_spill] sm:$0xff]  ;;  %v13344_v48 = vld [vmem:[#allocation166_spill] sm:$0xff] }
 0x86b   :  { %9803 = vtanh.f32 %v5352_v37 }
 0x86c   :  { %9805 = vtanh.f32 %v5353_v21  ;;  %5741 = vmatmul.mubr.f32.vlgmr.msra.gmra.mrb[42].mxu0 %v5201_v50  ;;  %5812 = vmatmul.mubr.f32.vlgmr.msra.gmra.mrb[42].mxu1 %v5201_v50  ;;  %v13345_v50 = vld [vmem:[#allocation167_spill] sm:$0xff] }
 0x86d   :  { %9107 = vmatpush1.bf16.msra.mxu0 %v12953_v59  ;;  %9139 = vmatpush1.bf16.msra.mxu1 %v12954_v62  ;;  %9807 = vtanh.f32 %v5350_v2 }
 0x86e   :  { %9109 = vmatprep.subr.bf16.mxu0 %v12955_v30  ;;  %9141 = vmatprep.subr.bf16.mxu1 %v12956_v16  ;;  %9809 = vtanh.f32 %v5354_v51  ;;  %v13346_v51 = vld [vmem:[#allocation168_spill] sm:$0xff] }
 0x86f   :  { %5882 = vmatprep.mubr.f32.mxu0 %v12545_v34  ;;  %5953 = vmatprep.mubr.f32.mxu1 %v12545_v34 }
 0x871   :  { %9111 = vmatpush1.bf16.msra.mxu0 %v12957_v41  ;;  %9143 = vmatpush1.bf16.msra.mxu1 %v13206_v46 }
 0x872   :  { %9113 = vmatprep.subr.bf16.mxu0 %v13207_v0  ;;  %9145 = vmatprep.subr.bf16.mxu1 %v13208_v52 }
 0x875   :  { %v9804_v35 = vpop.eup %9803  ;;  %9115 = vmatpush1.bf16.msra.mxu0 %v13209_v20  ;;  %9147 = vmatpush1.bf16.msra.mxu1 %v13210_v27 }
 0x876   :  { %v5358_v22 = vmul.f32 0.5, %v9804_v35  ;;  %v9806_v60 = vpop.eup %9805  ;;  %9117 = vmatprep.subr.bf16.mxu0 %v13211_v23  ;;  %9149 = vmatprep.subr.bf16.mxu1 %v13338_v61  ;;  %v13347_v35 = vld [vmem:[#allocation169_spill] sm:$0xff] }
 0x877   :  { %v5359_v63 = vmul.f32 0.5, %v9806_v60  ;;  %v9808_v21 = vpop.eup %9807  ;;  %v13348_v60 = vld [vmem:[#allocation170_spill] sm:$0xff] }
 0x878   :  { %v5361_v37 = vadd.f32 0.5, %v5358_v22  ;;  %v9810_v22 = vpop.eup %9809 }
 0x879   :  { %v5362_v39 = vadd.f32 0.5, %v5359_v63  ;;  %9119 = vmatpush1.bf16.msra.mxu0 %v13339_v43  ;;  %9151 = vmatpush1.bf16.msra.mxu1 %v13340_v19  ;;  %v13350_v63 = vld [vmem:[#allocation172_spill] sm:$0xff] }
 0x87a   :  { %v5366_v44 = vmul.f32 %v9808_v21, %v5361_v37  ;;  %9121 = vmatprep.subr.bf16.mxu0 %v13341_v47  ;;  %9153 = vmatprep.subr.bf16.mxu1 %v13342_v15  ;;  %v13349_v37 = vld [vmem:[#allocation171_spill] sm:$0xff]  ;;  %v13351_v21 = vld [vmem:[#allocation173_spill] sm:$0xff] }
 0x87b   :  { %v5365_v26 = vmul.f32 %v5362_v39, %v13343_v1  ;;  %v5360_v39 = vmul.f32 0.5, %v9810_v22  ;;  %v13353_v1 = vld [vmem:[#allocation175_spill] sm:$0xff] }
 0x87c   :  { %v13360_v22 = vld [vmem:[#allocation55_spill] sm:$0xff] }
 0x87d   :  { %v5367_v2 = vadd.f32 %v5366_v44, %v5365_v26  ;;  %9123 = vmatpush1.bf16.msra.mxu0 %v13344_v48  ;;  %9155 = vmatpush1.bf16.msra.mxu1 %v13345_v50  ;;  %v13352_v44 = vld [vmem:[#allocation174_spill] sm:$0xff]  ;;  %v13354_v26 = vld [vmem:[#allocation176_spill] sm:$0xff] }
 0x87e   :  { %9125 = vmatprep.subr.bf16.mxu0 %v13346_v51  ;;  %9157 = vmatprep.subr.bf16.mxu1 %v13347_v35  ;;  %v13355_v51 = vld [vmem:[#allocation177_spill] sm:$0xff]  ;;  %v5363_v35 = vadd.f32 0.5, %v5360_v39  ;;  %v13356_v50 = vld [vmem:[#allocation178_spill] sm:$0xff] }
 0x87f   :  { %9811 = vtanh.f32 %v5367_v2  ;;  %v13362_v39 = vld [vmem:[#allocation57_spill] sm:$0xff] }
 0x881   :  { %9127 = vmatpush1.bf16.msra.mxu0 %v13348_v60  ;;  %9159 = vmatpush1.bf16.msra.mxu1 %v13349_v37  ;;  %v13357_v60 = vld [vmem:[#allocation179_spill] sm:$0xff]  ;;  %v13358_v37 = vld [vmem:[#allocation45_spill] sm:$0xff] }
 0x882   :  { %9129 = vmatprep.subr.bf16.mxu0 %v13350_v63  ;;  %9161 = vmatprep.subr.bf16.mxu1 %v13351_v21  ;;  %v13359_v63 = vld [vmem:[#allocation46_spill] sm:$0xff] }
 0x885   :  { %9131 = vmatpush1.bf16.msra.mxu0 %v13352_v44  ;;  %9163 = vmatpush1.bf16.msra.mxu1 %v13353_v1  ;;  %v13392_v1 = vld [vmem:[#allocation117_spill] sm:$0xff] }
 0x886   :  { %9133 = vmatprep.subr.bf16.mxu0 %v13354_v26  ;;  %9165 = vmatprep.subr.bf16.mxu1 %v13355_v51  ;;  %v13361_v26 = vld [vmem:[#allocation56_spill] sm:$0xff]  ;;  %v13363_v51 = vld [vmem:[#allocation58_spill] sm:$0xff] }
 0x889   :  { %v9812_v2 = vpop.eup %9811  ;;  %9135 = vmatpush1.bf16.msra.mxu0 %v13356_v50  ;;  %9167 = vmatpush1.bf16.msra.mxu1 %v13357_v60  ;;  %v13373_v60 = vld [vmem:[#allocation68_spill] sm:$0xff]  ;;  %v13374_v50 = vld [vmem:[#allocation69_spill] sm:$0xff] }
 0x88a   :  { %9169 = vmatprep.subr.bf16.mxu0 %v13358_v37  ;;  %9201 = vmatprep.subr.bf16.mxu1 %v13359_v63  ;;  %v11811_v21 = vmul.f32 %v9812_v2, %v5363_v35  ;;  %v13364_v37 = vld [vmem:[#allocation59_spill] sm:$0xff]  ;;  %v13365_v35 = vld [vmem:[#allocation60_spill] sm:$0xff]  ;;  %v13366_v63 = vld [vmem:[#allocation61_spill] sm:$0xff] }
 0x88b   :  { %v13367_v2 = vld [vmem:[#allocation62_spill] sm:$0xff] }
 0x88c   :  { %5883 = vmatmul.mubr.f32.vlgmr.msra.gmra.mrb[42].mxu0 %v11690_v49  ;;  %5954 = vmatmul.mubr.f32.vlgmr.msra.gmra.mrb[42].mxu1 %v11690_v49  ;;  %v13368_v49 = vld [vmem:[#allocation63_spill] sm:$0xff] }
 0x88d   :  { %9171 = vmatpush1.bf16.msra.mxu0 %v13360_v22  ;;  %9203 = vmatpush1.bf16.msra.mxu1 %v13361_v26  ;;  %v13369_v22 = vld [vmem:[#allocation64_spill] sm:$0xff]  ;;  %v13370_v26 = vld [vmem:[#allocation65_spill] sm:$0xff] }
 0x88e   :  { %9173 = vmatprep.subr.bf16.mxu0 %v13362_v39  ;;  %9205 = vmatprep.subr.bf16.mxu1 %v13363_v51  ;;  %v13371_v39 = vld [vmem:[#allocation66_spill] sm:$0xff]  ;;  %v13372_v51 = vld [vmem:[#allocation67_spill] sm:$0xff] }
 0x88f   :  { %6046 = vmatprep.mubr.f32.mxu0 %v12545_v34  ;;  %6117 = vmatprep.mubr.f32.mxu1 %v12545_v34 }
 0x891   :  { %9175 = vmatpush1.bf16.msra.mxu0 %v13364_v37  ;;  %9207 = vmatpush1.bf16.msra.mxu1 %v13365_v35  ;;  %v13375_v37 = vld [vmem:[#allocation70_spill] sm:$0xff]  ;;  %v13376_v35 = vld [vmem:[#allocation71_spill] sm:$0xff] }
 0x892   :  { %9177 = vmatprep.subr.bf16.mxu0 %v13366_v63  ;;  %9209 = vmatprep.subr.bf16.mxu1 %v13367_v2  ;;  %v13377_v63 = vld [vmem:[#allocation72_spill] sm:$0xff]  ;;  %v13378_v2 = vld [vmem:[#allocation73_spill] sm:$0xff] }
 0x895   :  { %9179 = vmatpush1.bf16.msra.mxu0 %v13368_v49  ;;  %9211 = vmatpush1.bf16.msra.mxu1 %v13369_v22  ;;  %v13379_v49 = vld [vmem:[#allocation74_spill] sm:$0xff]  ;;  %v13380_v22 = vld [vmem:[#allocation75_spill] sm:$0xff] }
 0x896   :  { %9181 = vmatprep.subr.bf16.mxu0 %v13370_v26  ;;  %9213 = vmatprep.subr.bf16.mxu1 %v13371_v39  ;;  %v13381_v26 = vld [vmem:[#allocation76_spill] sm:$0xff]  ;;  %v13382_v39 = vld [vmem:[#allocation77_spill] sm:$0xff] }
 0x899   :  { %9183 = vmatpush1.bf16.msra.mxu0 %v13372_v51  ;;  %9215 = vmatpush1.bf16.msra.mxu1 %v13373_v60  ;;  %v13383_v51 = vld [vmem:[#allocation78_spill] sm:$0xff]  ;;  %v13384_v60 = vld [vmem:[#allocation79_spill] sm:$0xff] }
 0x89a   :  { %9185 = vmatprep.subr.bf16.mxu0 %v13374_v50  ;;  %9217 = vmatprep.subr.bf16.mxu1 %v13375_v37  ;;  %v13385_v50 = vld [vmem:[#allocation80_spill] sm:$0xff]  ;;  %v13386_v37 = vld [vmem:[#allocation81_spill] sm:$0xff] }
 0x89d   :  { %9187 = vmatpush1.bf16.msra.mxu0 %v13376_v35  ;;  %9219 = vmatpush1.bf16.msra.mxu1 %v13377_v63  ;;  %v13387_v35 = vld [vmem:[#allocation82_spill] sm:$0xff]  ;;  %v13388_v63 = vld [vmem:[#allocation83_spill] sm:$0xff] }
 0x89e   :  { %9189 = vmatprep.subr.bf16.mxu0 %v13378_v2  ;;  %9221 = vmatprep.subr.bf16.mxu1 %v13379_v49  ;;  %v13389_v2 = vld [vmem:[#allocation84_spill] sm:$0xff]  ;;  %v13390_v49 = vld [vmem:[#allocation85_spill] sm:$0xff] }
 0x8a1   :  { %9191 = vmatpush1.bf16.msra.mxu0 %v13380_v22  ;;  %9223 = vmatpush1.bf16.msra.mxu1 %v13381_v26  ;;  %v13391_v22 = vld [vmem:[#allocation86_spill] sm:$0xff] }
 0x8a2   :  { %9193 = vmatprep.subr.bf16.mxu0 %v13382_v39  ;;  %9225 = vmatprep.subr.bf16.mxu1 %v13383_v51 }
 0x8a5   :  { %9195 = vmatpush1.bf16.msra.mxu0 %v13384_v60  ;;  %9227 = vmatpush1.bf16.msra.mxu1 %v13385_v50 }
 0x8a6   :  { %9197 = vmatprep.subr.bf16.mxu0 %v13386_v37  ;;  %9229 = vmatprep.subr.bf16.mxu1 %v13387_v35 }
 0x8a9   :  { %9199 = vmatpush1.bf16.msra.mxu0 %v13388_v63  ;;  %9231 = vmatpush1.bf16.msra.mxu1 %v13389_v2 }
 0x8aa   :  { %9233 = vmatprep.subr.bf16.mxu0 %v13390_v49  ;;  %9265 = vmatprep.subr.bf16.mxu1 %v13391_v22 }
 0x91f   :  { %v5578_v26 = vpop.f32.mrb[40].mxu0  ;;  %v5649_v39 = vpop.f32.mrb[40].mxu1 }
 0x920   :  { %v5654_v51 = vadd.f32 %v5578_v26, %v13392_v1  ;;  %v5580_v44 = vpop.f32.mrb[41].mxu0  ;;  %v5651_v60 = vpop.f32.mrb[41].mxu1  ;;  %v5656_v63 = vadd.f32 %v5649_v39, %v10512_v8 }
 0x921   :  { %v5655_v50 = vadd.f32 %v5580_v44, %v12760_v38  ;;  %v5657_v35 = vadd.f32 %v5651_v60, %v12761_v58 }
 0x922   :  { %v5658_v48 = vmul.f32 0.5, %v5654_v51  ;;  %v5660_v2 = vmul.f32 0.5, %v5656_v63  ;;  %v13411_v63 = vld [vmem:[#allocation122_spill] sm:$0xff] }
 0x923   :  { %v5659_v37 = vmul.f32 0.5, %v5655_v50 }
 0x924   :  { %9813 = vtanh.f32 %v5658_v48 }
 0x925   :  { %9815 = vtanh.f32 %v5659_v37 }
 0x926   :  { %9817 = vtanh.f32 %v5657_v35 }
 0x927   :  { %9819 = vtanh.f32 %v5660_v2  ;;  %v13412_v2 = vld [vmem:[#allocation123_spill] sm:$0xff] }
 0x92e   :  { %v9814_v49 = vpop.eup %9813 }
 0x92f   :  { %v5664_v22 = vmul.f32 0.5, %v9814_v49  ;;  %v9816_v15 = vpop.eup %9815  ;;  %v13414_v49 = vld [vmem:[#allocation125_spill] sm:$0xff] }
 0x930   :  { %v5665_v26 = vmul.f32 0.5, %v9816_v15  ;;  %v9818_v1 = vpop.eup %9817  ;;  %v13409_v15 = vld [vmem:[#allocation121_spill] sm:$0xff] }
 0x931   :  { %v5667_v47 = vadd.f32 0.5, %v5664_v22  ;;  %v9820_v48 = vpop.eup %9819 }
 0x932   :  { %v5668_v19 = vadd.f32 0.5, %v5665_v26  ;;  %v5666_v60 = vmul.f32 0.5, %v9820_v48  ;;  %v13415_v48 = vld [vmem:[#allocation126_spill] sm:$0xff] }
 0x933   :  { %v5672_v43 = vmul.f32 %v9818_v1, %v5667_v47  ;;  %v13408_v47 = vld [vmem:[#allocation120_spill] sm:$0xff] }
 0x934   :  { %v5671_v44 = vmul.f32 %v5668_v19, %v11687_v53  ;;  %v5669_v50 = vadd.f32 0.5, %v5666_v60  ;;  %v13401_v53 = vld [vmem:[#allocation115_spill] sm:$0xff]  ;;  %v13407_v19 = vld [vmem:[#allocation90_spill] sm:$0xff]  ;;  %v13410_v1 = vld [vmem:[#allocation48_spill] sm:$0xff] }
 0x935   :  { %v13416_v60 = vld [vmem:[#allocation127_spill] sm:$0xff] }
 0x936   :  { %v11854_v51 = vadd.f32 %v5672_v43, %v5671_v44  ;;  %v13406_v43 = vld [vmem:[#allocation89_spill] sm:$0xff] }
 0x938   :  { %9821 = vtanh.f32 %v11854_v51 }
 0x942   :  { %v9822_v39 = vpop.eup %9821 }
 0x943   :  { %v11857_v37 = vmul.f32 %v9822_v39, %v5669_v50  ;;  %v13417_v39 = vld [vmem:[#allocation128_spill] sm:$0xff] }
 0x945   :  { %6047 = vmatmul.mubr.f32.vlgmr.msra.gmra.mrb[44].mxu0 %v11857_v37  ;;  %6118 = vmatmul.mubr.f32.vlgmr.msra.gmra.mrb[44].mxu1 %v11857_v37 }
 0x946   :  { %9235 = vmatpush1.bf16.msra.mxu0 %v12638_v55  ;;  %9267 = vmatpush1.bf16.msra.mxu1 %v12639_v28  ;;  %v13393_v55 = vld [vmem:[#allocation108_spill] sm:$0xff]  ;;  %v13394_v28 = vld [vmem:[#allocation109_spill] sm:$0xff] }
 0x947   :  { %9237 = vmatprep.subr.bf16.mxu0 %v12640_v10  ;;  %9269 = vmatprep.subr.bf16.mxu1 %v12641_v57  ;;  %v13395_v10 = vld [vmem:[#allocation110_spill] sm:$0xff]  ;;  %v13396_v57 = vld [vmem:[#allocation111_spill] sm:$0xff] }
 0x948   :  { %6188 = vmatprep.mubr.f32.mxu0 %v12545_v34  ;;  %6259 = vmatprep.mubr.f32.mxu1 %v12545_v34 }
 0x94a   :  { %9239 = vmatpush1.bf16.msra.mxu0 %v12897_v7  ;;  %9271 = vmatpush1.bf16.msra.mxu1 %v12898_v25  ;;  %v13397_v7 = vld [vmem:[#allocation112_spill] sm:$0xff] }
 0x94b   :  { %9241 = vmatprep.subr.bf16.mxu0 %v12899_v29  ;;  %9273 = vmatprep.subr.bf16.mxu1 %v12900_v40 }
 0x94e   :  { %9243 = vmatpush1.bf16.msra.mxu0 %v13028_v13  ;;  %9275 = vmatpush1.bf16.msra.mxu1 %v13029_v32 }
 0x94f   :  { %9245 = vmatprep.subr.bf16.mxu0 %v13030_v33  ;;  %9277 = vmatprep.subr.bf16.mxu1 %v13160_v4  ;;  %v13398_v33 = vld [vmem:[#allocation113_spill] sm:$0xff]  ;;  %v13399_v4 = vld [vmem:[#allocation114_spill] sm:$0xff] }
 0x952   :  { %9247 = vmatpush1.bf16.msra.mxu0 %v13161_v9  ;;  %9279 = vmatpush1.bf16.msra.mxu1 %v13162_v42  ;;  %v13400_v9 = vld [vmem:[#allocation119_spill] sm:$0xff] }
 0x953   :  { %9249 = vmatprep.subr.bf16.mxu0 %v13163_v24  ;;  %9281 = vmatprep.subr.bf16.mxu1 %v13164_v18 }
 0x956   :  { %9251 = vmatpush1.bf16.msra.mxu0 %v13293_v45  ;;  %9283 = vmatpush1.bf16.msra.mxu1 %v13294_v56  ;;  %v13402_v45 = vld [vmem:[#allocation116_spill] sm:$0xff]  ;;  %v13403_v56 = vld [vmem:[#allocation47_spill] sm:$0xff] }
 0x957   :  { %9253 = vmatprep.subr.bf16.mxu0 %v13295_v31  ;;  %9285 = vmatprep.subr.bf16.mxu1 %v13296_v6  ;;  %v13404_v6 = vld [vmem:[#allocation87_spill] sm:$0xff] }
 0x95a   :  { %9255 = vmatpush1.bf16.msra.mxu0 %v13297_v3  ;;  %9287 = vmatpush1.bf16.msra.mxu1 %v13393_v55  ;;  %v13405_v3 = vld [vmem:[#allocation88_spill] sm:$0xff]  ;;  %v13418_v55 = vld [vmem:[#allocation129_spill] sm:$0xff] }
 0x95b   :  { %9257 = vmatprep.subr.bf16.mxu0 %v13394_v28  ;;  %9289 = vmatprep.subr.bf16.mxu1 %v13395_v10 }
 0x95e   :  { %9259 = vmatpush1.bf16.msra.mxu0 %v13396_v57  ;;  %9291 = vmatpush1.bf16.msra.mxu1 %v13397_v7 }
 0x95f   :  { %v5884_v25 = vpop.f32.mrb[42].mxu0  ;;  %v5955_v29 = vpop.f32.mrb[42].mxu1  ;;  %9261 = vmatprep.subr.bf16.mxu0 %v13398_v33  ;;  %9293 = vmatprep.subr.bf16.mxu1 %v13399_v4  ;;  %v13423_v33 = vld [vmem:[#allocation54_spill] sm:$0xff] }
 0x960   :  { %v5960_v40 = vadd.f32 %v5884_v25, %v12919_v11  ;;  %v5886_v13 = vpop.f32.mrb[43].mxu0  ;;  %v5957_v32 = vpop.f32.mrb[43].mxu1  ;;  %v5962_v35 = vadd.f32 %v5955_v29, %v13410_v1  ;;  %v13419_v29 = vld [vmem:[#allocation130_spill] sm:$0xff] }
 0x961   :  { %v5961_v42 = vadd.f32 %v5886_v13, %v13400_v9  ;;  %v5963_v31 = vadd.f32 %v5957_v32, %v13403_v56  ;;  %v13421_v13 = vld [vmem:[#allocation132_spill] sm:$0xff]  ;;  %v13422_v32 = vld [vmem:[#allocation133_spill] sm:$0xff] }
 0x962   :  { %v5964_v24 = vmul.f32 0.5, %v5960_v40  ;;  %9263 = vmatpush1.bf16.msra.mxu0 %v13401_v53  ;;  %9295 = vmatpush1.bf16.msra.mxu1 %v13402_v45  ;;  %v5966_v22 = vmul.f32 0.5, %v5962_v35  ;;  %v13420_v40 = vld [vmem:[#allocation131_spill] sm:$0xff]  ;;  %v13426_v53 = vld [vmem:[#allocation136_spill] sm:$0xff]  ;;  %v13427_v45 = vld [vmem:[#allocation137_spill] sm:$0xff] }
 0x963   :  { %v5965_v18 = vmul.f32 0.5, %v5961_v42  ;;  %9297 = vmatprep.subr.bf16.mxu0 %v13404_v6  ;;  %9329 = vmatprep.subr.bf16.mxu1 %v13405_v3  ;;  %v13428_v35 = vld [vmem:[#allocation138_spill] sm:$0xff] }
 0x964   :  { %9823 = vtanh.f32 %v5964_v24  ;;  %v13424_v24 = vld [vmem:[#allocation134_spill] sm:$0xff] }
 0x965   :  { %9825 = vtanh.f32 %v5965_v18  ;;  %6189 = vmatmul.mubr.f32.vlgmr.msra.gmra.mrb[44].mxu0 %v11811_v21  ;;  %6260 = vmatmul.mubr.f32.vlgmr.msra.gmra.mrb[44].mxu1 %v11811_v21  ;;  %v13413_v21 = vld [vmem:[#allocation124_spill] sm:$0xff]  ;;  %v13425_v18 = vld [vmem:[#allocation135_spill] sm:$0xff] }
 0x966   :  { %9299 = vmatpush1.bf16.msra.mxu0 %v13406_v43  ;;  %9331 = vmatpush1.bf16.msra.mxu1 %v13407_v19  ;;  %9827 = vtanh.f32 %v5963_v31 }
 0x967   :  { %9301 = vmatprep.subr.bf16.mxu0 %v13408_v47  ;;  %9333 = vmatprep.subr.bf16.mxu1 %v13409_v15  ;;  %9829 = vtanh.f32 %v5966_v22  ;;  %v13429_v22 = vld [vmem:[#allocation139_spill] sm:$0xff] }
 0x968   :  { %6352 = vmatprep.mubr.f32.mxu0 %v12545_v34  ;;  %6423 = vmatprep.mubr.f32.mxu1 %v12545_v34 }
 0x96a   :  { %9303 = vmatpush1.bf16.msra.mxu0 %v13411_v63  ;;  %9335 = vmatpush1.bf16.msra.mxu1 %v13412_v2 }
 0x96b   :  { %9305 = vmatprep.subr.bf16.mxu0 %v13413_v21  ;;  %9337 = vmatprep.subr.bf16.mxu1 %v13414_v49 }
 0x96e   :  { %v9824_v26 = vpop.eup %9823  ;;  %9307 = vmatpush1.bf16.msra.mxu0 %v13415_v48  ;;  %9339 = vmatpush1.bf16.msra.mxu1 %v13416_v60 }
 0x96f   :  { %v5970_v44 = vmul.f32 0.5, %v9824_v26  ;;  %v9826_v50 = vpop.eup %9825  ;;  %9309 = vmatprep.subr.bf16.mxu0 %v13417_v39  ;;  %9341 = vmatprep.subr.bf16.mxu1 %v13418_v55  ;;  %v13430_v26 = vld [vmem:[#allocation140_spill] sm:$0xff] }
 0x970   :  { %v5971_v10 = vmul.f32 0.5, %v9826_v50  ;;  %v9828_v57 = vpop.eup %9827 }
 0x971   :  { %v5973_v28 = vadd.f32 0.5, %v5970_v44  ;;  %v9830_v31 = vpop.eup %9829  ;;  %v13431_v44 = vld [vmem:[#allocation141_spill] sm:$0xff] }
 0x972   :  { %v5974_v7 = vadd.f32 0.5, %v5971_v10  ;;  %9311 = vmatpush1.bf16.msra.mxu0 %v13419_v29  ;;  %9343 = vmatpush1.bf16.msra.mxu1 %v13420_v40  ;;  %v5972_v50 = vmul.f32 0.5, %v9830_v31  ;;  %v13433_v10 = vld [vmem:[#allocation143_spill] sm:$0xff]  ;;  %v13436_v31 = vld [vmem:[#allocation164_spill] sm:$0xff] }
 0x973   :  { %v5978_v25 = vmul.f32 %v9828_v57, %v5973_v28  ;;  %9313 = vmatprep.subr.bf16.mxu0 %v13421_v13  ;;  %9345 = vmatprep.subr.bf16.mxu1 %v13422_v32  ;;  %v13432_v28 = vld [vmem:[#allocation142_spill] sm:$0xff] }
 0x974   :  { %v5977_v4 = vmul.f32 %v5974_v7, %v13423_v33  ;;  %v5975_v57 = vadd.f32 0.5, %v5972_v50  ;;  %v13434_v33 = vld [vmem:[#allocation162_spill] sm:$0xff]  ;;  %v13437_v50 = vld [vmem:[#allocation165_spill] sm:$0xff] }
 0x976   :  { %v11920_v42 = vadd.f32 %v5978_v25, %v5977_v4  ;;  %9315 = vmatpush1.bf16.msra.mxu0 %v13424_v24  ;;  %9347 = vmatpush1.bf16.msra.mxu1 %v13425_v18  ;;  %v13435_v4 = vld [vmem:[#allocation163_spill] sm:$0xff] }
 0x977   :  { %9317 = vmatprep.subr.bf16.mxu0 %v13426_v53  ;;  %9349 = vmatprep.subr.bf16.mxu1 %v13427_v45 }
 0x978   :  { %9831 = vtanh.f32 %v11920_v42 }
 0x97a   :  { %9319 = vmatpush1.bf16.msra.mxu0 %v13428_v35  ;;  %9351 = vmatpush1.bf16.msra.mxu1 %v13429_v22 }
 0x97b   :  { %9321 = vmatprep.subr.bf16.mxu0 %v13430_v26  ;;  %9353 = vmatprep.subr.bf16.mxu1 %v13431_v44 }
 0x97e   :  { %9323 = vmatpush1.bf16.msra.mxu0 %v13432_v28  ;;  %9355 = vmatpush1.bf16.msra.mxu1 %v13433_v10 }
 0x97f   :  { %9325 = vmatprep.subr.bf16.mxu0 %v13073_v17  ;;  %9357 = vmatprep.subr.bf16.mxu1 %v13074_v5 }
 0x982   :  { %v9832_v7 = vpop.eup %9831  ;;  %9327 = vmatpush1.bf16.msra.mxu0 %v12825_v36  ;;  %9359 = vmatpush1.bf16.msra.mxu1 %v12950_v12 }
 0x983   :  { %9361 = vmatprep.subr.bf16.mxu0 %v13075_v54  ;;  %9393 = vmatprep.subr.bf16.mxu1 %v13076_v14  ;;  %v5981_v25 = vmul.f32 %v9832_v7, %v5975_v57  ;;  %v13438_v57 = vld [vmem:[#allocation166_spill] sm:$0xff]  ;;  %v13439_v7 = vld [vmem:[#allocation167_spill] sm:$0xff] }
 0x985   :  { %6353 = vmatmul.mubr.f32.vlgmr.msra.gmra.mrb[46].mxu0 %v5981_v25  ;;  %6424 = vmatmul.mubr.f32.vlgmr.msra.gmra.mrb[46].mxu1 %v5981_v25  ;;  %v13440_v25 = vld [vmem:[#allocation168_spill] sm:$0xff] }
 0x986   :  { %9363 = vmatpush1.bf16.msra.mxu0 %v12953_v59  ;;  %9395 = vmatpush1.bf16.msra.mxu1 %v12954_v62 }
 0x987   :  { %9365 = vmatprep.subr.bf16.mxu0 %v12955_v30  ;;  %9397 = vmatprep.subr.bf16.mxu1 %v12956_v16 }
 0x988   :  { %6494 = vmatprep.mubr.f32.mxu0 %v12545_v34  ;;  %6565 = vmatprep.mubr.f32.mxu1 %v12545_v34 }
 0x98a   :  { %9367 = vmatpush1.bf16.msra.mxu0 %v12957_v41  ;;  %9399 = vmatpush1.bf16.msra.mxu1 %v13206_v46 }
 0x98b   :  { %9369 = vmatprep.subr.bf16.mxu0 %v13207_v0  ;;  %9401 = vmatprep.subr.bf16.mxu1 %v13208_v52 }
 0x98e   :  { %9371 = vmatpush1.bf16.msra.mxu0 %v13209_v20  ;;  %9403 = vmatpush1.bf16.msra.mxu1 %v13210_v27  ;;  %v13441_v20 = vld [vmem:[#allocation169_spill] sm:$0xff]  ;;  %v13442_v27 = vld [vmem:[#allocation170_spill] sm:$0xff] }
 0x98f   :  { %9373 = vmatprep.subr.bf16.mxu0 %v13211_v23  ;;  %9405 = vmatprep.subr.bf16.mxu1 %v13338_v61  ;;  %v13443_v23 = vld [vmem:[#allocation171_spill] sm:$0xff]  ;;  %v13444_v61 = vld [vmem:[#allocation172_spill] sm:$0xff] }
 0x992   :  { %9375 = vmatpush1.bf16.msra.mxu0 %v13434_v33  ;;  %9407 = vmatpush1.bf16.msra.mxu1 %v13435_v4  ;;  %v13445_v33 = vld [vmem:[#allocation173_spill] sm:$0xff]  ;;  %v13446_v4 = vld [vmem:[#allocation174_spill] sm:$0xff] }
 0x993   :  { %9377 = vmatprep.subr.bf16.mxu0 %v13436_v31  ;;  %9409 = vmatprep.subr.bf16.mxu1 %v13437_v50  ;;  %v13447_v31 = vld [vmem:[#allocation175_spill] sm:$0xff]  ;;  %v13448_v50 = vld [vmem:[#allocation176_spill] sm:$0xff] }
 0x996   :  { %9379 = vmatpush1.bf16.msra.mxu0 %v13438_v57  ;;  %9411 = vmatpush1.bf16.msra.mxu1 %v13439_v7  ;;  %v13449_v57 = vld [vmem:[#allocation177_spill] sm:$0xff]  ;;  %v13450_v7 = vld [vmem:[#allocation178_spill] sm:$0xff] }
 0x997   :  { %9381 = vmatprep.subr.bf16.mxu0 %v13440_v25  ;;  %9413 = vmatprep.subr.bf16.mxu1 %v13441_v20  ;;  %v13451_v25 = vld [vmem:[#allocation179_spill] sm:$0xff] }
 0x99a   :  { %9383 = vmatpush1.bf16.msra.mxu0 %v13442_v27  ;;  %9415 = vmatpush1.bf16.msra.mxu1 %v13443_v23 }
 0x99b   :  { %9385 = vmatprep.subr.bf16.mxu0 %v13444_v61  ;;  %9417 = vmatprep.subr.bf16.mxu1 %v13445_v33 }
 0x99e   :  { %9387 = vmatpush1.bf16.msra.mxu0 %v13446_v4  ;;  %9419 = vmatpush1.bf16.msra.mxu1 %v13447_v31 }
 0x99f   :  { %9389 = vmatprep.subr.bf16.mxu0 %v13448_v50  ;;  %9421 = vmatprep.subr.bf16.mxu1 %v13449_v57 }
 0x9a2   :  { %9391 = vmatpush1.bf16.msra.mxu0 %v13450_v7  ;;  %9423 = vmatpush1.bf16.msra.mxu1 %v13451_v25 }
 0x9a3   :  { %9425 = vmatprep.subr.bf16.mxu0 %v13404_v6  ;;  %9457 = vmatprep.subr.bf16.mxu1 %v13405_v3  ;;  %v13452_v3 = vld [vmem:[#allocation117_spill] sm:$0xff] }
 0x9a5   :  { %6495 = vmatmul.mubr.f32.vlgmr.msra.gmra.mrb[46].mxu0 %v11857_v37  ;;  %6566 = vmatmul.mubr.f32.vlgmr.msra.gmra.mrb[46].mxu1 %v11857_v37 }
 0x9a6   :  { %9427 = vmatpush1.bf16.msra.mxu0 %v13406_v43  ;;  %9459 = vmatpush1.bf16.msra.mxu1 %v13407_v19 }
 0x9a7   :  { %9429 = vmatprep.subr.bf16.mxu0 %v13408_v47  ;;  %9461 = vmatprep.subr.bf16.mxu1 %v13409_v15 }
 0x9a8   :  { %6658 = vmatprep.mubr.f32.mxu0 %v12545_v34  ;;  %6729 = vmatprep.mubr.f32.mxu1 %v12545_v34 }
 0x9aa   :  { %9431 = vmatpush1.bf16.msra.mxu0 %v13411_v63  ;;  %9463 = vmatpush1.bf16.msra.mxu1 %v13412_v2 }
 0x9ab   :  { %9433 = vmatprep.subr.bf16.mxu0 %v13413_v21  ;;  %9465 = vmatprep.subr.bf16.mxu1 %v13414_v49 }
 0x9ae   :  { %9435 = vmatpush1.bf16.msra.mxu0 %v13415_v48  ;;  %9467 = vmatpush1.bf16.msra.mxu1 %v13416_v60 }
 0x9af   :  { %9437 = vmatprep.subr.bf16.mxu0 %v13417_v39  ;;  %9469 = vmatprep.subr.bf16.mxu1 %v13418_v55 }
 0x9b2   :  { %9439 = vmatpush1.bf16.msra.mxu0 %v13419_v29  ;;  %9471 = vmatpush1.bf16.msra.mxu1 %v13420_v40 }
 0x9b3   :  { %9441 = vmatprep.subr.bf16.mxu0 %v13421_v13  ;;  %9473 = vmatprep.subr.bf16.mxu1 %v13422_v32 }
 0x9b6   :  { %9443 = vmatpush1.bf16.msra.mxu0 %v13424_v24  ;;  %9475 = vmatpush1.bf16.msra.mxu1 %v13425_v18 }
 0x9b7   :  { %9445 = vmatprep.subr.bf16.mxu0 %v13426_v53  ;;  %9477 = vmatprep.subr.bf16.mxu1 %v13427_v45 }
 0x9ba   :  { %9447 = vmatpush1.bf16.msra.mxu0 %v13428_v35  ;;  %9479 = vmatpush1.bf16.msra.mxu1 %v13429_v22 }
 0x9bb   :  { %9449 = vmatprep.subr.bf16.mxu0 %v13430_v26  ;;  %9481 = vmatprep.subr.bf16.mxu1 %v13431_v44 }
 0x9be   :  { %9451 = vmatpush1.bf16.msra.mxu0 %v13432_v28  ;;  %9483 = vmatpush1.bf16.msra.mxu1 %v13433_v10 }
 0x9bf   :  { %9453 = vmatprep.subr.bf16.mxu0 %v13073_v17  ;;  %9485 = vmatprep.subr.bf16.mxu1 %v13074_v5 }
 0x9c2   :  { %9455 = vmatpush1.bf16.msra.mxu0 %v12825_v36  ;;  %9487 = vmatpush1.bf16.msra.mxu1 %v12950_v12 }
 0x9c3   :  { %9489 = vmatprep.subr.bf16.mxu0 %v13075_v54  ;;  %9521 = vmatprep.subr.bf16.mxu1 %v13076_v14 }
 0xa38   :  { %v6190_v37 = vpop.f32.mrb[44].mxu0  ;;  %v6261_v6 = vpop.f32.mrb[44].mxu1 }
 0xa39   :  { %v6266_v43 = vadd.f32 %v6190_v37, %v13452_v3  ;;  %v6192_v19 = vpop.f32.mrb[45].mxu0  ;;  %v6263_v47 = vpop.f32.mrb[45].mxu1  ;;  %v6268_v36 = vadd.f32 %v6261_v6, %v10512_v8 }
 0xa3a   :  { %v6267_v15 = vadd.f32 %v6192_v19, %v12760_v38  ;;  %v6269_v5 = vadd.f32 %v6263_v47, %v12761_v58 }
 0xa3b   :  { %v6270_v63 = vmul.f32 0.5, %v6266_v43  ;;  %v6272_v12 = vmul.f32 0.5, %v6268_v36 }
 0xa3c   :  { %v6271_v17 = vmul.f32 0.5, %v6267_v15 }
 0xa3d   :  { %9833 = vtanh.f32 %v6270_v63 }
 0xa3e   :  { %9835 = vtanh.f32 %v6271_v17 }
 0xa3f   :  { %9837 = vtanh.f32 %v6269_v5 }
 0xa40   :  { %9839 = vtanh.f32 %v6272_v12 }
 0xa47   :  { %v9834_v54 = vpop.eup %9833 }
 0xa48   :  { %v6276_v14 = vmul.f32 0.5, %v9834_v54  ;;  %v9836_v2 = vpop.eup %9835 }
 0xa49   :  { %v6277_v49 = vmul.f32 0.5, %v9836_v2  ;;  %v9838_v48 = vpop.eup %9837  ;;  %v13458_v2 = vld [vmem:[#allocation163_spill] sm:$0xff] }
 0xa4a   :  { %v6279_v21 = vadd.f32 0.5, %v6276_v14  ;;  %v9840_v29 = vpop.eup %9839 }
 0xa4b   :  { %v6280_v60 = vadd.f32 0.5, %v6277_v49  ;;  %v6278_v58 = vmul.f32 0.5, %v9840_v29 }
 0xa4c   :  { %v6284_v39 = vmul.f32 %v9838_v48, %v6279_v21 }
 0xa4d   :  { %v6283_v38 = vmul.f32 %v6280_v60, %v11854_v51  ;;  %v6281_v40 = vadd.f32 0.5, %v6278_v58 }
 0xa4f   :  { %v6285_v55 = vadd.f32 %v6284_v39, %v6283_v38 }
 0xa51   :  { %9841 = vtanh.f32 %v6285_v55 }
 0xa5b   :  { %v9842_v13 = vpop.eup %9841 }
 0xa5c   :  { %v12014_v32 = vmul.f32 %v9842_v13, %v6281_v40 }
 0xa78   :  { %v6496_v8 = vpop.f32.mrb[46].mxu0  ;;  %v6567_v24 = vpop.f32.mrb[46].mxu1 }
 0xa79   :  { %v6572_v18 = vadd.f32 %v6496_v8, %v12919_v11  ;;  %v6498_v53 = vpop.f32.mrb[47].mxu0  ;;  %v6569_v45 = vpop.f32.mrb[47].mxu1  ;;  %v6574_v44 = vadd.f32 %v6567_v24, %v13410_v1 }
 0xa7a   :  { %v6573_v35 = vadd.f32 %v6498_v53, %v13400_v9  ;;  %v6575_v51 = vadd.f32 %v6569_v45, %v13403_v56 }
 0xa7b   :  { %v6576_v22 = vmul.f32 0.5, %v6572_v18  ;;  %v6578_v28 = vmul.f32 0.5, %v6574_v44  ;;  %v6906_v18 = vld [vmem:[#allocation2] sm:$0x1] }
 0xa7c   :  { %v6577_v26 = vmul.f32 0.5, %v6573_v35 }
 0xa7d   :  { %9843 = vtanh.f32 %v6576_v22 }
 0xa7e   :  { %9845 = vtanh.f32 %v6577_v26 }
 0xa7f   :  { %9847 = vtanh.f32 %v6575_v51 }
 0xa80   :  { %9849 = vtanh.f32 %v6578_v28 }
 0xa87   :  { %v9844_v10 = vpop.eup %9843 }
 0xa88   :  { %v6582_v37 = vmul.f32 0.5, %v9844_v10  ;;  %v9846_v6 = vpop.eup %9845 }
 0xa89   :  { %v6583_v43 = vmul.f32 0.5, %v9846_v6  ;;  %v9848_v19 = vpop.eup %9847 }
 0xa8a   :  { %v6585_v3 = vadd.f32 0.5, %v6582_v37  ;;  %v9850_v5 = vpop.eup %9849 }
 0xa8b   :  { %v6586_v47 = vadd.f32 0.5, %v6583_v43  ;;  %v6584_v36 = vmul.f32 0.5, %v9850_v5 }
 0xa8c   :  { %v6590_v15 = vmul.f32 %v9848_v19, %v6585_v3 }
 0xa8d   :  { %v6589_v63 = vmul.f32 %v6586_v47, %v11920_v42  ;;  %v6587_v12 = vadd.f32 0.5, %v6584_v36  ;;  %v13453_v42 = vld [vmem:[#allocation158_spill] sm:$0xff] }
 0xa8f   :  { %v12021_v17 = vadd.f32 %v6590_v15, %v6589_v63 }
 0xa91   :  { %9851 = vtanh.f32 %v12021_v17 }
 0xa9b   :  { %v9852_v54 = vpop.eup %9851 }
 0xa9c   :  { %v6593_v14 = vmul.f32 %v9852_v54, %v6587_v12 }
 0xa9e   :  { %6659 = vmatmul.mubr.f32.vlgmr.msra.gmra.mrb[48].mxu0 %v6593_v14  ;;  %6730 = vmatmul.mubr.f32.vlgmr.msra.gmra.mrb[48].mxu1 %v6593_v14 }
 0xa9f   :  { %9491 = vmatpush1.bf16.msra.mxu0 %v12953_v59  ;;  %9523 = vmatpush1.bf16.msra.mxu1 %v12954_v62  ;;  %v13454_v59 = vld [vmem:[#allocation159_spill] sm:$0xff]  ;;  %v13455_v62 = vld [vmem:[#allocation160_spill] sm:$0xff] }
 0xaa0   :  { %9493 = vmatprep.subr.bf16.mxu0 %v12955_v30  ;;  %9525 = vmatprep.subr.bf16.mxu1 %v12956_v16  ;;  %v13456_v30 = vld [vmem:[#allocation161_spill] sm:$0xff]  ;;  %v13457_v16 = vld [vmem:[#allocation162_spill] sm:$0xff] }
 0xaa1   :  { %6800 = vmatprep.mubr.f32.mxu0 %v12545_v34  ;;  %6871 = vmatprep.mubr.f32.mxu1 %v12545_v34  ;;  %v13459_v34 = vld [vmem:[#allocation164_spill] sm:$0xff] }
 0xaa3   :  { %9495 = vmatpush1.bf16.msra.mxu0 %v12957_v41  ;;  %9527 = vmatpush1.bf16.msra.mxu1 %v13206_v46  ;;  %v13460_v41 = vld [vmem:[#allocation165_spill] sm:$0xff]  ;;  %v13461_v46 = vld [vmem:[#allocation166_spill] sm:$0xff] }
 0xaa4   :  { %9497 = vmatprep.subr.bf16.mxu0 %v13207_v0  ;;  %9529 = vmatprep.subr.bf16.mxu1 %v13208_v52  ;;  %v13462_v0 = vld [vmem:[#allocation167_spill] sm:$0xff]  ;;  %v13463_v52 = vld [vmem:[#allocation168_spill] sm:$0xff] }
 0xaa7   :  { %9499 = vmatpush1.bf16.msra.mxu0 %v13453_v42  ;;  %9531 = vmatpush1.bf16.msra.mxu1 %v13454_v59 }
 0xaa8   :  { %9501 = vmatprep.subr.bf16.mxu0 %v13455_v62  ;;  %9533 = vmatprep.subr.bf16.mxu1 %v13456_v30 }
 0xaab   :  { %9503 = vmatpush1.bf16.msra.mxu0 %v13457_v16  ;;  %9535 = vmatpush1.bf16.msra.mxu1 %v13458_v2 }
 0xaac   :  { %9505 = vmatprep.subr.bf16.mxu0 %v13459_v34  ;;  %9537 = vmatprep.subr.bf16.mxu1 %v13460_v41 }
 0xaaf   :  { %9507 = vmatpush1.bf16.msra.mxu0 %v13461_v46  ;;  %9539 = vmatpush1.bf16.msra.mxu1 %v13462_v0 }
 0xab0   :  { %9509 = vmatprep.subr.bf16.mxu0 %v13463_v52  ;;  %9541 = vmatprep.subr.bf16.mxu1 %v13441_v20 }
 0xab3   :  { %9511 = vmatpush1.bf16.msra.mxu0 %v13442_v27  ;;  %9543 = vmatpush1.bf16.msra.mxu1 %v13443_v23 }
 0xab4   :  { %9513 = vmatprep.subr.bf16.mxu0 %v13444_v61  ;;  %9545 = vmatprep.subr.bf16.mxu1 %v13445_v33 }
 0xab7   :  { %9515 = vmatpush1.bf16.msra.mxu0 %v13446_v4  ;;  %9547 = vmatpush1.bf16.msra.mxu1 %v13447_v31 }
 0xab8   :  { %9517 = vmatprep.subr.bf16.mxu0 %v13448_v50  ;;  %9549 = vmatprep.subr.bf16.mxu1 %v13449_v57 }
 0xabb   :  { %9519 = vmatpush1.bf16.msra.mxu0 %v13450_v7  ;;  %9551 = vmatpush1.bf16.msra.mxu1 %v13451_v25 }
 0xabe   :  { %6801 = vmatmul.mubr.f32.vlgmr.msra.gmra.mrb[48].mxu0 %v12014_v32  ;;  %6872 = vmatmul.mubr.f32.vlgmr.msra.gmra.mrb[48].mxu1 %v12014_v32 }
 0xb91   :  { %v6802_v20 = vpop.f32.mrb[48].mxu0  ;;  %v6873_v27 = vpop.f32.mrb[48].mxu1 }
 0xb92   :  { %v6878_v23 = vadd.f32 %v6802_v20, %v12919_v11  ;;  %v6804_v61 = vpop.f32.mrb[49].mxu0  ;;  %v6875_v33 = vpop.f32.mrb[49].mxu1  ;;  %v6880_v7 = vadd.f32 %v6873_v27, %v13410_v1  ;;  %v6900_v1 = vld [vmem:[%s12082_s4] sm:$0x1] }
 0xb93   :  { %v6879_v4 = vadd.f32 %v6804_v61, %v13400_v9  ;;  %v6881_v57 = vadd.f32 %v6875_v33, %v13403_v56 }
 0xb94   :  { %v6882_v31 = vmul.f32 0.5, %v6878_v23  ;;  %v6884_v25 = vmul.f32 0.5, %v6880_v7 }
 0xb95   :  { %v6883_v50 = vmul.f32 0.5, %v6879_v4 }
 0xb96   :  { %9853 = vtanh.f32 %v6882_v31 }
 0xb97   :  { %9855 = vtanh.f32 %v6883_v50 }
 0xb98   :  { %9857 = vtanh.f32 %v6881_v57 }
 0xb99   :  { %9859 = vtanh.f32 %v6884_v25 }
 0xba0   :  { %v9854_v21 = vpop.eup %9853 }
 0xba1   :  { %v6888_v49 = vmul.f32 0.5, %v9854_v21  ;;  %v9856_v48 = vpop.eup %9855 }
 0xba2   :  { %v6889_v11 = vmul.f32 0.5, %v9856_v48  ;;  %v9858_v39 = vpop.eup %9857 }
 0xba3   :  { %v6891_v60 = vadd.f32 0.5, %v6888_v49  ;;  %v9860_v58 = vpop.eup %9859 }
 0xba4   :  { %v6892_v38 = vadd.f32 0.5, %v6889_v11  ;;  %v6890_v56 = vmul.f32 0.5, %v9860_v58 }
 0xba5   :  { %v6896_v55 = vmul.f32 %v9858_v39, %v6891_v60 }
 0xba6   :  { %v6895_v9 = vmul.f32 %v6892_v38, %v12021_v17  ;;  %v6893_v40 = vadd.f32 0.5, %v6890_v56 }
 0xba8   :  { %v6897_v29 = vadd.f32 %v6896_v55, %v6895_v9 }
 0xbaa   :  { %9861 = vtanh.f32 %v6897_v29 }
 0xbb4   :  { %v9862_v13 = vpop.eup %9861 }
 0xbb5   :  { %v6899_v32 = vmul.f32 %v9862_v13, %v6893_v40 }
 0xbb7   :  { %v6901_v8 = vmul.f32 %v6900_v1, %v6899_v32 }
 0xbb9   :  { %v6903_v24 = vsel %vm6902_vm0, %v6901_v8, 0.0 }
 0xbba   :  { %6904 = vadd.xlane.f32.xlu0 %v6903_v24 }
 0xc47   :  { %v6905_v53 = vpop.xlane.xlu0 %6904 }
 0xc48   :  { %v6907_v45 = vadd.f32 %v6906_v18, %v6905_v53 }
 0xc4a   :  { %6909 = vst.msk [vmem:[#allocation9] sm:$0x1] %vm6908_vm1, %v6907_v45 }
 0xc4b   :  { %9940 = shalt.err (!%p9937_p0)
}
 0xc4c   :  { %s9941_s20 = scalar_lea.hbm %s12084_s6, 16 }
 0xc4d   :  { %p9942_p1 = scmp.ne.s32.totalorder %s12084_s6, %s9941_s20  ;;  %p9945_p2 = scmp.lt.u32.totalorder %s9941_s20, %s12084_s6 }
 0xc4f   :  { %p9947_p3 = pnand %p9945_p2, %p9942_p1 }
 0xc51   :  { %9950 = shalt.err (!%p9947_p3)
}
 0xc52   :  { %6919 = dma.vmem_to_hbm [thread:$0]  %s6917_s16, 16, %s12084_s6, [#allocation5]  }
 0xc53   :  { %9955 = dma.done.wait [#allocation5], 16  }
 0xc54   :  { %9956 = vsyncadd [#allocation5], 4294967280 }
 0xc55   :  { %6923 = vsyncpa [#allocation4], 1 }
 0xc56   :  { %6924 = vsyncpa [#allocation7], 1 }
 0xc57   :  { %6925 = vsyncpa [#allocation5], 1 }

</bundles_post_ra>
